<compile_context>
chip_gen: v5e
topology: v5e:2x2
jax: 0.10.0
libtpu: 0.0.40
codegen_flags: <defaults>
</compile_context>

<pallas_src>
import functools
import math

import jax
import jax.numpy as jnp
from jax.experimental import pallas as pl
from jax.experimental.pallas import tpu as pltpu

NEG_SLOPE = 0.1
BN_EPS = 1e-5
INTER_DTYPE = jnp.bfloat16     # storage dtype for activations between kernels
HPAD = 16                      # H halo pad per side (bf16 sublane-pack aligned)


# ----------------------------- tiling helpers -------------------------------

def _round_up(x, m):
    return (x + m - 1) // m * m


def _pick_row_tile(n, cap=2048):
    """Largest multiple-of-8 divisor of n <= cap, preferring >= 4 grid steps."""
    for min_steps in (4, 2, 1):
        best = None
        t = 8
        while t <= min(n, cap):
            if n % t == 0 and n // t >= min_steps:
                best = t
            t += 8
        if best is not None:
            return best
    return n


def _shortcut_vmem_bytes(td, hh, wc, whalf_p, out_bytes=4):
    """Per-step live-VMEM estimate for the shortcut kernel (double-buffered)."""
    in_t = td * hh * wc * 2                      # bf16 input tile
    out_t = td * hh * wc * out_bytes
    halo = 2 * hh * wc * 2
    wts = (wc * whalf_p + 9 * whalf_p * wc + 2 * (whalf_p + wc)) * 2
    hbuf = (td + 2) * (hh + 2 * HPAD) * whalf_p * 2
    return 2 * (in_t + out_t + halo + wts) + hbuf


def _pick_depth_tile(dep, hh, wc, whalf_p, bsz, budget_bytes=12 << 20):
    """Largest divisor of dep under the VMEM budget that keeps enough steps.

    With bsz >= 2 the grid already has parallel batch steps, so nd >= 2 gives
    >= 4 total steps; with bsz == 1 we require nd >= 4 so both v7x TensorCores
    get work and the pipeline can hide the first/last DMA.
    """
    min_steps = 2 if bsz >= 2 else 4
    divs = [t for t in range(1, dep + 1) if dep % t == 0]
    for want in (min_steps, 2, 1):
        cands = [t for t in divs
                 if dep // t >= want
                 and _shortcut_vmem_bytes(t, hh, wc, whalf_p) <= budget_bytes]
        if cands:
            return max(cands)
    return 1


# ----------------------------- Pallas kernels -------------------------------

def _conv1_kernel(yu_ref, x1_ref, wa_ref, wb_ref, b_ref, o_ref):
    """Fused W-upsample + concat + 1x1x1 conv (BN folded) + bias + LeakyReLU.

    yu is the D,H-upsampled (W still low-res) activation; the W interpolation
    is folded into wa.  All matmul operands are bf16, accumulation f32.
    """
    acc = jnp.dot(yu_ref[...], wa_ref[...], preferred_element_type=jnp.float32)
    acc = acc + jnp.dot(x1_ref[...], wb_ref[...],
                        preferred_element_type=jnp.float32)
    y = acc + b_ref[...]
    o_ref[...] = jnp.where(y > 0, y, NEG_SLOPE * y).astype(o_ref.dtype)


def _shortcut_kernel(y_ref, ylo_ref, yhi_ref, w1_ref, b1_ref, m_ref, b2_ref,
                     o_ref, hbuf, *, td, hh, wc, whalf_p, dchunk):
    """One whole ShortcutBlock in a single kernel.

    y = lrelu(bn1(conv1x1(x))); y = lrelu(bn2(conv3x3x3(y))); y = y + x
    The intermediate h lives only in the bf16 VMEM scratch `hbuf` (never HBM).
    The 3x3x3 conv is 9 banded matmuls: kw taps + W zero padding are encoded
    in the band matrices m_ref[kd*3+kh], kd/kh taps come from the D/H halo.
    """
    di = pl.program_id(1)
    nd = pl.num_programs(1)

    w1 = w1_ref[...]
    b1 = b1_ref[...]

    def conv1x1_lrelu(rows_2d):                    # bf16 in, bf16 out, f32 acc
        v = jnp.dot(rows_2d, w1, preferred_element_type=jnp.float32) + b1
        v = jnp.where(v > 0, v, NEG_SLOPE * v)
        return v.astype(hbuf.dtype)

    # H halo (conv padding=1): only the row adjacent to the data is ever read,
    # but we zero the full aligned HPAD-row border blocks (cheap, unmasked).
    hzero = jnp.zeros((td + 2, HPAD, whalf_p), hbuf.dtype)
    hbuf[:, 0:HPAD, :] = hzero
    hbuf[:, HPAD + hh:HPAD + hh + HPAD, :] = hzero

    # Interior: conv1x1 + BN + LReLU, chunked over D to bound f32 vreg pressure.
    for d0 in range(0, td, dchunk):
        blk = y_ref[0, d0:d0 + dchunk]                         # [dchunk, hh, wc]
        h = conv1x1_lrelu(blk.reshape(dchunk * hh, wc))
        hbuf[1 + d0:1 + d0 + dchunk, HPAD:HPAD + hh, :] = (
            h.reshape(dchunk, hh, whalf_p))

    # D halo rows: neighbouring D slice, or zero at the volume edge (always
    # written, so no stale scratch leaks between grid steps).
    @pl.when(di > 0)
    def _():
        hbuf[0, HPAD:HPAD + hh, :] = conv1x1_lrelu(ylo_ref[0, 0])

    @pl.when(di == 0)
    def _():
        hbuf[0, HPAD:HPAD + hh, :] = jnp.zeros((hh, whalf_p), hbuf.dtype)

    @pl.when(di < nd - 1)
    def _():
        hbuf[td + 1, HPAD:HPAD + hh, :] = conv1x1_lrelu(yhi_ref[0, 0])

    @pl.when(di == nd - 1)
    def _():
        hbuf[td + 1, HPAD:HPAD + hh, :] = jnp.zeros((hh, whalf_p), hbuf.dtype)

    b2 = b2_ref[...]

    # 3x3x3 conv as 9 banded matmuls, chunked over D.
    for d0 in range(0, td, dchunk):
        rows = dchunk * hh
        acc = jnp.zeros((rows, wc), jnp.float32)
        for kd in range(3):
            for kh in range(3):
                # TODO(synk): the kh != 1 reads are sublane-misaligned; a
                # pltpu.roll-based H shift would keep every scratch access
                # 8-row aligned at the cost of a masked select per tap.
                patch = hbuf[kd + d0:kd + d0 + dchunk,
                             HPAD - 1 + kh:HPAD - 1 + kh + hh, :]
                acc = acc + jnp.dot(patch.reshape(rows, whalf_p),
                                    m_ref[kd * 3 + kh],
                                    preferred_element_type=jnp.float32)
        v = acc + b2
        v = jnp.where(v > 0, v, NEG_SLOPE * v)
        v = v + y_ref[0, d0:d0 + dchunk].reshape(rows, wc).astype(jnp.float32)
        o_ref[0, d0:d0 + dchunk] = v.reshape(dchunk, hh, wc).astype(o_ref.dtype)


# ----------------------------- kernel wrappers -------------------------------

def conv1_fused(yu, x1, p, out_dtype=INTER_DTYPE):
    """yu: [R, W*Cin] (low-res W), x1: [R, 2W*Cout] -> [R, 2W*Cout]."""
    r, ka = yu.shape
    kb = x1.shape[1]
    wc = p['w_a'].shape[1]
    tr = _pick_row_tile(r)
    return pl.pallas_call(
        _conv1_kernel,
        out_shape=jax.ShapeDtypeStruct((r, wc), out_dtype),
        grid_spec=pltpu.PrefetchScalarGridSpec(
            num_scalar_prefetch=0, grid=(r // tr,),
            in_specs=[pl.BlockSpec((tr, ka), lambda i: (i, 0)),
                      pl.BlockSpec((tr, kb), lambda i: (i, 0)),
                      pl.BlockSpec((ka, wc), lambda i: (0, 0)),
                      pl.BlockSpec((kb, wc), lambda i: (0, 0)),
                      pl.BlockSpec((1, wc), lambda i: (0, 0))],
            out_specs=pl.BlockSpec((tr, wc), lambda i: (i, 0))),
        compiler_params=pltpu.CompilerParams(dimension_semantics=("parallel",)),
    )(yu, x1, p['w_a'], p['w_b'], p['bias'])


def shortcut_block(y, blk, out_dtype=INTER_DTYPE):
    """y: [B, D, H, W*C] -> same shape; one fused pallas_call per block."""
    bsz, dep, hh, wc = y.shape
    whalf_p = blk['w1'].shape[1]
    td = _pick_depth_tile(dep, hh, wc, whalf_p, bsz)
    nd = dep // td

    # Chunk the conv accumulation so the f32 accumulator stays ~<=16 vregs.
    max_rows = max(hh, 16384 // max(wc, whalf_p))
    dchunk = 1
    for t in range(1, td + 1):
        if td % t == 0 and t * hh <= max_rows:
            dchunk = t

    kernel = functools.partial(_shortcut_kernel, td=td, hh=hh, wc=wc,
                               whalf_p=whalf_p, dchunk=dchunk)

    y_cur_spec = pl.BlockSpec((1, td, hh, wc), lambda bi, di: (bi, di, 0, 0))
    # Single-row D halos (block size 1 along D => block index == element index);
    # index maps clamp at the volume edge and pl.when guards ignore the fetch.
    y_lo_spec = pl.BlockSpec(
        (1, 1, hh, wc), lambda bi, di: (bi, jnp.maximum(di * td - 1, 0), 0, 0))
    y_hi_spec = pl.BlockSpec(
        (1, 1, hh, wc),
        lambda bi, di: (bi, jnp.minimum(di * td + td, dep - 1), 0, 0))

    out_bytes = jnp.dtype(out_dtype).itemsize
    est = _shortcut_vmem_bytes(td, hh, wc, whalf_p, out_bytes)
    vmem_limit = int(min(max(est + (4 << 20), 16 << 20), 40 << 20))

    return pl.pallas_call(
        kernel,
        out_shape=jax.ShapeDtypeStruct((bsz, dep, hh, wc), out_dtype),
        grid_spec=pltpu.PrefetchScalarGridSpec(
            num_scalar_prefetch=0, grid=(bsz, nd),
            in_specs=[y_cur_spec, y_lo_spec, y_hi_spec,
                      pl.BlockSpec((wc, whalf_p), lambda bi, di: (0, 0)),
                      pl.BlockSpec((1, whalf_p), lambda bi, di: (0, 0)),
                      pl.BlockSpec((9, whalf_p, wc), lambda bi, di: (0, 0, 0)),
                      pl.BlockSpec((1, wc), lambda bi, di: (0, 0))],
            out_specs=pl.BlockSpec((1, td, hh, wc),
                                   lambda bi, di: (bi, di, 0, 0)),
            scratch_shapes=[pltpu.VMEM((td + 2, hh + 2 * HPAD, whalf_p),
                                       INTER_DTYPE)]),
        compiler_params=pltpu.CompilerParams(
            dimension_semantics=("parallel", "parallel"),
            vmem_limit_bytes=vmem_limit),
    )(y, y, y, blk['w1'], blk['b1'], blk['m2'], blk['b2'])


# ------------------------------- parameters ---------------------------------

def _fold_bn(gamma, beta, mean, var, eps=BN_EPS):
    scale = gamma / jnp.sqrt(var + eps)
    bias = beta - mean * scale
    return scale, bias


def _bn_params(key, c):
    k1, k2, k3, k4 = jax.random.split(key, 4)
    gamma = 1.0 + 0.1 * jax.random.normal(k1, (c,), jnp.float32)
    beta = 0.05 * jax.random.normal(k2, (c,), jnp.float32)
    mean = 0.02 * jax.random.normal(k3, (c,), jnp.float32)
    var = 1.0 + 0.1 * jax.random.uniform(k4, (c,), jnp.float32)
    return _fold_bn(gamma, beta, mean, var)


def _interp_matrix_x2_align_corners(n, dtype=jnp.float32):
    """1-D linear interpolation matrix [2n, n] for scale=2, align_corners=True."""
    m = 2 * n
    if n == 1:
        return jnp.ones((m, 1), dtype)
    src = jnp.arange(m, dtype=jnp.float32) * (n - 1) / (m - 1)
    lo = jnp.clip(jnp.floor(src).astype(jnp.int32), 0, n - 2)
    frac = src - lo.astype(jnp.float32)
    rows = jnp.arange(m)
    mat = jnp.zeros((m, n), jnp.float32)
    mat = mat.at[rows, lo].add(1.0 - frac)
    mat = mat.at[rows, lo + 1].add(frac)
    return mat.astype(dtype)


def _banded_conv2_mats(w2_taps, w):
    """w2_taps: [3,3,3,half_p,cout] (BN folded) -> [9, w*half_p, w*cout]."""
    half_p, cout = w2_taps.shape[3], w2_taps.shape[4]
    mats = []
    for kd in range(3):
        for kh in range(3):
            m = jnp.zeros((w * half_p, w * cout), jnp.float32)
            for kw in range(3):
                shift = jnp.eye(w, k=1 - kw, dtype=jnp.float32)
                m = m + jnp.kron(shift, w2_taps[kd, kh, kw])
            mats.append(m)
    return jnp.stack(mats, 0)


def init_params(key, in_ch, out_ch, w_low, num_blocks=2):
    """BN-folded parameters packed for the lane-dense [B, D, H, W*C] layout.

    The W-direction x2 trilinear interpolation is folded into conv1's w_a, so
    the upsampled-x operand is stored at low W resolution.  Weights are bf16,
    biases f32 (added after the f32 accumulation).
    """
    # TODO(synk): BatchNorm is inference-mode only (folded running stats);
    # training-mode batch statistics would need an extra reduction pass.
    half = out_ch // 2
    w_up = 2 * w_low
    # Pad half-channels so the conv2 intermediate is lane-dense (>=128 lanes).
    half_p = _round_up(half, max(1, 128 // math.gcd(w_up, 128)))
    keys = iter(jax.random.split(key, 2 + 4 * num_blocks))
    eye_up = jnp.eye(w_up, dtype=jnp.float32)
    mw = _interp_matrix_x2_align_corners(w_low)                 # [2W, W]

    # UpsampleBlock.conv1: Conv3d(in+out, out, k=1, bias=False) + BN + LReLU.
    w_cat = 0.1 * jax.random.normal(next(keys), (in_ch + out_ch, out_ch),
                                    jnp.float32)
    s, t = _bn_params(next(keys), out_ch)
    w_cat_s = w_cat * s[None, :]
    conv1 = dict(
        # upsampled-x half: W interpolation fused with the channel mix.
        w_a=jnp.kron(mw.T, w_cat_s[:in_ch]).astype(INTER_DTYPE),    # [W*Cin, 2W*Cout]
        w_b=jnp.kron(eye_up, w_cat_s[in_ch:]).astype(INTER_DTYPE),  # [2W*Cout, 2W*Cout]
        bias=jnp.tile(t, w_up).reshape(1, w_up * out_ch))

    blocks, ref_blocks = [], []
    for _ in range(num_blocks):
        w1 = 0.1 * jax.random.normal(next(keys), (out_ch, half), jnp.float32)
        s1, t1 = _bn_params(next(keys), half)
        w1s = w1 * s1[None, :]
        w1p = jnp.pad(w1s, ((0, 0), (0, half_p - half)))
        t1p = jnp.pad(t1, (0, half_p - half))
        w2 = 0.1 * jax.random.normal(next(keys), (3, 3, 3, half, out_ch),
                                     jnp.float32)
        s2, t2 = _bn_params(next(keys), out_ch)
        w2s = w2 * s2[None, None, None, None, :]
        w2p = jnp.pad(w2s, ((0, 0), (0, 0), (0, 0), (0, half_p - half), (0, 0)))
        # TODO(synk): the kron/banded packing wastes ~W x MXU FLOPs; switch to a
        # dense per-channel layout once channel counts are lane-paddable alone.
        blocks.append(dict(
            w1=jnp.kron(eye_up, w1p).astype(INTER_DTYPE),            # [2W*C, 2W*half_p]
            b1=jnp.tile(t1p, w_up).reshape(1, w_up * half_p),
            m2=_banded_conv2_mats(w2p, w_up).astype(INTER_DTYPE),    # [9, 2W*half_p, 2W*C]
            b2=jnp.tile(t2, w_up).reshape(1, w_up * out_ch)))
        ref_blocks.append(dict(w1=w1s, b1=t1, w2=w2s, b2=t2))

    ref = dict(w_a=w_cat_s[:in_ch], w_b=w_cat_s[in_ch:], b=t, blocks=ref_blocks)
    return dict(conv1=conv1, blocks=blocks, ref=ref)


# ------------------------------- JAX glue ------------------------------------

def upsample_block_forward(params, x_ncdhw, x1_ncdhw):
    """Matches UpsampleBlock.forward(x, x1); inputs/outputs are NCDHW."""
    bsz, cin, dd, hh0, ww = x_ncdhw.shape
    cout = x1_ncdhw.shape[1]
    d2, h2, w2 = 2 * dd, 2 * hh0, 2 * ww

    # D/H trilinear x2 upsample (align_corners=True) + channels-last relayout;
    # the W interpolation is folded into the conv1 kernel weights, so only the
    # half-size (low-W) bf16 tensor is materialized in HBM.
    # TODO(synk): the D/H interpolation could also be folded into the conv1
    # kernel (each output row reads <=2 source rows) to remove this XLA pass.
    md = _interp_matrix_x2_align_corners(dd)
    mh = _interp_matrix_x2_align_corners(hh0)
    y = jnp.einsum('od,bcdhw->bcohw', md, x_ncdhw)
    y = jnp.einsum('ph,bcdhw->bdpwc', mh, y)             # [B, 2D, 2H, W, Cin]
    yu = y.reshape(bsz * d2 * h2, ww * cin).astype(INTER_DTYPE)
    x1 = jnp.transpose(x1_ncdhw, (0, 2, 3, 4, 1)).reshape(
        bsz * d2 * h2, w2 * cout).astype(INTER_DTYPE)

    # conv1: W-upsample + concat + 1x1x1 conv + BN + LeakyReLU, fused.
    y = conv1_fused(yu, x1, params['conv1'])
    y = y.reshape(bsz, d2, h2, w2 * cout)

    # ShortcutBlocks: one fused pallas_call each; h never round-trips HBM.
    nblk = len(params['blocks'])
    for i, blk in enumerate(params['blocks']):
        out_dtype = jnp.float32 if i == nblk - 1 else INTER_DTYPE
        y = shortcut_block(y, blk, out_dtype=out_dtype)

    y = y.reshape(bsz, d2, h2, w2, cout)
    return jnp.transpose(y, (0, 4, 1, 2, 3))             # back to NCDHW


# ------------------------------- reference -----------------------------------

def _leaky(x):
    return jnp.where(x > 0, x, NEG_SLOPE * x)


def reference_forward(ref_p, x, x1):
    """Pure-JAX f32 reference (BN folded, same interpolation matrices)."""
    _, cin, dd, hh0, ww = x.shape
    md = _interp_matrix_x2_align_corners(dd)
    mh = _interp_matrix_x2_align_corners(hh0)
    mw = _interp_matrix_x2_align_corners(ww)
    y = jnp.einsum('od,bcdhw->bcohw', md, x)
    y = jnp.einsum('ph,bcdhw->bcdpw', mh, y)
    y = jnp.einsum('qw,bcdhw->bcdhq', mw, y)                    # [B,Cin,2D,2H,2W]
    z = (jnp.einsum('bcdhw,ce->bedhw', y, ref_p['w_a'])
         + jnp.einsum('bcdhw,ce->bedhw', x1, ref_p['w_b'])
         + ref_p['b'][None, :, None, None, None])
    z = _leaky(z)
    d2, h2, w2 = z.shape[2], z.shape[3], z.shape[4]
    for blk in ref_p['blocks']:
        h = (jnp.einsum('bcdhw,ce->bedhw', z, blk['w1'])
             + blk['b1'][None, :, None, None, None])
        h = _leaky(h)
        hp = jnp.pad(h, ((0, 0), (0, 0), (1, 1), (1, 1), (1, 1)))
        acc = jnp.zeros_like(z)
        for kd in range(3):
            for kh in range(3):
                for kw in range(3):
                    patch = hp[:, :, kd:kd + d2, kh:kh + h2, kw:kw + w2]
                    acc = acc + jnp.einsum('bcdhw,ce->bedhw', patch,
                                           blk['w2'][kd, kh, kw])
        v = _leaky(acc + blk['b2'][None, :, None, None, None])
        z = v + z
    return z


if __name__ == "__main__":
    key = jax.random.PRNGKey(0)
    k_x, k_x1, k_p = jax.random.split(key, 3)

    in_ch, out_ch = 4, 8
    B, D, H, W = 2, 8, 8, 8
    x = jax.random.normal(k_x, (B, in_ch, D, H, W), jnp.float32)
    x1 = jax.random.normal(k_x1, (B, out_ch, 2 * D, 2 * H, 2 * W), jnp.float32)

    params = init_params(k_p, in_ch, out_ch, w_low=W, num_blocks=2)

    out = jax.jit(upsample_block_forward)(params, x, x1)
    jax.block_until_ready(out)
    assert out.shape == (B, out_ch, 2 * D, 2 * H, 2 * W), out.shape
    assert bool(jnp.all(jnp.isfinite(out)))

    ref = reference_forward(params['ref'], x, x1)
    err = float(jnp.max(jnp.abs(out - ref)) / (jnp.max(jnp.abs(ref)) + 1e-6))
    assert err < 0.05, f"relative-to-max error too large: {err}"
    print("KERNEL_OK")
</pallas_src>

<mosaic_0001>
module attributes {stable_mosaic.version = 11 : i64} {
  func.func @_conv1_kernel(%arg0: i32, %arg1: memref<128x32xbf16, #tpu.memory_space<vmem>>, %arg2: memref<128x128xbf16, #tpu.memory_space<vmem>>, %arg3: memref<32x128xbf16, #tpu.memory_space<vmem>>, %arg4: memref<128x128xbf16, #tpu.memory_space<vmem>>, %arg5: memref<1x128xf32, #tpu.memory_space<vmem>>, %arg6: memref<128x128xbf16, #tpu.memory_space<vmem>>) attributes {dimension_semantics = [#tpu.dimension_semantics<parallel>], iteration_bounds = array<i64: 4>, scalar_prefetch = 0 : i64, scratch_operands = 0 : i64, tpu.core_type = #tpu.core_type<tc>, window_params = [{transform_indices = @transform_0, window_bounds = array<i64: 128, 32>}, {transform_indices = @transform_1, window_bounds = array<i64: 128, 128>}, {pipeline_mode = #tpu.pipeline_mode<synchronous>, transform_indices = @transform_2, window_bounds = array<i64: 32, 128>}, {pipeline_mode = #tpu.pipeline_mode<synchronous>, transform_indices = @transform_3, window_bounds = array<i64: 128, 128>}, {pipeline_mode = #tpu.pipeline_mode<synchronous>, transform_indices = @transform_4, window_bounds = array<i64: 1, 128>}, {transform_indices = @transform_5, window_bounds = array<i64: 128, 128>}]} {
    %c0 = arith.constant 0 : index
    %c0_0 = arith.constant 0 : index
    %0 = vector.load %arg1[%c0, %c0_0] : memref<128x32xbf16, #tpu.memory_space<vmem>>, vector<128x32xbf16>
    %c0_1 = arith.constant 0 : index
    %c0_2 = arith.constant 0 : index
    %1 = vector.load %arg3[%c0_1, %c0_2] : memref<32x128xbf16, #tpu.memory_space<vmem>>, vector<32x128xbf16>
    %cst = arith.constant dense<0.000000e+00> : vector<128x128xf32>
    %2 = tpu.matmul %0, %1, %cst {dimension_numbers = #tpu.dot_dimension_numbers<[1], [0], [0], [1], [0, 0, 1, 1], [], []>} : vector<128x32xbf16>, vector<32x128xbf16>, vector<128x128xf32> -> vector<128x128xf32>
    %c0_3 = arith.constant 0 : index
    %c0_4 = arith.constant 0 : index
    %3 = vector.load %arg2[%c0_3, %c0_4] : memref<128x128xbf16, #tpu.memory_space<vmem>>, vector<128x128xbf16>
    %c0_5 = arith.constant 0 : index
    %c0_6 = arith.constant 0 : index
    %4 = vector.load %arg4[%c0_5, %c0_6] : memref<128x128xbf16, #tpu.memory_space<vmem>>, vector<128x128xbf16>
    %cst_7 = arith.constant dense<0.000000e+00> : vector<128x128xf32>
    %5 = tpu.matmul %3, %4, %cst_7 {dimension_numbers = #tpu.dot_dimension_numbers<[1], [0], [0], [1], [0, 0, 1, 1], [], []>} : vector<128x128xbf16>, vector<128x128xbf16>, vector<128x128xf32> -> vector<128x128xf32>
    %6 = arith.addf %2, %5 : vector<128x128xf32>
    %c0_8 = arith.constant 0 : index
    %c0_9 = arith.constant 0 : index
    %7 = vector.load %arg5[%c0_8, %c0_9] : memref<1x128xf32, #tpu.memory_space<vmem>>, vector<1x128xf32>
    %8 = vector.broadcast %7 : vector<1x128xf32> to vector<128x128xf32>
    %9 = arith.addf %6, %8 : vector<128x128xf32>
    %cst_10 = arith.constant 0.000000e+00 : f32
    %10 = vector.broadcast %cst_10 : f32 to vector<128x128xf32>
    %11 = arith.cmpf ogt, %9, %10 : vector<128x128xf32>
    %cst_11 = arith.constant 1.000000e-01 : f32
    %12 = vector.broadcast %cst_11 : f32 to vector<128x128xf32>
    %13 = arith.mulf %12, %9 : vector<128x128xf32>
    %14 = arith.select %11, %9, %13 : vector<128x128xi1>, vector<128x128xf32>
    %15 = arith.truncf %14 : vector<128x128xf32> to vector<128x128xbf16>
    %c0_12 = arith.constant 0 : index
    %c0_13 = arith.constant 0 : index
    %16 = vector.load %arg6[%c0_12, %c0_13] : memref<128x128xbf16, #tpu.memory_space<vmem>>, vector<128x128xbf16>
    tpu.vector_store %arg6[%c0_12, %c0_13], %15 {strides = array<i32>} : memref<128x128xbf16, #tpu.memory_space<vmem>>, vector<128x128xbf16>,
    return
  }
  func.func @transform_0(%arg0: i32) -> (i32, i32) {
    %c0_i32 = arith.constant 0 : i32
    %c0_i32_0 = arith.constant 0 : i32
    return %arg0, %c0_i32 : i32, i32
  }
  func.func @transform_1(%arg0: i32) -> (i32, i32) {
    %c0_i32 = arith.constant 0 : i32
    %c0_i32_0 = arith.constant 0 : i32
    return %arg0, %c0_i32 : i32, i32
  }
  func.func @transform_2(%arg0: i32) -> (i32, i32) {
    %c0_i32 = arith.constant 0 : i32
    %c0_i32_0 = arith.constant 0 : i32
    %c0_i32_1 = arith.constant 0 : i32
    return %c0_i32, %c0_i32_0 : i32, i32
  }
  func.func @transform_3(%arg0: i32) -> (i32, i32) {
    %c0_i32 = arith.constant 0 : i32
    %c0_i32_0 = arith.constant 0 : i32
    %c0_i32_1 = arith.constant 0 : i32
    return %c0_i32, %c0_i32_0 : i32, i32
  }
  func.func @transform_4(%arg0: i32) -> (i32, i32) {
    %c0_i32 = arith.constant 0 : i32
    %c0_i32_0 = arith.constant 0 : i32
    %c0_i32_1 = arith.constant 0 : i32
    return %c0_i32, %c0_i32_0 : i32, i32
  }
  func.func @transform_5(%arg0: i32) -> (i32, i32) {
    %c0_i32 = arith.constant 0 : i32
    %c0_i32_0 = arith.constant 0 : i32
    return %arg0, %c0_i32 : i32, i32
  }
}

module attributes {stable_mosaic.version = 11 : i64} {
  func.func @_shortcut_kernel(%arg0: i32, %arg1: i32, %arg2: memref<1x8x16x128xbf16, #tpu.memory_space<vmem>>, %arg3: memref<1x1x16x128xbf16, #tpu.memory_space<vmem>>, %arg4: memref<1x1x16x128xbf16, #tpu.memory_space<vmem>>, %arg5: memref<128x128xbf16, #tpu.memory_space<vmem>>, %arg6: memref<1x128xf32, #tpu.memory_space<vmem>>, %arg7: memref<9x128x128xbf16, #tpu.memory_space<vmem>>, %arg8: memref<1x128xf32, #tpu.memory_space<vmem>>, %arg9: memref<1x8x16x128xbf16, #tpu.memory_space<vmem>>, %arg10: memref<10x48x128xbf16, #tpu.memory_space<vmem>>) attributes {dimension_semantics = [#tpu.dimension_semantics<parallel>, #tpu.dimension_semantics<parallel>], iteration_bounds = array<i64: 2, 2>, scalar_prefetch = 0 : i64, scratch_operands = 1 : i64, tpu.core_type = #tpu.core_type<tc>, window_params = [{transform_indices = @transform_0, window_bounds = array<i64: 1, 8, 16, 128>}, {transform_indices = @transform_1, window_bounds = array<i64: 1, 1, 16, 128>}, {transform_indices = @transform_2, window_bounds = array<i64: 1, 1, 16, 128>}, {pipeline_mode = #tpu.pipeline_mode<synchronous>, transform_indices = @transform_3, window_bounds = array<i64: 128, 128>}, {pipeline_mode = #tpu.pipeline_mode<synchronous>, transform_indices = @transform_4, window_bounds = array<i64: 1, 128>}, {pipeline_mode = #tpu.pipeline_mode<synchronous>, transform_indices = @transform_5, window_bounds = array<i64: 9, 128, 128>}, {pipeline_mode = #tpu.pipeline_mode<synchronous>, transform_indices = @transform_6, window_bounds = array<i64: 1, 128>}, {transform_indices = @transform_7, window_bounds = array<i64: 1, 8, 16, 128>}]} {
    %c0 = arith.constant 0 : index
    %c0_0 = arith.constant 0 : index
    %0 = vector.load %arg5[%c0, %c0_0] : memref<128x128xbf16, #tpu.memory_space<vmem>>, vector<128x128xbf16>
    %c0_1 = arith.constant 0 : index
    %c0_2 = arith.constant 0 : index
    %1 = vector.load %arg6[%c0_1, %c0_2] : memref<1x128xf32, #tpu.memory_space<vmem>>, vector<1x128xf32>
    %cst = arith.constant 0.000000e+00 : bf16
    %2 = vector.broadcast %cst : bf16 to vector<10x16x128xbf16>
    %c0_3 = arith.constant 0 : index
    %c0_4 = arith.constant 0 : index
    %c0_5 = arith.constant 0 : index
    %3 = vector.load %arg10[%c0_3, %c0_4, %c0_5] : memref<10x48x128xbf16, #tpu.memory_space<vmem>>, vector<10x16x128xbf16>
    tpu.vector_store %arg10[%c0_3, %c0_4, %c0_5], %2 {strides = array<i32>} : memref<10x48x128xbf16, #tpu.memory_space<vmem>>, vector<10x16x128xbf16>,
    %c0_6 = arith.constant 0 : index
    %c32 = arith.constant 32 : index
    %c0_7 = arith.constant 0 : index
    %4 = vector.load %arg10[%c0_6, %c32, %c0_7] : memref<10x48x128xbf16, #tpu.memory_space<vmem>>, vector<10x16x128xbf16>
    tpu.vector_store %arg10[%c0_6, %c32, %c0_7], %2 {strides = array<i32>} : memref<10x48x128xbf16, #tpu.memory_space<vmem>>, vector<10x16x128xbf16>,
    %c0_8 = arith.constant 0 : index
    %c0_9 = arith.constant 0 : index
    %c0_10 = arith.constant 0 : index
    %c0_11 = arith.constant 0 : index
    %5 = vector.load %arg2[%c0_8, %c0_9, %c0_10, %c0_11] : memref<1x8x16x128xbf16, #tpu.memory_space<vmem>>, vector<1x8x16x128xbf16>
    %6 = vector.shape_cast %5 : vector<1x8x16x128xbf16> to vector<8x16x128xbf16>
    %7 = vector.shape_cast %6 : vector<8x16x128xbf16> to vector<128x128xbf16>
    %cst_12 = arith.constant dense<0.000000e+00> : vector<128x128xf32>
    %8 = tpu.matmul %7, %0, %cst_12 {dimension_numbers = #tpu.dot_dimension_numbers<[1], [0], [0], [1], [0, 0, 1, 1], [], []>} : vector<128x128xbf16>, vector<128x128xbf16>, vector<128x128xf32> -> vector<128x128xf32>
    %9 = vector.broadcast %1 : vector<1x128xf32> to vector<128x128xf32>
    %10 = arith.addf %8, %9 : vector<128x128xf32>
    %cst_13 = arith.constant 0.000000e+00 : f32
    %11 = vector.broadcast %cst_13 : f32 to vector<128x128xf32>
    %12 = arith.cmpf ogt, %10, %11 : vector<128x128xf32>
    %cst_14 = arith.constant 1.000000e-01 : f32
    %13 = vector.broadcast %cst_14 : f32 to vector<128x128xf32>
    %14 = arith.mulf %13, %10 : vector<128x128xf32>
    %15 = arith.select %12, %10, %14 : vector<128x128xi1>, vector<128x128xf32>
    %16 = arith.truncf %15 : vector<128x128xf32> to vector<128x128xbf16>
    %17 = vector.shape_cast %16 : vector<128x128xbf16> to vector<8x16x128xbf16>
    %c1 = arith.constant 1 : index
    %c16 = arith.constant 16 : index
    %c0_15 = arith.constant 0 : index
    %18 = vector.load %arg10[%c1, %c16, %c0_15] : memref<10x48x128xbf16, #tpu.memory_space<vmem>>, vector<8x16x128xbf16>
    tpu.vector_store %arg10[%c1, %c16, %c0_15], %17 {strides = array<i32>} : memref<10x48x128xbf16, #tpu.memory_space<vmem>>, vector<8x16x128xbf16>,
    %c0_i32 = arith.constant 0 : i32
    %19 = arith.cmpi sgt, %arg1, %c0_i32 : i32
    %20 = arith.extui %19 : i1 to i32
    %c0_i32_16 = arith.constant 0 : i32
    %21 = arith.cmpi ne, %20, %c0_i32_16 : i32
    scf.if %21 {
      %c0_89 = arith.constant 0 : index
      %c0_90 = arith.constant 0 : index
      %c0_91 = arith.constant 0 : index
      %c0_92 = arith.constant 0 : index
      %104 = vector.load %arg3[%c0_89, %c0_90, %c0_91, %c0_92] : memref<1x1x16x128xbf16, #tpu.memory_space<vmem>>, vector<1x1x16x128xbf16>
      %105 = vector.shape_cast %104 : vector<1x1x16x128xbf16> to vector<16x128xbf16>
      %cst_93 = arith.constant dense<0.000000e+00> : vector<16x128xf32>
      %106 = tpu.matmul %105, %0, %cst_93 {dimension_numbers = #tpu.dot_dimension_numbers<[1], [0], [0], [1], [0, 0, 1, 1], [], []>} : vector<16x128xbf16>, vector<128x128xbf16>, vector<16x128xf32> -> vector<16x128xf32>
      %107 = vector.broadcast %1 : vector<1x128xf32> to vector<16x128xf32>
      %108 = arith.addf %106, %107 : vector<16x128xf32>
      %cst_94 = arith.constant 0.000000e+00 : f32
      %109 = vector.broadcast %cst_94 : f32 to vector<16x128xf32>
      %110 = arith.cmpf ogt, %108, %109 : vector<16x128xf32>
      %cst_95 = arith.constant 1.000000e-01 : f32
      %111 = vector.broadcast %cst_95 : f32 to vector<16x128xf32>
      %112 = arith.mulf %111, %108 : vector<16x128xf32>
      %113 = arith.select %110, %108, %112 : vector<16x128xi1>, vector<16x128xf32>
      %114 = arith.truncf %113 : vector<16x128xf32> to vector<16x128xbf16>
      %c0_96 = arith.constant 0 : index
      %c16_97 = arith.constant 16 : index
      %c0_98 = arith.constant 0 : index
      %115 = vector.load %arg10[%c0_96, %c16_97, %c0_98] : memref<10x48x128xbf16, #tpu.memory_space<vmem>>, vector<1x16x128xbf16>
      %116 = vector.shape_cast %115 : vector<1x16x128xbf16> to vector<16x128xbf16>
      %117 = vector.shape_cast %114 : vector<16x128xbf16> to vector<1x16x128xbf16>
      tpu.vector_store %arg10[%c0_96, %c16_97, %c0_98], %117 {strides = array<i32>} : memref<10x48x128xbf16, #tpu.memory_space<vmem>>, vector<1x16x128xbf16>,
    } else {
    }
    %c0_i32_17 = arith.constant 0 : i32
    %22 = arith.cmpi eq, %arg1, %c0_i32_17 : i32
    %23 = arith.extui %22 : i1 to i32
    %c0_i32_18 = arith.constant 0 : i32
    %24 = arith.cmpi ne, %23, %c0_i32_18 : i32
    scf.if %24 {
      %cst_89 = arith.constant 0.000000e+00 : bf16
      %104 = vector.broadcast %cst_89 : bf16 to vector<16x128xbf16>
      %c0_90 = arith.constant 0 : index
      %c16_91 = arith.constant 16 : index
      %c0_92 = arith.constant 0 : index
      %105 = vector.load %arg10[%c0_90, %c16_91, %c0_92] : memref<10x48x128xbf16, #tpu.memory_space<vmem>>, vector<1x16x128xbf16>
      %106 = vector.shape_cast %105 : vector<1x16x128xbf16> to vector<16x128xbf16>
      %107 = vector.shape_cast %104 : vector<16x128xbf16> to vector<1x16x128xbf16>
      tpu.vector_store %arg10[%c0_90, %c16_91, %c0_92], %107 {strides = array<i32>} : memref<10x48x128xbf16, #tpu.memory_space<vmem>>, vector<1x16x128xbf16>,
    } else {
    }
    %c1_i32 = arith.constant 1 : i32
    %25 = arith.cmpi slt, %arg1, %c1_i32 : i32
    %26 = arith.extui %25 : i1 to i32
    %c0_i32_19 = arith.constant 0 : i32
    %27 = arith.cmpi ne, %26, %c0_i32_19 : i32
    scf.if %27 {
      %c0_89 = arith.constant 0 : index
      %c0_90 = arith.constant 0 : index
      %c0_91 = arith.constant 0 : index
      %c0_92 = arith.constant 0 : index
      %104 = vector.load %arg4[%c0_89, %c0_90, %c0_91, %c0_92] : memref<1x1x16x128xbf16, #tpu.memory_space<vmem>>, vector<1x1x16x128xbf16>
      %105 = vector.shape_cast %104 : vector<1x1x16x128xbf16> to vector<16x128xbf16>
      %cst_93 = arith.constant dense<0.000000e+00> : vector<16x128xf32>
      %106 = tpu.matmul %105, %0, %cst_93 {dimension_numbers = #tpu.dot_dimension_numbers<[1], [0], [0], [1], [0, 0, 1, 1], [], []>} : vector<16x128xbf16>, vector<128x128xbf16>, vector<16x128xf32> -> vector<16x128xf32>
      %107 = vector.broadcast %1 : vector<1x128xf32> to vector<16x128xf32>
      %108 = arith.addf %106, %107 : vector<16x128xf32>
      %cst_94 = arith.constant 0.000000e+00 : f32
      %109 = vector.broadcast %cst_94 : f32 to vector<16x128xf32>
      %110 = arith.cmpf ogt, %108, %109 : vector<16x128xf32>
      %cst_95 = arith.constant 1.000000e-01 : f32
      %111 = vector.broadcast %cst_95 : f32 to vector<16x128xf32>
      %112 = arith.mulf %111, %108 : vector<16x128xf32>
      %113 = arith.select %110, %108, %112 : vector<16x128xi1>, vector<16x128xf32>
      %114 = arith.truncf %113 : vector<16x128xf32> to vector<16x128xbf16>
      %c9 = arith.constant 9 : index
      %c16_96 = arith.constant 16 : index
      %c0_97 = arith.constant 0 : index
      %115 = vector.load %arg10[%c9, %c16_96, %c0_97] : memref<10x48x128xbf16, #tpu.memory_space<vmem>>, vector<1x16x128xbf16>
      %116 = vector.shape_cast %115 : vector<1x16x128xbf16> to vector<16x128xbf16>
      %117 = vector.shape_cast %114 : vector<16x128xbf16> to vector<1x16x128xbf16>
      tpu.vector_store %arg10[%c9, %c16_96, %c0_97], %117 {strides = array<i32>} : memref<10x48x128xbf16, #tpu.memory_space<vmem>>, vector<1x16x128xbf16>,
    } else {
    }
    %c1_i32_20 = arith.constant 1 : i32
    %28 = arith.cmpi eq, %arg1, %c1_i32_20 : i32
    %29 = arith.extui %28 : i1 to i32
    %c0_i32_21 = arith.constant 0 : i32
    %30 = arith.cmpi ne, %29, %c0_i32_21 : i32
    scf.if %30 {
      %cst_89 = arith.constant 0.000000e+00 : bf16
      %104 = vector.broadcast %cst_89 : bf16 to vector<16x128xbf16>
      %c9 = arith.constant 9 : index
      %c16_90 = arith.constant 16 : index
      %c0_91 = arith.constant 0 : index
      %105 = vector.load %arg10[%c9, %c16_90, %c0_91] : memref<10x48x128xbf16, #tpu.memory_space<vmem>>, vector<1x16x128xbf16>
      %106 = vector.shape_cast %105 : vector<1x16x128xbf16> to vector<16x128xbf16>
      %107 = vector.shape_cast %104 : vector<16x128xbf16> to vector<1x16x128xbf16>
      tpu.vector_store %arg10[%c9, %c16_90, %c0_91], %107 {strides = array<i32>} : memref<10x48x128xbf16, #tpu.memory_space<vmem>>, vector<1x16x128xbf16>,
    } else {
    }
    %c0_22 = arith.constant 0 : index
    %c0_23 = arith.constant 0 : index
    %31 = vector.load %arg8[%c0_22, %c0_23] : memref<1x128xf32, #tpu.memory_space<vmem>>, vector<1x128xf32>
    %cst_24 = arith.constant 0.000000e+00 : f32
    %32 = vector.broadcast %cst_24 : f32 to vector<128x128xf32>
    %c0_25 = arith.constant 0 : index
    %c15 = arith.constant 15 : index
    %c0_26 = arith.constant 0 : index
    %33 = vector.load %arg10[%c0_25, %c15, %c0_26] : memref<10x48x128xbf16, #tpu.memory_space<vmem>>, vector<8x16x128xbf16>
    %34 = vector.shape_cast %33 : vector<8x16x128xbf16> to vector<128x128xbf16>
    %c0_27 = arith.constant 0 : index
    %c0_28 = arith.constant 0 : index
    %c0_29 = arith.constant 0 : index
    %35 = vector.load %arg7[%c0_27, %c0_28, %c0_29] : memref<9x128x128xbf16, #tpu.memory_space<vmem>>, vector<1x128x128xbf16>
    %36 = vector.shape_cast %35 : vector<1x128x128xbf16> to vector<128x128xbf16>
    %cst_30 = arith.constant dense<0.000000e+00> : vector<128x128xf32>
    %37 = tpu.matmul %34, %36, %cst_30 {dimension_numbers = #tpu.dot_dimension_numbers<[1], [0], [0], [1], [0, 0, 1, 1], [], []>} : vector<128x128xbf16>, vector<128x128xbf16>, vector<128x128xf32> -> vector<128x128xf32>
    %38 = arith.addf %32, %37 : vector<128x128xf32>
    %c0_31 = arith.constant 0 : index
    %c16_32 = arith.constant 16 : index
    %c0_33 = arith.constant 0 : index
    %39 = vector.load %arg10[%c0_31, %c16_32, %c0_33] : memref<10x48x128xbf16, #tpu.memory_space<vmem>>, vector<8x16x128xbf16>
    %40 = vector.shape_cast %39 : vector<8x16x128xbf16> to vector<128x128xbf16>
    %c1_34 = arith.constant 1 : index
    %c0_35 = arith.constant 0 : index
    %c0_36 = arith.constant 0 : index
    %41 = vector.load %arg7[%c1_34, %c0_35, %c0_36] : memref<9x128x128xbf16, #tpu.memory_space<vmem>>, vector<1x128x128xbf16>
    %42 = vector.shape_cast %41 : vector<1x128x128xbf16> to vector<128x128xbf16>
    %cst_37 = arith.constant dense<0.000000e+00> : vector<128x128xf32>
    %43 = tpu.matmul %40, %42, %cst_37 {dimension_numbers = #tpu.dot_dimension_numbers<[1], [0], [0], [1], [0, 0, 1, 1], [], []>} : vector<128x128xbf16>, vector<128x128xbf16>, vector<128x128xf32> -> vector<128x128xf32>
    %44 = arith.addf %38, %43 : vector<128x128xf32>
    %c0_38 = arith.constant 0 : index
    %c17 = arith.constant 17 : index
    %c0_39 = arith.constant 0 : index
    %45 = vector.load %arg10[%c0_38, %c17, %c0_39] : memref<10x48x128xbf16, #tpu.memory_space<vmem>>, vector<8x16x128xbf16>
    %46 = vector.shape_cast %45 : vector<8x16x128xbf16> to vector<128x128xbf16>
    %c2 = arith.constant 2 : index
    %c0_40 = arith.constant 0 : index
    %c0_41 = arith.constant 0 : index
    %47 = vector.load %arg7[%c2, %c0_40, %c0_41] : memref<9x128x128xbf16, #tpu.memory_space<vmem>>, vector<1x128x128xbf16>
    %48 = vector.shape_cast %47 : vector<1x128x128xbf16> to vector<128x128xbf16>
    %cst_42 = arith.constant dense<0.000000e+00> : vector<128x128xf32>
    %49 = tpu.matmul %46, %48, %cst_42 {dimension_numbers = #tpu.dot_dimension_numbers<[1], [0], [0], [1], [0, 0, 1, 1], [], []>} : vector<128x128xbf16>, vector<128x128xbf16>, vector<128x128xf32> -> vector<128x128xf32>
    %50 = arith.addf %44, %49 : vector<128x128xf32>
    %c1_43 = arith.constant 1 : index
    %c15_44 = arith.constant 15 : index
    %c0_45 = arith.constant 0 : index
    %51 = vector.load %arg10[%c1_43, %c15_44, %c0_45] : memref<10x48x128xbf16, #tpu.memory_space<vmem>>, vector<8x16x128xbf16>
    %52 = vector.shape_cast %51 : vector<8x16x128xbf16> to vector<128x128xbf16>
    %c3 = arith.constant 3 : index
    %c0_46 = arith.constant 0 : index
    %c0_47 = arith.constant 0 : index
    %53 = vector.load %arg7[%c3, %c0_46, %c0_47] : memref<9x128x128xbf16, #tpu.memory_space<vmem>>, vector<1x128x128xbf16>
    %54 = vector.shape_cast %53 : vector<1x128x128xbf16> to vector<128x128xbf16>
    %cst_48 = arith.constant dense<0.000000e+00> : vector<128x128xf32>
    %55 = tpu.matmul %52, %54, %cst_48 {dimension_numbers = #tpu.dot_dimension_numbers<[1], [0], [0], [1], [0, 0, 1, 1], [], []>} : vector<128x128xbf16>, vector<128x128xbf16>, vector<128x128xf32> -> vector<128x128xf32>
    %56 = arith.addf %50, %55 : vector<128x128xf32>
    %c1_49 = arith.constant 1 : index
    %c16_50 = arith.constant 16 : index
    %c0_51 = arith.constant 0 : index
    %57 = vector.load %arg10[%c1_49, %c16_50, %c0_51] : memref<10x48x128xbf16, #tpu.memory_space<vmem>>, vector<8x16x128xbf16>
    %58 = vector.shape_cast %57 : vector<8x16x128xbf16> to vector<128x128xbf16>
    %c4 = arith.constant 4 : index
    %c0_52 = arith.constant 0 : index
    %c0_53 = arith.constant 0 : index
    %59 = vector.load %arg7[%c4, %c0_52, %c0_53] : memref<9x128x128xbf16, #tpu.memory_space<vmem>>, vector<1x128x128xbf16>
    %60 = vector.shape_cast %59 : vector<1x128x128xbf16> to vector<128x128xbf16>
    %cst_54 = arith.constant dense<0.000000e+00> : vector<128x128xf32>
    %61 = tpu.matmul %58, %60, %cst_54 {dimension_numbers = #tpu.dot_dimension_numbers<[1], [0], [0], [1], [0, 0, 1, 1], [], []>} : vector<128x128xbf16>, vector<128x128xbf16>, vector<128x128xf32> -> vector<128x128xf32>
    %62 = arith.addf %56, %61 : vector<128x128xf32>
    %c1_55 = arith.constant 1 : index
    %c17_56 = arith.constant 17 : index
    %c0_57 = arith.constant 0 : index
    %63 = vector.load %arg10[%c1_55, %c17_56, %c0_57] : memref<10x48x128xbf16, #tpu.memory_space<vmem>>, vector<8x16x128xbf16>
    %64 = vector.shape_cast %63 : vector<8x16x128xbf16> to vector<128x128xbf16>
    %c5 = arith.constant 5 : index
    %c0_58 = arith.constant 0 : index
    %c0_59 = arith.constant 0 : index
    %65 = vector.load %arg7[%c5, %c0_58, %c0_59] : memref<9x128x128xbf16, #tpu.memory_space<vmem>>, vector<1x128x128xbf16>
    %66 = vector.shape_cast %65 : vector<1x128x128xbf16> to vector<128x128xbf16>
    %cst_60 = arith.constant dense<0.000000e+00> : vector<128x128xf32>
    %67 = tpu.matmul %64, %66, %cst_60 {dimension_numbers = #tpu.dot_dimension_numbers<[1], [0], [0], [1], [0, 0, 1, 1], [], []>} : vector<128x128xbf16>, vector<128x128xbf16>, vector<128x128xf32> -> vector<128x128xf32>
    %68 = arith.addf %62, %67 : vector<128x128xf32>
    %c2_61 = arith.constant 2 : index
    %c15_62 = arith.constant 15 : index
    %c0_63 = arith.constant 0 : index
    %69 = vector.load %arg10[%c2_61, %c15_62, %c0_63] : memref<10x48x128xbf16, #tpu.memory_space<vmem>>, vector<8x16x128xbf16>
    %70 = vector.shape_cast %69 : vector<8x16x128xbf16> to vector<128x128xbf16>
    %c6 = arith.constant 6 : index
    %c0_64 = arith.constant 0 : index
    %c0_65 = arith.constant 0 : index
    %71 = vector.load %arg7[%c6, %c0_64, %c0_65] : memref<9x128x128xbf16, #tpu.memory_space<vmem>>, vector<1x128x128xbf16>
    %72 = vector.shape_cast %71 : vector<1x128x128xbf16> to vector<128x128xbf16>
    %cst_66 = arith.constant dense<0.000000e+00> : vector<128x128xf32>
    %73 = tpu.matmul %70, %72, %cst_66 {dimension_numbers = #tpu.dot_dimension_numbers<[1], [0], [0], [1], [0, 0, 1, 1], [], []>} : vector<128x128xbf16>, vector<128x128xbf16>, vector<128x128xf32> -> vector<128x128xf32>
    %74 = arith.addf %68, %73 : vector<128x128xf32>
    %c2_67 = arith.constant 2 : index
    %c16_68 = arith.constant 16 : index
    %c0_69 = arith.constant 0 : index
    %75 = vector.load %arg10[%c2_67, %c16_68, %c0_69] : memref<10x48x128xbf16, #tpu.memory_space<vmem>>, vector<8x16x128xbf16>
    %76 = vector.shape_cast %75 : vector<8x16x128xbf16> to vector<128x128xbf16>
    %c7 = arith.constant 7 : index
    %c0_70 = arith.constant 0 : index
    %c0_71 = arith.constant 0 : index
    %77 = vector.load %arg7[%c7, %c0_70, %c0_71] : memref<9x128x128xbf16, #tpu.memory_space<vmem>>, vector<1x128x128xbf16>
    %78 = vector.shape_cast %77 : vector<1x128x128xbf16> to vector<128x128xbf16>
    %cst_72 = arith.constant dense<0.000000e+00> : vector<128x128xf32>
    %79 = tpu.matmul %76, %78, %cst_72 {dimension_numbers = #tpu.dot_dimension_numbers<[1], [0], [0], [1], [0, 0, 1, 1], [], []>} : vector<128x128xbf16>, vector<128x128xbf16>, vector<128x128xf32> -> vector<128x128xf32>
    %80 = arith.addf %74, %79 : vector<128x128xf32>
    %c2_73 = arith.constant 2 : index
    %c17_74 = arith.constant 17 : index
    %c0_75 = arith.constant 0 : index
    %81 = vector.load %arg10[%c2_73, %c17_74, %c0_75] : memref<10x48x128xbf16, #tpu.memory_space<vmem>>, vector<8x16x128xbf16>
    %82 = vector.shape_cast %81 : vector<8x16x128xbf16> to vector<128x128xbf16>
    %c8 = arith.constant 8 : index
    %c0_76 = arith.constant 0 : index
    %c0_77 = arith.constant 0 : index
    %83 = vector.load %arg7[%c8, %c0_76, %c0_77] : memref<9x128x128xbf16, #tpu.memory_space<vmem>>, vector<1x128x128xbf16>
    %84 = vector.shape_cast %83 : vector<1x128x128xbf16> to vector<128x128xbf16>
    %cst_78 = arith.constant dense<0.000000e+00> : vector<128x128xf32>
    %85 = tpu.matmul %82, %84, %cst_78 {dimension_numbers = #tpu.dot_dimension_numbers<[1], [0], [0], [1], [0, 0, 1, 1], [], []>} : vector<128x128xbf16>, vector<128x128xbf16>, vector<128x128xf32> -> vector<128x128xf32>
    %86 = arith.addf %80, %85 : vector<128x128xf32>
    %87 = vector.broadcast %31 : vector<1x128xf32> to vector<128x128xf32>
    %88 = arith.addf %86, %87 : vector<128x128xf32>
    %cst_79 = arith.constant 0.000000e+00 : f32
    %89 = vector.broadcast %cst_79 : f32 to vector<128x128xf32>
    %90 = arith.cmpf ogt, %88, %89 : vector<128x128xf32>
    %cst_80 = arith.constant 1.000000e-01 : f32
    %91 = vector.broadcast %cst_80 : f32 to vector<128x128xf32>
    %92 = arith.mulf %91, %88 : vector<128x128xf32>
    %93 = arith.select %90, %88, %92 : vector<128x128xi1>, vector<128x128xf32>
    %c0_81 = arith.constant 0 : index
    %c0_82 = arith.constant 0 : index
    %c0_83 = arith.constant 0 : index
    %c0_84 = arith.constant 0 : index
    %94 = vector.load %arg2[%c0_81, %c0_82, %c0_83, %c0_84] : memref<1x8x16x128xbf16, #tpu.memory_space<vmem>>, vector<1x8x16x128xbf16>
    %95 = vector.shape_cast %94 : vector<1x8x16x128xbf16> to vector<8x16x128xbf16>
    %96 = vector.shape_cast %95 : vector<8x16x128xbf16> to vector<128x128xbf16>
    %97 = arith.extf %96 : vector<128x128xbf16> to vector<128x128xf32>
    %98 = arith.addf %93, %97 : vector<128x128xf32>
    %99 = vector.shape_cast %98 : vector<128x128xf32> to vector<8x16x128xf32>
    %100 = arith.truncf %99 : vector<8x16x128xf32> to vector<8x16x128xbf16>
    %c0_85 = arith.constant 0 : index
    %c0_86 = arith.constant 0 : index
    %c0_87 = arith.constant 0 : index
    %c0_88 = arith.constant 0 : index
    %101 = vector.load %arg9[%c0_85, %c0_86, %c0_87, %c0_88] : memref<1x8x16x128xbf16, #tpu.memory_space<vmem>>, vector<1x8x16x128xbf16>
    %102 = vector.shape_cast %101 : vector<1x8x16x128xbf16> to vector<8x16x128xbf16>
    %103 = vector.shape_cast %100 : vector<8x16x128xbf16> to vector<1x8x16x128xbf16>
    tpu.vector_store %arg9[%c0_85, %c0_86, %c0_87, %c0_88], %103 {strides = array<i32>} : memref<1x8x16x128xbf16, #tpu.memory_space<vmem>>, vector<1x8x16x128xbf16>,
    return
  }
  func.func @transform_0(%arg0: i32, %arg1: i32) -> (i32, i32, i32, i32) {
    %c0_i32 = arith.constant 0 : i32
    %c0_i32_0 = arith.constant 0 : i32
    %c0_i32_1 = arith.constant 0 : i32
    return %arg0, %arg1, %c0_i32, %c0_i32_0 : i32, i32, i32, i32
  }
  func.func @transform_1(%arg0: i32, %arg1: i32) -> (i32, i32, i32, i32) {
    %c8_i32 = arith.constant 8 : i32
    %0 = arith.muli %arg1, %c8_i32 : i32
    %c1_i32 = arith.constant 1 : i32
    %1 = arith.subi %0, %c1_i32 : i32
    %c0_i32 = arith.constant 0 : i32
    %2 = arith.maxsi %1, %c0_i32 : i32
    %c0_i32_0 = arith.constant 0 : i32
    %c0_i32_1 = arith.constant 0 : i32
    %c0_i32_2 = arith.constant 0 : i32
    return %arg0, %2, %c0_i32_0, %c0_i32_1 : i32, i32, i32, i32
  }
  func.func @transform_2(%arg0: i32, %arg1: i32) -> (i32, i32, i32, i32) {
    %c8_i32 = arith.constant 8 : i32
    %0 = arith.muli %arg1, %c8_i32 : i32
    %c8_i32_0 = arith.constant 8 : i32
    %1 = arith.addi %0, %c8_i32_0 : i32
    %c15_i32 = arith.constant 15 : i32
    %2 = arith.minsi %1, %c15_i32 : i32
    %c0_i32 = arith.constant 0 : i32
    %c0_i32_1 = arith.constant 0 : i32
    %c0_i32_2 = arith.constant 0 : i32
    return %arg0, %2, %c0_i32, %c0_i32_1 : i32, i32, i32, i32
  }
  func.func @transform_3(%arg0: i32, %arg1: i32) -> (i32, i32) {
    %c0_i32 = arith.constant 0 : i32
    %c0_i32_0 = arith.constant 0 : i32
    %c0_i32_1 = arith.constant 0 : i32
    return %c0_i32, %c0_i32_0 : i32, i32
  }
  func.func @transform_4(%arg0: i32, %arg1: i32) -> (i32, i32) {
    %c0_i32 = arith.constant 0 : i32
    %c0_i32_0 = arith.constant 0 : i32
    %c0_i32_1 = arith.constant 0 : i32
    return %c0_i32, %c0_i32_0 : i32, i32
  }
  func.func @transform_5(%arg0: i32, %arg1: i32) -> (i32, i32, i32) {
    %c0_i32 = arith.constant 0 : i32
    %c0_i32_0 = arith.constant 0 : i32
    %c0_i32_1 = arith.constant 0 : i32
    %c0_i32_2 = arith.constant 0 : i32
    return %c0_i32, %c0_i32_0, %c0_i32_1 : i32, i32, i32
  }
  func.func @transform_6(%arg0: i32, %arg1: i32) -> (i32, i32) {
    %c0_i32 = arith.constant 0 : i32
    %c0_i32_0 = arith.constant 0 : i32
    %c0_i32_1 = arith.constant 0 : i32
    return %c0_i32, %c0_i32_0 : i32, i32
  }
  func.func @transform_7(%arg0: i32, %arg1: i32) -> (i32, i32, i32, i32) {
    %c0_i32 = arith.constant 0 : i32
    %c0_i32_0 = arith.constant 0 : i32
    %c0_i32_1 = arith.constant 0 : i32
    return %arg0, %arg1, %c0_i32, %c0_i32_0 : i32, i32, i32, i32
  }
}

module attributes {stable_mosaic.version = 11 : i64} {
  func.func @_shortcut_kernel(%arg0: i32, %arg1: i32, %arg2: memref<1x8x16x128xbf16, #tpu.memory_space<vmem>>, %arg3: memref<1x1x16x128xbf16, #tpu.memory_space<vmem>>, %arg4: memref<1x1x16x128xbf16, #tpu.memory_space<vmem>>, %arg5: memref<128x128xbf16, #tpu.memory_space<vmem>>, %arg6: memref<1x128xf32, #tpu.memory_space<vmem>>, %arg7: memref<9x128x128xbf16, #tpu.memory_space<vmem>>, %arg8: memref<1x128xf32, #tpu.memory_space<vmem>>, %arg9: memref<1x8x16x128xf32, #tpu.memory_space<vmem>>, %arg10: memref<10x48x128xbf16, #tpu.memory_space<vmem>>) attributes {dimension_semantics = [#tpu.dimension_semantics<parallel>, #tpu.dimension_semantics<parallel>], iteration_bounds = array<i64: 2, 2>, scalar_prefetch = 0 : i64, scratch_operands = 1 : i64, tpu.core_type = #tpu.core_type<tc>, window_params = [{transform_indices = @transform_0, window_bounds = array<i64: 1, 8, 16, 128>}, {transform_indices = @transform_1, window_bounds = array<i64: 1, 1, 16, 128>}, {transform_indices = @transform_2, window_bounds = array<i64: 1, 1, 16, 128>}, {pipeline_mode = #tpu.pipeline_mode<synchronous>, transform_indices = @transform_3, window_bounds = array<i64: 128, 128>}, {pipeline_mode = #tpu.pipeline_mode<synchronous>, transform_indices = @transform_4, window_bounds = array<i64: 1, 128>}, {pipeline_mode = #tpu.pipeline_mode<synchronous>, transform_indices = @transform_5, window_bounds = array<i64: 9, 128, 128>}, {pipeline_mode = #tpu.pipeline_mode<synchronous>, transform_indices = @transform_6, window_bounds = array<i64: 1, 128>}, {transform_indices = @transform_7, window_bounds = array<i64: 1, 8, 16, 128>}]} {
    %c0 = arith.constant 0 : index
    %c0_0 = arith.constant 0 : index
    %0 = vector.load %arg5[%c0, %c0_0] : memref<128x128xbf16, #tpu.memory_space<vmem>>, vector<128x128xbf16>
    %c0_1 = arith.constant 0 : index
    %c0_2 = arith.constant 0 : index
    %1 = vector.load %arg6[%c0_1, %c0_2] : memref<1x128xf32, #tpu.memory_space<vmem>>, vector<1x128xf32>
    %cst = arith.constant 0.000000e+00 : bf16
    %2 = vector.broadcast %cst : bf16 to vector<10x16x128xbf16>
    %c0_3 = arith.constant 0 : index
    %c0_4 = arith.constant 0 : index
    %c0_5 = arith.constant 0 : index
    %3 = vector.load %arg10[%c0_3, %c0_4, %c0_5] : memref<10x48x128xbf16, #tpu.memory_space<vmem>>, vector<10x16x128xbf16>
    tpu.vector_store %arg10[%c0_3, %c0_4, %c0_5], %2 {strides = array<i32>} : memref<10x48x128xbf16, #tpu.memory_space<vmem>>, vector<10x16x128xbf16>,
    %c0_6 = arith.constant 0 : index
    %c32 = arith.constant 32 : index
    %c0_7 = arith.constant 0 : index
    %4 = vector.load %arg10[%c0_6, %c32, %c0_7] : memref<10x48x128xbf16, #tpu.memory_space<vmem>>, vector<10x16x128xbf16>
    tpu.vector_store %arg10[%c0_6, %c32, %c0_7], %2 {strides = array<i32>} : memref<10x48x128xbf16, #tpu.memory_space<vmem>>, vector<10x16x128xbf16>,
    %c0_8 = arith.constant 0 : index
    %c0_9 = arith.constant 0 : index
    %c0_10 = arith.constant 0 : index
    %c0_11 = arith.constant 0 : index
    %5 = vector.load %arg2[%c0_8, %c0_9, %c0_10, %c0_11] : memref<1x8x16x128xbf16, #tpu.memory_space<vmem>>, vector<1x8x16x128xbf16>
    %6 = vector.shape_cast %5 : vector<1x8x16x128xbf16> to vector<8x16x128xbf16>
    %7 = vector.shape_cast %6 : vector<8x16x128xbf16> to vector<128x128xbf16>
    %cst_12 = arith.constant dense<0.000000e+00> : vector<128x128xf32>
    %8 = tpu.matmul %7, %0, %cst_12 {dimension_numbers = #tpu.dot_dimension_numbers<[1], [0], [0], [1], [0, 0, 1, 1], [], []>} : vector<128x128xbf16>, vector<128x128xbf16>, vector<128x128xf32> -> vector<128x128xf32>
    %9 = vector.broadcast %1 : vector<1x128xf32> to vector<128x128xf32>
    %10 = arith.addf %8, %9 : vector<128x128xf32>
    %cst_13 = arith.constant 0.000000e+00 : f32
    %11 = vector.broadcast %cst_13 : f32 to vector<128x128xf32>
    %12 = arith.cmpf ogt, %10, %11 : vector<128x128xf32>
    %cst_14 = arith.constant 1.000000e-01 : f32
    %13 = vector.broadcast %cst_14 : f32 to vector<128x128xf32>
    %14 = arith.mulf %13, %10 : vector<128x128xf32>
    %15 = arith.select %12, %10, %14 : vector<128x128xi1>, vector<128x128xf32>
    %16 = arith.truncf %15 : vector<128x128xf32> to vector<128x128xbf16>
    %17 = vector.shape_cast %16 : vector<128x128xbf16> to vector<8x16x128xbf16>
    %c1 = arith.constant 1 : index
    %c16 = arith.constant 16 : index
    %c0_15 = arith.constant 0 : index
    %18 = vector.load %arg10[%c1, %c16, %c0_15] : memref<10x48x128xbf16, #tpu.memory_space<vmem>>, vector<8x16x128xbf16>
    tpu.vector_store %arg10[%c1, %c16, %c0_15], %17 {strides = array<i32>} : memref<10x48x128xbf16, #tpu.memory_space<vmem>>, vector<8x16x128xbf16>,
    %c0_i32 = arith.constant 0 : i32
    %19 = arith.cmpi sgt, %arg1, %c0_i32 : i32
    %20 = arith.extui %19 : i1 to i32
    %c0_i32_16 = arith.constant 0 : i32
    %21 = arith.cmpi ne, %20, %c0_i32_16 : i32
    scf.if %21 {
      %c0_89 = arith.constant 0 : index
      %c0_90 = arith.constant 0 : index
      %c0_91 = arith.constant 0 : index
      %c0_92 = arith.constant 0 : index
      %103 = vector.load %arg3[%c0_89, %c0_90, %c0_91, %c0_92] : memref<1x1x16x128xbf16, #tpu.memory_space<vmem>>, vector<1x1x16x128xbf16>
      %104 = vector.shape_cast %103 : vector<1x1x16x128xbf16> to vector<16x128xbf16>
      %cst_93 = arith.constant dense<0.000000e+00> : vector<16x128xf32>
      %105 = tpu.matmul %104, %0, %cst_93 {dimension_numbers = #tpu.dot_dimension_numbers<[1], [0], [0], [1], [0, 0, 1, 1], [], []>} : vector<16x128xbf16>, vector<128x128xbf16>, vector<16x128xf32> -> vector<16x128xf32>
      %106 = vector.broadcast %1 : vector<1x128xf32> to vector<16x128xf32>
      %107 = arith.addf %105, %106 : vector<16x128xf32>
      %cst_94 = arith.constant 0.000000e+00 : f32
      %108 = vector.broadcast %cst_94 : f32 to vector<16x128xf32>
      %109 = arith.cmpf ogt, %107, %108 : vector<16x128xf32>
      %cst_95 = arith.constant 1.000000e-01 : f32
      %110 = vector.broadcast %cst_95 : f32 to vector<16x128xf32>
      %111 = arith.mulf %110, %107 : vector<16x128xf32>
      %112 = arith.select %109, %107, %111 : vector<16x128xi1>, vector<16x128xf32>
      %113 = arith.truncf %112 : vector<16x128xf32> to vector<16x128xbf16>
      %c0_96 = arith.constant 0 : index
      %c16_97 = arith.constant 16 : index
      %c0_98 = arith.constant 0 : index
      %114 = vector.load %arg10[%c0_96, %c16_97, %c0_98] : memref<10x48x128xbf16, #tpu.memory_space<vmem>>, vector<1x16x128xbf16>
      %115 = vector.shape_cast %114 : vector<1x16x128xbf16> to vector<16x128xbf16>
      %116 = vector.shape_cast %113 : vector<16x128xbf16> to vector<1x16x128xbf16>
      tpu.vector_store %arg10[%c0_96, %c16_97, %c0_98], %116 {strides = array<i32>} : memref<10x48x128xbf16, #tpu.memory_space<vmem>>, vector<1x16x128xbf16>,
    } else {
    }
    %c0_i32_17 = arith.constant 0 : i32
    %22 = arith.cmpi eq, %arg1, %c0_i32_17 : i32
    %23 = arith.extui %22 : i1 to i32
    %c0_i32_18 = arith.constant 0 : i32
    %24 = arith.cmpi ne, %23, %c0_i32_18 : i32
    scf.if %24 {
      %cst_89 = arith.constant 0.000000e+00 : bf16
      %103 = vector.broadcast %cst_89 : bf16 to vector<16x128xbf16>
      %c0_90 = arith.constant 0 : index
      %c16_91 = arith.constant 16 : index
      %c0_92 = arith.constant 0 : index
      %104 = vector.load %arg10[%c0_90, %c16_91, %c0_92] : memref<10x48x128xbf16, #tpu.memory_space<vmem>>, vector<1x16x128xbf16>
      %105 = vector.shape_cast %104 : vector<1x16x128xbf16> to vector<16x128xbf16>
      %106 = vector.shape_cast %103 : vector<16x128xbf16> to vector<1x16x128xbf16>
      tpu.vector_store %arg10[%c0_90, %c16_91, %c0_92], %106 {strides = array<i32>} : memref<10x48x128xbf16, #tpu.memory_space<vmem>>, vector<1x16x128xbf16>,
    } else {
    }
    %c1_i32 = arith.constant 1 : i32
    %25 = arith.cmpi slt, %arg1, %c1_i32 : i32
    %26 = arith.extui %25 : i1 to i32
    %c0_i32_19 = arith.constant 0 : i32
    %27 = arith.cmpi ne, %26, %c0_i32_19 : i32
    scf.if %27 {
      %c0_89 = arith.constant 0 : index
      %c0_90 = arith.constant 0 : index
      %c0_91 = arith.constant 0 : index
      %c0_92 = arith.constant 0 : index
      %103 = vector.load %arg4[%c0_89, %c0_90, %c0_91, %c0_92] : memref<1x1x16x128xbf16, #tpu.memory_space<vmem>>, vector<1x1x16x128xbf16>
      %104 = vector.shape_cast %103 : vector<1x1x16x128xbf16> to vector<16x128xbf16>
      %cst_93 = arith.constant dense<0.000000e+00> : vector<16x128xf32>
      %105 = tpu.matmul %104, %0, %cst_93 {dimension_numbers = #tpu.dot_dimension_numbers<[1], [0], [0], [1], [0, 0, 1, 1], [], []>} : vector<16x128xbf16>, vector<128x128xbf16>, vector<16x128xf32> -> vector<16x128xf32>
      %106 = vector.broadcast %1 : vector<1x128xf32> to vector<16x128xf32>
      %107 = arith.addf %105, %106 : vector<16x128xf32>
      %cst_94 = arith.constant 0.000000e+00 : f32
      %108 = vector.broadcast %cst_94 : f32 to vector<16x128xf32>
      %109 = arith.cmpf ogt, %107, %108 : vector<16x128xf32>
      %cst_95 = arith.constant 1.000000e-01 : f32
      %110 = vector.broadcast %cst_95 : f32 to vector<16x128xf32>
      %111 = arith.mulf %110, %107 : vector<16x128xf32>
      %112 = arith.select %109, %107, %111 : vector<16x128xi1>, vector<16x128xf32>
      %113 = arith.truncf %112 : vector<16x128xf32> to vector<16x128xbf16>
      %c9 = arith.constant 9 : index
      %c16_96 = arith.constant 16 : index
      %c0_97 = arith.constant 0 : index
      %114 = vector.load %arg10[%c9, %c16_96, %c0_97] : memref<10x48x128xbf16, #tpu.memory_space<vmem>>, vector<1x16x128xbf16>
      %115 = vector.shape_cast %114 : vector<1x16x128xbf16> to vector<16x128xbf16>
      %116 = vector.shape_cast %113 : vector<16x128xbf16> to vector<1x16x128xbf16>
      tpu.vector_store %arg10[%c9, %c16_96, %c0_97], %116 {strides = array<i32>} : memref<10x48x128xbf16, #tpu.memory_space<vmem>>, vector<1x16x128xbf16>,
    } else {
    }
    %c1_i32_20 = arith.constant 1 : i32
    %28 = arith.cmpi eq, %arg1, %c1_i32_20 : i32
    %29 = arith.extui %28 : i1 to i32
    %c0_i32_21 = arith.constant 0 : i32
    %30 = arith.cmpi ne, %29, %c0_i32_21 : i32
    scf.if %30 {
      %cst_89 = arith.constant 0.000000e+00 : bf16
      %103 = vector.broadcast %cst_89 : bf16 to vector<16x128xbf16>
      %c9 = arith.constant 9 : index
      %c16_90 = arith.constant 16 : index
      %c0_91 = arith.constant 0 : index
      %104 = vector.load %arg10[%c9, %c16_90, %c0_91] : memref<10x48x128xbf16, #tpu.memory_space<vmem>>, vector<1x16x128xbf16>
      %105 = vector.shape_cast %104 : vector<1x16x128xbf16> to vector<16x128xbf16>
      %106 = vector.shape_cast %103 : vector<16x128xbf16> to vector<1x16x128xbf16>
      tpu.vector_store %arg10[%c9, %c16_90, %c0_91], %106 {strides = array<i32>} : memref<10x48x128xbf16, #tpu.memory_space<vmem>>, vector<1x16x128xbf16>,
    } else {
    }
    %c0_22 = arith.constant 0 : index
    %c0_23 = arith.constant 0 : index
    %31 = vector.load %arg8[%c0_22, %c0_23] : memref<1x128xf32, #tpu.memory_space<vmem>>, vector<1x128xf32>
    %cst_24 = arith.constant 0.000000e+00 : f32
    %32 = vector.broadcast %cst_24 : f32 to vector<128x128xf32>
    %c0_25 = arith.constant 0 : index
    %c15 = arith.constant 15 : index
    %c0_26 = arith.constant 0 : index
    %33 = vector.load %arg10[%c0_25, %c15, %c0_26] : memref<10x48x128xbf16, #tpu.memory_space<vmem>>, vector<8x16x128xbf16>
    %34 = vector.shape_cast %33 : vector<8x16x128xbf16> to vector<128x128xbf16>
    %c0_27 = arith.constant 0 : index
    %c0_28 = arith.constant 0 : index
    %c0_29 = arith.constant 0 : index
    %35 = vector.load %arg7[%c0_27, %c0_28, %c0_29] : memref<9x128x128xbf16, #tpu.memory_space<vmem>>, vector<1x128x128xbf16>
    %36 = vector.shape_cast %35 : vector<1x128x128xbf16> to vector<128x128xbf16>
    %cst_30 = arith.constant dense<0.000000e+00> : vector<128x128xf32>
    %37 = tpu.matmul %34, %36, %cst_30 {dimension_numbers = #tpu.dot_dimension_numbers<[1], [0], [0], [1], [0, 0, 1, 1], [], []>} : vector<128x128xbf16>, vector<128x128xbf16>, vector<128x128xf32> -> vector<128x128xf32>
    %38 = arith.addf %32, %37 : vector<128x128xf32>
    %c0_31 = arith.constant 0 : index
    %c16_32 = arith.constant 16 : index
    %c0_33 = arith.constant 0 : index
    %39 = vector.load %arg10[%c0_31, %c16_32, %c0_33] : memref<10x48x128xbf16, #tpu.memory_space<vmem>>, vector<8x16x128xbf16>
    %40 = vector.shape_cast %39 : vector<8x16x128xbf16> to vector<128x128xbf16>
    %c1_34 = arith.constant 1 : index
    %c0_35 = arith.constant 0 : index
    %c0_36 = arith.constant 0 : index
    %41 = vector.load %arg7[%c1_34, %c0_35, %c0_36] : memref<9x128x128xbf16, #tpu.memory_space<vmem>>, vector<1x128x128xbf16>
    %42 = vector.shape_cast %41 : vector<1x128x128xbf16> to vector<128x128xbf16>
    %cst_37 = arith.constant dense<0.000000e+00> : vector<128x128xf32>
    %43 = tpu.matmul %40, %42, %cst_37 {dimension_numbers = #tpu.dot_dimension_numbers<[1], [0], [0], [1], [0, 0, 1, 1], [], []>} : vector<128x128xbf16>, vector<128x128xbf16>, vector<128x128xf32> -> vector<128x128xf32>
    %44 = arith.addf %38, %43 : vector<128x128xf32>
    %c0_38 = arith.constant 0 : index
    %c17 = arith.constant 17 : index
    %c0_39 = arith.constant 0 : index
    %45 = vector.load %arg10[%c0_38, %c17, %c0_39] : memref<10x48x128xbf16, #tpu.memory_space<vmem>>, vector<8x16x128xbf16>
    %46 = vector.shape_cast %45 : vector<8x16x128xbf16> to vector<128x128xbf16>
    %c2 = arith.constant 2 : index
    %c0_40 = arith.constant 0 : index
    %c0_41 = arith.constant 0 : index
    %47 = vector.load %arg7[%c2, %c0_40, %c0_41] : memref<9x128x128xbf16, #tpu.memory_space<vmem>>, vector<1x128x128xbf16>
    %48 = vector.shape_cast %47 : vector<1x128x128xbf16> to vector<128x128xbf16>
    %cst_42 = arith.constant dense<0.000000e+00> : vector<128x128xf32>
    %49 = tpu.matmul %46, %48, %cst_42 {dimension_numbers = #tpu.dot_dimension_numbers<[1], [0], [0], [1], [0, 0, 1, 1], [], []>} : vector<128x128xbf16>, vector<128x128xbf16>, vector<128x128xf32> -> vector<128x128xf32>
    %50 = arith.addf %44, %49 : vector<128x128xf32>
    %c1_43 = arith.constant 1 : index
    %c15_44 = arith.constant 15 : index
    %c0_45 = arith.constant 0 : index
    %51 = vector.load %arg10[%c1_43, %c15_44, %c0_45] : memref<10x48x128xbf16, #tpu.memory_space<vmem>>, vector<8x16x128xbf16>
    %52 = vector.shape_cast %51 : vector<8x16x128xbf16> to vector<128x128xbf16>
    %c3 = arith.constant 3 : index
    %c0_46 = arith.constant 0 : index
    %c0_47 = arith.constant 0 : index
    %53 = vector.load %arg7[%c3, %c0_46, %c0_47] : memref<9x128x128xbf16, #tpu.memory_space<vmem>>, vector<1x128x128xbf16>
    %54 = vector.shape_cast %53 : vector<1x128x128xbf16> to vector<128x128xbf16>
    %cst_48 = arith.constant dense<0.000000e+00> : vector<128x128xf32>
    %55 = tpu.matmul %52, %54, %cst_48 {dimension_numbers = #tpu.dot_dimension_numbers<[1], [0], [0], [1], [0, 0, 1, 1], [], []>} : vector<128x128xbf16>, vector<128x128xbf16>, vector<128x128xf32> -> vector<128x128xf32>
    %56 = arith.addf %50, %55 : vector<128x128xf32>
    %c1_49 = arith.constant 1 : index
    %c16_50 = arith.constant 16 : index
    %c0_51 = arith.constant 0 : index
    %57 = vector.load %arg10[%c1_49, %c16_50, %c0_51] : memref<10x48x128xbf16, #tpu.memory_space<vmem>>, vector<8x16x128xbf16>
    %58 = vector.shape_cast %57 : vector<8x16x128xbf16> to vector<128x128xbf16>
    %c4 = arith.constant 4 : index
    %c0_52 = arith.constant 0 : index
    %c0_53 = arith.constant 0 : index
    %59 = vector.load %arg7[%c4, %c0_52, %c0_53] : memref<9x128x128xbf16, #tpu.memory_space<vmem>>, vector<1x128x128xbf16>
    %60 = vector.shape_cast %59 : vector<1x128x128xbf16> to vector<128x128xbf16>
    %cst_54 = arith.constant dense<0.000000e+00> : vector<128x128xf32>
    %61 = tpu.matmul %58, %60, %cst_54 {dimension_numbers = #tpu.dot_dimension_numbers<[1], [0], [0], [1], [0, 0, 1, 1], [], []>} : vector<128x128xbf16>, vector<128x128xbf16>, vector<128x128xf32> -> vector<128x128xf32>
    %62 = arith.addf %56, %61 : vector<128x128xf32>
    %c1_55 = arith.constant 1 : index
    %c17_56 = arith.constant 17 : index
    %c0_57 = arith.constant 0 : index
    %63 = vector.load %arg10[%c1_55, %c17_56, %c0_57] : memref<10x48x128xbf16, #tpu.memory_space<vmem>>, vector<8x16x128xbf16>
    %64 = vector.shape_cast %63 : vector<8x16x128xbf16> to vector<128x128xbf16>
    %c5 = arith.constant 5 : index
    %c0_58 = arith.constant 0 : index
    %c0_59 = arith.constant 0 : index
    %65 = vector.load %arg7[%c5, %c0_58, %c0_59] : memref<9x128x128xbf16, #tpu.memory_space<vmem>>, vector<1x128x128xbf16>
    %66 = vector.shape_cast %65 : vector<1x128x128xbf16> to vector<128x128xbf16>
    %cst_60 = arith.constant dense<0.000000e+00> : vector<128x128xf32>
    %67 = tpu.matmul %64, %66, %cst_60 {dimension_numbers = #tpu.dot_dimension_numbers<[1], [0], [0], [1], [0, 0, 1, 1], [], []>} : vector<128x128xbf16>, vector<128x128xbf16>, vector<128x128xf32> -> vector<128x128xf32>
    %68 = arith.addf %62, %67 : vector<128x128xf32>
    %c2_61 = arith.constant 2 : index
    %c15_62 = arith.constant 15 : index
    %c0_63 = arith.constant 0 : index
    %69 = vector.load %arg10[%c2_61, %c15_62, %c0_63] : memref<10x48x128xbf16, #tpu.memory_space<vmem>>, vector<8x16x128xbf16>
    %70 = vector.shape_cast %69 : vector<8x16x128xbf16> to vector<128x128xbf16>
    %c6 = arith.constant 6 : index
    %c0_64 = arith.constant 0 : index
    %c0_65 = arith.constant 0 : index
    %71 = vector.load %arg7[%c6, %c0_64, %c0_65] : memref<9x128x128xbf16, #tpu.memory_space<vmem>>, vector<1x128x128xbf16>
    %72 = vector.shape_cast %71 : vector<1x128x128xbf16> to vector<128x128xbf16>
    %cst_66 = arith.constant dense<0.000000e+00> : vector<128x128xf32>
    %73 = tpu.matmul %70, %72, %cst_66 {dimension_numbers = #tpu.dot_dimension_numbers<[1], [0], [0], [1], [0, 0, 1, 1], [], []>} : vector<128x128xbf16>, vector<128x128xbf16>, vector<128x128xf32> -> vector<128x128xf32>
    %74 = arith.addf %68, %73 : vector<128x128xf32>
    %c2_67 = arith.constant 2 : index
    %c16_68 = arith.constant 16 : index
    %c0_69 = arith.constant 0 : index
    %75 = vector.load %arg10[%c2_67, %c16_68, %c0_69] : memref<10x48x128xbf16, #tpu.memory_space<vmem>>, vector<8x16x128xbf16>
    %76 = vector.shape_cast %75 : vector<8x16x128xbf16> to vector<128x128xbf16>
    %c7 = arith.constant 7 : index
    %c0_70 = arith.constant 0 : index
    %c0_71 = arith.constant 0 : index
    %77 = vector.load %arg7[%c7, %c0_70, %c0_71] : memref<9x128x128xbf16, #tpu.memory_space<vmem>>, vector<1x128x128xbf16>
    %78 = vector.shape_cast %77 : vector<1x128x128xbf16> to vector<128x128xbf16>
    %cst_72 = arith.constant dense<0.000000e+00> : vector<128x128xf32>
    %79 = tpu.matmul %76, %78, %cst_72 {dimension_numbers = #tpu.dot_dimension_numbers<[1], [0], [0], [1], [0, 0, 1, 1], [], []>} : vector<128x128xbf16>, vector<128x128xbf16>, vector<128x128xf32> -> vector<128x128xf32>
    %80 = arith.addf %74, %79 : vector<128x128xf32>
    %c2_73 = arith.constant 2 : index
    %c17_74 = arith.constant 17 : index
    %c0_75 = arith.constant 0 : index
    %81 = vector.load %arg10[%c2_73, %c17_74, %c0_75] : memref<10x48x128xbf16, #tpu.memory_space<vmem>>, vector<8x16x128xbf16>
    %82 = vector.shape_cast %81 : vector<8x16x128xbf16> to vector<128x128xbf16>
    %c8 = arith.constant 8 : index
    %c0_76 = arith.constant 0 : index
    %c0_77 = arith.constant 0 : index
    %83 = vector.load %arg7[%c8, %c0_76, %c0_77] : memref<9x128x128xbf16, #tpu.memory_space<vmem>>, vector<1x128x128xbf16>
    %84 = vector.shape_cast %83 : vector<1x128x128xbf16> to vector<128x128xbf16>
    %cst_78 = arith.constant dense<0.000000e+00> : vector<128x128xf32>
    %85 = tpu.matmul %82, %84, %cst_78 {dimension_numbers = #tpu.dot_dimension_numbers<[1], [0], [0], [1], [0, 0, 1, 1], [], []>} : vector<128x128xbf16>, vector<128x128xbf16>, vector<128x128xf32> -> vector<128x128xf32>
    %86 = arith.addf %80, %85 : vector<128x128xf32>
    %87 = vector.broadcast %31 : vector<1x128xf32> to vector<128x128xf32>
    %88 = arith.addf %86, %87 : vector<128x128xf32>
    %cst_79 = arith.constant 0.000000e+00 : f32
    %89 = vector.broadcast %cst_79 : f32 to vector<128x128xf32>
    %90 = arith.cmpf ogt, %88, %89 : vector<128x128xf32>
    %cst_80 = arith.constant 1.000000e-01 : f32
    %91 = vector.broadcast %cst_80 : f32 to vector<128x128xf32>
    %92 = arith.mulf %91, %88 : vector<128x128xf32>
    %93 = arith.select %90, %88, %92 : vector<128x128xi1>, vector<128x128xf32>
    %c0_81 = arith.constant 0 : index
    %c0_82 = arith.constant 0 : index
    %c0_83 = arith.constant 0 : index
    %c0_84 = arith.constant 0 : index
    %94 = vector.load %arg2[%c0_81, %c0_82, %c0_83, %c0_84] : memref<1x8x16x128xbf16, #tpu.memory_space<vmem>>, vector<1x8x16x128xbf16>
    %95 = vector.shape_cast %94 : vector<1x8x16x128xbf16> to vector<8x16x128xbf16>
    %96 = vector.shape_cast %95 : vector<8x16x128xbf16> to vector<128x128xbf16>
    %97 = arith.extf %96 : vector<128x128xbf16> to vector<128x128xf32>
    %98 = arith.addf %93, %97 : vector<128x128xf32>
    %99 = vector.shape_cast %98 : vector<128x128xf32> to vector<8x16x128xf32>
    %c0_85 = arith.constant 0 : index
    %c0_86 = arith.constant 0 : index
    %c0_87 = arith.constant 0 : index
    %c0_88 = arith.constant 0 : index
    %100 = vector.load %arg9[%c0_85, %c0_86, %c0_87, %c0_88] : memref<1x8x16x128xf32, #tpu.memory_space<vmem>>, vector<1x8x16x128xf32>
    %101 = vector.shape_cast %100 : vector<1x8x16x128xf32> to vector<8x16x128xf32>
    %102 = vector.shape_cast %99 : vector<8x16x128xf32> to vector<1x8x16x128xf32>
    tpu.vector_store %arg9[%c0_85, %c0_86, %c0_87, %c0_88], %102 {strides = array<i32>} : memref<1x8x16x128xf32, #tpu.memory_space<vmem>>, vector<1x8x16x128xf32>,
    return
  }
  func.func @transform_0(%arg0: i32, %arg1: i32) -> (i32, i32, i32, i32) {
    %c0_i32 = arith.constant 0 : i32
    %c0_i32_0 = arith.constant 0 : i32
    %c0_i32_1 = arith.constant 0 : i32
    return %arg0, %arg1, %c0_i32, %c0_i32_0 : i32, i32, i32, i32
  }
  func.func @transform_1(%arg0: i32, %arg1: i32) -> (i32, i32, i32, i32) {
    %c8_i32 = arith.constant 8 : i32
    %0 = arith.muli %arg1, %c8_i32 : i32
    %c1_i32 = arith.constant 1 : i32
    %1 = arith.subi %0, %c1_i32 : i32
    %c0_i32 = arith.constant 0 : i32
    %2 = arith.maxsi %1, %c0_i32 : i32
    %c0_i32_0 = arith.constant 0 : i32
    %c0_i32_1 = arith.constant 0 : i32
    %c0_i32_2 = arith.constant 0 : i32
    return %arg0, %2, %c0_i32_0, %c0_i32_1 : i32, i32, i32, i32
  }
  func.func @transform_2(%arg0: i32, %arg1: i32) -> (i32, i32, i32, i32) {
    %c8_i32 = arith.constant 8 : i32
    %0 = arith.muli %arg1, %c8_i32 : i32
    %c8_i32_0 = arith.constant 8 : i32
    %1 = arith.addi %0, %c8_i32_0 : i32
    %c15_i32 = arith.constant 15 : i32
    %2 = arith.minsi %1, %c15_i32 : i32
    %c0_i32 = arith.constant 0 : i32
    %c0_i32_1 = arith.constant 0 : i32
    %c0_i32_2 = arith.constant 0 : i32
    return %arg0, %2, %c0_i32, %c0_i32_1 : i32, i32, i32, i32
  }
  func.func @transform_3(%arg0: i32, %arg1: i32) -> (i32, i32) {
    %c0_i32 = arith.constant 0 : i32
    %c0_i32_0 = arith.constant 0 : i32
    %c0_i32_1 = arith.constant 0 : i32
    return %c0_i32, %c0_i32_0 : i32, i32
  }
  func.func @transform_4(%arg0: i32, %arg1: i32) -> (i32, i32) {
    %c0_i32 = arith.constant 0 : i32
    %c0_i32_0 = arith.constant 0 : i32
    %c0_i32_1 = arith.constant 0 : i32
    return %c0_i32, %c0_i32_0 : i32, i32
  }
  func.func @transform_5(%arg0: i32, %arg1: i32) -> (i32, i32, i32) {
    %c0_i32 = arith.constant 0 : i32
    %c0_i32_0 = arith.constant 0 : i32
    %c0_i32_1 = arith.constant 0 : i32
    %c0_i32_2 = arith.constant 0 : i32
    return %c0_i32, %c0_i32_0, %c0_i32_1 : i32, i32, i32
  }
  func.func @transform_6(%arg0: i32, %arg1: i32) -> (i32, i32) {
    %c0_i32 = arith.constant 0 : i32
    %c0_i32_0 = arith.constant 0 : i32
    %c0_i32_1 = arith.constant 0 : i32
    return %c0_i32, %c0_i32_0 : i32, i32
  }
  func.func @transform_7(%arg0: i32, %arg1: i32) -> (i32, i32, i32, i32) {
    %c0_i32 = arith.constant 0 : i32
    %c0_i32_0 = arith.constant 0 : i32
    %c0_i32_1 = arith.constant 0 : i32
    return %arg0, %arg1, %c0_i32, %c0_i32_0 : i32, i32, i32, i32
  }
}

</mosaic_0001>

<bundles_post_ra>
// kernel: upsample_block_forward.3
= control target key start
LH: loop header
LB: loop body
LE: loop exit
PB: predicated region body
PF: predicated region fallthrough
CT: control target
= control target key end

     0   :  { %s997_s18 = smov 0   ;;  %s1104_s0 = inlined_call_operand.vmem [shape: bf16[512,32], index: 0, kind: input, shape index: {}]   ;;  %s1105_s1 = inlined_call_operand.vmem [shape: bf16[512,128], index: 1, kind: input, shape index: {}]   ;;  %s1106_s2 = inlined_call_operand.vmem [shape: bf16[32,128], index: 2, kind: input, shape index: {}]   ;;  %s1107_s3 = inlined_call_operand.vmem [shape: bf16[128,128], index: 3, kind: input, shape index: {}]   ;;  %s1108_s4 = inlined_call_operand.vmem [shape: f32[1,128], index: 4, kind: input, shape index: {}]   ;;  %s1109_s5 = inlined_call_operand.vmem [shape: bf16[512,128], index: 5, kind: output, shape index: {}]  }
   0x1 LB: > { %s742_s19 = sadd.s32 4294967295, %s965_s18   ;;  %p746_p0 = scmp.ge.s32.totalorder %s965_s18, 1  ;;  %s965_s18 = sphi %s997_s18, %s15_s18  }
   0x2   : > { %p199_p1 = scmp.lt.s32.totalorder %s965_s18, 5 }
   0x4   : > { %p200_p2 = pnand %p746_p0, %p199_p1 }
   0x5   : > { %s747_s24 = sshll.u32 (!%p200_p2), %s742_s19, 4 }
   0x6   : > { %203 = sbr.rel (%p200_p2) target bundleno = 242 (0xf2), region = 40  ;;  %p233_p3 = scmp.lt.s32.totalorder (!%p200_p2), %s747_s24, 63 }
   0xb   : > { %v892_v0 = vld [vmem:[%s1107_s3 + $0x38] sm:$0xff]  ;;  %v876_v1 = vld [vmem:[%s1106_s2 + $0x8] sm:$0xff]  ;;  %v891_v2 = vld [vmem:[%s1107_s3 + $0x30] sm:$0xff]  ;;  %s1111_s24 = smov (!%p233_p3, %s747_s24), 63  ;;  %vm500_vm0 = vcmask 261120  }
   0xc   : > { %399 = vmatpush.bf16.msra.mxu0 %v892_v0  ;;  %940 = vmatpush.bf16.msra.mxu2 %v892_v0  ;;  %v875_v3 = vld [vmem:[%s1106_s2] sm:$0xff]  ;;  %s1017_s29 = sshll.u32 %s1111_s24, 2  ;;  %v890_v4 = vld [vmem:[%s1107_s3 + $0x28] sm:$0xff]  ;;  %v888_v8 = vld [vmem:[%s1107_s3 + $0x18] sm:$0xff] }
   0xd   : > { %531 = vmatpush.bf16.msra.mxu1 %v876_v1  ;;  %948 = vmatpush.bf16.msra.mxu3 %v876_v1  ;;  %s1023_s7 = scalar_lea.vmem %s1104_s0, %s1017_s29  ;;  %v889_v7 = vld [vmem:[%s1107_s3 + $0x20] sm:$0xff]  ;;  %v887_v9 = vld [vmem:[%s1107_s3 + $0x10] sm:$0xff]  ;;  %v886_v11 = vld [vmem:[%s1107_s3 + $0x8] sm:$0xff]  ;;  %s242_s23 = scalar_lea.vmem %s1105_s1, %s1017_s29 }
   0xe   : > { %v867_v5 = vld [vmem:[%s1023_s7] sm:$0xff]  ;;  %v872_v6 = vld [vmem:[%s1023_s7 + $0x28] sm:$0xff]  ;;  %v873_v12 = vld [vmem:[%s1023_s7 + $0x30] sm:$0xff]  ;;  %s1074_s28 = scalar_lea.vmem %s1109_s5, %s1017_s29 }
   0xf   : > { %v868_v10 = vld [vmem:[%s1023_s7 + $0x8] sm:$0xff]  ;;  %v885_v13 = vld [vmem:[%s1107_s3] sm:$0xff]  ;;  %v869_v16 = vld [vmem:[%s1023_s7 + $0x10] sm:$0xff] }
  0x10   : > { %400 = vmatpush.bf16.msra.mxu0 %v891_v2  ;;  %941 = vmatpush.bf16.msra.mxu2 %v891_v2  ;;  %v877_v14 = vld [vmem:[%s242_s23] sm:$0xff]  ;;  %v874_v17 = vld [vmem:[%s1023_s7 + $0x38] sm:$0xff]  ;;  %v878_v18 = vld [vmem:[%s242_s23 + $0x8] sm:$0xff] }
  0x11   : > { %532 = vmatpush.bf16.msra.mxu1 %v875_v3  ;;  %949 = vmatpush.bf16.msra.mxu3 %v875_v3  ;;  %v881_v15 = vld [vmem:[%s242_s23 + $0x20] sm:$0xff]  ;;  %v882_v19 = vld [vmem:[%s242_s23 + $0x28] sm:$0xff]  ;;  %v870_v20 = vld [vmem:[%s1023_s7 + $0x18] sm:$0xff] }
  0x12   : > { %v879_v21 = vld [vmem:[%s242_s23 + $0x10] sm:$0xff]  ;;  %v871_v23 = vld [vmem:[%s1023_s7 + $0x20] sm:$0xff]  ;;  %v880_v24 = vld [vmem:[%s242_s23 + $0x18] sm:$0xff] }
  0x13   : > { %v883_v22 = vld [vmem:[%s242_s23 + $0x30] sm:$0xff]  ;;  %v884_v25 = vld [vmem:[%s242_s23 + $0x38] sm:$0xff]  ;;  %v1066_v32 = vld [vmem:[%s1108_s4] ss:$0 sm:$0xff] }
  0x14   : > { %857 = vmatmul.msk.bf16.vlgmr.msra.gmra.mxu1 %vm500_vm0, %v867_v5  ;;  %401 = vmatpush.bf16.msra.mxu0 %v890_v4 }
  0x15   : > { %942 = vmatpush.bf16.msra.mxu2 %v890_v4  ;;  %862 = vmatmul.msk.bf16.vlgmr.msra.gmra.mxu3 %vm500_vm0, %v872_v6 }
  0x18   : > { %402 = vmatpush.bf16.msra.mxu0 %v889_v7 }
  0x19   : > { %943 = vmatpush.bf16.msra.mxu2 %v889_v7 }
  0x1c   : > { %403 = vmatpush.bf16.msra.mxu0 %v888_v8 }
  0x1d   : > { %944 = vmatpush.bf16.msra.mxu2 %v888_v8 }
  0x20   : > { %404 = vmatpush.bf16.msra.mxu0 %v887_v9 }
  0x21   : > { %945 = vmatpush.bf16.msra.mxu2 %v887_v9 }
  0x24   : > { %858 = vmatmul.msk.bf16.gmra.mxu1 %vm500_vm0, %v868_v10  ;;  %405 = vmatpush.bf16.msra.mxu0 %v886_v11 }
  0x25   : > { %946 = vmatpush.bf16.msra.mxu2 %v886_v11  ;;  %863 = vmatmul.msk.bf16.gmra.mxu3 %vm500_vm0, %v873_v12 }
  0x28   : > { %406 = vmatpush.bf16.msra.mxu0 %v885_v13 }
  0x29   : > { %947 = vmatpush.bf16.msra.mxu2 %v885_v13 }
  0x2b   : > { %407 = vmatmul.bf16.vlgmr.msra.gmra.mxu0 %v877_v14 }
  0x2c   : > { %427 = vmatmul.bf16.vlgmr.msra.gmra.mxu2 %v881_v15 }
  0x34   : > { %859 = vmatmul.msk.bf16.gmra.mxu1 %vm500_vm0, %v869_v16 }
  0x35   : > { %864 = vmatmul.msk.bf16.gmra.mxu3 %vm500_vm0, %v874_v17 }
  0x3b   : > { %412 = vmatmul.bf16.gmra.mxu0 %v878_v18 }
  0x3c   : > { %432 = vmatmul.bf16.gmra.mxu2 %v882_v19 }
  0x44   : > { %860 = vmatmul.msk.bf16.gmra.mxu1 %vm500_vm0, %v870_v20 }
  0x4b   : > { %417 = vmatmul.bf16.gmra.mxu0 %v879_v21 }
  0x4c   : > { %437 = vmatmul.bf16.gmra.mxu2 %v883_v22 }
  0x54   : > { %861 = vmatmul.msk.bf16.gmra.mxu1 %vm500_vm0, %v871_v23 }
  0x5b   : > { %422 = vmatmul.bf16.gmra.mxu0 %v880_v24 }
  0x5c   : > { %442 = vmatmul.bf16.gmra.mxu2 %v884_v25 }
  0x91   : > { %v534_v26 = vpop.f32.mrf.mxu1 }
  0x98   : > { %v559_v41 = vpop.f32.mrf.mxu3 }
  0x99   : > { %v536_v27 = vpop.f32.mrf.mxu1 }
  0xa0   : > { %v561_v51 = vpop.f32.mrf.mxu3 }
  0xa1   : > { %v539_v28 = vpop.f32.mrf.mxu1 }
  0xa8   : > { %v408_v29 = vpop.f32.mrf.mxu0  ;;  %v564_v2 = vpop.f32.mrf.mxu3 }
  0xa9   : > { %v541_v30 = vpop.f32.mrf.mxu1  ;;  %v535_v31 = vadd.f32 %v534_v26, %v408_v29 }
  0xab   : > { %v578_v33 = vadd.f32 %v1066_v32, %v535_v31 }
  0xad   : > { %v610_v38 = vmul.f32 0.1, %v578_v33  ;;  %vm594_vm1 = vcmp.gt.f32.partialorder %v578_v33, 0.0 }
  0xaf   : > { %v428_v34 = vpop.f32.mrf.mxu2  ;;  %v626_v42 = vsel %vm594_vm1, %v578_v33, %v610_v38 }
  0xb0   : > { %v410_v35 = vpop.f32.mrf.mxu0  ;;  %v566_v18 = vpop.f32.mrf.mxu3 }
  0xb1   : > { %v537_v36 = vadd.f32 %v536_v27, %v410_v35  ;;  %v544_v37 = vpop.f32.mrf.mxu1 }
  0xb3   : > { %v579_v39 = vadd.f32 %v1066_v32, %v537_v36 }
  0xb5   : > { %vm595_vm2 = vcmp.gt.f32.partialorder %v579_v39, 0.0  ;;  %v611_v40 = vmul.f32 0.1, %v579_v39 }
  0xb7   : > { %v627_v43 = vsel %vm595_vm2, %v579_v39, %v611_v40  ;;  %v1076_v44 = vpop.f32.mrf.mxu2 }
  0xb8   : > { %v896_v45 = vpack.c.bf16 %v627_v43, %v626_v42  ;;  %v413_v46 = vpop.f32.mrf.mxu0  ;;  %v569_v39 = vpop.f32.mrf.mxu3 }
  0xb9   : > { %v546_v47 = vpop.f32.mrf.mxu1  ;;  %v540_v48 = vadd.f32 %v539_v28, %v413_v46 }
  0xba   : > { %897 = vst [vmem:[%s1074_s28] sm:$0xff] %v896_v45  }
  0xbb   : > { %v580_v49 = vadd.f32 %v1066_v32, %v540_v48 }
  0xbd   : > { %v612_v56 = vmul.f32 0.1, %v580_v49  ;;  %vm596_vm3 = vcmp.gt.f32.partialorder %v580_v49, 0.0 }
  0xbf   : > { %v433_v50 = vpop.f32.mrf.mxu2  ;;  %v628_v60 = vsel %vm596_vm3, %v580_v49, %v612_v56 }
  0xc0   : > { %v415_v52 = vpop.f32.mrf.mxu0  ;;  %v560_v55 = vadd.f32 %v559_v41, %v433_v50 }
  0xc1   : > { %v542_v53 = vadd.f32 %v541_v30, %v415_v52  ;;  %v549_v54 = vpop.f32.mrf.mxu1 }
  0xc2   : > { %v588_v59 = vadd.f32 %v1066_v32, %v560_v55 }
  0xc3   : > { %v581_v57 = vadd.f32 %v1066_v32, %v542_v53 }
  0xc4   : > { %v620_v4 = vmul.f32 0.1, %v588_v59  ;;  %vm604_vm5 = vcmp.gt.f32.partialorder %v588_v59, 0.0 }
  0xc5   : > { %vm597_vm4 = vcmp.gt.f32.partialorder %v581_v57, 0.0  ;;  %v613_v58 = vmul.f32 0.1, %v581_v57 }
  0xc6   : > { %v636_v8 = vsel %vm604_vm5, %v588_v59, %v620_v4 }
  0xc7   : > { %v629_v61 = vsel %vm597_vm4, %v581_v57, %v613_v58  ;;  %v435_v62 = vpop.f32.mrf.mxu2  ;;  %v571_v57 = vpop.f32.mrf.mxu3 }
  0xc8   : > { %v901_v63 = vpack.c.bf16 %v629_v61, %v628_v60  ;;  %v562_v0 = vadd.f32 %v561_v51, %v435_v62  ;;  %v418_v1 = vpop.f32.mrf.mxu0 }
  0xc9   : > { %v551_v3 = vpop.f32.mrf.mxu1  ;;  %v545_v6 = vadd.f32 %v544_v37, %v418_v1 }
  0xca   : > { %933 = vst [vmem:[%s1074_s28 + $0x8] sm:$0xff] %v901_v63   ;;  %v589_v5 = vadd.f32 %v1066_v32, %v562_v0 }
  0xcb   : > { %v582_v11 = vadd.f32 %v1066_v32, %v545_v6 }
  0xcc   : > { %vm605_vm6 = vcmp.gt.f32.partialorder %v589_v5, 0.0  ;;  %v621_v7 = vmul.f32 0.1, %v589_v5 }
  0xcd   : > { %v614_v17 = vmul.f32 0.1, %v582_v11  ;;  %vm598_vm7 = vcmp.gt.f32.partialorder %v582_v11, 0.0 }
  0xce   : > { %v637_v9 = vsel %vm605_vm6, %v589_v5, %v621_v7 }
  0xcf   : > { %v921_v10 = vpack.c.bf16 %v637_v9, %v636_v8  ;;  %v438_v12 = vpop.f32.mrf.mxu2  ;;  %v630_v23 = vsel %vm598_vm7, %v582_v11, %v614_v17 }
  0xd0   : > { %v420_v13 = vpop.f32.mrf.mxu0  ;;  %v565_v16 = vadd.f32 %v564_v2, %v438_v12 }
  0xd1   : > { %937 = vst [vmem:[%s1074_s28 + $0x28] sm:$0xff] %v921_v10   ;;  %v547_v14 = vadd.f32 %v546_v47, %v420_v13  ;;  %v554_v15 = vpop.f32.mrf.mxu1 }
  0xd2   : > { %v555_v20 = vadd.f32 %v554_v15, %v428_v34  ;;  %v590_v22 = vadd.f32 %v1066_v32, %v565_v16 }
  0xd3   : > { %v583_v19 = vadd.f32 %v1066_v32, %v547_v14 }
  0xd4   : > { %v586_v27 = vadd.f32 %v1066_v32, %v555_v20  ;;  %v622_v31 = vmul.f32 0.1, %v590_v22  ;;  %vm606_vm9 = vcmp.gt.f32.partialorder %v590_v22, 0.0 }
  0xd5   : > { %vm599_vm8 = vcmp.gt.f32.partialorder %v583_v19, 0.0  ;;  %v615_v21 = vmul.f32 0.1, %v583_v19 }
  0xd6   : > { %v618_v36 = vmul.f32 0.1, %v586_v27  ;;  %vm602_vm11 = vcmp.gt.f32.partialorder %v586_v27, 0.0  ;;  %v638_v40 = vsel %vm606_vm9, %v590_v22, %v622_v31 }
  0xd7   : > { %v631_v24 = vsel %vm599_vm8, %v583_v19, %v615_v21  ;;  %v440_v25 = vpop.f32.mrf.mxu2 }
  0xd8   : > { %v906_v26 = vpack.c.bf16 %v631_v24, %v630_v23  ;;  %v567_v28 = vadd.f32 %v566_v18, %v440_v25  ;;  %v423_v29 = vpop.f32.mrf.mxu0 }
  0xd9   : > { %v556_v30 = vpop.f32.mrf.mxu1  ;;  %v550_v34 = vadd.f32 %v549_v54, %v423_v29 }
  0xda   : > { %934 = vst [vmem:[%s1074_s28 + $0x10] sm:$0xff] %v906_v26   ;;  %v591_v33 = vadd.f32 %v1066_v32, %v567_v28  ;;  %v557_v35 = vadd.f32 %v556_v30, %v1076_v44  ;;  %v634_v44 = vsel %vm602_vm11, %v586_v27, %v618_v36 }
  0xdb   : > { %v584_v45 = vadd.f32 %v1066_v32, %v550_v34 }
  0xdc   : > { %vm607_vm10 = vcmp.gt.f32.partialorder %v591_v33, 0.0  ;;  %v623_v37 = vmul.f32 0.1, %v591_v33  ;;  %v587_v38 = vadd.f32 %v1066_v32, %v557_v35 }
  0xdd   : > { %v616_v52 = vmul.f32 0.1, %v584_v45  ;;  %vm600_vm13 = vcmp.gt.f32.partialorder %v584_v45, 0.0 }
  0xde   : > { %v639_v41 = vsel %vm607_vm10, %v591_v33, %v623_v37  ;;  %vm603_vm12 = vcmp.gt.f32.partialorder %v587_v38, 0.0  ;;  %v619_v42 = vmul.f32 0.1, %v587_v38 }
  0xdf   : > { %v926_v43 = vpack.c.bf16 %v639_v41, %v638_v40  ;;  %v443_v46 = vpop.f32.mrf.mxu2  ;;  %v632_v56 = vsel %vm600_vm13, %v584_v45, %v616_v52 }
  0xe0   : > { %v635_v47 = vsel %vm603_vm12, %v587_v38, %v619_v42  ;;  %v425_v48 = vpop.f32.mrf.mxu0  ;;  %v570_v51 = vadd.f32 %v569_v39, %v443_v46 }
  0xe1   : > { %938 = vst [vmem:[%s1074_s28 + $0x30] sm:$0xff] %v926_v43   ;;  %v916_v49 = vpack.c.bf16 %v635_v47, %v634_v44  ;;  %v552_v50 = vadd.f32 %v551_v3, %v425_v48 }
  0xe2   : > { %v592_v55 = vadd.f32 %v1066_v32, %v570_v51 }
  0xe3   : > { %936 = vst [vmem:[%s1074_s28 + $0x20] sm:$0xff] %v916_v49   ;;  %v585_v53 = vadd.f32 %v1066_v32, %v552_v50 }
  0xe4   : > { %v624_v62 = vmul.f32 0.1, %v592_v55  ;;  %vm608_vm15 = vcmp.gt.f32.partialorder %v592_v55, 0.0 }
  0xe5   : > { %vm601_vm14 = vcmp.gt.f32.partialorder %v585_v53, 0.0  ;;  %v617_v54 = vmul.f32 0.1, %v585_v53 }
  0xe6   : > { %v640_v1 = vsel %vm608_vm15, %v592_v55, %v624_v62 }
  0xe7   : > { %v633_v58 = vsel %vm601_vm14, %v585_v53, %v617_v54  ;;  %v445_v59 = vpop.f32.mrf.mxu2 }
  0xe8   : > { %v911_v60 = vpack.c.bf16 %v633_v58, %v632_v56  ;;  %v572_v61 = vadd.f32 %v571_v57, %v445_v59 }
  0xea   : > { %935 = vst [vmem:[%s1074_s28 + $0x18] sm:$0xff] %v911_v60   ;;  %v593_v63 = vadd.f32 %v1066_v32, %v572_v61 }
  0xec   : > { %vm609_vm0 = vcmp.gt.f32.partialorder %v593_v63, 0.0  ;;  %v625_v0 = vmul.f32 0.1, %v593_v63 }
  0xee   : > { %v641_v2 = vsel %vm609_vm0, %v593_v63, %v625_v0 }
  0xef   : > { %v931_v3 = vpack.c.bf16 %v641_v2, %v640_v1 }
  0xf1   : > { %939 = vst [vmem:[%s1074_s28 + $0x38] sm:$0xff] %v931_v3  }
  0xf2 PF: > { %s15_s18 = sadd.s32 1, %s965_s18  }
  0xf3   : > { %p12_p4 = scmp.ge.s32.totalorder %s15_s18, 6  }
  0xf5   :  { %14 = sbr.rel (!%p12_p4) target bundleno = 1 (0x1), region = 73 }

// kernel: upsample_block_forward.4
= control target key start
LH: loop header
LB: loop body
LE: loop exit
PB: predicated region body
PF: predicated region fallthrough
CT: control target
= control target key end

     0   :  { %s4941_s24 = smov 0   ;;  %s4943_s25 = smov 0   ;;  %s5911_s0 = inlined_call_operand.vmem [shape: bf16[2,16,16,128], index: 0, kind: input, shape index: {}, may-alias: {0,1,2}]   ;;  %s5912_s1 = inlined_call_operand.vmem [shape: bf16[2,16,16,128], index: 1, kind: input, shape index: {}, may-alias: {0,1,2}]   ;;  %s5913_s2 = inlined_call_operand.vmem [shape: bf16[2,16,16,128], index: 2, kind: input, shape index: {}, may-alias: {0,1,2}]   ;;  %s5914_s3 = inlined_call_operand.vmem [shape: bf16[128,128], index: 3, kind: input, shape index: {}]   ;;  %s5915_s4 = inlined_call_operand.vmem [shape: f32[1,128], index: 4, kind: input, shape index: {}]   ;;  %s5916_s5 = inlined_call_operand.vmem [shape: bf16[9,128,128], index: 5, kind: input, shape index: {}]   ;;  %s5917_s6 = inlined_call_operand.vmem [shape: f32[1,128], index: 6, kind: input, shape index: {}]   ;;  %s5918_s7 = inlined_call_operand.vmem [shape: bf16[2,16,16,128], index: 7, kind: output, shape index: {}]  }
   0x1   :  { %s4945_s26 = smov 0   ;;  %s4947_s27 = smov 0  }
   0x2   :  { %s4949_s28 = smov 0  }
   0x3 LB: > { %s26_s29 = sadd.s32 1, %s4888_s26  ;;  %s29_s30 = sadd.s32 1, %s4892_s27  ;;  %s4896_s28 = sphi %s4949_s28, %s17_s28   ;;  %s4892_s27 = sphi %s4947_s27, %s5927_s27   ;;  %s4888_s26 = sphi %s4945_s26, %s5926_s26   ;;  %s4884_s25 = sphi %s4943_s25, %s5925_s25   ;;  %s4880_s24 = sphi %s4941_s24, %s5924_s24  }
   0x4   : > { %p27_p0 = scmp.ge.s32.totalorder %s26_s29, 2  ;;  %p3863_p1 = scmp.ge.s32.totalorder %s4896_s28, 1 }
   0x5   : > { %p323_p2 = scmp.lt.s32.totalorder %s4896_s28, 5 }
   0x6   : > { %s5929_s29 = smov (%p27_p0, %s26_s29), 0  ;;  %s5931_s30 = smov (!%p27_p0, %s29_s30), %s4892_s27 }
   0x7   : > { %p324_p3 = pnand %p3863_p1, %p323_p2  ;;  %p31_p4 = scmp.ge.s32.totalorder %s5931_s30, 2 }
   0x8   : > { %s4979_s10 = sshll.u32 (!%p324_p3), %s4880_s24, 3  ;;  %p392_p5 = scmp.lt.s32.totalorder (!%p324_p3), %s4884_s25, 1 }
   0x9   : > { %s5933_s30 = smov (%p31_p4, %s5931_s30), 0  ;;  %327 = sbr.rel (%p324_p3) target bundleno = 1045 (0x415), region = 48 }
   0xa   : > { %p394_p6 = scmp.lt.s32.totalorder (!%p324_p3), %s4979_s10, 15  ;;  %s3869_s15 = sadd.s32 (!%p324_p3), 4294967295, %s4979_s10 }
   0xb   : > { %p404_p7 = scmp.gt.s32.totalorder (!%p324_p3), %s3869_s15, 0  ;;  %p3870_p8 = scmp.lt.s32.totalorder (!%p324_p3), %s3869_s15, 15 }
   0xc   : > { %s420_s20 = sadd.s32 (!%p324_p3), 8, %s4979_s10  ;;  %p3953_p10 = scmp.le.s32.totalorder (!%p324_p3), %s4880_s24, 0 }
   0xd   : > { %p5013_p9 = scmp.lt.s32.totalorder (!%p324_p3), %s420_s20, 15 }
   0xe   : > { %v4976_v0 = vld [vmem:[%s5914_s3 + $0x38] sm:$0xff]  ;;  %v4898_v1 = vmov 0   ;;  %v4988_v2 = vld [vmem:[%s5914_s3 + $0x30] sm:$0xff]  ;;  %s5935_s25 = smov (!%p392_p5, %s4884_s25), 1  ;;  %v5003_v3 = vld [vmem:[%s5914_s3 + $0x28] sm:$0xff]  ;;  %s5937_s15 = smov (!%p404_p7, %s3869_s15), 0 }
   0xf   : > { %466 = vst [vmem:[#allocation2 + $0x4] sm:$0xf] %v4898_v1  ;;  %620 = vmatpush.bf16.msra.mxu0 %v4976_v0  ;;  %4765 = vmatpush.bf16.msra.mxu1 %v4976_v0  ;;  %s395_s13 = scalar_select %p394_p6, %s4979_s10, 15  ;;  %v5023_v4 = vld [vmem:[%s5914_s3 + $0x20] sm:$0xff]  ;;  %v5045_v5 = vld [vmem:[%s5914_s3 + $0x18] sm:$0xff]  ;;  %v5069_v6 = vld [vmem:[%s5914_s3 + $0x10] sm:$0xff] }
  0x10   : > { %4766 = vmatpush.bf16.msra.mxu2 %v4976_v0  ;;  %4767 = vmatpush.bf16.msra.mxu3 %v4976_v0  ;;  %468 = vst [vmem:[#allocation2 + $0x1c] sm:$0xf] %v4898_v1  ;;  %s4994_s14 = sshll.u32 %s5935_s25, 5  ;;  %s5939_s20 = smov (!%p5013_p9, %s420_s20), 15  ;;  %v5080_v7 = vld [vmem:[%s5914_s3 + $0x8] sm:$0xff]  ;;  %v5091_v8 = vld [vmem:[%s5914_s3] sm:$0xff] }
  0x11   : > { %s3865_s16 = sshll.u32 %s395_s13, 1  ;;  %470 = vst [vmem:[#allocation2 + $0x34] sm:$0xf] %v4898_v1  ;;  %s5941_s15 = smov (!%p3870_p8, %s5937_s15), 15  ;;  %v5124_v19 = vld [vmem:[%s5915_s4] ss:$0 sm:$0xff] }
  0x12   : > { %s5006_s19 = sadd.s32 %s4994_s14, %s3865_s16  ;;  %472 = vst [vmem:[#allocation2 + $0x4c] sm:$0xf] %v4898_v1  ;;  %s5943_s20 = smov (!%p5013_p9, %s5939_s20), 15 }
  0x13   : > { %621 = vmatpush.bf16.msra.mxu0 %v4988_v2  ;;  %4768 = vmatpush.bf16.msra.mxu1 %v4988_v2  ;;  %s3867_s21 = sshll.u32 %s5006_s19, 2  ;;  %474 = vst [vmem:[#allocation2 + $0x64] sm:$0xf] %v4898_v1  ;;  %s3875_s8 = sshll.u32 %s5941_s15, 1 }
  0x14   : > { %4769 = vmatpush.bf16.msra.mxu2 %v4988_v2  ;;  %4770 = vmatpush.bf16.msra.mxu3 %v4988_v2  ;;  %476 = vst [vmem:[#allocation2 + $0x7c] sm:$0xf] %v4898_v1  ;;  %s5037_s11 = scalar_lea.vmem %s5918_s7, %s3867_s21  ;;  %s412_s16 = sadd.s32 %s3875_s8, %s4994_s14 }
  0x15   : > { %478 = vst [vmem:[#allocation2 + $0x94] sm:$0xf] %v4898_v1  ;;  %s3882_s17 = sshll.u32 %s5943_s20, 1  ;;  %s3877_s15 = sshll.u32 %s412_s16, 2 }
  0x16   : > { %s429_s18 = sadd.s32 %s3882_s17, %s4994_s14  ;;  %480 = vst [vmem:[#allocation2 + $0xac] sm:$0xf] %v4898_v1  ;;  %s5055_s25 = scalar_lea.vmem %s5912_s1, %s3877_s15 }
  0x17   : > { %622 = vmatpush.bf16.msra.mxu0 %v5003_v3  ;;  %4771 = vmatpush.bf16.msra.mxu1 %v5003_v3  ;;  %s5057_s9 = sshll.u32 %s429_s18, 2  ;;  %482 = vst [vmem:[#allocation2 + $0xc4] sm:$0xf] %v4898_v1  ;;  %s5098_s23 = scalar_lea.vmem %s5911_s0, %s3867_s21 }
  0x18   : > { %4772 = vmatpush.bf16.msra.mxu2 %v5003_v3  ;;  %4773 = vmatpush.bf16.msra.mxu3 %v5003_v3  ;;  %s431_s20 = scalar_lea.vmem %s5913_s2, %s5057_s9  ;;  %484 = vst [vmem:[#allocation2 + $0xdc] sm:$0xf] %v4898_v1  ;;  %v4513_v9 = vld [vmem:[%s5098_s23] sm:$0xff]  ;;  %v4515_v10 = vld [vmem:[%s5098_s23 + $0x10] sm:$0xff]  ;;  %v4514_v13 = vld [vmem:[%s5098_s23 + $0x8] sm:$0xff] }
  0x19   : > { %485 = vst [vmem:[#allocation2 + $0x10] sm:$0xf] %v4898_v1  ;;  %v4517_v11 = vld [vmem:[%s5098_s23 + $0x20] sm:$0xff]  ;;  %v4519_v12 = vld [vmem:[%s5098_s23 + $0x30] sm:$0xff]  ;;  %v4516_v14 = vld [vmem:[%s5098_s23 + $0x18] sm:$0xff] }
  0x1a   : > { %487 = vst [vmem:[#allocation2 + $0x28] sm:$0xf] %v4898_v1  ;;  %v4518_v15 = vld [vmem:[%s5098_s23 + $0x28] sm:$0xff]  ;;  %v4520_v16 = vld [vmem:[%s5098_s23 + $0x38] sm:$0xff] }
  0x1b   : > { %623 = vmatpush.bf16.msra.mxu0 %v5023_v4  ;;  %4774 = vmatpush.bf16.msra.mxu1 %v5023_v4  ;;  %489 = vst [vmem:[#allocation2 + $0x40] sm:$0xf] %v4898_v1 }
  0x1c   : > { %4775 = vmatpush.bf16.msra.mxu2 %v5023_v4  ;;  %4776 = vmatpush.bf16.msra.mxu3 %v5023_v4  ;;  %491 = vst [vmem:[#allocation2 + $0x58] sm:$0xf] %v4898_v1 }
  0x1d   : > { %493 = vst [vmem:[#allocation2 + $0x70] sm:$0xf] %v4898_v1 }
  0x1e   : > { %495 = vst [vmem:[#allocation2 + $0x88] sm:$0xf] %v4898_v1 }
  0x1f   : > { %624 = vmatpush.bf16.msra.mxu0 %v5045_v5  ;;  %4777 = vmatpush.bf16.msra.mxu1 %v5045_v5  ;;  %497 = vst [vmem:[#allocation2 + $0xa0] sm:$0xf] %v4898_v1 }
  0x20   : > { %4778 = vmatpush.bf16.msra.mxu2 %v5045_v5  ;;  %4779 = vmatpush.bf16.msra.mxu3 %v5045_v5  ;;  %499 = vst [vmem:[#allocation2 + $0xb8] sm:$0xf] %v4898_v1 }
  0x21   : > { %501 = vst [vmem:[#allocation2 + $0xd0] sm:$0xf] %v4898_v1 }
  0x22   : > { %503 = vst [vmem:[#allocation2 + $0xe8] sm:$0xf] %v4898_v1 }
  0x23   : > { %625 = vmatpush.bf16.msra.mxu0 %v5069_v6  ;;  %4780 = vmatpush.bf16.msra.mxu1 %v5069_v6 }
  0x24   : > { %4781 = vmatpush.bf16.msra.mxu2 %v5069_v6  ;;  %4782 = vmatpush.bf16.msra.mxu3 %v5069_v6 }
  0x27   : > { %626 = vmatpush.bf16.msra.mxu0 %v5080_v7  ;;  %4783 = vmatpush.bf16.msra.mxu1 %v5080_v7 }
  0x28   : > { %4784 = vmatpush.bf16.msra.mxu2 %v5080_v7  ;;  %4785 = vmatpush.bf16.msra.mxu3 %v5080_v7 }
  0x2b   : > { %627 = vmatpush.bf16.msra.mxu0 %v5091_v8  ;;  %4786 = vmatpush.bf16.msra.mxu1 %v5091_v8 }
  0x2c   : > { %4787 = vmatpush.bf16.msra.mxu2 %v5091_v8  ;;  %4788 = vmatpush.bf16.msra.mxu3 %v5091_v8 }
  0x2e   : > { %628 = vmatmul.bf16.vlgmr.msra.gmra.mxu0 %v4513_v9  ;;  %638 = vmatmul.bf16.vlgmr.msra.gmra.mxu1 %v4515_v10 }
  0x2f   : > { %648 = vmatmul.bf16.vlgmr.msra.gmra.mxu2 %v4517_v11  ;;  %658 = vmatmul.bf16.vlgmr.msra.gmra.mxu3 %v4519_v12 }
  0x3e   : > { %633 = vmatmul.bf16.gmra.mxu0 %v4514_v13  ;;  %643 = vmatmul.bf16.gmra.mxu1 %v4516_v14 }
  0x3f   : > { %653 = vmatmul.bf16.gmra.mxu2 %v4518_v15  ;;  %663 = vmatmul.bf16.gmra.mxu3 %v4520_v16 }
  0xab   : > { %v629_v17 = vpop.f32.mrf.mxu0  ;;  %v639_v18 = vpop.f32.mrf.mxu1 }
  0xac   : > { %v630_v20 = vadd.f32 %v5124_v19, %v629_v17  ;;  %v640_v21 = vadd.f32 %v5124_v19, %v639_v18 }
  0xae   : > { %v685_v26 = vmul.f32 0.1, %v630_v20  ;;  %v689_v27 = vmul.f32 0.1, %v640_v21  ;;  %vm669_vm0 = vcmp.gt.f32.partialorder %v630_v20, 0.0  ;;  %vm673_vm1 = vcmp.gt.f32.partialorder %v640_v21, 0.0 }
  0xb0   : > { %v701_v34 = vsel %vm669_vm0, %v630_v20, %v685_v26  ;;  %v705_v35 = vsel %vm673_vm1, %v640_v21, %v689_v27 }
  0xb2   : > { %v649_v22 = vpop.f32.mrf.mxu2  ;;  %v659_v23 = vpop.f32.mrf.mxu3 }
  0xb3   : > { %v631_v24 = vpop.f32.mrf.mxu0  ;;  %v641_v25 = vpop.f32.mrf.mxu1  ;;  %v650_v32 = vadd.f32 %v5124_v19, %v649_v22  ;;  %v660_v33 = vadd.f32 %v5124_v19, %v659_v23 }
  0xb4   : > { %v632_v28 = vadd.f32 %v5124_v19, %v631_v24  ;;  %v642_v29 = vadd.f32 %v5124_v19, %v641_v25 }
  0xb5   : > { %v693_v42 = vmul.f32 0.1, %v650_v32  ;;  %v697_v43 = vmul.f32 0.1, %v660_v33  ;;  %vm677_vm4 = vcmp.gt.f32.partialorder %v650_v32, 0.0  ;;  %vm681_vm5 = vcmp.gt.f32.partialorder %v660_v33, 0.0 }
  0xb6   : > { %vm670_vm2 = vcmp.gt.f32.partialorder %v632_v28, 0.0  ;;  %v686_v30 = vmul.f32 0.1, %v632_v28  ;;  %vm674_vm3 = vcmp.gt.f32.partialorder %v642_v29, 0.0  ;;  %v690_v31 = vmul.f32 0.1, %v642_v29 }
  0xb7   : > { %v709_v50 = vsel %vm677_vm4, %v650_v32, %v693_v42  ;;  %v713_v51 = vsel %vm681_vm5, %v660_v33, %v697_v43 }
  0xb8   : > { %v702_v36 = vsel %vm670_vm2, %v632_v28, %v686_v30  ;;  %v706_v37 = vsel %vm674_vm3, %v642_v29, %v690_v31 }
  0xb9   : > { %v4622_v38 = vpack.c.bf16 %v702_v36, %v701_v34  ;;  %v4632_v39 = vpack.c.bf16 %v706_v37, %v705_v35 }
  0xba   : > { %v651_v40 = vpop.f32.mrf.mxu2  ;;  %v661_v41 = vpop.f32.mrf.mxu3 }
  0xbb   : > { %4741 = vst [vmem:[#allocation2 + $0x20] sm:$0xff] %v4622_v38   ;;  %v652_v44 = vadd.f32 %v5124_v19, %v651_v40  ;;  %v662_v45 = vadd.f32 %v5124_v19, %v661_v41  ;;  %v634_v46 = vpop.f32.mrf.mxu0  ;;  %v644_v47 = vpop.f32.mrf.mxu1 }
  0xbc   : > { %4743 = vst [vmem:[#allocation2 + $0x50] sm:$0xff] %v4632_v39   ;;  %v635_v56 = vadd.f32 %v5124_v19, %v634_v46  ;;  %v645_v57 = vadd.f32 %v5124_v19, %v644_v47 }
  0xbd   : > { %vm678_vm6 = vcmp.gt.f32.partialorder %v652_v44, 0.0  ;;  %v694_v48 = vmul.f32 0.1, %v652_v44  ;;  %vm682_vm7 = vcmp.gt.f32.partialorder %v662_v45, 0.0  ;;  %v698_v49 = vmul.f32 0.1, %v662_v45 }
  0xbe   : > { %v687_v62 = vmul.f32 0.1, %v635_v56  ;;  %v691_v63 = vmul.f32 0.1, %v645_v57  ;;  %vm671_vm8 = vcmp.gt.f32.partialorder %v635_v56, 0.0  ;;  %vm675_vm9 = vcmp.gt.f32.partialorder %v645_v57, 0.0 }
  0xbf   : > { %v710_v52 = vsel %vm678_vm6, %v652_v44, %v694_v48  ;;  %v714_v53 = vsel %vm682_vm7, %v662_v45, %v698_v49 }
  0xc0   : > { %v4642_v54 = vpack.c.bf16 %v710_v52, %v709_v50  ;;  %v4652_v55 = vpack.c.bf16 %v714_v53, %v713_v51  ;;  %v703_v14 = vsel %vm671_vm8, %v635_v56, %v687_v62  ;;  %v707_v15 = vsel %vm675_vm9, %v645_v57, %v691_v63 }
  0xc2   : > { %4745 = vst [vmem:[#allocation2 + $0x80] sm:$0xff] %v4642_v54   ;;  %v654_v58 = vpop.f32.mrf.mxu2  ;;  %v664_v59 = vpop.f32.mrf.mxu3 }
  0xc3   : > { %4747 = vst [vmem:[#allocation2 + $0xb0] sm:$0xff] %v4652_v55   ;;  %v636_v60 = vpop.f32.mrf.mxu0  ;;  %v646_v61 = vpop.f32.mrf.mxu1  ;;  %v655_v12 = vadd.f32 %v5124_v19, %v654_v58  ;;  %v665_v13 = vadd.f32 %v5124_v19, %v664_v59 }
  0xc4   : > { %v637_v1 = vadd.f32 %v5124_v19, %v636_v60  ;;  %v647_v9 = vadd.f32 %v5124_v19, %v646_v61 }
  0xc5   : > { %v695_v23 = vmul.f32 0.1, %v655_v12  ;;  %v699_v24 = vmul.f32 0.1, %v665_v13  ;;  %vm679_vm12 = vcmp.gt.f32.partialorder %v655_v12, 0.0  ;;  %vm683_vm13 = vcmp.gt.f32.partialorder %v665_v13, 0.0 }
  0xc6   : > { %vm672_vm10 = vcmp.gt.f32.partialorder %v637_v1, 0.0  ;;  %v688_v10 = vmul.f32 0.1, %v637_v1  ;;  %vm676_vm11 = vcmp.gt.f32.partialorder %v647_v9, 0.0  ;;  %v692_v11 = vmul.f32 0.1, %v647_v9 }
  0xc7   : > { %v711_v29 = vsel %vm679_vm12, %v655_v12, %v695_v23  ;;  %v715_v30 = vsel %vm683_vm13, %v665_v13, %v699_v24 }
  0xc8   : > { %v704_v16 = vsel %vm672_vm10, %v637_v1, %v688_v10  ;;  %v708_v17 = vsel %vm676_vm11, %v647_v9, %v692_v11 }
  0xc9   : > { %v4627_v18 = vpack.c.bf16 %v704_v16, %v703_v14  ;;  %v4637_v20 = vpack.c.bf16 %v708_v17, %v707_v15 }
  0xca   : > { %v656_v21 = vpop.f32.mrf.mxu2  ;;  %v666_v22 = vpop.f32.mrf.mxu3 }
  0xcb   : > { %4742 = vst [vmem:[#allocation2 + $0x38] sm:$0xff] %v4627_v18   ;;  %v657_v25 = vadd.f32 %v5124_v19, %v656_v21  ;;  %v667_v26 = vadd.f32 %v5124_v19, %v666_v22 }
  0xcc   : > { %4744 = vst [vmem:[#allocation2 + $0x68] sm:$0xff] %v4637_v20  }
  0xcd   : > { %vm680_vm14 = vcmp.gt.f32.partialorder %v657_v25, 0.0  ;;  %v696_v27 = vmul.f32 0.1, %v657_v25  ;;  %vm684_vm15 = vcmp.gt.f32.partialorder %v667_v26, 0.0  ;;  %v700_v28 = vmul.f32 0.1, %v667_v26 }
  0xcf   : > { %v712_v31 = vsel %vm680_vm14, %v657_v25, %v696_v27  ;;  %v716_v32 = vsel %vm684_vm15, %v667_v26, %v700_v28  ;;  %753 = sbr.rel (%p3953_p10) target bundleno = 385 (0x181), region = 52 }
  0xd0   : > { %v4647_v33 = vpack.c.bf16 %v712_v31, %v711_v29  ;;  %v4657_v34 = vpack.c.bf16 %v716_v32, %v715_v30 }
  0xd2   : > { %4746 = vst [vmem:[#allocation2 + $0x98] sm:$0xff] %v4647_v33  }
  0xd3   : > { %4748 = vst [vmem:[#allocation2 + $0xc8] sm:$0xff] %v4657_v34  }
  0xd4   : > { %762 = vmatpush.bf16.msra.mxu0 %v4976_v0  ;;  %v4521_v35 = vld [vmem:[%s5055_s25] sm:$0xff] }
  0xd8   : > { %763 = vmatpush.bf16.msra.mxu0 %v4988_v2 }
  0xdc   : > { %764 = vmatpush.bf16.msra.mxu0 %v5003_v3 }
  0xe0   : > { %765 = vmatpush.bf16.msra.mxu0 %v5023_v4 }
  0xe4   : > { %766 = vmatpush.bf16.msra.mxu0 %v5045_v5 }
  0xe8   : > { %767 = vmatpush.bf16.msra.mxu0 %v5069_v6 }
  0xec   : > { %768 = vmatpush.bf16.msra.mxu0 %v5080_v7 }
  0xf0   : > { %769 = vmatpush.bf16.msra.mxu0 %v5091_v8 }
  0xf3   : > { %770 = vmatmul.bf16.vlgmr.msra.gmra.mxu0 %v4521_v35 }
 0x170   : > { %v771_v36 = vpop.f32.mrf.mxu0 }
 0x171   : > { %v772_v37 = vadd.f32 %v5124_v19, %v771_v36 }
 0x173   : > { %v778_v39 = vmul.f32 0.1, %v772_v37  ;;  %vm776_vm0 = vcmp.gt.f32.partialorder %v772_v37, 0.0 }
 0x175   : > { %v780_v42 = vsel %vm776_vm0, %v772_v37, %v778_v39 }
 0x178   : > { %v773_v38 = vpop.f32.mrf.mxu0 }
 0x179   : > { %v774_v40 = vadd.f32 %v5124_v19, %v773_v38 }
 0x17b   : > { %vm777_vm1 = vcmp.gt.f32.partialorder %v774_v40, 0.0  ;;  %v779_v41 = vmul.f32 0.1, %v774_v40 }
 0x17d   : > { %v781_v43 = vsel %vm777_vm1, %v774_v40, %v779_v41 }
 0x17e   : > { %v4662_v44 = vpack.c.bf16 %v781_v43, %v780_v42 }
 0x180   : > { %4749 = vst [vmem:[#allocation2 + $0x8] sm:$0xff] %v4662_v44  }
 0x181 PF: > { %p3958_p11 = scmp.ne.s32.totalorder %s4880_s24, 0 }
 0x183   : > { %789 = sbr.rel (%p3958_p11) target bundleno = 395 (0x18b), region = 56 }
 0x188   : > { %v4899_v45 = vmov 0  }
 0x189   : > { %790 = vst [vmem:[#allocation2 + $0x8] sm:$0xf] %v4899_v45 }
 0x18a   : > { %791 = vst [vmem:[#allocation2 + $0xc] sm:$0xf] %v4899_v45 }
 0x18b PF: > { %p3959_p12 = scmp.ge.s32.totalorder %s4880_s24, 1 }
 0x18d   : > { %795 = sbr.rel (%p3959_p12) target bundleno = 575 (0x23f), region = 60 }
 0x192   : > { %804 = vmatpush.bf16.msra.mxu0 %v4976_v0  ;;  %v4522_v46 = vld [vmem:[%s431_s20] sm:$0xff] }
 0x196   : > { %805 = vmatpush.bf16.msra.mxu0 %v4988_v2 }
 0x19a   : > { %806 = vmatpush.bf16.msra.mxu0 %v5003_v3 }
 0x19e   : > { %807 = vmatpush.bf16.msra.mxu0 %v5023_v4 }
 0x1a2   : > { %808 = vmatpush.bf16.msra.mxu0 %v5045_v5 }
 0x1a6   : > { %809 = vmatpush.bf16.msra.mxu0 %v5069_v6 }
 0x1aa   : > { %810 = vmatpush.bf16.msra.mxu0 %v5080_v7 }
 0x1ae   : > { %811 = vmatpush.bf16.msra.mxu0 %v5091_v8 }
 0x1b1   : > { %812 = vmatmul.bf16.vlgmr.msra.gmra.mxu0 %v4522_v46 }
 0x22e   : > { %v813_v0 = vpop.f32.mrf.mxu0 }
 0x22f   : > { %v814_v2 = vadd.f32 %v5124_v19, %v813_v0 }
 0x231   : > { %v820_v47 = vmul.f32 0.1, %v814_v2  ;;  %vm818_vm2 = vcmp.gt.f32.partialorder %v814_v2, 0.0 }
 0x233   : > { %v822_v6 = vsel %vm818_vm2, %v814_v2, %v820_v47 }
 0x236   : > { %v815_v3 = vpop.f32.mrf.mxu0 }
 0x237   : > { %v816_v4 = vadd.f32 %v5124_v19, %v815_v3 }
 0x239   : > { %vm819_vm3 = vcmp.gt.f32.partialorder %v816_v4, 0.0  ;;  %v821_v5 = vmul.f32 0.1, %v816_v4 }
 0x23b   : > { %v823_v7 = vsel %vm819_vm3, %v816_v4, %v821_v5 }
 0x23c   : > { %v4667_v48 = vpack.c.bf16 %v823_v7, %v822_v6 }
 0x23e   : > { %4750 = vst [vmem:[#allocation2 + $0xe0] sm:$0xff] %v4667_v48  }
 0x23f PF: > { %p3964_p13 = scmp.ne.s32.totalorder %s4880_s24, 1 }
 0x241   : > { %832 = sbr.rel (%p3964_p13) target bundleno = 585 (0x249), region = 64 }
 0x246   : > { %v4900_v8 = vmov 0  }
 0x247   : > { %834 = vst [vmem:[#allocation2 + $0xe0] sm:$0xf] %v4900_v8 }
 0x248   : > { %835 = vst [vmem:[#allocation2 + $0xe4] sm:$0xf] %v4900_v8 }
 0x249 PF: > { %v4546_v49 = vld [vmem:[%s5916_s5 + $0x78] sm:$0xff]  ;;  %v4545_v19 = vld [vmem:[%s5916_s5 + $0x70] sm:$0xff]  ;;  %v4544_v50 = vld [vmem:[%s5916_s5 + $0x68] sm:$0xff]  ;;  %vm861_vm4 = vsmask.f32 256 }
 0x24a   : > { %4789 = vmatpush.bf16.msra.mxu1 %v4546_v49  ;;  %4790 = vmatpush.bf16.msra.mxu2 %v4546_v49  ;;  %v4543_v51 = vld [vmem:[%s5916_s5 + $0x60] sm:$0xff]  ;;  %v4542_v52 = vld [vmem:[%s5916_s5 + $0x58] sm:$0xff]  ;;  %v4541_v53 = vld [vmem:[%s5916_s5 + $0x50] sm:$0xff]  ;;  %vm862_vm5 = vsmask.f32 4368 }
 0x24b   : > { %4791 = vmatpush.bf16.msra.mxu3 %v4546_v49  ;;  %1169 = vmatpush.bf16.msra.mxu0 %v4546_v49  ;;  %v4540_v54 = vld [vmem:[%s5916_s5 + $0x48] sm:$0xff]  ;;  %v4539_v55 = vld [vmem:[%s5916_s5 + $0x40] sm:$0xff]  ;;  %v4554_v56 = vld [vmem:[%s5916_s5 + $0xb8] sm:$0xff]  ;;  %vm1371_vm6 = vsmask.f32 3328 }
 0x24c   : > { %v4538_v57 = vld [vmem:[%s5916_s5 + $0x38] sm:$0xff]  ;;  %v4527_v59 = vld [vmem:[#allocation2 + $0x68] sm:$0xff]  ;;  %v4553_v1 = vld [vmem:[%s5916_s5 + $0xb0] sm:$0xff]  ;;  %vm1372_vm7 = vsmask.f32 7440 }
 0x24d   : > { %v4525_v58 = vld [vmem:[#allocation2 + $0x38] sm:$0xff]  ;;  %v4523_v61 = vld [vmem:[#allocation2 + $0x8] sm:$0xff]  ;;  %v4537_v9 = vld [vmem:[%s5916_s5 + $0x30] sm:$0xff] }
 0x24e   : > { %4792 = vmatpush.bf16.msra.mxu1 %v4545_v19  ;;  %4793 = vmatpush.bf16.msra.mxu2 %v4545_v19  ;;  %v4529_v60 = vld [vmem:[#allocation2 + $0x98] sm:$0xff]  ;;  %v1347_v10 = vld [vmem:[#allocation2 + $0x8] sm:$0xf]  ;;  %v1348_v11 = vld [vmem:[#allocation2 + $0xc] sm:$0xf] }
 0x24f   : > { %4794 = vmatpush.bf16.msra.mxu3 %v4545_v19  ;;  %1170 = vmatpush.bf16.msra.mxu0 %v4545_v19  ;;  %v4570_v62 = vld [vmem:[%s5916_s5 + $0xf8] sm:$0xff]  ;;  %v4569_v12 = vld [vmem:[%s5916_s5 + $0xf0] sm:$0xff]  ;;  %v4552_v14 = vld [vmem:[%s5916_s5 + $0xa8] sm:$0xff]  ;;  %v1375_v16 = vshrl.u32 %v1347_v10, 16  ;;  %v1378_v17 = vshll.u32 %v1347_v10, 16  ;;  %v1384_v21 = vshll.u32 %v1348_v11, 16 }
 0x250   : > { %v4578_v63 = vld [vmem:[%s5916_s5 + $0x138] sm:$0xff]  ;;  %v4577_v13 = vld [vmem:[%s5916_s5 + $0x130] sm:$0xff]  ;;  %v4536_v15 = vld [vmem:[%s5916_s5 + $0x28] sm:$0xff]  ;;  %v1388_v22 = vshrl.u32 %v1348_v11, 16 }
 0x251   : > { %v838_v18 = vld [vmem:[#allocation2 + $0x8] sm:$0xf]  ;;  %v5226_v20 = vld [vmem:[#allocation2 + $0xc] sm:$0xf]  ;;  %v5234_v25 = vld [vmem:[#allocation2 + $0x20] sm:$0xf] }
 0x252   : > { %4795 = vmatpush.bf16.msra.mxu1 %v4544_v50  ;;  %4796 = vmatpush.bf16.msra.mxu2 %v4544_v50  ;;  %v4568_v23 = vld [vmem:[%s5916_s5 + $0xe8] sm:$0xff]  ;;  %v837_v26 = vld [vmem:[#allocation2 + $0x4] sm:$0x8]  ;;  %v870_v27 = vshrl.u32 %v838_v18, 16  ;;  %v879_v28 = vshrl.u32 %v5226_v20, 16  ;;  %v1377_v32 = vrot.slane %v1375_v16, 4  ;;  %vm5279_vm8 = vmor %vm861_vm4, %vm862_vm5 }
 0x253   : > { %4797 = vmatpush.bf16.msra.mxu3 %v4544_v50  ;;  %1171 = vmatpush.bf16.msra.mxu0 %v4544_v50  ;;  %v4576_v24 = vld [vmem:[%s5916_s5 + $0x128] sm:$0xff]  ;;  %v5237_v29 = vld [vmem:[#allocation2 + $0x24] sm:$0xf]  ;;  %v1380_v33 = vrot.slane %v1378_v17, 5  ;;  %v5245_v34 = vrot.slane %v1384_v21, 5  ;;  %v1390_v35 = vrot.slane %v1388_v22, 4  ;;  %vm5285_vm9 = vmor %vm1371_vm6, %vm1372_vm7 }
 0x254   : > { %v4551_v30 = vld [vmem:[%s5916_s5 + $0xa0] sm:$0xff]  ;;  %v1349_v36 = vld [vmem:[#allocation2 + $0x10] sm:$0x1]  ;;  %v1758_v37 = vshrl.u32 %v5234_v25, 16  ;;  %v865_v40 = vshrl.u32 %v837_v26, 16  ;;  %v1767_v42 = vshrl.u32 %v5237_v29, 16 }
 0x255   : > { %v4535_v31 = vld [vmem:[%s5916_s5 + $0x20] sm:$0xff]  ;;  %v1728_v41 = vld [vmem:[#allocation2 + $0x1c] sm:$0x8]  ;;  %v4526_v43 = vld [vmem:[#allocation2 + $0x50] sm:$0xff]  ;;  %v872_v45 = vrot.slane %v870_v27, 7  ;;  %v873_v46 = vshll.u32 %v838_v18, 16  ;;  %v1381_v5 = vor.u32 %v1380_v33, %v1377_v32  ;;  %v1391_v6 = vor.u32 %v1390_v35, %v5245_v34 }
 0x256   : > { %4798 = vmatpush.bf16.msra.mxu1 %v4543_v51  ;;  %4799 = vmatpush.bf16.msra.mxu2 %v4543_v51  ;;  %v4567_v38 = vld [vmem:[%s5916_s5 + $0xe0] sm:$0xff]  ;;  %v881_v0 = vrot.slane %v879_v28, 7  ;;  %v882_v2 = vshll.u32 %v5226_v20, 16  ;;  %v4530_v3 = vld [vmem:[#allocation2 + $0xb0] sm:$0xff]  ;;  %v4550_v47 = vld [vmem:[%s5916_s5 + $0x98] sm:$0xff]  ;;  %v1394_v7 = vshll.u32 %v1349_v36, 16 }
 0x257   : > { %4800 = vmatpush.bf16.msra.mxu3 %v4543_v51  ;;  %1172 = vmatpush.bf16.msra.mxu0 %v4543_v51  ;;  %v4575_v39 = vld [vmem:[%s5916_s5 + $0x120] sm:$0xff]  ;;  %v4534_v4 = vld [vmem:[%s5916_s5 + $0x18] sm:$0xff]  ;;  %v1753_v8 = vshrl.u32 %v1728_v41, 16  ;;  %v1760_v49 = vrot.slane %v1758_v37, 7  ;;  %v1761_v19 = vshll.u32 %v5234_v25, 16  ;;  %v1769_v50 = vrot.slane %v1767_v42, 7 }
 0x258   : > { %v4528_v44 = vld [vmem:[#allocation2 + $0x80] sm:$0xff]  ;;  %v1770_v51 = vshll.u32 %v5237_v29, 16  ;;  %v4573_v16 = vld [vmem:[%s5916_s5 + $0x110] sm:$0xff]  ;;  %v4548_v20 = vld [vmem:[%s5916_s5 + $0x88] sm:$0xff] }
 0x259   : > { %v4524_v48 = vld [vmem:[#allocation2 + $0x20] sm:$0xff]  ;;  %v1763_v10 = vor.u32 %v1761_v19, %v1760_v49  ;;  %v1765_v11 = vrot.slane %v1760_v49, 4  ;;  %v4532_v21 = vld [vmem:[%s5916_s5 + $0x8] sm:$0xff]  ;;  %v840_v27 = vld [vmem:[#allocation2 + $0x1c] sm:$0x8] }
 0x25a   : > { %4801 = vmatpush.bf16.msra.mxu1 %v4542_v52  ;;  %4802 = vmatpush.bf16.msra.mxu2 %v4542_v52  ;;  %v1351_v18 = vld [vmem:[#allocation2 + $0x24] sm:$0xf]  ;;  %v4572_v35 = vld [vmem:[%s5916_s5 + $0x108] sm:$0xff] }
 0x25b   : > { %4803 = vmatpush.bf16.msra.mxu3 %v4542_v52  ;;  %1173 = vmatpush.bf16.msra.mxu0 %v4542_v52  ;;  %v4566_v52 = vld [vmem:[%s5916_s5 + $0xd8] sm:$0xff]  ;;  %v5312_v25 = vld [vmem:[#allocation2 + $0x24] sm:$0xf]  ;;  %v1408_v32 = vshll.u32 %v1351_v18, 16  ;;  %v1412_v33 = vshrl.u32 %v1351_v18, 16 }
 0x25c   : > { %v4547_v41 = vld [vmem:[%s5916_s5 + $0x80] sm:$0xff] }
 0x25d   : > { %v4531_v42 = vld [vmem:[%s5916_s5] sm:$0xff]  ;;  %v1414_v49 = vrot.slane %v1412_v33, 4 }
 0x25e   : > { %4804 = vmatpush.bf16.msra.mxu1 %v4541_v53  ;;  %4805 = vmatpush.bf16.msra.mxu2 %v4541_v53 }
 0x25f   : > { %4806 = vmatpush.bf16.msra.mxu3 %v4541_v53  ;;  %1174 = vmatpush.bf16.msra.mxu0 %v4541_v53  ;;  %v4574_v53 = vld [vmem:[%s5916_s5 + $0x118] sm:$0xff] }
 0x262   : > { %4807 = vmatpush.bf16.msra.mxu1 %v4540_v54  ;;  %4808 = vmatpush.bf16.msra.mxu2 %v4540_v54 }
 0x263   : > { %4809 = vmatpush.bf16.msra.mxu3 %v4540_v54  ;;  %1175 = vmatpush.bf16.msra.mxu0 %v4540_v54  ;;  %v3965_v54 = vrot.slane %v865_v40, 11  ;;  %v5326_v40 = vld [vmem:[#allocation2 + $0x38] sm:$0xf] }
 0x264   : > { %v1780_v19 = vshrl.u32 %v5326_v40, 16 }
 0x266   : > { %4810 = vmatpush.bf16.msra.mxu1 %v4539_v55  ;;  %4811 = vmatpush.bf16.msra.mxu2 %v4539_v55 }
 0x267   : > { %4812 = vmatpush.bf16.msra.mxu3 %v4539_v55  ;;  %1176 = vmatpush.bf16.msra.mxu0 %v4539_v55  ;;  %v875_v55 = vor.u32 %v873_v46, %v872_v45 }
 0x269   : > { %1187 = vmatmul.bf16.vlgmr.msra.gmra.mxu1 %v4525_v58  ;;  %1197 = vmatmul.bf16.vlgmr.msra.gmra.mxu2 %v4527_v59  ;;  %v4533_v58 = vld [vmem:[%s5916_s5 + $0x10] sm:$0xff]  ;;  %v876_v17 = vsel %vm5279_vm8, %v3965_v54, %v875_v55 }
 0x26a   : > { %1663 = vmatpush.bf16.msrb.mxu2 %v4554_v56  ;;  %1298 = vmatpush.bf16.msrb.mxu1 %v4538_v57  ;;  %v877_v56 = vrot.slane %v872_v45, 4  ;;  %v4549_v57 = vld [vmem:[%s5916_s5 + $0x90] sm:$0xff]  ;;  %v1218_v36 = vunpack.c.l.b16 %v876_v17  ;;  %v887_v45 = vshrl.u32 %v840_v27, 16  ;;  %v1354_v27 = vld [vmem:[#allocation2 + $0x3c] sm:$0xf] }
 0x26b   : > { %1207 = vmatmul.bf16.vlgmr.msra.gmra.mxu3 %v4529_v60  ;;  %1177 = vmatmul.bf16.vlgmr.msra.gmra.mxu0 %v4523_v61  ;;  %v884_v60 = vor.u32 %v882_v2, %v881_v0  ;;  %v1382_v61 = vrot.slane %v1381_v5, 4  ;;  %v5335_v0 = vld [vmem:[#allocation2 + $0x3c] sm:$0xf] }
 0x26c   : > { %2025 = vmatpush.bf16.msrb.mxu3 %v4570_v62  ;;  %2203 = vmatpush.bf16.msrb.mxu0 %v4578_v63  ;;  %v1392_v62 = vrot.slane %v1391_v6, 4  ;;  %v1396_v63 = vrot.slane %v1394_v7, 5  ;;  %v4563_v7 = vld [vmem:[%s5916_s5 + $0xc0] sm:$0xff]  ;;  %v1789_v54 = vshrl.u32 %v5335_v0, 16  ;;  %v1792_v18 = vshll.u32 %v5335_v0, 16 }
 0x26d   : > { %v885_v22 = vsel %vm5279_vm8, %v877_v56, %v884_v60  ;;  %v3966_v60 = vrot.slane %v887_v45, 11 }
 0x26e   : > { %1664 = vmatpush.bf16.msrb.mxu2 %v4553_v1  ;;  %1299 = vmatpush.bf16.msrb.mxu1 %v4537_v9  ;;  %v4133_v9 = vrot.slane %v1753_v8, 11  ;;  %v1219_v37 = vunpack.c.l.b16 %v885_v22  ;;  %v5346_v8 = vrot.slane %v1408_v32, 5  ;;  %v1791_v17 = vrot.slane %v1789_v54, 7  ;;  %v4609_v22 = vld [vmem:[%s5916_s5 + $0x1f0] sm:$0xff]  ;;  %v5377_v32 = vld [vmem:[#allocation2 + $0x38] sm:$0xf] }
 0x270   : > { %2026 = vmatpush.bf16.msrb.mxu3 %v4569_v12  ;;  %2204 = vmatpush.bf16.msrb.mxu0 %v4577_v13  ;;  %v1772_v12 = vor.u32 %v1770_v51, %v1769_v50  ;;  %v5289_v13 = vld [vmem:[#allocation2 + $0x20] sm:$0xf]  ;;  %v1764_v26 = vsel %vm5279_vm8, %v4133_v9, %v1763_v10  ;;  %v1234_v55 = vpack.c.b16 %v1219_v37, %v1218_v36  ;;  %v845_v36 = vld [vmem:[#allocation2 + $0x3c] sm:$0xf] }
 0x271   : > { %v892_v28 = vshrl.u32 %v5289_v13, 16  ;;  %v895_v46 = vshll.u32 %v5289_v13, 16  ;;  %v4571_v50 = vld [vmem:[%s5916_s5 + $0x100] sm:$0xff]  ;;  %v1782_v13 = vrot.slane %v1780_v19, 7 }
 0x272   : > { %1665 = vmatpush.bf16.msrb.mxu2 %v4552_v14  ;;  %1300 = vmatpush.bf16.msrb.mxu1 %v4536_v15  ;;  %v1350_v14 = vld [vmem:[#allocation2 + $0x20] sm:$0xf]  ;;  %v4565_v15 = vld [vmem:[%s5916_s5 + $0xd0] sm:$0xff] }
 0x273   : > { %v1399_v29 = vshrl.u32 %v1350_v14, 16  ;;  %v4555_v10 = vld [vmem:[#allocation2 + $0x20] sm:$0xff] }
 0x274   : > { %2027 = vmatpush.bf16.msrb.mxu3 %v4568_v23  ;;  %2205 = vmatpush.bf16.msrb.mxu0 %v4576_v24  ;;  %v1387_v23 = vsel %vm5285_vm9, %v1382_v61, %v5245_v34  ;;  %v1397_v24 = vsel %vm5285_vm9, %v1392_v62, %v1396_v63  ;;  %v4564_v34 = vld [vmem:[%s5916_s5 + $0xc8] sm:$0xff] }
 0x275   : > { %v1401_v5 = vrot.slane %v1399_v29, 4 }
 0x276   : > { %1666 = vmatpush.bf16.msrb.mxu2 %v4551_v30  ;;  %1301 = vmatpush.bf16.msrb.mxu1 %v4535_v31  ;;  %v1402_v30 = vshll.u32 %v1350_v14, 16  ;;  %v1773_v31 = vsel %vm5279_vm8, %v1765_v11, %v1772_v12  ;;  %v1415_v11 = vor.u32 %v1414_v49, %v5346_v8  ;;  %v1783_v14 = vshll.u32 %v5326_v40, 16  ;;  %v1355_v49 = vld [vmem:[#allocation2 + $0x40] sm:$0x1] }
 0x277   : > { %v1946_v2 = vunpack.c.l.b16 %v1773_v31 }
 0x278   : > { %2028 = vmatpush.bf16.msrb.mxu3 %v4567_v38  ;;  %2206 = vmatpush.bf16.msrb.mxu0 %v4575_v39  ;;  %v1583_v38 = vunpack.c.l.b16 %v1387_v23  ;;  %v901_v39 = vshrl.u32 %v5312_v25, 16  ;;  %v1404_v6 = vrot.slane %v1402_v30, 5  ;;  %v4617_v23 = vld [vmem:[%s5916_s5 + $0x230] sm:$0xff]  ;;  %v1785_v31 = vor.u32 %v1783_v14, %v1782_v13 }
 0x279   : > { %1192 = vmatmul.bf16.gmra.mxu1 %v4526_v43  ;;  %1202 = vmatmul.bf16.gmra.mxu2 %v4528_v44  ;;  %v1584_v43 = vunpack.c.l.b16 %v1397_v24  ;;  %v1945_v44 = vunpack.c.l.b16 %v1764_v26  ;;  %v1353_v24 = vld [vmem:[#allocation2 + $0x38] sm:$0xf] }
 0x27a   : > { %1667 = vmatpush.bf16.msrb.mxu2 %v4550_v47  ;;  %1302 = vmatpush.bf16.msrb.mxu1 %v4534_v4  ;;  %v4586_v47 = vld [vmem:[%s5916_s5 + $0x178] sm:$0xff]  ;;  %v894_v4 = vrot.slane %v892_v28, 7  ;;  %v903_v51 = vrot.slane %v901_v39, 7  ;;  %v1405_v63 = vor.u32 %v1404_v6, %v1401_v5  ;;  %v1416_v28 = vrot.slane %v1415_v11, 4  ;;  %v4584_v39 = vld [vmem:[%s5916_s5 + $0x168] sm:$0xff] }
 0x27b   : > { %1212 = vmatmul.bf16.gmra.mxu3 %v4530_v3  ;;  %1182 = vmatmul.bf16.gmra.mxu0 %v4524_v48  ;;  %v4602_v3 = vld [vmem:[%s5916_s5 + $0x1b8] sm:$0xff]  ;;  %v1352_v48 = vld [vmem:[#allocation2 + $0x28] sm:$0x1]  ;;  %v1599_v56 = vpack.c.b16 %v1584_v43, %v1583_v38  ;;  %v1961_v61 = vpack.c.b16 %v1946_v2, %v1945_v44  ;;  %v1423_v37 = vshrl.u32 %v1353_v24, 16  ;;  %v1426_v40 = vshll.u32 %v1353_v24, 16 }
 0x27c   : > { %2029 = vmatpush.bf16.msrb.mxu3 %v4566_v52  ;;  %2207 = vmatpush.bf16.msrb.mxu0 %v4574_v53  ;;  %v904_v52 = vshll.u32 %v5312_v25, 16  ;;  %v1731_v53 = vld [vmem:[#allocation2 + $0x34] sm:$0x8]  ;;  %v897_v62 = vor.u32 %v895_v46, %v894_v4  ;;  %v1418_v9 = vshll.u32 %v1352_v48, 16  ;;  %v1406_v26 = vrot.slane %v1405_v63, 4  ;;  %v4600_v38 = vld [vmem:[%s5916_s5 + $0x1a8] sm:$0xff] }
 0x27d   : > { %v1775_v12 = vshrl.u32 %v1731_v53, 16  ;;  %v4608_v43 = vld [vmem:[%s5916_s5 + $0x1e8] sm:$0xff]  ;;  %v1735_v46 = vld [vmem:[#allocation2 + $0x50] sm:$0xf]  ;;  %v1736_v5 = vld [vmem:[#allocation2 + $0x54] sm:$0xf] }
 0x27e   : > { %1668 = vmatpush.bf16.msrb.mxu2 %v4549_v57  ;;  %1303 = vmatpush.bf16.msrb.mxu1 %v4533_v58  ;;  %v4610_v57 = vld [vmem:[%s5916_s5 + $0x1f8] sm:$0xff]  ;;  %v898_v25 = vsel %vm5279_vm8, %v3966_v60, %v897_v62  ;;  %v1420_v29 = vrot.slane %v1418_v9, 5  ;;  %v4616_v44 = vld [vmem:[%s5916_s5 + $0x228] sm:$0xff]  ;;  %v1411_v2 = vsel %vm5285_vm9, %v1406_v26, %v5346_v8  ;;  %v923_v48 = vshrl.u32 %v845_v36, 16 }
 0x27f   : > { %v4618_v58 = vld [vmem:[%s5916_s5 + $0x238] sm:$0xff]  ;;  %v4134_v30 = vrot.slane %v1775_v12, 11  ;;  %v1220_v45 = vunpack.c.l.b16 %v898_v25  ;;  %v1425_v19 = vrot.slane %v1423_v37, 4  ;;  %v1802_v53 = vshrl.u32 %v1735_v46, 16  ;;  %v4607_v37 = vld [vmem:[%s5916_s5 + $0x1e0] sm:$0xff] }
 0x280   : > { %2030 = vmatpush.bf16.msrb.mxu3 %v4565_v15  ;;  %2208 = vmatpush.bf16.msrb.mxu0 %v4573_v16  ;;  %v899_v15 = vrot.slane %v894_v4, 4  ;;  %v906_v16 = vor.u32 %v904_v52, %v903_v51  ;;  %v843_v4 = vld [vmem:[#allocation2 + $0x34] sm:$0x8]  ;;  %v1734_v52 = vld [vmem:[#allocation2 + $0x4c] sm:$0x8]  ;;  %v1585_v54 = vunpack.c.l.b16 %v1411_v2  ;;  %v926_v62 = vshll.u32 %v845_v36, 16 }
 0x281   : > { %v909_v60 = vshrl.u32 %v843_v4, 16  ;;  %v925_v9 = vrot.slane %v923_v48, 7  ;;  %v1797_v11 = vshrl.u32 %v1734_v52, 16  ;;  %v1804_v14 = vrot.slane %v1802_v53, 7  ;;  %v4599_v36 = vld [vmem:[%s5916_s5 + $0x1a0] sm:$0xff] }
 0x282   : > { %1669 = vmatpush.bf16.msrb.mxu2 %v4548_v20  ;;  %1304 = vmatpush.bf16.msrb.mxu1 %v4532_v21  ;;  %v4601_v20 = vld [vmem:[%s5916_s5 + $0x1b0] sm:$0xff]  ;;  %v907_v33 = vsel %vm5279_vm8, %v899_v15, %v906_v16  ;;  %v1805_v15 = vshll.u32 %v1735_v46, 16  ;;  %v846_v46 = vld [vmem:[#allocation2 + $0x4c] sm:$0x8] }
 0x283   : > { %v4585_v21 = vld [vmem:[%s5916_s5 + $0x170] sm:$0xff]  ;;  %v1221_v0 = vunpack.c.l.b16 %v907_v33  ;;  %v928_v26 = vor.u32 %v926_v62, %v925_v9  ;;  %v1739_v52 = vld [vmem:[#allocation2 + $0x6c] sm:$0xf]  ;;  %v1737_v9 = vld [vmem:[#allocation2 + $0x64] sm:$0x8] }
 0x284   : > { %2031 = vmatpush.bf16.msrb.mxu3 %v4564_v34  ;;  %2209 = vmatpush.bf16.msrb.mxu0 %v4572_v35  ;;  %v1787_v34 = vrot.slane %v1782_v13, 4  ;;  %v1794_v35 = vor.u32 %v1792_v18, %v1791_v17 }
 0x285   : > { %v1235_v16 = vpack.c.b16 %v1221_v0, %v1220_v45 }
 0x286   : > { %1670 = vmatpush.bf16.msrb.mxu2 %v4547_v41  ;;  %1305 = vmatpush.bf16.msrb.mxu1 %v4531_v42  ;;  %v1432_v41 = vshll.u32 %v1354_v27, 16  ;;  %v1436_v42 = vshrl.u32 %v1354_v27, 16  ;;  %v1795_v6 = vsel %vm5279_vm8, %v1787_v34, %v1794_v35  ;;  %v847_v34 = vld [vmem:[#allocation2 + $0x50] sm:$0xf] }
 0x287   : > { %v1356_v35 = vld [vmem:[#allocation2 + $0x50] sm:$0xf]  ;;  %v936_v0 = vshrl.u32 %v847_v34, 16 }
 0x288   : > { %2032 = vmatpush.bf16.msrb.mxu3 %v4563_v7  ;;  %2210 = vmatpush.bf16.msrb.mxu0 %v4571_v50  ;;  %v914_v7 = vshrl.u32 %v5377_v32, 16  ;;  %v1428_v50 = vrot.slane %v1426_v40, 5  ;;  %v5403_v8 = vrot.slane %v1432_v41, 5  ;;  %v1438_v51 = vrot.slane %v1436_v42, 4  ;;  %v1357_v40 = vld [vmem:[#allocation2 + $0x54] sm:$0xf] }
 0x289   : > { %1306 = vmatmul.bf16.vlgmr.msrb.gmra.mxu1 %v1234_v55  ;;  %1671 = vmatmul.bf16.vlgmr.msrb.gmra.mxu2 %v1599_v56  ;;  %v4583_v41 = vld [vmem:[%s5916_s5 + $0x160] sm:$0xff]  ;;  %v1450_v4 = vshll.u32 %v1356_v35, 16  ;;  %v1460_v48 = vshrl.u32 %v1357_v40, 16 }
 0x28a   : > { %2944 = vmatpush.bf16.msra.mxu2 %v4602_v3  ;;  %2581 = vmatpush.bf16.msra.mxu1 %v4586_v47  ;;  %v1421_v3 = vsel %vm5285_vm9, %v1416_v28, %v1420_v29  ;;  %v1786_v47 = vsel %vm5279_vm8, %v4134_v30, %v1785_v31  ;;  %v916_v63 = vrot.slane %v914_v7, 7  ;;  %v1429_v12 = vor.u32 %v1428_v50, %v1425_v19  ;;  %v4615_v42 = vld [vmem:[%s5916_s5 + $0x220] sm:$0xff] }
 0x28b   : > { %2033 = vmatmul.bf16.vlgmr.msrb.gmra.mxu3 %v1961_v61  ;;  %2211 = vmatmul.bf16.vlgmr.msrb.gmra.mxu0 %v4555_v10  ;;  %v1586_v55 = vunpack.c.l.b16 %v1421_v3  ;;  %v1947_v56 = vunpack.c.l.b16 %v1786_v47  ;;  %v917_v61 = vshll.u32 %v5377_v32, 16  ;;  %v1442_v10 = vshll.u32 %v1355_v49, 16  ;;  %v848_v3 = vld [vmem:[#allocation2 + $0x54] sm:$0xf]  ;;  %v1738_v49 = vld [vmem:[#allocation2 + $0x68] sm:$0xf] }
 0x28c   : > { %3122 = vmatpush.bf16.msra.mxu3 %v4610_v57  ;;  %3500 = vmatpush.bf16.msra.mxu0 %v4618_v58  ;;  %v1811_v57 = vshrl.u32 %v1736_v5, 16  ;;  %v1948_v58 = vunpack.c.l.b16 %v1795_v6  ;;  %v1439_v13 = vor.u32 %v1438_v51, %v5403_v8  ;;  %v921_v25 = vrot.slane %v916_v63, 4 }
 0x28d   : > { %v1600_v17 = vpack.c.b16 %v1586_v55, %v1585_v54  ;;  %v919_v24 = vor.u32 %v917_v61, %v916_v63  ;;  %v1444_v27 = vrot.slane %v1442_v10, 5  ;;  %v1430_v28 = vrot.slane %v1429_v12, 4 }
 0x28e   : > { %2945 = vmatpush.bf16.msra.mxu2 %v4601_v20  ;;  %2582 = vmatpush.bf16.msra.mxu1 %v4585_v21  ;;  %v1813_v18 = vrot.slane %v1811_v57, 7  ;;  %v1814_v20 = vshll.u32 %v1736_v5, 16  ;;  %v1962_v21 = vpack.c.b16 %v1948_v58, %v1947_v56  ;;  %v1440_v29 = vrot.slane %v1439_v13, 4  ;;  %v1358_v57 = vld [vmem:[#allocation2 + $0x58] sm:$0x1] }
 0x28f   : > { %v4135_v30 = vrot.slane %v1797_v11, 11  ;;  %v1807_v31 = vor.u32 %v1805_v15, %v1804_v14  ;;  %v1809_v32 = vrot.slane %v1804_v14, 4  ;;  %v1447_v47 = vshrl.u32 %v1356_v35, 16  ;;  %v1360_v35 = vld [vmem:[#allocation2 + $0x6c] sm:$0xf] }
 0x290   : > { %3123 = vmatpush.bf16.msra.mxu3 %v4609_v22  ;;  %3501 = vmatpush.bf16.msra.mxu0 %v4617_v23  ;;  %v4556_v22 = vld [vmem:[#allocation2 + $0x38] sm:$0xff]  ;;  %v3967_v23 = vrot.slane %v909_v60, 11  ;;  %v1816_v33 = vor.u32 %v1814_v20, %v1813_v18  ;;  %v1456_v7 = vshll.u32 %v1357_v40, 16  ;;  %v931_v51 = vshrl.u32 %v846_v46, 16  ;;  %v850_v46 = vld [vmem:[#allocation2 + $0x68] sm:$0xf] }
 0x291   : > { %v1808_v45 = vsel %vm5279_vm8, %v4135_v30, %v1807_v31  ;;  %v938_v54 = vrot.slane %v936_v0, 7  ;;  %v939_v55 = vshll.u32 %v847_v34, 16  ;;  %v945_v56 = vshrl.u32 %v848_v3, 16  ;;  %v1359_v30 = vld [vmem:[#allocation2 + $0x68] sm:$0xf]  ;;  %v4598_v40 = vld [vmem:[%s5916_s5 + $0x198] sm:$0xff] }
 0x292   : > { %2946 = vmatpush.bf16.msra.mxu2 %v4600_v38  ;;  %2583 = vmatpush.bf16.msra.mxu1 %v4584_v39  ;;  %v920_v38 = vsel %vm5279_vm8, %v3967_v23, %v919_v24  ;;  %v929_v39 = vsel %vm5279_vm8, %v921_v25, %v928_v26  ;;  %v1817_v2 = vsel %vm5279_vm8, %v1809_v32, %v1816_v33  ;;  %v1449_v58 = vrot.slane %v1447_v47, 4  ;;  %v4557_v23 = vld [vmem:[#allocation2 + $0x50] sm:$0xff]  ;;  %v851_v0 = vld [vmem:[#allocation2 + $0x6c] sm:$0xf] }
 0x293   : > { %v1222_v5 = vunpack.c.l.b16 %v920_v38  ;;  %v1223_v6 = vunpack.c.l.b16 %v929_v39  ;;  %v1950_v53 = vunpack.c.l.b16 %v1817_v2  ;;  %v1452_v60 = vrot.slane %v1450_v4, 5 }
 0x294   : > { %3124 = vmatpush.bf16.msra.mxu3 %v4608_v43  ;;  %3502 = vmatpush.bf16.msra.mxu0 %v4616_v44  ;;  %v1435_v43 = vsel %vm5285_vm9, %v1430_v28, %v5403_v8  ;;  %v1445_v44 = vsel %vm5285_vm9, %v1440_v29, %v1444_v27  ;;  %v1949_v8 = vunpack.c.l.b16 %v1808_v45  ;;  %v1824_v61 = vshrl.u32 %v1738_v49, 16  ;;  %v4614_v45 = vld [vmem:[%s5916_s5 + $0x218] sm:$0xff] }
 0x295   : > { %v1587_v19 = vunpack.c.l.b16 %v1435_v43  ;;  %v1588_v50 = vunpack.c.l.b16 %v1445_v44  ;;  %v5432_v62 = vrot.slane %v1456_v7, 5  ;;  %v1462_v63 = vrot.slane %v1460_v48, 4  ;;  %v4582_v44 = vld [vmem:[%s5916_s5 + $0x158] sm:$0xff] }
 0x296   : > { %2947 = vmatpush.bf16.msra.mxu2 %v4599_v36  ;;  %2584 = vmatpush.bf16.msra.mxu1 %v4583_v41  ;;  %v1833_v10 = vshrl.u32 %v1739_v52, 16  ;;  %v1236_v11 = vpack.c.b16 %v1223_v6, %v1222_v5  ;;  %v3968_v13 = vrot.slane %v931_v51, 11  ;;  %v1963_v14 = vpack.c.b16 %v1950_v53, %v1949_v8  ;;  %v4606_v41 = vld [vmem:[%s5916_s5 + $0x1d8] sm:$0xff]  ;;  %v1741_v5 = vld [vmem:[#allocation2 + $0x80] sm:$0xf] }
 0x297   : > { %v1601_v12 = vpack.c.b16 %v1588_v50, %v1587_v19  ;;  %v941_v15 = vor.u32 %v939_v55, %v938_v54  ;;  %v1453_v18 = vor.u32 %v1452_v60, %v1449_v58  ;;  %v1466_v20 = vshll.u32 %v1358_v57, 16  ;;  %v1742_v19 = vld [vmem:[#allocation2 + $0x84] sm:$0xf]  ;;  %v1361_v55 = vld [vmem:[#allocation2 + $0x70] sm:$0x1] }
 0x298   : > { %3125 = vmatpush.bf16.msra.mxu3 %v4607_v37  ;;  %3503 = vmatpush.bf16.msra.mxu0 %v4615_v42  ;;  %v1463_v24 = vor.u32 %v1462_v63, %v5432_v62  ;;  %v1827_v25 = vshll.u32 %v1738_v49, 16  ;;  %v1835_v26 = vrot.slane %v1833_v10, 7  ;;  %v1836_v27 = vshll.u32 %v1739_v52, 16  ;;  %v849_v50 = vld [vmem:[#allocation2 + $0x64] sm:$0x8] }
 0x299   : > { %1311 = vmatmul.bf16.gmra.mxu1 %v1235_v16  ;;  %1676 = vmatmul.bf16.gmra.mxu2 %v1600_v17  ;;  %v947_v16 = vrot.slane %v945_v56, 7  ;;  %v948_v17 = vshll.u32 %v848_v3, 16  ;;  %v943_v28 = vrot.slane %v938_v54, 4  ;;  %v942_v31 = vsel %vm5279_vm8, %v3968_v13, %v941_v15  ;;  %v1740_v63 = vld [vmem:[#allocation2 + $0x7c] sm:$0x8] }
 0x29a   : > { %v1454_v32 = vrot.slane %v1453_v18, 4  ;;  %v1468_v33 = vrot.slane %v1466_v20, 5  ;;  %v1464_v36 = vrot.slane %v1463_v24, 4  ;;  %v1838_v39 = vor.u32 %v1836_v27, %v1835_v26  ;;  %2948 = vmatpush.bf16.msra.mxu2 %v4598_v40  ;;  %2585 = vmatpush.bf16.msra.mxu1 %v4582_v44  ;;  %v853_v40 = vld [vmem:[#allocation2 + $0x80] sm:$0xf] }
 0x29b   : > { %2038 = vmatmul.bf16.gmra.mxu3 %v1962_v21  ;;  %2216 = vmatmul.bf16.gmra.mxu0 %v4556_v22  ;;  %v1819_v21 = vshrl.u32 %v1737_v9, 16  ;;  %v1826_v22 = vrot.slane %v1824_v61, 7  ;;  %v950_v29 = vor.u32 %v948_v17, %v947_v16  ;;  %v1471_v42 = vshrl.u32 %v1359_v30, 16 }
 0x29c   : > { %v1474_v43 = vshll.u32 %v1359_v30, 16  ;;  %v1480_v2 = vshll.u32 %v1360_v35, 16  ;;  %v1484_v3 = vshrl.u32 %v1360_v35, 16  ;;  %3126 = vmatpush.bf16.msra.mxu3 %v4606_v41  ;;  %v1224_v4 = vunpack.c.l.b16 %v942_v31  ;;  %3504 = vmatpush.bf16.msra.mxu0 %v4614_v45  ;;  %v1362_v41 = vld [vmem:[#allocation2 + $0x80] sm:$0xf] }
 0x29d   : > { %v4136_v34 = vrot.slane %v1819_v21, 11  ;;  %v1829_v37 = vor.u32 %v1827_v25, %v1826_v22  ;;  %v1831_v38 = vrot.slane %v1826_v22, 4  ;;  %v951_v47 = vsel %vm5279_vm8, %v943_v28, %v950_v29  ;;  %v4558_v28 = vld [vmem:[#allocation2 + $0x68] sm:$0xff] }
 0x29e   : > { %v1459_v6 = vsel %vm5285_vm9, %v1454_v32, %v5432_v62  ;;  %v1469_v7 = vsel %vm5285_vm9, %v1464_v36, %v1468_v33  ;;  %v958_v8 = vshrl.u32 %v850_v46, 16  ;;  %v967_v51 = vshrl.u32 %v851_v0, 16 }
 0x29f   : > { %v1830_v48 = vsel %vm5279_vm8, %v4136_v34, %v1829_v37  ;;  %v1839_v49 = vsel %vm5279_vm8, %v1831_v38, %v1838_v39  ;;  %v1473_v52 = vrot.slane %v1471_v42, 4  ;;  %v1476_v53 = vrot.slane %v1474_v43, 5  ;;  %v4597_v42 = vld [vmem:[%s5916_s5 + $0x190] sm:$0xff] }
 0x2a0   : > { %v1225_v54 = vunpack.c.l.b16 %v951_v47  ;;  %v5460_v56 = vrot.slane %v1480_v2, 5  ;;  %v1486_v57 = vrot.slane %v1484_v3, 4  ;;  %v1846_v58 = vshrl.u32 %v1741_v5, 16  ;;  %v4605_v43 = vld [vmem:[%s5916_s5 + $0x1d0] sm:$0xff]  ;;  %2949 = vmatpush.bf16.msra.mxu2 %v4597_v42 }
 0x2a1   : > { %v1589_v60 = vunpack.c.l.b16 %v1459_v6  ;;  %v1590_v61 = vunpack.c.l.b16 %v1469_v7  ;;  %v1951_v62 = vunpack.c.l.b16 %v1830_v48  ;;  %v1855_v9 = vshrl.u32 %v1742_v19, 16  ;;  %v4613_v2 = vld [vmem:[%s5916_s5 + $0x210] sm:$0xff]  ;;  %3127 = vmatpush.bf16.msra.mxu3 %v4605_v43  ;;  %v852_v6 = vld [vmem:[#allocation2 + $0x7c] sm:$0x8] }
 0x2a2   : > { %v1952_v10 = vunpack.c.l.b16 %v1839_v49  ;;  %v970_v13 = vshll.u32 %v851_v0, 16  ;;  %v969_v15 = vrot.slane %v967_v51, 7  ;;  %v1477_v16 = vor.u32 %v1476_v53, %v1473_v52  ;;  %v4581_v0 = vld [vmem:[%s5916_s5 + $0x150] sm:$0xff]  ;;  %3505 = vmatpush.bf16.msra.mxu0 %v4613_v2  ;;  %v856_v2 = vld [vmem:[#allocation2 + $0x98] sm:$0xf] }
 0x2a3   : > { %v1490_v17 = vshll.u32 %v1361_v55, 16  ;;  %v1487_v18 = vor.u32 %v1486_v57, %v5460_v56  ;;  %v1841_v20 = vshrl.u32 %v1740_v63, 16  ;;  %v1848_v21 = vrot.slane %v1846_v58, 7  ;;  %2586 = vmatpush.bf16.msra.mxu1 %v4581_v0  ;;  %v1744_v55 = vld [vmem:[#allocation2 + $0x98] sm:$0xf] }
 0x2a4   : > { %v1849_v22 = vshll.u32 %v1741_v5, 16  ;;  %v1602_v24 = vpack.c.b16 %v1590_v61, %v1589_v60  ;;  %v1857_v25 = vrot.slane %v1855_v9, 7  ;;  %v1858_v26 = vshll.u32 %v1742_v19, 16  ;;  %v854_v19 = vld [vmem:[#allocation2 + $0x84] sm:$0xf] }
 0x2a5   : > { %v1964_v27 = vpack.c.b16 %v1952_v10, %v1951_v62  ;;  %v972_v32 = vor.u32 %v970_v13, %v969_v15  ;;  %v1478_v33 = vrot.slane %v1477_v16, 4  ;;  %v1488_v34 = vrot.slane %v1487_v18, 4  ;;  %v1745_v61 = vld [vmem:[#allocation2 + $0x9c] sm:$0xf]  ;;  %v1743_v16 = vld [vmem:[#allocation2 + $0x94] sm:$0x8] }
 0x2a6   : > { %v1492_v35 = vrot.slane %v1490_v17, 5  ;;  %v4137_v36 = vrot.slane %v1841_v20, 11  ;;  %v1851_v37 = vor.u32 %v1849_v22, %v1848_v21  ;;  %v1853_v38 = vrot.slane %v1848_v21, 4 }
 0x2a7   : > { %v1860_v39 = vor.u32 %v1858_v26, %v1857_v25  ;;  %v1483_v3 = vsel %vm5285_vm9, %v1478_v33, %v5460_v56  ;;  %v980_v7 = vshrl.u32 %v853_v40, 16  ;;  %v1495_v48 = vshrl.u32 %v1362_v41, 16 }
 0x2a8   : > { %v1493_v47 = vsel %vm5285_vm9, %v1488_v34, %v1492_v35  ;;  %v1498_v49 = vshll.u32 %v1362_v41, 16  ;;  %v1591_v53 = vunpack.c.l.b16 %v1483_v3  ;;  %v975_v58 = vshrl.u32 %v852_v6, 16  ;;  %v1365_v34 = vld [vmem:[#allocation2 + $0x98] sm:$0xf] }
 0x2a9   : > { %1316 = vmatmul.bf16.gmra.mxu1 %v1236_v11  ;;  %1681 = vmatmul.bf16.gmra.mxu2 %v1601_v12  ;;  %v953_v11 = vshrl.u32 %v849_v50, 16  ;;  %v961_v12 = vshll.u32 %v850_v46, 16  ;;  %v1363_v46 = vld [vmem:[#allocation2 + $0x84] sm:$0xf]  ;;  %v1861_v5 = vsel %vm5279_vm8, %v1853_v38, %v1860_v39  ;;  %v1592_v56 = vunpack.c.l.b16 %v1493_v47  ;;  %v1366_v39 = vld [vmem:[#allocation2 + $0x9c] sm:$0xf] }
 0x2aa   : > { %v1504_v50 = vshll.u32 %v1363_v46, 16  ;;  %v1954_v57 = vunpack.c.l.b16 %v1861_v5  ;;  %v983_v60 = vshll.u32 %v853_v40, 16  ;;  %v982_v62 = vrot.slane %v980_v7, 7 }
 0x2ab   : > { %2043 = vmatmul.bf16.gmra.mxu3 %v1963_v14  ;;  %2221 = vmatmul.bf16.gmra.mxu0 %v4557_v23  ;;  %v960_v14 = vrot.slane %v958_v8, 7  ;;  %v1237_v23 = vpack.c.b16 %v1225_v54, %v1224_v4  ;;  %v3969_v29 = vrot.slane %v953_v11, 11  ;;  %v1852_v4 = vsel %vm5279_vm8, %v4137_v36, %v1851_v37  ;;  %v1364_v11 = vld [vmem:[#allocation2 + $0x88] sm:$0x1] }
 0x2ac   : > { %v1508_v8 = vshrl.u32 %v1363_v46, 16  ;;  %v1953_v54 = vunpack.c.l.b16 %v1852_v4  ;;  %v989_v63 = vshrl.u32 %v854_v19, 16  ;;  %v1497_v9 = vrot.slane %v1495_v48, 4  ;;  %v857_v4 = vld [vmem:[#allocation2 + $0x9c] sm:$0xf] }
 0x2ad   : > { %v963_v30 = vor.u32 %v961_v12, %v960_v14  ;;  %v965_v31 = vrot.slane %v960_v14, 4  ;;  %v1500_v10 = vrot.slane %v1498_v49, 5  ;;  %v5488_v12 = vrot.slane %v1504_v50, 5  ;;  %v1747_v49 = vld [vmem:[#allocation2 + $0xb0] sm:$0xf] }
 0x2ae   : > { %v1510_v13 = vrot.slane %v1508_v8, 4  ;;  %v1868_v14 = vshrl.u32 %v1744_v55, 16  ;;  %v1877_v17 = vshrl.u32 %v1745_v61, 16  ;;  %v1603_v18 = vpack.c.b16 %v1592_v56, %v1591_v53  ;;  %v1748_v53 = vld [vmem:[#allocation2 + $0xb4] sm:$0xf] }
 0x2af   : > { %v964_v44 = vsel %vm5279_vm8, %v3969_v29, %v963_v30  ;;  %v973_v45 = vsel %vm5279_vm8, %v965_v31, %v972_v32  ;;  %v1965_v20 = vpack.c.b16 %v1954_v57, %v1953_v54  ;;  %v3970_v21 = vrot.slane %v975_v58, 11 }
 0x2b0   : > { %v1226_v51 = vunpack.c.l.b16 %v964_v44  ;;  %v1227_v52 = vunpack.c.l.b16 %v973_v45  ;;  %v992_v22 = vshll.u32 %v854_v19, 16  ;;  %v1501_v25 = vor.u32 %v1500_v10, %v1497_v9  ;;  %v4596_v44 = vld [vmem:[%s5916_s5 + $0x188] sm:$0xff] }
 0x2b1   : > { %v1514_v26 = vshll.u32 %v1364_v11, 16  ;;  %v1863_v29 = vshrl.u32 %v1743_v16, 16  ;;  %v1870_v30 = vrot.slane %v1868_v14, 7  ;;  %v1871_v31 = vshll.u32 %v1744_v55, 16  ;;  %v4604_v45 = vld [vmem:[%s5916_s5 + $0x1c8] sm:$0xff]  ;;  %2950 = vmatpush.bf16.msra.mxu2 %v4596_v44 }
 0x2b2   : > { %v1238_v15 = vpack.c.b16 %v1227_v52, %v1226_v51  ;;  %v1879_v32 = vrot.slane %v1877_v17, 7  ;;  %v1880_v33 = vshll.u32 %v1745_v61, 16  ;;  %v987_v36 = vrot.slane %v982_v62, 4  ;;  %3128 = vmatpush.bf16.msra.mxu3 %v4604_v45  ;;  %v4580_v19 = vld [vmem:[%s5916_s5 + $0x148] sm:$0xff]  ;;  %v855_v55 = vld [vmem:[#allocation2 + $0x94] sm:$0x8] }
 0x2b3   : > { %v1502_v38 = vrot.slane %v1501_v25, 4  ;;  %v1516_v41 = vrot.slane %v1514_v26, 5  ;;  %v4138_v42 = vrot.slane %v1863_v29, 11  ;;  %v1873_v43 = vor.u32 %v1871_v31, %v1870_v30  ;;  %2587 = vmatpush.bf16.msra.mxu1 %v4580_v19  ;;  %v1746_v14 = vld [vmem:[#allocation2 + $0xac] sm:$0x8] }
 0x2b4   : > { %v1875_v46 = vrot.slane %v1870_v30, 4  ;;  %v1882_v0 = vor.u32 %v1880_v33, %v1879_v32  ;;  %v1519_v3 = vshrl.u32 %v1365_v34, 16  ;;  %v1522_v47 = vshll.u32 %v1365_v34, 16  ;;  %v4560_v34 = vld [vmem:[#allocation2 + $0x98] sm:$0xff] }
 0x2b5   : > { %v1528_v5 = vshll.u32 %v1366_v39, 16  ;;  %v1532_v6 = vshrl.u32 %v1366_v39, 16  ;;  %v1507_v50 = vsel %vm5285_vm9, %v1502_v38, %v5488_v12  ;;  %v1874_v51 = vsel %vm5279_vm8, %v4138_v42, %v1873_v43 }
 0x2b6   : > { %v1002_v52 = vshrl.u32 %v856_v2, 16  ;;  %v1883_v54 = vsel %vm5279_vm8, %v1875_v46, %v1882_v0  ;;  %v1011_v56 = vshrl.u32 %v857_v4, 16  ;;  %v1521_v57 = vrot.slane %v1519_v3, 4 }
 0x2b7   : > { %v1524_v58 = vrot.slane %v1522_v47, 5  ;;  %v1534_v9 = vrot.slane %v1532_v6, 4  ;;  %v1890_v10 = vshrl.u32 %v1747_v49, 16  ;;  %v1593_v11 = vunpack.c.l.b16 %v1507_v50 }
 0x2b8   : > { %v1956_v16 = vunpack.c.l.b16 %v1883_v54  ;;  %v997_v17 = vshrl.u32 %v855_v55, 16  ;;  %v1885_v26 = vshrl.u32 %v1746_v14, 16  ;;  %v1902_v32 = vshll.u32 %v1748_v53, 16  ;;  %v858_v54 = vld [vmem:[#allocation2 + $0xac] sm:$0x8]  ;;  %v4611_v14 = vld [vmem:[%s5916_s5 + $0x200] sm:$0xff] }
 0x2b9   : > { %1321 = vmatmul.bf16.gmra.mxu1 %v1237_v23  ;;  %1686 = vmatmul.bf16.gmra.mxu2 %v1602_v24  ;;  %v985_v23 = vor.u32 %v983_v60, %v982_v62  ;;  %v991_v24 = vrot.slane %v989_v63, 7  ;;  %v4612_v60 = vld [vmem:[%s5916_s5 + $0x208] sm:$0xff]  ;;  %v1367_v62 = vld [vmem:[#allocation2 + $0xa0] sm:$0x1]  ;;  %v5516_v63 = vrot.slane %v1528_v5, 5 }
 0x2ba   : > { %3506 = vmatpush.bf16.msra.mxu0 %v4612_v60  ;;  %v4139_v44 = vrot.slane %v1885_v26, 11  ;;  %v1749_v26 = vld [vmem:[#allocation2 + $0xc4] sm:$0x8] }
 0x2bb   : > { %2048 = vmatmul.bf16.gmra.mxu3 %v1964_v27  ;;  %2226 = vmatmul.bf16.gmra.mxu0 %v4558_v28  ;;  %v4559_v27 = vld [vmem:[#allocation2 + $0x80] sm:$0xff]  ;;  %v1511_v28 = vor.u32 %v1510_v13, %v5488_v12  ;;  %v986_v35 = vsel %vm5279_vm8, %v3970_v21, %v985_v23  ;;  %v994_v37 = vor.u32 %v992_v22, %v991_v24  ;;  %v1955_v13 = vunpack.c.l.b16 %v1874_v51 }
 0x2bc   : > { %v1228_v48 = vunpack.c.l.b16 %v986_v35  ;;  %v1013_v21 = vrot.slane %v1011_v56, 7  ;;  %v1014_v22 = vshll.u32 %v857_v4, 16  ;;  %v1525_v23 = vor.u32 %v1524_v58, %v1521_v57  ;;  %v860_v4 = vld [vmem:[#allocation2 + $0xb4] sm:$0xf]  ;;  %v4579_v58 = vld [vmem:[%s5916_s5 + $0x140] sm:$0xff] }
 0x2bd   : > { %v1512_v40 = vrot.slane %v1511_v28, 4  ;;  %v995_v7 = vsel %vm5279_vm8, %v987_v36, %v994_v37  ;;  %v1538_v24 = vshll.u32 %v1367_v62, 16  ;;  %v1535_v25 = vor.u32 %v1534_v9, %v5516_v63  ;;  %v1368_v36 = vld [vmem:[#allocation2 + $0xb0] sm:$0xf]  ;;  %2588 = vmatpush.bf16.msra.mxu1 %v4579_v58 }
 0x2be   : > { %v1229_v61 = vunpack.c.l.b16 %v995_v7  ;;  %v1893_v28 = vshll.u32 %v1747_v49, 16  ;;  %v1966_v33 = vpack.c.b16 %v1956_v16, %v1955_v13  ;;  %v3971_v35 = vrot.slane %v997_v17, 11  ;;  %v4595_v7 = vld [vmem:[%s5916_s5 + $0x180] sm:$0xff]  ;;  %v1750_v13 = vld [vmem:[#allocation2 + $0xc8] sm:$0xf]  ;;  %3507 = vmatpush.bf16.msra.mxu0 %v4611_v14 }
 0x2bf   : > { %v1517_v8 = vsel %vm5285_vm9, %v1512_v40, %v1516_v41  ;;  %v1016_v39 = vor.u32 %v1014_v22, %v1013_v21  ;;  %v1526_v40 = vrot.slane %v1525_v23, 4  ;;  %v1369_v41 = vld [vmem:[#allocation2 + $0xb4] sm:$0xf]  ;;  %v1536_v42 = vrot.slane %v1535_v25, 4  ;;  %2951 = vmatpush.bf16.msra.mxu2 %v4595_v7 }
 0x2c0   : > { %v1594_v12 = vunpack.c.l.b16 %v1517_v8  ;;  %v1239_v29 = vpack.c.b16 %v1229_v61, %v1228_v48  ;;  %v1540_v43 = vrot.slane %v1538_v24, 5  ;;  %v1543_v3 = vshrl.u32 %v1368_v36, 16  ;;  %v4603_v48 = vld [vmem:[%s5916_s5 + $0x1c0] sm:$0xff] }
 0x2c1   : > { %v1546_v47 = vshll.u32 %v1368_v36, 16  ;;  %v1552_v5 = vshll.u32 %v1369_v41, 16  ;;  %v1556_v6 = vshrl.u32 %v1369_v41, 16  ;;  %v1531_v50 = vsel %vm5285_vm9, %v1526_v40, %v5516_v63  ;;  %3129 = vmatpush.bf16.msra.mxu3 %v4603_v48  ;;  %v4561_v41 = vld [vmem:[#allocation2 + $0xb0] sm:$0xff] }
 0x2c2   : > { %v1604_v30 = vpack.c.b16 %v1594_v12, %v1593_v11  ;;  %v1541_v8 = vsel %vm5285_vm9, %v1536_v42, %v1540_v43  ;;  %v1033_v55 = vshrl.u32 %v860_v4, 16  ;;  %v1545_v56 = vrot.slane %v1543_v3, 4  ;;  %v1370_v12 = vld [vmem:[#allocation2 + $0xb8] sm:$0x1] }
 0x2c3   : > { %v1548_v57 = vrot.slane %v1546_v47, 5  ;;  %v5541_v61 = vrot.slane %v1552_v5, 5  ;;  %v1558_v62 = vrot.slane %v1556_v6, 4  ;;  %v1595_v9 = vunpack.c.l.b16 %v1531_v50 }
 0x2c4   : > { %v1019_v16 = vshrl.u32 %v858_v54, 16  ;;  %v1035_v21 = vrot.slane %v1033_v55, 7  ;;  %v1036_v22 = vshll.u32 %v860_v4, 16  ;;  %v1562_v25 = vshll.u32 %v1370_v12, 16 }
 0x2c5   : > { %v1549_v23 = vor.u32 %v1548_v57, %v1545_v56  ;;  %v1559_v24 = vor.u32 %v1558_v62, %v5541_v61 }
 0x2c6   : > { %v1038_v36 = vor.u32 %v1036_v22, %v1035_v21  ;;  %v1564_v43 = vrot.slane %v1562_v25, 5 }
 0x2c7   : > { %v1560_v42 = vrot.slane %v1559_v24, 4  ;;  %v2647_v24 = vld [vmem:[#allocation2 + $0x34] sm:$0x8] }
 0x2c9   : > { %1326 = vmatmul.bf16.gmra.mxu1 %v1238_v15  ;;  %1691 = vmatmul.bf16.gmra.mxu2 %v1603_v18  ;;  %v1899_v15 = vshrl.u32 %v1748_v53, 16  ;;  %v1004_v18 = vrot.slane %v1002_v52, 7 }
 0x2cb   : > { %2053 = vmatmul.bf16.gmra.mxu3 %v1965_v20  ;;  %2231 = vmatmul.bf16.gmra.mxu0 %v4559_v27  ;;  %v1005_v20 = vshll.u32 %v856_v2, 16  ;;  %v1892_v27 = vrot.slane %v1890_v10, 7  ;;  %v1901_v31 = vrot.slane %v1899_v15, 7  ;;  %v1009_v38 = vrot.slane %v1004_v18, 4  ;;  %v859_v2 = vld [vmem:[#allocation2 + $0xb0] sm:$0xf] }
 0x2cc   : > { %v1024_v52 = vshrl.u32 %v859_v2, 16  ;;  %v1596_v10 = vunpack.c.l.b16 %v1541_v8  ;;  %v3187_v8 = vld [vmem:[#allocation2 + $0x38] sm:$0xf] }
 0x2cd   : > { %v1007_v37 = vor.u32 %v1005_v20, %v1004_v18  ;;  %v1895_v45 = vor.u32 %v1893_v28, %v1892_v27  ;;  %v1897_v46 = vrot.slane %v1892_v27, 4  ;;  %v1904_v0 = vor.u32 %v1902_v32, %v1901_v31  ;;  %v1751_v20 = vld [vmem:[#allocation2 + $0xcc] sm:$0xf] }
 0x2ce   : > { %v1017_v19 = vsel %vm5279_vm8, %v1009_v38, %v1016_v39  ;;  %v1026_v17 = vrot.slane %v1024_v52, 7  ;;  %v1027_v18 = vshll.u32 %v859_v2, 16  ;;  %v1912_v27 = vshrl.u32 %v1750_v13, 16  ;;  %v2269_v39 = vld [vmem:[#allocation2 + $0x24] sm:$0xf] }
 0x2cf   : > { %v1008_v49 = vsel %vm5279_vm8, %v3971_v35, %v1007_v37  ;;  %v1896_v51 = vsel %vm5279_vm8, %v4139_v44, %v1895_v45  ;;  %v1905_v53 = vsel %vm5279_vm8, %v1897_v46, %v1904_v0  ;;  %v1231_v63 = vunpack.c.l.b16 %v1017_v19 }
 0x2d0   : > { %v1230_v60 = vunpack.c.l.b16 %v1008_v49  ;;  %v1957_v11 = vunpack.c.l.b16 %v1896_v51  ;;  %v1958_v15 = vunpack.c.l.b16 %v1905_v53  ;;  %v3972_v32 = vrot.slane %v1019_v16, 11  ;;  %v3188_v51 = vld [vmem:[#allocation2 + $0x3c] sm:$0xf] }
 0x2d1   : > { %v1031_v35 = vrot.slane %v1026_v17, 4  ;;  %v1550_v37 = vrot.slane %v1549_v23, 4  ;;  %v1907_v38 = vshrl.u32 %v1749_v26, 16  ;;  %v1914_v44 = vrot.slane %v1912_v27, 7 }
 0x2d2   : > { %v1240_v28 = vpack.c.b16 %v1231_v63, %v1230_v60  ;;  %v1967_v31 = vpack.c.b16 %v1958_v15, %v1957_v11  ;;  %v1915_v45 = vshll.u32 %v1750_v13, 16  ;;  %v1924_v2 = vshll.u32 %v1751_v20, 16  ;;  %v2270_v60 = vld [vmem:[#allocation2 + $0x28] sm:$0x1] }
 0x2d3   : > { %v2302_v4 = vshll.u32 %v2269_v39, 16  ;;  %v2306_v5 = vshrl.u32 %v2269_v39, 16  ;;  %v1039_v7 = vsel %vm5279_vm8, %v1031_v35, %v1038_v36  ;;  %v1555_v48 = vsel %vm5285_vm9, %v1550_v37, %v5541_v61  ;;  %v2648_v61 = vld [vmem:[#allocation2 + $0x38] sm:$0xf] }
 0x2d4   : > { %v1565_v49 = vsel %vm5285_vm9, %v1560_v42, %v1564_v43  ;;  %v4140_v19 = vrot.slane %v1907_v38, 11  ;;  %v1917_v50 = vor.u32 %v1915_v45, %v1914_v44  ;;  %v1919_v52 = vrot.slane %v1914_v44, 4  ;;  %v2271_v38 = vld [vmem:[#allocation2 + $0x38] sm:$0xf] }
 0x2d5   : > { %v1233_v58 = vunpack.c.l.b16 %v1039_v7  ;;  %v5562_v62 = vrot.slane %v2302_v4, 5  ;;  %v2308_v63 = vrot.slane %v2306_v5, 4  ;;  %v3212_v11 = vshrl.u32 %v3187_v8, 16 }
 0x2d6   : > { %v3215_v12 = vshll.u32 %v3187_v8, 16  ;;  %v3221_v13 = vshll.u32 %v3188_v51, 16  ;;  %v3225_v14 = vshrl.u32 %v3188_v51, 16  ;;  %v1597_v16 = vunpack.c.l.b16 %v1555_v48 }
 0x2d7   : > { %v2312_v23 = vshll.u32 %v2270_v60, 16  ;;  %v2677_v25 = vshrl.u32 %v2648_v61, 16  ;;  %v2309_v27 = vor.u32 %v2308_v63, %v5562_v62  ;;  %v2672_v37 = vshrl.u32 %v2647_v24, 16 }
 0x2d8   : > { %v2680_v43 = vshll.u32 %v2648_v61, 16  ;;  %v2317_v7 = vshrl.u32 %v2271_v38, 16  ;;  %v2320_v48 = vshll.u32 %v2271_v38, 16 }
 0x2d9   : > { %1331 = vmatmul.bf16.gmra.mxu1 %v1239_v29  ;;  %1696 = vmatmul.bf16.gmra.mxu2 %v1604_v30  ;;  %v1921_v29 = vshrl.u32 %v1751_v20, 16  ;;  %v1605_v30 = vpack.c.b16 %v1596_v10, %v1595_v9  ;;  %v2649_v10 = vld [vmem:[#allocation2 + $0x3c] sm:$0xf]  ;;  %v2679_v42 = vrot.slane %v2677_v25, 7  ;;  %v2310_v45 = vrot.slane %v2309_v27, 4 }
 0x2da   : > { %v4317_v8 = vrot.slane %v2672_v37, 11  ;;  %v2273_v25 = vld [vmem:[#allocation2 + $0x40] sm:$0x1]  ;;  %v2650_v27 = vld [vmem:[#allocation2 + $0x4c] sm:$0x8] }
 0x2db   : > { %2058 = vmatmul.bf16.gmra.mxu3 %v1966_v33  ;;  %2236 = vmatmul.bf16.gmra.mxu0 %v4560_v34  ;;  %v1029_v33 = vor.u32 %v1027_v18, %v1026_v17  ;;  %v2268_v34 = vld [vmem:[#allocation2 + $0x20] sm:$0xf]  ;;  %v1923_v0 = vrot.slane %v1921_v29, 7  ;;  %v1598_v17 = vunpack.c.l.b16 %v1565_v49  ;;  %v1918_v18 = vsel %vm5279_vm8, %v4140_v19, %v1917_v50  ;;  %v4562_v50 = vld [vmem:[#allocation2 + $0xc8] sm:$0xff] }
 0x2dc   : > { %v2293_v3 = vshrl.u32 %v2268_v34, 16  ;;  %v2296_v47 = vshll.u32 %v2268_v34, 16  ;;  %v3189_v29 = vld [vmem:[#allocation2 + $0x40] sm:$0x1]  ;;  %v1959_v35 = vunpack.c.l.b16 %v1918_v18  ;;  %v3190_v18 = vld [vmem:[#allocation2 + $0x50] sm:$0xf] }
 0x2dd   : > { %v1030_v6 = vsel %vm5279_vm8, %v3972_v32, %v1029_v33  ;;  %v1926_v53 = vor.u32 %v1924_v2, %v1923_v0  ;;  %v5575_v32 = vrot.slane %v3221_v13, 5  ;;  %v3227_v33 = vrot.slane %v3225_v14, 4  ;;  %v2651_v13 = vld [vmem:[#allocation2 + $0x50] sm:$0xf]  ;;  %v2652_v14 = vld [vmem:[#allocation2 + $0x54] sm:$0xf] }
 0x2de   : > { %v2295_v54 = vrot.slane %v2293_v3, 4  ;;  %v2298_v55 = vrot.slane %v2296_v47, 5  ;;  %v1232_v57 = vunpack.c.l.b16 %v1030_v6  ;;  %v1606_v34 = vpack.c.b16 %v1598_v17, %v1597_v16  ;;  %v2272_v47 = vld [vmem:[#allocation2 + $0x3c] sm:$0xf] }
 0x2df   : > { %v1927_v21 = vsel %vm5279_vm8, %v1919_v52, %v1926_v53  ;;  %v2689_v2 = vshll.u32 %v2649_v10, 16  ;;  %v3231_v3 = vshll.u32 %v3189_v29, 16  ;;  %v3228_v6 = vor.u32 %v3227_v33, %v5575_v32 }
 0x2e0   : > { %v2299_v22 = vor.u32 %v2298_v55, %v2295_v54  ;;  %v1241_v26 = vpack.c.b16 %v1233_v58, %v1232_v57  ;;  %v1960_v36 = vunpack.c.l.b16 %v1927_v21  ;;  %v2682_v53 = vor.u32 %v2680_v43, %v2679_v42  ;;  %v3191_v21 = vld [vmem:[#allocation2 + $0x54] sm:$0xf] }
 0x2e1   : > { %v2684_v54 = vrot.slane %v2679_v42, 4  ;;  %v2326_v55 = vshll.u32 %v2272_v47, 16  ;;  %v3233_v60 = vrot.slane %v3231_v3, 5  ;;  %v2330_v63 = vshrl.u32 %v2272_v47, 16 }
 0x2e2   : > { %v2300_v39 = vrot.slane %v2299_v22, 4  ;;  %v1968_v19 = vpack.c.b16 %v1960_v36, %v1959_v35  ;;  %v2683_v16 = vsel %vm5279_vm8, %v4317_v8, %v2682_v53  ;;  %v3236_v36 = vshrl.u32 %v3190_v18, 16 }
 0x2e3   : > { %v5595_v17 = vrot.slane %v2326_v55, 5  ;;  %v3239_v37 = vshll.u32 %v3190_v18, 16  ;;  %v3245_v38 = vshll.u32 %v3191_v21, 16  ;;  %v2864_v42 = vunpack.c.l.b16 %v2683_v16 }
 0x2e4   : > { %v2305_v52 = vsel %vm5285_vm9, %v2300_v39, %v5562_v62  ;;  %v3249_v39 = vshrl.u32 %v3191_v21, 16  ;;  %v2702_v47 = vshll.u32 %v2651_v13, 16 }
 0x2e5   : > { %v5591_v62 = vunpack.c.l.b16 %v2305_v52  ;;  %v3241_v8 = vrot.slane %v3239_v37, 5  ;;  %v5615_v52 = vrot.slane %v3245_v38, 5  ;;  %v2654_v38 = vld [vmem:[#allocation2 + $0x68] sm:$0xf] }
 0x2e6   : > { %v5547_v40 = vpop.f32.mrf.mxu1  ;;  %v3251_v53 = vrot.slane %v3249_v39, 4 }
 0x2e8   : > { %v5549_v46 = vpop.f32.mrf.mxu0 }
 0x2e9   : > { %1336 = vmatmul.bf16.gmra.mxu1 %v1240_v28  ;;  %1701 = vmatmul.bf16.gmra.mxu2 %v1605_v30  ;;  %v2686_v28 = vshrl.u32 %v2649_v10, 16  ;;  %v3214_v30 = vrot.slane %v3212_v11, 4  ;;  %v3229_v10 = vrot.slane %v3228_v6, 4  ;;  %v2319_v11 = vrot.slane %v2317_v7, 4 }
 0x2eb   : > { %2063 = vmatmul.bf16.gmra.mxu3 %v1967_v31  ;;  %2241 = vmatmul.bf16.gmra.mxu0 %v4561_v41  ;;  %v3217_v31 = vrot.slane %v3215_v12, 5  ;;  %v2314_v41 = vrot.slane %v2312_v23, 5  ;;  %v2688_v0 = vrot.slane %v2686_v28, 7  ;;  %v2322_v12 = vrot.slane %v2320_v48, 5 }
 0x2ec   : > { %v5560_v56 = vpop.f32.mrf.mxu2  ;;  %v2699_v28 = vshrl.u32 %v2651_v13, 16  ;;  %v2711_v48 = vshll.u32 %v2652_v14, 16 }
 0x2ed   : > { %v3218_v5 = vor.u32 %v3217_v31, %v3214_v30  ;;  %v2315_v57 = vsel %vm5285_vm9, %v2310_v45, %v2314_v41  ;;  %v2691_v58 = vor.u32 %v2689_v2, %v2688_v0  ;;  %v3234_v31 = vsel %vm5285_vm9, %v3229_v10, %v3233_v60  ;;  %v3192_v60 = vld [vmem:[#allocation2 + $0x58] sm:$0x1] }
 0x2ee   : > { %v5564_v9 = vpop.f32.mrf.mxu3  ;;  %v5566_v15 = vpop.f32.mrf.mxu1  ;;  %v5599_v23 = vunpack.c.l.b16 %v2315_v57  ;;  %v2323_v33 = vor.u32 %v2322_v12, %v2319_v11  ;;  %v2336_v45 = vshll.u32 %v2273_v25, 16  ;;  %v2694_v0 = vshrl.u32 %v2650_v27, 16 }
 0x2ef   : > { %v3219_v61 = vrot.slane %v3218_v5, 4  ;;  %v2692_v24 = vsel %vm5279_vm8, %v2684_v54, %v2691_v58  ;;  %v2701_v3 = vrot.slane %v2699_v28, 7  ;;  %v3421_v5 = vunpack.c.l.b16 %v3234_v31 }
 0x2f0   : > { %v5570_v20 = vpop.f32.mrf.mxu0  ;;  %v2865_v43 = vunpack.c.l.b16 %v2692_v24  ;;  %v2324_v6 = vrot.slane %v2323_v33, 4  ;;  %v2517_v54 = vpack.c.b16 %v5599_v23, %v5591_v62  ;;  %v2338_v57 = vrot.slane %v2336_v45, 5  ;;  %v4587_v24 = vld [vmem:[#allocation2 + $0x38] sm:$0xff] }
 0x2f1   : > { %v3224_v30 = vsel %vm5285_vm9, %v3219_v61, %v5575_v32  ;;  %v4318_v58 = vrot.slane %v2694_v0, 11  ;;  %v2704_v11 = vor.u32 %v2702_v47, %v2701_v3  ;;  %v2706_v21 = vrot.slane %v2701_v3, 4  ;;  %v3194_v3 = vld [vmem:[#allocation2 + $0x6c] sm:$0xf] }
 0x2f2   : > { %v3420_v2 = vunpack.c.l.b16 %v3224_v30  ;;  %v2880_v55 = vpack.c.b16 %v2865_v43, %v2864_v42  ;;  %v2329_v18 = vsel %vm5285_vm9, %v2324_v6, %v5595_v17  ;;  %v3255_v27 = vshll.u32 %v3192_v60, 16  ;;  %v3193_v43 = vld [vmem:[#allocation2 + $0x68] sm:$0xf]  ;;  %v2276_v6 = vld [vmem:[#allocation2 + $0x58] sm:$0x1] }
 0x2f3   : > { %v5634_v39 = vunpack.c.l.b16 %v2329_v18  ;;  %v3263_v60 = vshll.u32 %v3193_v43, 16 }
 0x2f4   : > { %v5577_v44 = vpop.f32.mrf.mxu2  ;;  %v3436_v16 = vpack.c.b16 %v3421_v5, %v3420_v2  ;;  %v3257_v2 = vrot.slane %v3255_v27, 5  ;;  %v2724_v27 = vshll.u32 %v2654_v38, 16 }
 0x2f6   : > { %v5579_v4 = vpop.f32.mrf.mxu3  ;;  %v5582_v49 = vpop.f32.mrf.mxu1 }
 0x2f8   : > { %v5584_v51 = vpop.f32.mrf.mxu0 }
 0x2f9   : > { %1341 = vmatmul.bf16.gmra.mxu1 %v1241_v26  ;;  %1706 = vmatmul.bf16.gmra.mxu2 %v1606_v34  ;;  %v2332_v26 = vrot.slane %v2330_v63, 4  ;;  %v2708_v34 = vshrl.u32 %v2652_v14, 16  ;;  %v2275_v63 = vld [vmem:[#allocation2 + $0x54] sm:$0xf] }
 0x2fa   : > { %v2350_v28 = vshll.u32 %v2275_v63, 16  ;;  %v2354_v33 = vshrl.u32 %v2275_v63, 16  ;;  %v3269_v63 = vshll.u32 %v3194_v3, 16 }
 0x2fb   : > { %2068 = vmatmul.bf16.gmra.mxu3 %v1968_v19  ;;  %2246 = vmatmul.bf16.gmra.mxu0 %v4562_v50  ;;  %v2333_v32 = vor.u32 %v2332_v26, %v5595_v17  ;;  %v2710_v7 = vrot.slane %v2708_v34, 7  ;;  %v2274_v19 = vld [vmem:[#allocation2 + $0x50] sm:$0xf]  ;;  %v3238_v50 = vrot.slane %v3236_v36, 4  ;;  %v3252_v26 = vor.u32 %v3251_v53, %v5615_v52 }
 0x2fc   : > { %v5597_v22 = vpop.f32.mrf.mxu2  ;;  %v2341_v12 = vshrl.u32 %v2274_v19, 16  ;;  %v2344_v13 = vshll.u32 %v2274_v19, 16  ;;  %v2705_v17 = vsel %vm5279_vm8, %v4318_v58, %v2704_v11  ;;  %v2721_v19 = vshrl.u32 %v2654_v38, 16 }
 0x2fd   : > { %v2334_v10 = vrot.slane %v2333_v32, 4  ;;  %v2713_v62 = vor.u32 %v2711_v48, %v2710_v7  ;;  %v3242_v25 = vor.u32 %v3241_v8, %v3238_v50  ;;  %v3253_v0 = vrot.slane %v3252_v26, 4  ;;  %v2653_v48 = vld [vmem:[#allocation2 + $0x64] sm:$0x8] }
 0x2fe   : > { %v5603_v29 = vpop.f32.mrf.mxu3  ;;  %v5610_v35 = vpop.f32.mrf.mxu1  ;;  %v2343_v36 = vrot.slane %v2341_v12, 4  ;;  %v2346_v37 = vrot.slane %v2344_v13, 5  ;;  %v5638_v32 = vrot.slane %v2350_v28, 5  ;;  %v2866_v5 = vunpack.c.l.b16 %v2705_v17 }
 0x2ff   : > { %v2339_v34 = vsel %vm5285_vm9, %v2334_v10, %v2338_v57  ;;  %v2714_v42 = vsel %vm5279_vm8, %v2706_v21, %v2713_v62  ;;  %v3243_v45 = vrot.slane %v3242_v25, 4  ;;  %v2356_v7 = vrot.slane %v2354_v33, 4 }
 0x300   : > { %v5612_v41 = vpop.f32.mrf.mxu0  ;;  %v5640_v47 = vunpack.c.l.b16 %v2339_v34  ;;  %v2867_v8 = vunpack.c.l.b16 %v2714_v42  ;;  %v2347_v53 = vor.u32 %v2346_v37, %v2343_v36  ;;  %v3273_v10 = vshrl.u32 %v3194_v3, 16  ;;  %v2277_v3 = vld [vmem:[#allocation2 + $0x68] sm:$0xf] }
 0x301   : > { %v3248_v12 = vsel %vm5285_vm9, %v3243_v45, %v5615_v52  ;;  %v3258_v13 = vsel %vm5285_vm9, %v3253_v0, %v3257_v2  ;;  %v2716_v18 = vshrl.u32 %v2653_v48, 16  ;;  %v2723_v25 = vrot.slane %v2721_v19, 7 }
 0x302   : > { %v2348_v26 = vrot.slane %v2347_v53, 4  ;;  %v3265_v34 = vrot.slane %v3263_v60, 5  ;;  %v5651_v52 = vrot.slane %v3269_v63, 5  ;;  %v3275_v17 = vrot.slane %v3273_v10, 4 }
 0x303   : > { %v2518_v36 = vpack.c.b16 %v5640_v47, %v5634_v39  ;;  %v3422_v37 = vunpack.c.l.b16 %v3248_v12  ;;  %v3423_v42 = vunpack.c.l.b16 %v3258_v13  ;;  %v4319_v2 = vrot.slane %v2716_v18, 11  ;;  %v3196_v18 = vld [vmem:[#allocation2 + $0x80] sm:$0xf] }
 0x304   : > { %v5619_v61 = vpop.f32.mrf.mxu2  ;;  %v2353_v38 = vsel %vm5285_vm9, %v2348_v26, %v5638_v32  ;;  %v3276_v39 = vor.u32 %v3275_v17, %v5651_v52  ;;  %v2657_v26 = vld [vmem:[#allocation2 + $0x80] sm:$0xf] }
 0x306   : > { %v5621_v14 = vpop.f32.mrf.mxu3  ;;  %v1307_v23 = vpop.f32.mrf.mxu1 }
 0x307   : > { %v1308_v30 = vadd.f32 %v1307_v23, %v5549_v46  ;;  %v2655_v46 = vld [vmem:[#allocation2 + $0x6c] sm:$0xf] }
 0x308   : > { %v5628_v31 = vpop.f32.mrf.mxu0 }
 0x309   : > { %2589 = vmatmul.bf16.vlgmr.msra.gmra.mxu1 %v2517_v54  ;;  %2952 = vmatmul.bf16.vlgmr.msra.gmra.mxu2 %v2880_v55  ;;  %v2730_v54 = vshrl.u32 %v2655_v46, 16  ;;  %v3260_v55 = vshrl.u32 %v3193_v43, 16  ;;  %v2881_v43 = vpack.c.b16 %v2867_v8, %v2866_v5  ;;  %v4588_v8 = vld [vmem:[#allocation2 + $0x50] sm:$0xff] }
 0x30b   : > { %3130 = vmatmul.bf16.vlgmr.msra.gmra.mxu3 %v4587_v24  ;;  %3508 = vmatmul.bf16.vlgmr.msra.gmra.mxu0 %v3436_v16  ;;  %v2360_v16 = vshll.u32 %v2276_v6, 16  ;;  %v2357_v24 = vor.u32 %v2356_v7, %v5638_v32  ;;  %v2732_v28 = vrot.slane %v2730_v54, 7  ;;  %v3262_v33 = vrot.slane %v3260_v55, 4  ;;  %v2278_v54 = vld [vmem:[#allocation2 + $0x6c] sm:$0xf] }
 0x30c   : > { %v1672_v50 = vpop.f32.mrf.mxu2  ;;  %v2728_v7 = vrot.slane %v2723_v25, 4  ;;  %v3437_v55 = vpack.c.b16 %v3423_v42, %v3422_v37  ;;  %v2374_v13 = vshll.u32 %v2278_v54, 16  ;;  %v2279_v37 = vld [vmem:[#allocation2 + $0x70] sm:$0x1]  ;;  %v3284_v42 = vshrl.u32 %v3196_v18, 16 }
 0x30d   : > { %v1712_v57 = vadd.f32 %v1672_v50, %v1308_v30  ;;  %v2733_v30 = vshll.u32 %v2655_v46, 16  ;;  %v2358_v45 = vrot.slane %v2357_v24, 4  ;;  %v2362_v0 = vrot.slane %v2360_v16, 5 }
 0x30e   : > { %v2034_v58 = vpop.f32.mrf.mxu3  ;;  %v1309_v11 = vpop.f32.mrf.mxu1  ;;  %v2726_v46 = vor.u32 %v2724_v27, %v2723_v25  ;;  %v3266_v53 = vor.u32 %v3265_v34, %v3262_v33  ;;  %v2378_v16 = vshrl.u32 %v2278_v54, 16  ;;  %v2658_v33 = vld [vmem:[#allocation2 + $0x84] sm:$0xf] }
 0x30f   : > { %v2074_v21 = vadd.f32 %v2034_v58, %v1712_v57  ;;  %v1310_v62 = vadd.f32 %v1309_v11, %v5570_v20  ;;  %v3195_v20 = vld [vmem:[#allocation2 + $0x70] sm:$0x1]  ;;  %v2735_v48 = vor.u32 %v2733_v30, %v2732_v28  ;;  %v2365_v57 = vshrl.u32 %v2277_v3, 16  ;;  %v3197_v34 = vld [vmem:[#allocation2 + $0x84] sm:$0xf] }
 0x310   : > { %v5648_v23 = vpop.f32.mrf.mxu0  ;;  %v3279_v47 = vshll.u32 %v3195_v20, 16  ;;  %v2368_v58 = vshll.u32 %v2277_v3, 16  ;;  %v2363_v32 = vsel %vm5285_vm9, %v2358_v45, %v2362_v0  ;;  %v5664_v11 = vunpack.c.l.b16 %v2353_v38 }
 0x311   : > { %v2727_v12 = vsel %vm5279_vm8, %v4319_v2, %v2726_v46  ;;  %v3267_v24 = vrot.slane %v3266_v53, 4  ;;  %v5670_v27 = vunpack.c.l.b16 %v2363_v32  ;;  %v2367_v28 = vrot.slane %v2365_v57, 4 }
 0x312   : > { %v3281_v25 = vrot.slane %v3279_v47, 5  ;;  %v2370_v30 = vrot.slane %v2368_v58, 5  ;;  %v5673_v17 = vadd.f32 %v5628_v31, %v2074_v21  ;;  %v3287_v20 = vshll.u32 %v3196_v18, 16 }
 0x313   : > { %v5678_v2 = vrot.slane %v2374_v13, 5  ;;  %v2380_v3 = vrot.slane %v2378_v16, 4  ;;  %v3297_v31 = vshrl.u32 %v3197_v34, 16  ;;  %v2519_v16 = vpack.c.b16 %v5670_v27, %v5664_v11  ;;  %v2281_v11 = vld [vmem:[#allocation2 + $0x84] sm:$0xf] }
 0x314   : > { %v1674_v6 = vpop.f32.mrf.mxu2  ;;  %v2371_v53 = vor.u32 %v2370_v30, %v2367_v28  ;;  %v2280_v30 = vld [vmem:[#allocation2 + $0x80] sm:$0xf] }
 0x315   : > { %v1713_v19 = vadd.f32 %v1674_v6, %v1310_v62  ;;  %v2736_v62 = vsel %vm5279_vm8, %v2728_v7, %v2735_v48  ;;  %v2743_v6 = vshrl.u32 %v2657_v26, 16  ;;  %v2656_v7 = vld [vmem:[#allocation2 + $0x7c] sm:$0x8]  ;;  %v2752_v48 = vshrl.u32 %v2658_v33, 16 }
 0x316   : > { %v2036_v50 = vpop.f32.mrf.mxu3  ;;  %v1312_v5 = vpop.f32.mrf.mxu1  ;;  %v2869_v0 = vunpack.c.l.b16 %v2736_v62  ;;  %v2381_v57 = vor.u32 %v2380_v3, %v5678_v2  ;;  %v2738_v58 = vshrl.u32 %v2656_v7, 16 }
 0x317   : > { %v2075_v60 = vadd.f32 %v2036_v50, %v1713_v19  ;;  %v1313_v63 = vadd.f32 %v1312_v5, %v5584_v51  ;;  %v3277_v51 = vrot.slane %v3276_v39, 4  ;;  %v3293_v19 = vshll.u32 %v3197_v34, 16 }
 0x318   : > { %v5660_v10 = vpop.f32.mrf.mxu0  ;;  %v3272_v50 = vsel %vm5285_vm9, %v3267_v24, %v5651_v52  ;;  %v2384_v39 = vshll.u32 %v2279_v37, 16  ;;  %v2754_v32 = vrot.slane %v2752_v48, 7  ;;  %v3299_v52 = vrot.slane %v3297_v31, 4  ;;  %v3198_v24 = vld [vmem:[#allocation2 + $0x88] sm:$0x1] }
 0x319   : > { %2594 = vmatmul.bf16.gmra.mxu1 %v2518_v36  ;;  %2957 = vmatmul.bf16.gmra.mxu2 %v2881_v43  ;;  %v2868_v36 = vunpack.c.l.b16 %v2727_v12  ;;  %v5676_v43 = vadd.f32 %v5648_v23, %v2075_v60  ;;  %v3282_v23 = vsel %vm5285_vm9, %v3277_v51, %v3281_v25  ;;  %v2745_v60 = vrot.slane %v2743_v6, 7 }
 0x31a   : > { %v2755_v12 = vshll.u32 %v2658_v33, 16  ;;  %v5687_v13 = vrot.slane %v3293_v19, 5  ;;  %v3424_v18 = vunpack.c.l.b16 %v3272_v50  ;;  %v3425_v62 = vunpack.c.l.b16 %v3282_v23 }
 0x31b   : > { %3135 = vmatmul.bf16.gmra.mxu3 %v4588_v8  ;;  %3513 = vmatmul.bf16.gmra.mxu0 %v3437_v55  ;;  %v3286_v8 = vrot.slane %v3284_v42, 4  ;;  %v3289_v55 = vrot.slane %v3287_v20, 5  ;;  %v2372_v51 = vrot.slane %v2371_v53, 4  ;;  %v2386_v25 = vrot.slane %v2384_v39, 5 }
 0x31c   : > { %v1677_v45 = vpop.f32.mrf.mxu2  ;;  %v2382_v37 = vrot.slane %v2381_v57, 4  ;;  %v4320_v42 = vrot.slane %v2738_v58, 11  ;;  %v2750_v20 = vrot.slane %v2745_v60, 4  ;;  %v2757_v3 = vor.u32 %v2755_v12, %v2754_v32 }
 0x31d   : > { %v1714_v38 = vadd.f32 %v1677_v45, %v1313_v63  ;;  %v2746_v63 = vshll.u32 %v2657_v26, 16  ;;  %v3290_v28 = vor.u32 %v3289_v55, %v3286_v8  ;;  %v3300_v6 = vor.u32 %v3299_v52, %v5687_v13 }
 0x31e   : > { %v2039_v46 = vpop.f32.mrf.mxu3  ;;  %v1314_v21 = vpop.f32.mrf.mxu1  ;;  %v3438_v7 = vpack.c.b16 %v3425_v62, %v3424_v18  ;;  %v2377_v50 = vsel %vm5285_vm9, %v2372_v51, %v5678_v2  ;;  %v2387_v23 = vsel %vm5285_vm9, %v2382_v37, %v2386_v25  ;;  %v2398_v53 = vshll.u32 %v2281_v11, 16  ;;  %v2660_v2 = vld [vmem:[#allocation2 + $0x98] sm:$0xf]  ;;  %v2659_v37 = vld [vmem:[#allocation2 + $0x94] sm:$0x8] }
 0x31f   : > { %v2076_v47 = vadd.f32 %v2039_v46, %v1714_v38  ;;  %v1315_v54 = vadd.f32 %v1314_v21, %v5612_v41  ;;  %v2882_v41 = vpack.c.b16 %v2869_v0, %v2868_v36  ;;  %v2748_v26 = vor.u32 %v2746_v63, %v2745_v60  ;;  %v4589_v46 = vld [vmem:[#allocation2 + $0x68] sm:$0xff]  ;;  %v2661_v60 = vld [vmem:[#allocation2 + $0x9c] sm:$0xf] }
 0x320   : > { %v2219_v5 = vpop.f32.mrf.mxu0  ;;  %v3303_v38 = vshll.u32 %v3198_v24, 16  ;;  %v2389_v36 = vshrl.u32 %v2280_v30, 16  ;;  %v2392_v0 = vshll.u32 %v2280_v30, 16  ;;  %v3291_v21 = vrot.slane %v3290_v28, 4  ;;  %v3200_v28 = vld [vmem:[#allocation2 + $0x9c] sm:$0xf] }
 0x321   : > { %v2402_v39 = vshrl.u32 %v2281_v11, 16  ;;  %v3301_v8 = vrot.slane %v3300_v6, 4  ;;  %v5705_v63 = vadd.f32 %v5660_v10, %v2076_v47  ;;  %v5707_v32 = vunpack.c.l.b16 %v2377_v50 }
 0x322   : > { %v3305_v55 = vrot.slane %v3303_v38, 5  ;;  %v2391_v57 = vrot.slane %v2389_v36, 4  ;;  %v2394_v58 = vrot.slane %v2392_v0, 5  ;;  %v5709_v12 = vunpack.c.l.b16 %v2387_v23 }
 0x323   : > { %v3296_v52 = vsel %vm5285_vm9, %v3291_v21, %v5687_v13  ;;  %v5716_v51 = vrot.slane %v2398_v53, 5  ;;  %v2404_v25 = vrot.slane %v2402_v39, 4  ;;  %v3317_v11 = vshll.u32 %v3200_v28, 16 }
 0x324   : > { %v1679_v34 = vpop.f32.mrf.mxu2  ;;  %v3306_v30 = vsel %vm5285_vm9, %v3301_v8, %v3305_v55  ;;  %v2760_v0 = vshrl.u32 %v2659_v37, 16  ;;  %v2777_v50 = vshll.u32 %v2661_v60, 16 }
 0x325   : > { %v1715_v33 = vadd.f32 %v1679_v34, %v1315_v54  ;;  %v2749_v54 = vsel %vm5279_vm8, %v4320_v42, %v2748_v26  ;;  %v2282_v34 = vld [vmem:[#allocation2 + $0x88] sm:$0x1]  ;;  %v2765_v42 = vshrl.u32 %v2660_v2, 16  ;;  %v2774_v26 = vshrl.u32 %v2661_v60, 16 }
 0x326   : > { %v2041_v45 = vpop.f32.mrf.mxu3  ;;  %v1317_v27 = vpop.f32.mrf.mxu1  ;;  %v2870_v24 = vunpack.c.l.b16 %v2749_v54  ;;  %v2408_v36 = vshll.u32 %v2282_v34, 16  ;;  %v2520_v54 = vpack.c.b16 %v5709_v12, %v5707_v32  ;;  %v5726_v8 = vrot.slane %v3317_v11, 5  ;;  %v4590_v34 = vld [vmem:[#allocation2 + $0x80] sm:$0xff] }
 0x327   : > { %v2077_v48 = vadd.f32 %v2041_v45, %v1715_v33  ;;  %v1318_v19 = vadd.f32 %v1317_v27, %v5547_v40  ;;  %v2758_v40 = vsel %vm5279_vm8, %v2750_v20, %v2757_v3  ;;  %v3426_v20 = vunpack.c.l.b16 %v3296_v52 }
 0x328   : > { %v5693_v31 = vpop.f32.mrf.mxu0  ;;  %v3321_v27 = vshrl.u32 %v3200_v28, 16  ;;  %v2776_v21 = vrot.slane %v2774_v26, 7 }
 0x329   : > { %2599 = vmatmul.bf16.gmra.mxu1 %v2519_v16  ;;  %2962 = vmatmul.bf16.gmra.mxu2 %v2882_v41  ;;  %v3199_v16 = vld [vmem:[#allocation2 + $0x98] sm:$0xf]  ;;  %v5714_v18 = vadd.f32 %v2219_v5, %v2077_v48  ;;  %v2871_v41 = vunpack.c.l.b16 %v2758_v40  ;;  %v2395_v5 = vor.u32 %v2394_v58, %v2391_v57  ;;  %v2767_v48 = vrot.slane %v2765_v42, 7  ;;  %v3201_v40 = vld [vmem:[#allocation2 + $0xa0] sm:$0x1] }
 0x32a   : > { %v3308_v33 = vshrl.u32 %v3199_v16, 16  ;;  %v3311_v45 = vshll.u32 %v3199_v16, 16  ;;  %v3323_v55 = vrot.slane %v3321_v27, 4  ;;  %v2283_v57 = vld [vmem:[#allocation2 + $0x98] sm:$0xf] }
 0x32b   : > { %3140 = vmatmul.bf16.gmra.mxu3 %v4589_v46  ;;  %3518 = vmatmul.bf16.gmra.mxu0 %v3438_v7  ;;  %v3427_v46 = vunpack.c.l.b16 %v3306_v30  ;;  %v2405_v7 = vor.u32 %v2404_v25, %v5716_v51  ;;  %v2396_v23 = vrot.slane %v2395_v5, 4  ;;  %v4321_v25 = vrot.slane %v2760_v0, 11 }
 0x32c   : > { %v1682_v62 = vpop.f32.mrf.mxu2  ;;  %v3310_v53 = vrot.slane %v3308_v33, 4  ;;  %v3313_v39 = vrot.slane %v3311_v45, 5  ;;  %v2416_v5 = vshll.u32 %v2283_v57, 16 }
 0x32d   : > { %v1716_v10 = vadd.f32 %v1682_v62, %v1318_v19  ;;  %v2768_v19 = vshll.u32 %v2660_v2, 16  ;;  %v3439_v52 = vpack.c.b16 %v3427_v46, %v3426_v20  ;;  %v2406_v16 = vrot.slane %v2405_v7, 4  ;;  %v2284_v20 = vld [vmem:[#allocation2 + $0x9c] sm:$0xf]  ;;  %v3203_v7 = vld [vmem:[#allocation2 + $0xb4] sm:$0xf] }
 0x32e   : > { %v2044_v47 = vpop.f32.mrf.mxu3  ;;  %v1319_v13 = vpop.f32.mrf.mxu1  ;;  %v2410_v62 = vrot.slane %v2408_v36, 5  ;;  %v2401_v32 = vsel %vm5285_vm9, %v2396_v23, %v5716_v51  ;;  %v3314_v12 = vor.u32 %v3313_v39, %v3310_v53  ;;  %v2422_v27 = vshll.u32 %v2284_v20, 16  ;;  %v2663_v39 = vld [vmem:[#allocation2 + $0xb0] sm:$0xf] }
 0x32f   : > { %v2078_v3 = vadd.f32 %v2044_v47, %v1716_v10  ;;  %v1320_v6 = vadd.f32 %v1319_v13, %v5566_v15  ;;  %v2883_v15 = vpack.c.b16 %v2871_v41, %v2870_v24  ;;  %v2770_v60 = vor.u32 %v2768_v19, %v2767_v48 }
 0x330   : > { %v5721_v38 = vpop.f32.mrf.mxu0  ;;  %v2772_v10 = vrot.slane %v2767_v48, 4  ;;  %v2779_v47 = vor.u32 %v2777_v50, %v2776_v21  ;;  %v3327_v24 = vshll.u32 %v3201_v40, 16  ;;  %v2413_v41 = vshrl.u32 %v2283_v57, 16  ;;  %v2664_v57 = vld [vmem:[#allocation2 + $0xb4] sm:$0xf] }
 0x331   : > { %v3324_v13 = vor.u32 %v3323_v55, %v5726_v8  ;;  %v2411_v33 = vsel %vm5285_vm9, %v2406_v16, %v2410_v62  ;;  %v5737_v45 = vunpack.c.l.b16 %v2401_v32  ;;  %v2771_v51 = vsel %vm5279_vm8, %v4321_v25, %v2770_v60 }
 0x332   : > { %v3315_v11 = vrot.slane %v3314_v12, 4  ;;  %v2426_v46 = vshrl.u32 %v2284_v20, 16  ;;  %v5744_v36 = vadd.f32 %v5693_v31, %v2078_v3  ;;  %v3329_v48 = vrot.slane %v3327_v24, 5 }
 0x333   : > { %v3325_v0 = vrot.slane %v3324_v13, 4  ;;  %v2415_v19 = vrot.slane %v2413_v41, 4  ;;  %v2418_v21 = vrot.slane %v2416_v5, 5  ;;  %v5746_v23 = vunpack.c.l.b16 %v2411_v33 }
 0x334   : > { %v1684_v58 = vpop.f32.mrf.mxu2  ;;  %v2872_v53 = vunpack.c.l.b16 %v2771_v51  ;;  %v3345_v31 = vshrl.u32 %v3203_v7, 16  ;;  %v3320_v62 = vsel %vm5285_vm9, %v3315_v11, %v5726_v8  ;;  %v5754_v25 = vrot.slane %v2422_v27, 5 }
 0x335   : > { %v1717_v2 = vadd.f32 %v1684_v58, %v1320_v6  ;;  %v2780_v6 = vsel %vm5279_vm8, %v2772_v10, %v2779_v47  ;;  %v3330_v10 = vsel %vm5285_vm9, %v3325_v0, %v3329_v48  ;;  %v2285_v47 = vld [vmem:[#allocation2 + $0xa0] sm:$0x1]  ;;  %v2787_v32 = vshrl.u32 %v2663_v39, 16 }
 0x336   : > { %v2046_v28 = vpop.f32.mrf.mxu3  ;;  %v1322_v30 = vpop.f32.mrf.mxu1  ;;  %v2873_v16 = vunpack.c.l.b16 %v2780_v6  ;;  %v2796_v12 = vshrl.u32 %v2664_v57, 16  ;;  %v3347_v8 = vrot.slane %v3345_v31, 4  ;;  %v3429_v13 = vunpack.c.l.b16 %v3330_v10 }
 0x337   : > { %v2079_v37 = vadd.f32 %v2046_v28, %v1717_v2  ;;  %v1323_v42 = vadd.f32 %v1322_v30, %v5582_v49  ;;  %v3202_v49 = vld [vmem:[#allocation2 + $0xb0] sm:$0xf]  ;;  %v2428_v2 = vrot.slane %v2426_v46, 4  ;;  %v2419_v30 = vor.u32 %v2418_v21, %v2415_v19 }
 0x338   : > { %v5732_v26 = vpop.f32.mrf.mxu0  ;;  %v3335_v58 = vshll.u32 %v3202_v49, 16  ;;  %v2432_v5 = vshll.u32 %v2285_v47, 16  ;;  %v2521_v33 = vpack.c.b16 %v5746_v23, %v5737_v45  ;;  %v2884_v51 = vpack.c.b16 %v2873_v16, %v2872_v53 }
 0x339   : > { %2604 = vmatmul.bf16.gmra.mxu1 %v2520_v54  ;;  %2967 = vmatmul.bf16.gmra.mxu2 %v2883_v15  ;;  %v3332_v54 = vshrl.u32 %v3202_v49, 16  ;;  %v5749_v15 = vadd.f32 %v5721_v38, %v2079_v37  ;;  %v2429_v20 = vor.u32 %v2428_v2, %v5754_v25  ;;  %v2420_v6 = vrot.slane %v2419_v30, 4  ;;  %v2287_v2 = vld [vmem:[#allocation2 + $0xb4] sm:$0xf] }
 0x33a   : > { %v3337_v41 = vrot.slane %v3335_v58, 5  ;;  %v2789_v27 = vrot.slane %v2787_v32, 7  ;;  %v2790_v46 = vshll.u32 %v2663_v39, 16  ;;  %v2799_v0 = vshll.u32 %v2664_v57, 16  ;;  %v4591_v58 = vld [vmem:[#allocation2 + $0x98] sm:$0xff] }
 0x33b   : > { %3145 = vmatmul.bf16.gmra.mxu3 %v4590_v34  ;;  %3523 = vmatmul.bf16.gmra.mxu0 %v3439_v52  ;;  %v3341_v52 = vshll.u32 %v3203_v7, 16  ;;  %v2662_v34 = vld [vmem:[#allocation2 + $0xac] sm:$0x8]  ;;  %v3334_v24 = vrot.slane %v3332_v54, 4  ;;  %v2798_v7 = vrot.slane %v2796_v12, 7  ;;  %v2430_v31 = vrot.slane %v2429_v20, 4 }
 0x33c   : > { %v1687_v50 = vpop.f32.mrf.mxu2  ;;  %v2782_v49 = vshrl.u32 %v2662_v34, 16  ;;  %v2434_v45 = vrot.slane %v2432_v5, 5  ;;  %v2425_v39 = vsel %vm5285_vm9, %v2420_v6, %v5754_v25  ;;  %v2794_v16 = vrot.slane %v2789_v27, 4 }
 0x33d   : > { %v1718_v40 = vadd.f32 %v1687_v50, %v1323_v42  ;;  %v5759_v37 = vrot.slane %v3341_v52, 5  ;;  %v3428_v42 = vunpack.c.l.b16 %v3320_v62  ;;  %v3338_v21 = vor.u32 %v3337_v41, %v3334_v24 }
 0x33e   : > { %v2049_v55 = vpop.f32.mrf.mxu3  ;;  %v1324_v3 = vpop.f32.mrf.mxu1  ;;  %v4322_v57 = vrot.slane %v2782_v49, 11  ;;  %v2801_v62 = vor.u32 %v2799_v0, %v2798_v7  ;;  %v2435_v32 = vsel %vm5285_vm9, %v2430_v31, %v2434_v45  ;;  %v2446_v24 = vshll.u32 %v2287_v2, 16  ;;  %v2666_v49 = vld [vmem:[#allocation2 + $0xc8] sm:$0xf] }
 0x33f   : > { %v2080_v28 = vadd.f32 %v2049_v55, %v1718_v40  ;;  %v1325_v60 = vadd.f32 %v1324_v3, %v5610_v35  ;;  %v3204_v35 = vld [vmem:[#allocation2 + $0xb8] sm:$0x1]  ;;  %v3348_v50 = vor.u32 %v3347_v8, %v5759_v37  ;;  %v2286_v40 = vld [vmem:[#allocation2 + $0xb0] sm:$0xf]  ;;  %v3440_v52 = vpack.c.b16 %v3429_v13, %v3428_v42  ;;  %v3205_v8 = vld [vmem:[#allocation2 + $0xc8] sm:$0xf] }
 0x340   : > { %v2229_v38 = vpop.f32.mrf.mxu0  ;;  %v3351_v54 = vshll.u32 %v3204_v35, 16  ;;  %v2792_v3 = vor.u32 %v2790_v46, %v2789_v27  ;;  %v3339_v10 = vrot.slane %v3338_v21, 4  ;;  %v2440_v34 = vshll.u32 %v2286_v40, 16  ;;  %v3206_v42 = vld [vmem:[#allocation2 + $0xcc] sm:$0xf] }
 0x341   : > { %v3349_v47 = vrot.slane %v3348_v50, 4  ;;  %v5773_v12 = vadd.f32 %v5732_v26, %v2080_v28  ;;  %v2450_v41 = vshrl.u32 %v2287_v2, 16  ;;  %v2511_v5 = vunpack.c.l.b16 %v2425_v39  ;;  %v2667_v27 = vld [vmem:[#allocation2 + $0xcc] sm:$0xf]  ;;  %v2665_v39 = vld [vmem:[#allocation2 + $0xc4] sm:$0x8] }
 0x342   : > { %v3353_v30 = vrot.slane %v3351_v54, 5  ;;  %v2793_v35 = vsel %vm5279_vm8, %v4322_v57, %v2792_v3  ;;  %v3356_v46 = vshrl.u32 %v3205_v8, 16  ;;  %v3359_v7 = vshll.u32 %v3205_v8, 16 }
 0x343   : > { %v3365_v0 = vshll.u32 %v3206_v42, 16  ;;  %v2512_v50 = vunpack.c.l.b16 %v2435_v32  ;;  %v2448_v54 = vrot.slane %v2446_v24, 5  ;;  %v2818_v57 = vshrl.u32 %v2667_v27, 16 }
 0x344   : > { %v1689_v11 = vpop.f32.mrf.mxu2  ;;  %v3354_v28 = vsel %vm5285_vm9, %v3349_v47, %v3353_v30  ;;  %v3358_v3 = vrot.slane %v3356_v46, 4  ;;  %v2804_v24 = vshrl.u32 %v2665_v39, 16  ;;  %v2812_v8 = vshll.u32 %v2666_v49, 16  ;;  %v3208_v39 = vld [vmem:[#allocation2 + $0xe0] sm:$0xf] }
 0x345   : > { %v1719_v48 = vadd.f32 %v1689_v11, %v1325_v60  ;;  %v2437_v60 = vshrl.u32 %v2286_v40, 16  ;;  %v2452_v40 = vrot.slane %v2450_v41, 4  ;;  %v3431_v45 = vunpack.c.l.b16 %v3354_v28 }
 0x346   : > { %v2051_v19 = vpop.f32.mrf.mxu3  ;;  %v1327_v55 = vpop.f32.mrf.mxu1 }
 0x347   : > { %v2081_v23 = vadd.f32 %v2051_v19, %v1719_v48  ;;  %v1328_v25 = vadd.f32 %v1327_v55, %v5560_v56  ;;  %v3344_v56 = vsel %vm5285_vm9, %v3339_v10, %v5759_v37  ;;  %v3369_v48 = vshrl.u32 %v3206_v42, 16 }
 0x348   : > { %v5765_v53 = vpop.f32.mrf.mxu0  ;;  %v2874_v55 = vunpack.c.l.b16 %v2793_v35  ;;  %v2809_v37 = vshrl.u32 %v2666_v49, 16  ;;  %v3430_v31 = vunpack.c.l.b16 %v3344_v56  ;;  %v2522_v10 = vpack.c.b16 %v2512_v50, %v2511_v5 }
 0x349   : > { %2609 = vmatmul.bf16.gmra.mxu1 %v2521_v33  ;;  %2972 = vmatmul.bf16.gmra.mxu2 %v2884_v51  ;;  %v5776_v13 = vadd.f32 %v2229_v38, %v2081_v23  ;;  %v2802_v33 = vsel %vm5279_vm8, %v2794_v16, %v2801_v62  ;;  %v2439_v51 = vrot.slane %v2437_v60, 4  ;;  %v2442_v38 = vrot.slane %v2440_v34, 5  ;;  %v3207_v34 = vld [vmem:[#allocation2 + $0xd0] sm:$0x1] }
 0x34a   : > { %v3361_v16 = vrot.slane %v3359_v7, 5  ;;  %v5787_v62 = vrot.slane %v3365_v0, 5  ;;  %v3371_v2 = vrot.slane %v3369_v48, 4  ;;  %v2453_v47 = vor.u32 %v2452_v40, %v2448_v54  ;;  %v2289_v40 = vld [vmem:[#allocation2 + $0xc8] sm:$0xf] }
 0x34b   : > { %3150 = vmatmul.bf16.gmra.mxu3 %v4591_v58  ;;  %3528 = vmatmul.bf16.gmra.mxu0 %v3440_v52  ;;  %v2875_v58 = vunpack.c.l.b16 %v2802_v33  ;;  %v2288_v52 = vld [vmem:[#allocation2 + $0xb8] sm:$0x1]  ;;  %v2443_v23 = vor.u32 %v2442_v38, %v2439_v51  ;;  %v2811_v41 = vrot.slane %v2809_v37, 7  ;;  %v2820_v33 = vrot.slane %v2818_v57, 7  ;;  %v2290_v37 = vld [vmem:[#allocation2 + $0xcc] sm:$0xf] }
 0x34c   : > { %v1692_v20 = vpop.f32.mrf.mxu2  ;;  %v2456_v30 = vshll.u32 %v2288_v52, 16  ;;  %v2821_v51 = vshll.u32 %v2667_v27, 16  ;;  %v3441_v56 = vpack.c.b16 %v3431_v45, %v3430_v31  ;;  %v3362_v28 = vor.u32 %v3361_v16, %v3358_v3 }
 0x34d   : > { %v1720_v6 = vadd.f32 %v1692_v20, %v1328_v25  ;;  %v2885_v25 = vpack.c.b16 %v2875_v58, %v2874_v55  ;;  %v2444_v35 = vrot.slane %v2443_v23, 4  ;;  %v3375_v5 = vshll.u32 %v3207_v34, 16 }
 0x34e   : > { %v2054_v26 = vpop.f32.mrf.mxu3  ;;  %v1329_v11 = vpop.f32.mrf.mxu1  ;;  %v2454_v46 = vrot.slane %v2453_v47, 4  ;;  %v2458_v7 = vrot.slane %v2456_v30, 5  ;;  %v4323_v0 = vrot.slane %v2804_v24, 11  ;;  %v2814_v48 = vor.u32 %v2812_v8, %v2811_v41  ;;  %v2669_v24 = vld [vmem:[#allocation2 + $0xe0] sm:$0xf] }
 0x34f   : > { %v2082_v19 = vadd.f32 %v2054_v26, %v1720_v6  ;;  %v1330_v60 = vadd.f32 %v1329_v11, %v5577_v44  ;;  %v4592_v26 = vld [vmem:[#allocation2 + $0xb0] sm:$0xff]  ;;  %v3372_v44 = vor.u32 %v3371_v2, %v5787_v62  ;;  %v2449_v49 = vsel %vm5285_vm9, %v2444_v35, %v2448_v54 }
 0x350   : > { %v2234_v21 = vpop.f32.mrf.mxu0  ;;  %v2816_v50 = vrot.slane %v2811_v41, 4  ;;  %v2823_v27 = vor.u32 %v2821_v51, %v2820_v33  ;;  %v3363_v55 = vrot.slane %v3362_v28, 4  ;;  %v3377_v52 = vrot.slane %v3375_v5, 5 }
 0x351   : > { %v3373_v58 = vrot.slane %v3372_v44, 4  ;;  %v5794_v31 = vadd.f32 %v5765_v53, %v2082_v19  ;;  %v2459_v23 = vsel %vm5285_vm9, %v2454_v46, %v2458_v7  ;;  %v2513_v3 = vunpack.c.l.b16 %v2449_v49  ;;  %v2291_v44 = vld [vmem:[#allocation2 + $0xd0] sm:$0x1] }
 0x352   : > { %v2815_v16 = vsel %vm5279_vm8, %v4323_v0, %v2814_v48  ;;  %v2461_v2 = vshrl.u32 %v2289_v40, 16  ;;  %v2824_v53 = vsel %vm5279_vm8, %v2816_v50, %v2823_v27  ;;  %v2474_v19 = vshrl.u32 %v2290_v37, 16  ;;  %v2668_v48 = vld [vmem:[#allocation2 + $0xdc] sm:$0x8] }
 0x353   : > { %v3380_v41 = vshrl.u32 %v3208_v39, 16  ;;  %v3383_v35 = vshll.u32 %v3208_v39, 16  ;;  %v2480_v39 = vshll.u32 %v2291_v44, 16 }
 0x354   : > { %v1694_v32 = vpop.f32.mrf.mxu2 }
 0x355   : > { %v1721_v42 = vadd.f32 %v1694_v32, %v1330_v60  ;;  %v2464_v60 = vshll.u32 %v2289_v40, 16  ;;  %v2514_v32 = vunpack.c.l.b16 %v2459_v23  ;;  %v3382_v50 = vrot.slane %v3380_v41, 4 }
 0x356   : > { %v2056_v20 = vpop.f32.mrf.mxu3  ;;  %v1332_v6 = vpop.f32.mrf.mxu1  ;;  %v3385_v40 = vrot.slane %v3383_v35, 5  ;;  %v2482_v35 = vrot.slane %v2480_v39, 5 }
 0x357   : > { %v2083_v38 = vadd.f32 %v2056_v20, %v1721_v42  ;;  %v1333_v45 = vadd.f32 %v1332_v6, %v5597_v22  ;;  %v2470_v22 = vshll.u32 %v2290_v37, 16  ;;  %v2670_v20 = vld [vmem:[#allocation2 + $0xe4] sm:$0xf]  ;;  %v2876_v6 = vunpack.c.l.b16 %v2815_v16 }
 0x358   : > { %v2237_v11 = vpop.f32.mrf.mxu0  ;;  %v2466_v28 = vrot.slane %v2464_v60, 5  ;;  %v2840_v49 = vshrl.u32 %v2670_v20, 16  ;;  %v2523_v37 = vpack.c.b16 %v2514_v32, %v2513_v3  ;;  %v2826_v60 = vshrl.u32 %v2668_v48, 16 }
 0x359   : > { %2614 = vmatmul.bf16.gmra.mxu1 %v2522_v10  ;;  %2977 = vmatmul.bf16.gmra.mxu2 %v2885_v25  ;;  %v5799_v57 = vadd.f32 %v2234_v21, %v2083_v38  ;;  %v3209_v10 = vld [vmem:[#allocation2 + $0xe4] sm:$0xf]  ;;  %v3368_v21 = vsel %vm5285_vm9, %v3363_v55, %v5787_v62  ;;  %v3378_v25 = vsel %vm5285_vm9, %v3373_v58, %v3377_v52  ;;  %v5810_v5 = vrot.slane %v2470_v22, 5 }
 0x35a   : > { %v3389_v33 = vshll.u32 %v3209_v10, 16  ;;  %v3393_v51 = vshrl.u32 %v3209_v10, 16  ;;  %v2476_v38 = vrot.slane %v2474_v19, 4  ;;  %v2831_v62 = vshrl.u32 %v2669_v24, 16 }
 0x35b   : > { %3155 = vmatmul.bf16.gmra.mxu3 %v4592_v26  ;;  %3533 = vmatmul.bf16.gmra.mxu0 %v3441_v56  ;;  %v2877_v26 = vunpack.c.l.b16 %v2824_v53  ;;  %v2463_v56 = vrot.slane %v2461_v2, 4  ;;  %v3432_v7 = vunpack.c.l.b16 %v3368_v21  ;;  %v3433_v0 = vunpack.c.l.b16 %v3378_v25 }
 0x35c   : > { %v1697_v54 = vpop.f32.mrf.mxu2  ;;  %v3391_v55 = vrot.slane %v3389_v33, 5  ;;  %v3395_v58 = vrot.slane %v3393_v51, 4  ;;  %v2833_v10 = vrot.slane %v2831_v62, 7  ;;  %v2834_v22 = vshll.u32 %v2669_v24, 16 }
 0x35d   : > { %v1722_v47 = vadd.f32 %v1697_v54, %v1333_v45  ;;  %v2886_v45 = vpack.c.b16 %v2877_v26, %v2876_v6  ;;  %v2467_v23 = vor.u32 %v2466_v28, %v2463_v56  ;;  %v3210_v54 = vld [vmem:[#allocation2 + $0xe8] sm:$0x1]  ;;  %v3442_v53 = vpack.c.b16 %v3433_v0, %v3432_v7 }
 0x35e   : > { %v2059_v30 = vpop.f32.mrf.mxu3  ;;  %v1334_v34 = vpop.f32.mrf.mxu1  ;;  %v2843_v19 = vshll.u32 %v2670_v20, 16  ;;  %v3386_v25 = vor.u32 %v3385_v40, %v3382_v50  ;;  %v3396_v3 = vor.u32 %v3395_v58, %v3391_v55  ;;  %v3399_v32 = vshll.u32 %v3210_v54, 16 }
 0x35f   : > { %v2084_v8 = vadd.f32 %v2059_v30, %v1722_v47  ;;  %v1335_v27 = vadd.f32 %v1334_v34, %v5619_v61  ;;  %v4593_v30 = vld [vmem:[#allocation2 + $0xc8] sm:$0xff]  ;;  %v2842_v61 = vrot.slane %v2840_v49, 7  ;;  %v2468_v41 = vrot.slane %v2467_v23, 4 }
 0x360   : > { %v2239_v42 = vpop.f32.mrf.mxu0  ;;  %v4324_v51 = vrot.slane %v2826_v60, 11  ;;  %v2836_v6 = vor.u32 %v2834_v22, %v2833_v10  ;;  %v2838_v26 = vrot.slane %v2833_v10, 4  ;;  %v3387_v56 = vrot.slane %v3386_v25, 4 }
 0x361   : > { %v5812_v46 = vadd.f32 %v2237_v11, %v2084_v8  ;;  %v2477_v11 = vor.u32 %v2476_v38, %v5810_v5  ;;  %v2845_v24 = vor.u32 %v2843_v19, %v2842_v61  ;;  %v3397_v28 = vrot.slane %v3396_v3, 4 }
 0x362   : > { %v3401_v44 = vrot.slane %v3399_v32, 5  ;;  %v2473_v0 = vsel %vm5285_vm9, %v2468_v41, %v5810_v5  ;;  %v2837_v49 = vsel %vm5279_vm8, %v4324_v51, %v2836_v6  ;;  %v3392_v40 = vsel %vm5285_vm9, %v3387_v56, %v3391_v55  ;;  %v4594_v55 = vld [vmem:[#allocation2 + $0xe0] sm:$0xff] }
 0x363   : > { %v2478_v8 = vrot.slane %v2477_v11, 4  ;;  %v3434_v39 = vunpack.c.l.b16 %v3392_v40 }
 0x364   : > { %v1699_v52 = vpop.f32.mrf.mxu2  ;;  %v3402_v58 = vsel %vm5285_vm9, %v3397_v28, %v3401_v44 }
 0x365   : > { %v1723_v16 = vadd.f32 %v1699_v52, %v1335_v27  ;;  %v2483_v48 = vsel %vm5285_vm9, %v2478_v8, %v2482_v35  ;;  %v2515_v52 = vunpack.c.l.b16 %v2473_v0  ;;  %v3435_v54 = vunpack.c.l.b16 %v3402_v58 }
 0x366   : > { %v2061_v2 = vpop.f32.mrf.mxu3  ;;  %v1337_v47 = vpop.f32.mrf.mxu1  ;;  %v2516_v5 = vunpack.c.l.b16 %v2483_v48 }
 0x367   : > { %v2085_v34 = vadd.f32 %v2061_v2, %v1723_v16  ;;  %v1338_v20 = vadd.f32 %v1337_v47, %v5564_v9  ;;  %v2846_v9 = vsel %vm5279_vm8, %v2838_v26, %v2845_v24 }
 0x368   : > { %v2242_v21 = vpop.f32.mrf.mxu0  ;;  %v2524_v60 = vpack.c.b16 %v2516_v5, %v2515_v52  ;;  %v4670_v52 = vld [vmem:[%s5098_s23] sm:$0xff]  }
 0x369   : > { %2619 = vmatmul.bf16.gmra.mxu1 %v2523_v37  ;;  %2982 = vmatmul.bf16.gmra.mxu2 %v2886_v45  ;;  %v5816_v33 = vadd.f32 %v2239_v42, %v2085_v34  ;;  %v2878_v37 = vunpack.c.l.b16 %v2837_v49  ;;  %v2879_v45 = vunpack.c.l.b16 %v2846_v9 }
 0x36b   : > { %3160 = vmatmul.bf16.gmra.mxu3 %v4593_v30  ;;  %3538 = vmatmul.bf16.gmra.mxu0 %v3442_v53  ;;  %v2887_v10 = vpack.c.b16 %v2879_v45, %v2878_v37  ;;  %v3443_v30 = vpack.c.b16 %v3435_v54, %v3434_v39  ;;  %v4671_v39 = vunpack.c.l.bf16 %v4670_v52  ;;  %v4672_v54 = vunpack.c.h.bf16 %v4670_v52 }
 0x36c   : > { %v1702_v38 = vpop.f32.mrf.mxu2 }
 0x36d   : > { %v1724_v62 = vadd.f32 %v1702_v38, %v1338_v20 }
 0x36e   : > { %v2064_v7 = vpop.f32.mrf.mxu3  ;;  %v1339_v42 = vpop.f32.mrf.mxu1 }
 0x36f   : > { %v2086_v50 = vadd.f32 %v2064_v7, %v1724_v62  ;;  %v1340_v16 = vadd.f32 %v1339_v42, %v5579_v4 }
 0x370   : > { %v2244_v27 = vpop.f32.mrf.mxu0 }
 0x371   : > { %v5832_v23 = vadd.f32 %v2242_v21, %v2086_v50 }
 0x374   : > { %v1704_v59 = vpop.f32.mrf.mxu2 }
 0x375   : > { %v1725_v2 = vadd.f32 %v1704_v59, %v1340_v16 }
 0x376   : > { %v2066_v11 = vpop.f32.mrf.mxu3  ;;  %v1342_v47 = vpop.f32.mrf.mxu1 }
 0x377   : > { %v2087_v1 = vadd.f32 %v2066_v11, %v1725_v2  ;;  %v1343_v61 = vadd.f32 %v1342_v47, %v5603_v29 }
 0x378   : > { %v2247_v53 = vpop.f32.mrf.mxu0 }
 0x379   : > { %2624 = vmatmul.bf16.gmra.mxu1 %v2524_v60  ;;  %2987 = vmatmul.bf16.gmra.mxu2 %v2887_v10  ;;  %v5835_v22 = vadd.f32 %v2244_v27, %v2087_v1 }
 0x37b   : > { %3165 = vmatmul.bf16.gmra.mxu3 %v4594_v55  ;;  %3543 = vmatmul.bf16.gmra.mxu0 %v3443_v30 }
 0x37c   : > { %v1707_v19 = vpop.f32.mrf.mxu2 }
 0x37d   : > { %v1726_v4 = vadd.f32 %v1707_v19, %v1343_v61 }
 0x37e   : > { %v2069_v34 = vpop.f32.mrf.mxu3  ;;  %v1344_v21 = vpop.f32.mrf.mxu1 }
 0x37f   : > { %v2088_v25 = vadd.f32 %v2069_v34, %v1726_v4  ;;  %v1345_v41 = vadd.f32 %v1344_v21, %v5621_v14  ;;  %v5847_v14 = vld [vmem:[%s5917_s6] ss:$0 sm:$0xff] }
 0x380   : > { %v2249_v3 = vpop.f32.mrf.mxu0 }
 0x381   : > { %v5838_v32 = vadd.f32 %v2247_v53, %v2088_v25 }
 0x384   : > { %v1709_v8 = vpop.f32.mrf.mxu2 }
 0x385   : > { %v1727_v35 = vadd.f32 %v1709_v8, %v1345_v41 }
 0x386   : > { %v2071_v51 = vpop.f32.mrf.mxu3  ;;  %v2590_v6 = vpop.f32.mrf.mxu1 }
 0x387   : > { %v2089_v26 = vadd.f32 %v2071_v51, %v1727_v35  ;;  %v2630_v29 = vadd.f32 %v2590_v6, %v5673_v17  ;;  %v4751_v35 = vld [vmem:[%s5098_s23 + $0x8] sm:$0xff]  }
 0x388   : > { %v3509_v24 = vpop.f32.mrf.mxu0 }
 0x389   : > { %v5841_v20 = vadd.f32 %v2249_v3, %v2089_v26 }
 0x38c   : > { %v2953_v56 = vpop.f32.mrf.mxu2 }
 0x38d   : > { %v2993_v28 = vadd.f32 %v2953_v56, %v2630_v29  ;;  %v4676_v29 = vunpack.c.h.bf16 %v4751_v35 }
 0x38e   : > { %v3131_v44 = vpop.f32.mrf.mxu3  ;;  %v2592_v38 = vpop.f32.mrf.mxu1 }
 0x38f   : > { %v3171_v62 = vadd.f32 %v3131_v44, %v2993_v28  ;;  %v2631_v42 = vadd.f32 %v2592_v38, %v5676_v43 }
 0x390   : > { %v3511_v7 = vpop.f32.mrf.mxu0 }
 0x391   : > { %v3549_v0 = vadd.f32 %v3509_v24, %v3171_v62  ;;  %v4675_v24 = vunpack.c.l.bf16 %v4751_v35 }
 0x393   : > { %v3568_v49 = vadd.f32 %v5847_v14, %v3549_v0 }
 0x394   : > { %v2955_v48 = vpop.f32.mrf.mxu2 }
 0x395   : > { %v2994_v9 = vadd.f32 %v2955_v48, %v2631_v42  ;;  %v3600_v58 = vmul.f32 0.1, %v3568_v49  ;;  %vm3584_vm10 = vcmp.gt.f32.partialorder %v3568_v49, 0.0 }
 0x396   : > { %v3133_v17 = vpop.f32.mrf.mxu3  ;;  %v2595_v50 = vpop.f32.mrf.mxu1 }
 0x397   : > { %v3172_v27 = vadd.f32 %v3133_v17, %v2994_v9  ;;  %v2632_v45 = vadd.f32 %v2595_v50, %v5705_v63  ;;  %v3616_v16 = vsel %vm3584_vm10, %v3568_v49, %v3600_v58 }
 0x398   : > { %v3514_v40 = vpop.f32.mrf.mxu0  ;;  %v3664_v30 = vadd.f32 %v4671_v39, %v3616_v16  ;;  %v4752_v39 = vld [vmem:[%s5098_s23 + $0x10] sm:$0xff]  }
 0x399   : > { %v3550_v5 = vadd.f32 %v3511_v7, %v3172_v27 }
 0x39b   : > { %v3569_v37 = vadd.f32 %v5847_v14, %v3550_v5 }
 0x39c   : > { %v2958_v43 = vpop.f32.mrf.mxu2 }
 0x39d   : > { %vm3585_vm11 = vcmp.gt.f32.partialorder %v3569_v37, 0.0  ;;  %v3601_v59 = vmul.f32 0.1, %v3569_v37  ;;  %v2995_v2 = vadd.f32 %v2958_v43, %v2632_v45 }
 0x39e   : > { %v3136_v11 = vpop.f32.mrf.mxu3  ;;  %v2597_v60 = vpop.f32.mrf.mxu1 }
 0x39f   : > { %v3617_v10 = vsel %vm3585_vm11, %v3569_v37, %v3601_v59  ;;  %v3173_v47 = vadd.f32 %v3136_v11, %v2995_v2  ;;  %v2633_v63 = vadd.f32 %v2597_v60, %v5714_v18  ;;  %v4679_v59 = vunpack.c.l.bf16 %v4752_v39 }
 0x3a0   : > { %v3516_v55 = vpop.f32.mrf.mxu0  ;;  %v3665_v1 = vadd.f32 %v4672_v54, %v3617_v10  ;;  %v4680_v2 = vunpack.c.h.bf16 %v4752_v39  ;;  %v4754_v39 = vld [vmem:[%s5098_s23 + $0x20] sm:$0xff]  }
 0x3a1   : > { %v3551_v53 = vadd.f32 %v3514_v40, %v3173_v47 }
 0x3a2   : > { %v4704_v61 = vpack.c.bf16 %v3665_v1, %v3664_v30 }
 0x3a3   : > { %v3570_v4 = vadd.f32 %v5847_v14, %v3551_v53 }
 0x3a4   : > { %4705 = vst [vmem:[%s5037_s11] sm:$0xff] %v4704_v61   ;;  %v2960_v19 = vpop.f32.mrf.mxu2 }
 0x3a5   : > { %v2996_v34 = vadd.f32 %v2960_v19, %v2633_v63  ;;  %v3602_v8 = vmul.f32 0.1, %v3570_v4  ;;  %vm3586_vm12 = vcmp.gt.f32.partialorder %v3570_v4, 0.0 }
 0x3a6   : > { %v3138_v21 = vpop.f32.mrf.mxu3  ;;  %v2600_v25 = vpop.f32.mrf.mxu1 }
 0x3a7   : > { %v3174_v3 = vadd.f32 %v3138_v21, %v2996_v34  ;;  %v2634_v26 = vadd.f32 %v2600_v25, %v5744_v36  ;;  %v3618_v56 = vsel %vm3586_vm12, %v3570_v4, %v3602_v8 }
 0x3a8   : > { %v3519_v41 = vpop.f32.mrf.mxu0  ;;  %v3666_v48 = vadd.f32 %v4675_v24, %v3618_v56 }
 0x3a9   : > { %v3552_v51 = vadd.f32 %v3516_v55, %v3174_v3 }
 0x3ab   : > { %v3571_v6 = vadd.f32 %v5847_v14, %v3552_v51 }
 0x3ac   : > { %v2963_v18 = vpop.f32.mrf.mxu2 }
 0x3ad   : > { %vm3587_vm13 = vcmp.gt.f32.partialorder %v3571_v6, 0.0  ;;  %v3603_v28 = vmul.f32 0.1, %v3571_v6  ;;  %v2997_v44 = vadd.f32 %v2963_v18, %v2634_v26 }
 0x3ae   : > { %v3141_v38 = vpop.f32.mrf.mxu3  ;;  %v2602_v62 = vpop.f32.mrf.mxu1 }
 0x3af   : > { %v3619_v7 = vsel %vm3587_vm13, %v3571_v6, %v3603_v28  ;;  %v3175_v0 = vadd.f32 %v3141_v38, %v2997_v44  ;;  %v2635_v36 = vadd.f32 %v2602_v62, %v5749_v15  ;;  %v4753_v6 = vld [vmem:[%s5098_s23 + $0x18] sm:$0xff]  }
 0x3b0   : > { %v3521_v42 = vpop.f32.mrf.mxu0  ;;  %v3667_v49 = vadd.f32 %v4676_v29, %v3619_v7  ;;  %v4683_v18 = vunpack.c.l.bf16 %v4753_v6  ;;  %v4684_v56 = vunpack.c.h.bf16 %v4753_v6 }
 0x3b1   : > { %v3553_v9 = vadd.f32 %v3519_v41, %v3175_v0 }
 0x3b2   : > { %v4709_v17 = vpack.c.bf16 %v3667_v49, %v3666_v48 }
 0x3b3   : > { %v3572_v27 = vadd.f32 %v5847_v14, %v3553_v9 }
 0x3b4   : > { %4758 = vst [vmem:[%s5037_s11 + $0x8] sm:$0xff] %v4709_v17   ;;  %v2965_v50 = vpop.f32.mrf.mxu2 }
 0x3b5   : > { %v2998_v40 = vadd.f32 %v2965_v50, %v2635_v36  ;;  %v3604_v45 = vmul.f32 0.1, %v3572_v27  ;;  %vm3588_vm14 = vcmp.gt.f32.partialorder %v3572_v27, 0.0 }
 0x3b6   : > { %v3143_v58 = vpop.f32.mrf.mxu3  ;;  %v2605_v52 = vpop.f32.mrf.mxu1 }
 0x3b7   : > { %v3176_v5 = vadd.f32 %v3143_v58, %v2998_v40  ;;  %v2636_v16 = vadd.f32 %v2605_v52, %v5773_v12  ;;  %v3620_v11 = vsel %vm3588_vm14, %v3572_v27, %v3604_v45 }
 0x3b8   : > { %v3524_v37 = vpop.f32.mrf.mxu0  ;;  %v3668_v61 = vadd.f32 %v4679_v59, %v3620_v11  ;;  %v4687_v59 = vunpack.c.l.bf16 %v4754_v39 }
 0x3b9   : > { %v3554_v54 = vadd.f32 %v3521_v42, %v3176_v5 }
 0x3bb   : > { %v3573_v43 = vadd.f32 %v5847_v14, %v3554_v54 }
 0x3bc   : > { %v2968_v15 = vpop.f32.mrf.mxu2 }
 0x3bd   : > { %vm3589_vm15 = vcmp.gt.f32.partialorder %v3573_v43, 0.0  ;;  %v3605_v60 = vmul.f32 0.1, %v3573_v43  ;;  %v2999_v10 = vadd.f32 %v2968_v15, %v2636_v16 }
 0x3be   : > { %v3146_v47 = vpop.f32.mrf.mxu3  ;;  %v2607_v55 = vpop.f32.mrf.mxu1 }
 0x3bf   : > { %v3621_v30 = vsel %vm3589_vm15, %v3573_v43, %v3605_v60  ;;  %v3177_v1 = vadd.f32 %v3146_v47, %v2999_v10  ;;  %v2637_v12 = vadd.f32 %v2607_v55, %v5776_v13 }
 0x3c0   : > { %v3526_v53 = vpop.f32.mrf.mxu0  ;;  %v3669_v63 = vadd.f32 %v4680_v2, %v3621_v30  ;;  %v4688_v2 = vunpack.c.h.bf16 %v4754_v39 }
 0x3c1   : > { %v3555_v19 = vadd.f32 %v3524_v37, %v3177_v1 }
 0x3c2   : > { %v4714_v4 = vpack.c.bf16 %v3669_v63, %v3668_v61 }
 0x3c3   : > { %v3574_v21 = vadd.f32 %v5847_v14, %v3555_v19 }
 0x3c4   : > { %4759 = vst [vmem:[%s5037_s11 + $0x10] sm:$0xff] %v4714_v4   ;;  %v2970_v34 = vpop.f32.mrf.mxu2 }
 0x3c5   : > { %v3000_v25 = vadd.f32 %v2970_v34, %v2637_v12  ;;  %v3606_v51 = vmul.f32 0.1, %v3574_v21  ;;  %vm3590_vm0 = vcmp.gt.f32.partialorder %v3574_v21, 0.0 }
 0x3c6   : > { %v3148_v3 = vpop.f32.mrf.mxu3  ;;  %v2610_v41 = vpop.f32.mrf.mxu1 }
 0x3c7   : > { %v3178_v8 = vadd.f32 %v3148_v3, %v3000_v25  ;;  %v2638_v29 = vadd.f32 %v2610_v41, %v5794_v31  ;;  %v3622_v28 = vsel %vm3590_vm0, %v3574_v21, %v3606_v51 }
 0x3c8   : > { %v3529_v35 = vpop.f32.mrf.mxu0  ;;  %v3670_v49 = vadd.f32 %v4683_v18, %v3622_v28 }
 0x3c9   : > { %v3556_v26 = vadd.f32 %v3526_v53, %v3178_v8  ;;  %v4755_v8 = vld [vmem:[%s5098_s23 + $0x28] sm:$0xff]  }
 0x3cb   : > { %v3575_v24 = vadd.f32 %v5847_v14, %v3556_v26 }
 0x3cc   : > { %v2973_v13 = vpop.f32.mrf.mxu2 }
 0x3cd   : > { %vm3591_vm1 = vcmp.gt.f32.partialorder %v3575_v24, 0.0  ;;  %v3607_v44 = vmul.f32 0.1, %v3575_v24  ;;  %v3001_v38 = vadd.f32 %v2973_v13, %v2638_v29 }
 0x3ce   : > { %v3151_v62 = vpop.f32.mrf.mxu3  ;;  %v2612_v7 = vpop.f32.mrf.mxu1 }
 0x3cf   : > { %v3623_v0 = vsel %vm3591_vm1, %v3575_v24, %v3607_v44  ;;  %v3179_v42 = vadd.f32 %v3151_v62, %v3001_v38  ;;  %v2639_v31 = vadd.f32 %v2612_v7, %v5799_v57  ;;  %v4691_v24 = vunpack.c.l.bf16 %v4755_v8 }
 0x3d0   : > { %v3531_v48 = vpop.f32.mrf.mxu0  ;;  %v3671_v9 = vadd.f32 %v4684_v56, %v3623_v0 }
 0x3d1   : > { %v3557_v17 = vadd.f32 %v3529_v35, %v3179_v42 }
 0x3d2   : > { %v4719_v36 = vpack.c.bf16 %v3671_v9, %v3670_v49 }
 0x3d3   : > { %v3576_v27 = vadd.f32 %v5847_v14, %v3557_v17 }
 0x3d4   : > { %4760 = vst [vmem:[%s5037_s11 + $0x18] sm:$0xff] %v4719_v36   ;;  %v2975_v50 = vpop.f32.mrf.mxu2 }
 0x3d5   : > { %v3002_v40 = vadd.f32 %v2975_v50, %v2639_v31  ;;  %v3608_v45 = vmul.f32 0.1, %v3576_v27  ;;  %vm3592_vm2 = vcmp.gt.f32.partialorder %v3576_v27, 0.0 }
 0x3d6   : > { %v3153_v58 = vpop.f32.mrf.mxu3  ;;  %v2615_v52 = vpop.f32.mrf.mxu1 }
 0x3d7   : > { %v3180_v5 = vadd.f32 %v3153_v58, %v3002_v40  ;;  %v2640_v16 = vadd.f32 %v2615_v52, %v5812_v46  ;;  %v3624_v15 = vsel %vm3592_vm2, %v3576_v27, %v3608_v45  ;;  %v4756_v58 = vld [vmem:[%s5098_s23 + $0x30] sm:$0xff]  }
 0x3d8   : > { %v3534_v37 = vpop.f32.mrf.mxu0  ;;  %v3672_v1 = vadd.f32 %v4687_v59, %v3624_v15  ;;  %v4695_v45 = vunpack.c.l.bf16 %v4756_v58  ;;  %v4696_v39 = vunpack.c.h.bf16 %v4756_v58 }
 0x3d9   : > { %v3558_v54 = vadd.f32 %v3531_v48, %v3180_v5 }
 0x3db   : > { %v3577_v43 = vadd.f32 %v5847_v14, %v3558_v54 }
 0x3dc   : > { %v2978_v57 = vpop.f32.mrf.mxu2 }
 0x3dd   : > { %vm3593_vm3 = vcmp.gt.f32.partialorder %v3577_v43, 0.0  ;;  %v3609_v11 = vmul.f32 0.1, %v3577_v43  ;;  %v3003_v60 = vadd.f32 %v2978_v57, %v2640_v16 }
 0x3de   : > { %v3156_v10 = vpop.f32.mrf.mxu3  ;;  %v2617_v47 = vpop.f32.mrf.mxu1 }
 0x3df   : > { %v3625_v55 = vsel %vm3593_vm3, %v3577_v43, %v3609_v11  ;;  %v3181_v30 = vadd.f32 %v3156_v10, %v3003_v60  ;;  %v2641_v46 = vadd.f32 %v2617_v47, %v5816_v33  ;;  %v4692_v33 = vunpack.c.h.bf16 %v4755_v8 }
 0x3e0   : > { %v3673_v53 = vadd.f32 %v4688_v2, %v3625_v55  ;;  %v3536_v61 = vpop.f32.mrf.mxu0 }
 0x3e1   : > { %v3559_v63 = vadd.f32 %v3534_v37, %v3181_v30 }
 0x3e2   : > { %v4724_v19 = vpack.c.bf16 %v3673_v53, %v3672_v1 }
 0x3e3   : > { %v3578_v12 = vadd.f32 %v5847_v14, %v3559_v63 }
 0x3e4   : > { %4761 = vst [vmem:[%s5037_s11 + $0x20] sm:$0xff] %v4724_v19   ;;  %v2980_v4 = vpop.f32.mrf.mxu2 }
 0x3e5   : > { %v3004_v34 = vadd.f32 %v2980_v4, %v2641_v46  ;;  %v3610_v41 = vmul.f32 0.1, %v3578_v12  ;;  %vm3594_vm4 = vcmp.gt.f32.partialorder %v3578_v12, 0.0  ;;  %v4757_v4 = vld [vmem:[%s5098_s23 + $0x38] sm:$0xff]  }
 0x3e6   : > { %v3158_v21 = vpop.f32.mrf.mxu3  ;;  %v2620_v25 = vpop.f32.mrf.mxu1 }
 0x3e7   : > { %v3182_v3 = vadd.f32 %v3158_v21, %v3004_v34  ;;  %v2642_v26 = vadd.f32 %v2620_v25, %v5832_v23  ;;  %v3626_v18 = vsel %vm3594_vm4, %v3578_v12, %v3610_v41  ;;  %v4699_v21 = vunpack.c.l.bf16 %v4757_v4 }
 0x3e8   : > { %v3539_v51 = vpop.f32.mrf.mxu0  ;;  %v3674_v7 = vadd.f32 %v4691_v24, %v3626_v18  ;;  %v4700_v25 = vunpack.c.h.bf16 %v4757_v4 }
 0x3e9   : > { %v3560_v35 = vadd.f32 %v3536_v61, %v3182_v3 }
 0x3eb   : > { %v3579_v6 = vadd.f32 %v5847_v14, %v3560_v35 }
 0x3ec   : > { %v2983_v29 = vpop.f32.mrf.mxu2 }
 0x3ed   : > { %vm3595_vm5 = vcmp.gt.f32.partialorder %v3579_v6, 0.0  ;;  %v3611_v56 = vmul.f32 0.1, %v3579_v6  ;;  %v3005_v13 = vadd.f32 %v2983_v29, %v2642_v26 }
 0x3ee   : > { %v3161_v28 = vpop.f32.mrf.mxu3  ;;  %v2622_v44 = vpop.f32.mrf.mxu1 }
 0x3ef   : > { %v3627_v38 = vsel %vm3595_vm5, %v3579_v6, %v3611_v56  ;;  %v3183_v62 = vadd.f32 %v3161_v28, %v3005_v13  ;;  %v2643_v49 = vadd.f32 %v2622_v44, %v5835_v22 }
 0x3f0   : > { %v3675_v0 = vadd.f32 %v4692_v33, %v3627_v38  ;;  %v3541_v23 = vpop.f32.mrf.mxu0 }
 0x3f1   : > { %v3561_v42 = vadd.f32 %v3539_v51, %v3183_v62 }
 0x3f2   : > { %v4729_v48 = vpack.c.bf16 %v3675_v0, %v3674_v7 }
 0x3f3   : > { %v3580_v17 = vadd.f32 %v5847_v14, %v3561_v42 }
 0x3f4   : > { %4762 = vst [vmem:[%s5037_s11 + $0x28] sm:$0xff] %v4729_v48   ;;  %v2985_v9 = vpop.f32.mrf.mxu2 }
 0x3f5   : > { %v3006_v36 = vadd.f32 %v2985_v9, %v2643_v49  ;;  %v3612_v40 = vmul.f32 0.1, %v3580_v17  ;;  %vm3596_vm6 = vcmp.gt.f32.partialorder %v3580_v17, 0.0 }
 0x3f6   : > { %v3163_v31 = vpop.f32.mrf.mxu3  ;;  %v2625_v50 = vpop.f32.mrf.mxu1 }
 0x3f7   : > { %v3184_v27 = vadd.f32 %v3163_v31, %v3006_v36  ;;  %v2644_v37 = vadd.f32 %v2625_v50, %v5838_v32  ;;  %v3628_v54 = vsel %vm3596_vm6, %v3580_v17, %v3612_v40 }
 0x3f8   : > { %v3544_v2 = vpop.f32.mrf.mxu0  ;;  %v3676_v11 = vadd.f32 %v4695_v45, %v3628_v54 }
 0x3f9   : > { %v3562_v52 = vadd.f32 %v3541_v23, %v3184_v27 }
 0x3fb   : > { %v3581_v5 = vadd.f32 %v5847_v14, %v3562_v52 }
 0x3fc   : > { %v2988_v22 = vpop.f32.mrf.mxu2 }
 0x3fd   : > { %vm3597_vm7 = vcmp.gt.f32.partialorder %v3581_v5, 0.0  ;;  %v3613_v43 = vmul.f32 0.1, %v3581_v5  ;;  %v3007_v16 = vadd.f32 %v2988_v22, %v2644_v37 }
 0x3fe   : > { %v3166_v59 = vpop.f32.mrf.mxu3  ;;  %v2627_v10 = vpop.f32.mrf.mxu1 }
 0x3ff   : > { %v3629_v57 = vsel %vm3597_vm7, %v3581_v5, %v3613_v43  ;;  %v3185_v15 = vadd.f32 %v3166_v59, %v3007_v16  ;;  %v2645_v32 = vadd.f32 %v2627_v10, %v5841_v20 }
 0x400   : > { %v3677_v60 = vadd.f32 %v4696_v39, %v3629_v57  ;;  %v3546_v19 = vpop.f32.mrf.mxu0 }
 0x401   : > { %v3563_v47 = vadd.f32 %v3544_v2, %v3185_v15 }
 0x402   : > { %v4734_v55 = vpack.c.bf16 %v3677_v60, %v3676_v11 }
 0x403   : > { %v3582_v1 = vadd.f32 %v5847_v14, %v3563_v47 }
 0x404   : > { %4763 = vst [vmem:[%s5037_s11 + $0x30] sm:$0xff] %v4734_v55   ;;  %v2990_v30 = vpop.f32.mrf.mxu2 }
 0x405   : > { %v3008_v53 = vadd.f32 %v2990_v30, %v2645_v32  ;;  %v3614_v46 = vmul.f32 0.1, %v3582_v1  ;;  %vm3598_vm8 = vcmp.gt.f32.partialorder %v3582_v1, 0.0 }
 0x406   : > { %v3168_v61 = vpop.f32.mrf.mxu3 }
 0x407   : > { %v3186_v63 = vadd.f32 %v3168_v61, %v3008_v53  ;;  %v3630_v3 = vsel %vm3598_vm8, %v3582_v1, %v3614_v46 }
 0x408   : > { %v3678_v8 = vadd.f32 %v4699_v21, %v3630_v3 }
 0x409   : > { %v3564_v12 = vadd.f32 %v3546_v19, %v3186_v63 }
 0x40b   : > { %v3583_v34 = vadd.f32 %v5847_v14, %v3564_v12 }
 0x40d   : > { %vm3599_vm9 = vcmp.gt.f32.partialorder %v3583_v34, 0.0  ;;  %v3615_v20 = vmul.f32 0.1, %v3583_v34 }
 0x40f   : > { %v3631_v41 = vsel %vm3599_vm9, %v3583_v34, %v3615_v20 }
 0x410   : > { %v3679_v35 = vadd.f32 %v4700_v25, %v3631_v41 }
 0x412   : > { %v4739_v51 = vpack.c.bf16 %v3679_v35, %v3678_v8 }
 0x414   : > { %4764 = vst [vmem:[%s5037_s11 + $0x38] sm:$0xff] %v4739_v51  }
 0x415 PF: > { %s17_s28 = sadd.s32 1, %s4896_s28   ;;  %s5924_s24 = smov %s4888_s26 }
 0x416   : > { %p14_p0 = scmp.ge.s32.totalorder %s17_s28, 6   ;;  %s5925_s25 = smov %s4892_s27 }
 0x417   : > { %s5926_s26 = smov %s5929_s29  ;;  %s5927_s27 = smov %s5933_s30 }
 0x418   :  { %16 = sbr.rel (!%p14_p0) target bundleno = 3 (0x3), region = 112 }

// kernel: upsample_block_forward.5
= control target key start
LH: loop header
LB: loop body
LE: loop exit
PB: predicated region body
PF: predicated region fallthrough
CT: control target
= control target key end

     0   :  { %s4878_s24 = smov 0   ;;  %s4880_s25 = smov 0   ;;  %s5853_s0 = inlined_call_operand.vmem [shape: bf16[2,16,16,128], index: 0, kind: input, shape index: {}, may-alias: {0,1,2}]   ;;  %s5854_s1 = inlined_call_operand.vmem [shape: bf16[2,16,16,128], index: 1, kind: input, shape index: {}, may-alias: {0,1,2}]   ;;  %s5855_s2 = inlined_call_operand.vmem [shape: bf16[2,16,16,128], index: 2, kind: input, shape index: {}, may-alias: {0,1,2}]   ;;  %s5856_s3 = inlined_call_operand.vmem [shape: bf16[128,128], index: 3, kind: input, shape index: {}]   ;;  %s5857_s4 = inlined_call_operand.vmem [shape: f32[1,128], index: 4, kind: input, shape index: {}]   ;;  %s5858_s5 = inlined_call_operand.vmem [shape: bf16[9,128,128], index: 5, kind: input, shape index: {}]   ;;  %s5859_s6 = inlined_call_operand.vmem [shape: f32[1,128], index: 6, kind: input, shape index: {}]   ;;  %s5860_s7 = inlined_call_operand.vmem [shape: f32[2,16,16,128], index: 7, kind: output, shape index: {}]  }
   0x1   :  { %s4882_s26 = smov 0   ;;  %s4884_s27 = smov 0  }
   0x2   :  { %s4886_s28 = smov 0  }
   0x3 LB: > { %s26_s29 = sadd.s32 1, %s4825_s26  ;;  %s29_s30 = sadd.s32 1, %s4829_s27  ;;  %s4833_s28 = sphi %s4886_s28, %s17_s28   ;;  %s4829_s27 = sphi %s4884_s27, %s5869_s27   ;;  %s4825_s26 = sphi %s4882_s26, %s5868_s26   ;;  %s4821_s25 = sphi %s4880_s25, %s5867_s25   ;;  %s4817_s24 = sphi %s4878_s24, %s5866_s24  }
   0x4   : > { %p27_p0 = scmp.ge.s32.totalorder %s26_s29, 2  ;;  %p3847_p1 = scmp.ge.s32.totalorder %s4833_s28, 1 }
   0x5   : > { %p323_p2 = scmp.lt.s32.totalorder %s4833_s28, 5 }
   0x6   : > { %s5871_s29 = smov (%p27_p0, %s26_s29), 0  ;;  %s5873_s30 = smov (!%p27_p0, %s29_s30), %s4829_s27 }
   0x7   : > { %p324_p3 = pnand %p3847_p1, %p323_p2  ;;  %p31_p4 = scmp.ge.s32.totalorder %s5873_s30, 2 }
   0x8   : > { %s4916_s10 = sshll.u32 (!%p324_p3), %s4817_s24, 3  ;;  %p392_p5 = scmp.lt.s32.totalorder (!%p324_p3), %s4821_s25, 1 }
   0x9   : > { %s5875_s30 = smov (%p31_p4, %s5873_s30), 0  ;;  %327 = sbr.rel (%p324_p3) target bundleno = 1043 (0x413), region = 48 }
   0xa   : > { %p394_p6 = scmp.lt.s32.totalorder (!%p324_p3), %s4916_s10, 15  ;;  %s3853_s15 = sadd.s32 (!%p324_p3), 4294967295, %s4916_s10 }
   0xb   : > { %p404_p7 = scmp.gt.s32.totalorder (!%p324_p3), %s3853_s15, 0  ;;  %p3854_p8 = scmp.lt.s32.totalorder (!%p324_p3), %s3853_s15, 15 }
   0xc   : > { %s420_s19 = sadd.s32 (!%p324_p3), 8, %s4916_s10  ;;  %p3937_p10 = scmp.le.s32.totalorder (!%p324_p3), %s4817_s24, 0 }
   0xd   : > { %p4949_p9 = scmp.lt.s32.totalorder (!%p324_p3), %s420_s19, 15 }
   0xe   : > { %v4913_v0 = vld [vmem:[%s5856_s3 + $0x38] sm:$0xff]  ;;  %v4835_v1 = vmov 0   ;;  %v4925_v2 = vld [vmem:[%s5856_s3 + $0x30] sm:$0xff]  ;;  %s5877_s25 = smov (!%p392_p5, %s4821_s25), 1  ;;  %v4940_v3 = vld [vmem:[%s5856_s3 + $0x28] sm:$0xff]  ;;  %s5879_s15 = smov (!%p404_p7, %s3853_s15), 0 }
   0xf   : > { %466 = vst [vmem:[#allocation2 + $0x4] sm:$0xf] %v4835_v1  ;;  %620 = vmatpush.bf16.msra.mxu0 %v4913_v0  ;;  %4702 = vmatpush.bf16.msra.mxu1 %v4913_v0  ;;  %s395_s13 = scalar_select %p394_p6, %s4916_s10, 15  ;;  %v4959_v4 = vld [vmem:[%s5856_s3 + $0x20] sm:$0xff]  ;;  %v4975_v5 = vld [vmem:[%s5856_s3 + $0x18] sm:$0xff]  ;;  %v5004_v6 = vld [vmem:[%s5856_s3 + $0x10] sm:$0xff] }
  0x10   : > { %4703 = vmatpush.bf16.msra.mxu2 %v4913_v0  ;;  %4704 = vmatpush.bf16.msra.mxu3 %v4913_v0  ;;  %468 = vst [vmem:[#allocation2 + $0x1c] sm:$0xf] %v4835_v1  ;;  %s4931_s14 = sshll.u32 %s5877_s25, 5  ;;  %s5881_s19 = smov (!%p4949_p9, %s420_s19), 15  ;;  %v5015_v7 = vld [vmem:[%s5856_s3 + $0x8] sm:$0xff]  ;;  %v5027_v8 = vld [vmem:[%s5856_s3] sm:$0xff] }
  0x11   : > { %s3849_s16 = sshll.u32 %s395_s13, 1  ;;  %470 = vst [vmem:[#allocation2 + $0x34] sm:$0xf] %v4835_v1  ;;  %s5883_s15 = smov (!%p3854_p8, %s5879_s15), 15  ;;  %v5058_v19 = vld [vmem:[%s5857_s4] ss:$0 sm:$0xff] }
  0x12   : > { %472 = vst [vmem:[#allocation2 + $0x4c] sm:$0xf] %v4835_v1  ;;  %s4947_s20 = sadd.s32 %s4931_s14, %s3849_s16  ;;  %s5885_s19 = smov (!%p4949_p9, %s5881_s19), 15 }
  0x13   : > { %621 = vmatpush.bf16.msra.mxu0 %v4925_v2  ;;  %4705 = vmatpush.bf16.msra.mxu1 %v4925_v2  ;;  %474 = vst [vmem:[#allocation2 + $0x64] sm:$0xf] %v4835_v1  ;;  %s3859_s25 = sshll.u32 %s5883_s15, 1  ;;  %s3872_s8 = sshll.u32 %s4947_s20, 3 }
  0x14   : > { %4706 = vmatpush.bf16.msra.mxu2 %v4925_v2  ;;  %4707 = vmatpush.bf16.msra.mxu3 %v4925_v2  ;;  %476 = vst [vmem:[#allocation2 + $0x7c] sm:$0xf] %v4835_v1  ;;  %s412_s11 = sadd.s32 %s3859_s25, %s4931_s14  ;;  %s3866_s12 = sshll.u32 %s5885_s19, 1 }
  0x15   : > { %478 = vst [vmem:[#allocation2 + $0x94] sm:$0xf] %v4835_v1  ;;  %s3861_s13 = sshll.u32 %s412_s11, 2  ;;  %s429_s15 = sadd.s32 %s3866_s12, %s4931_s14 }
  0x16   : > { %480 = vst [vmem:[#allocation2 + $0xac] sm:$0xf] %v4835_v1  ;;  %s4985_s18 = scalar_lea.vmem %s5854_s1, %s3861_s13  ;;  %s4987_s21 = sshll.u32 %s429_s15, 2 }
  0x17   : > { %622 = vmatpush.bf16.msra.mxu0 %v4940_v3  ;;  %4708 = vmatpush.bf16.msra.mxu1 %v4940_v3  ;;  %s431_s19 = scalar_lea.vmem %s5855_s2, %s4987_s21  ;;  %s4996_s10 = scalar_lea.vmem %s5860_s7, %s3872_s8  ;;  %482 = vst [vmem:[#allocation2 + $0xc4] sm:$0xf] %v4835_v1 }
  0x18   : > { %4709 = vmatpush.bf16.msra.mxu2 %v4940_v3  ;;  %4710 = vmatpush.bf16.msra.mxu3 %v4940_v3  ;;  %484 = vst [vmem:[#allocation2 + $0xdc] sm:$0xf] %v4835_v1  ;;  %s3851_s13 = sshll.u32 %s4947_s20, 2 }
  0x19   : > { %485 = vst [vmem:[#allocation2 + $0x10] sm:$0xf] %v4835_v1  ;;  %s5032_s23 = scalar_lea.vmem %s5853_s0, %s3851_s13 }
  0x1a   : > { %487 = vst [vmem:[#allocation2 + $0x28] sm:$0xf] %v4835_v1  ;;  %v4497_v9 = vld [vmem:[%s5032_s23] sm:$0xff]  ;;  %v4499_v10 = vld [vmem:[%s5032_s23 + $0x10] sm:$0xff]  ;;  %v4498_v13 = vld [vmem:[%s5032_s23 + $0x8] sm:$0xff] }
  0x1b   : > { %623 = vmatpush.bf16.msra.mxu0 %v4959_v4  ;;  %4711 = vmatpush.bf16.msra.mxu1 %v4959_v4  ;;  %489 = vst [vmem:[#allocation2 + $0x40] sm:$0xf] %v4835_v1  ;;  %v4501_v11 = vld [vmem:[%s5032_s23 + $0x20] sm:$0xff]  ;;  %v4503_v12 = vld [vmem:[%s5032_s23 + $0x30] sm:$0xff]  ;;  %v4500_v14 = vld [vmem:[%s5032_s23 + $0x18] sm:$0xff] }
  0x1c   : > { %4712 = vmatpush.bf16.msra.mxu2 %v4959_v4  ;;  %4713 = vmatpush.bf16.msra.mxu3 %v4959_v4  ;;  %491 = vst [vmem:[#allocation2 + $0x58] sm:$0xf] %v4835_v1  ;;  %v4502_v15 = vld [vmem:[%s5032_s23 + $0x28] sm:$0xff]  ;;  %v4504_v16 = vld [vmem:[%s5032_s23 + $0x38] sm:$0xff] }
  0x1d   : > { %493 = vst [vmem:[#allocation2 + $0x70] sm:$0xf] %v4835_v1 }
  0x1e   : > { %495 = vst [vmem:[#allocation2 + $0x88] sm:$0xf] %v4835_v1 }
  0x1f   : > { %624 = vmatpush.bf16.msra.mxu0 %v4975_v5  ;;  %4714 = vmatpush.bf16.msra.mxu1 %v4975_v5  ;;  %497 = vst [vmem:[#allocation2 + $0xa0] sm:$0xf] %v4835_v1 }
  0x20   : > { %4715 = vmatpush.bf16.msra.mxu2 %v4975_v5  ;;  %4716 = vmatpush.bf16.msra.mxu3 %v4975_v5  ;;  %499 = vst [vmem:[#allocation2 + $0xb8] sm:$0xf] %v4835_v1 }
  0x21   : > { %501 = vst [vmem:[#allocation2 + $0xd0] sm:$0xf] %v4835_v1 }
  0x22   : > { %503 = vst [vmem:[#allocation2 + $0xe8] sm:$0xf] %v4835_v1 }
  0x23   : > { %625 = vmatpush.bf16.msra.mxu0 %v5004_v6  ;;  %4717 = vmatpush.bf16.msra.mxu1 %v5004_v6 }
  0x24   : > { %4718 = vmatpush.bf16.msra.mxu2 %v5004_v6  ;;  %4719 = vmatpush.bf16.msra.mxu3 %v5004_v6 }
  0x27   : > { %626 = vmatpush.bf16.msra.mxu0 %v5015_v7  ;;  %4720 = vmatpush.bf16.msra.mxu1 %v5015_v7 }
  0x28   : > { %4721 = vmatpush.bf16.msra.mxu2 %v5015_v7  ;;  %4722 = vmatpush.bf16.msra.mxu3 %v5015_v7 }
  0x2b   : > { %627 = vmatpush.bf16.msra.mxu0 %v5027_v8  ;;  %4723 = vmatpush.bf16.msra.mxu1 %v5027_v8 }
  0x2c   : > { %4724 = vmatpush.bf16.msra.mxu2 %v5027_v8  ;;  %4725 = vmatpush.bf16.msra.mxu3 %v5027_v8 }
  0x2e   : > { %628 = vmatmul.bf16.vlgmr.msra.gmra.mxu0 %v4497_v9  ;;  %638 = vmatmul.bf16.vlgmr.msra.gmra.mxu1 %v4499_v10 }
  0x2f   : > { %648 = vmatmul.bf16.vlgmr.msra.gmra.mxu2 %v4501_v11  ;;  %658 = vmatmul.bf16.vlgmr.msra.gmra.mxu3 %v4503_v12 }
  0x3e   : > { %633 = vmatmul.bf16.gmra.mxu0 %v4498_v13  ;;  %643 = vmatmul.bf16.gmra.mxu1 %v4500_v14 }
  0x3f   : > { %653 = vmatmul.bf16.gmra.mxu2 %v4502_v15  ;;  %663 = vmatmul.bf16.gmra.mxu3 %v4504_v16 }
  0xab   : > { %v629_v17 = vpop.f32.mrf.mxu0  ;;  %v639_v18 = vpop.f32.mrf.mxu1 }
  0xac   : > { %v630_v20 = vadd.f32 %v5058_v19, %v629_v17  ;;  %v640_v21 = vadd.f32 %v5058_v19, %v639_v18 }
  0xae   : > { %v685_v26 = vmul.f32 0.1, %v630_v20  ;;  %v689_v27 = vmul.f32 0.1, %v640_v21  ;;  %vm669_vm0 = vcmp.gt.f32.partialorder %v630_v20, 0.0  ;;  %vm673_vm1 = vcmp.gt.f32.partialorder %v640_v21, 0.0 }
  0xb0   : > { %v701_v34 = vsel %vm669_vm0, %v630_v20, %v685_v26  ;;  %v705_v35 = vsel %vm673_vm1, %v640_v21, %v689_v27 }
  0xb2   : > { %v649_v22 = vpop.f32.mrf.mxu2  ;;  %v659_v23 = vpop.f32.mrf.mxu3 }
  0xb3   : > { %v631_v24 = vpop.f32.mrf.mxu0  ;;  %v641_v25 = vpop.f32.mrf.mxu1  ;;  %v650_v32 = vadd.f32 %v5058_v19, %v649_v22  ;;  %v660_v33 = vadd.f32 %v5058_v19, %v659_v23 }
  0xb4   : > { %v632_v28 = vadd.f32 %v5058_v19, %v631_v24  ;;  %v642_v29 = vadd.f32 %v5058_v19, %v641_v25 }
  0xb5   : > { %v693_v42 = vmul.f32 0.1, %v650_v32  ;;  %v697_v43 = vmul.f32 0.1, %v660_v33  ;;  %vm677_vm4 = vcmp.gt.f32.partialorder %v650_v32, 0.0  ;;  %vm681_vm5 = vcmp.gt.f32.partialorder %v660_v33, 0.0 }
  0xb6   : > { %vm670_vm2 = vcmp.gt.f32.partialorder %v632_v28, 0.0  ;;  %v686_v30 = vmul.f32 0.1, %v632_v28  ;;  %vm674_vm3 = vcmp.gt.f32.partialorder %v642_v29, 0.0  ;;  %v690_v31 = vmul.f32 0.1, %v642_v29 }
  0xb7   : > { %v709_v50 = vsel %vm677_vm4, %v650_v32, %v693_v42  ;;  %v713_v51 = vsel %vm681_vm5, %v660_v33, %v697_v43 }
  0xb8   : > { %v702_v36 = vsel %vm670_vm2, %v632_v28, %v686_v30  ;;  %v706_v37 = vsel %vm674_vm3, %v642_v29, %v690_v31 }
  0xb9   : > { %v4606_v38 = vpack.c.bf16 %v702_v36, %v701_v34  ;;  %v4616_v39 = vpack.c.bf16 %v706_v37, %v705_v35 }
  0xba   : > { %v651_v40 = vpop.f32.mrf.mxu2  ;;  %v661_v41 = vpop.f32.mrf.mxu3 }
  0xbb   : > { %4685 = vst [vmem:[#allocation2 + $0x20] sm:$0xff] %v4606_v38   ;;  %v652_v44 = vadd.f32 %v5058_v19, %v651_v40  ;;  %v662_v45 = vadd.f32 %v5058_v19, %v661_v41  ;;  %v634_v46 = vpop.f32.mrf.mxu0  ;;  %v644_v47 = vpop.f32.mrf.mxu1 }
  0xbc   : > { %4687 = vst [vmem:[#allocation2 + $0x50] sm:$0xff] %v4616_v39   ;;  %v635_v56 = vadd.f32 %v5058_v19, %v634_v46  ;;  %v645_v57 = vadd.f32 %v5058_v19, %v644_v47 }
  0xbd   : > { %vm678_vm6 = vcmp.gt.f32.partialorder %v652_v44, 0.0  ;;  %v694_v48 = vmul.f32 0.1, %v652_v44  ;;  %vm682_vm7 = vcmp.gt.f32.partialorder %v662_v45, 0.0  ;;  %v698_v49 = vmul.f32 0.1, %v662_v45 }
  0xbe   : > { %v687_v62 = vmul.f32 0.1, %v635_v56  ;;  %v691_v63 = vmul.f32 0.1, %v645_v57  ;;  %vm671_vm8 = vcmp.gt.f32.partialorder %v635_v56, 0.0  ;;  %vm675_vm9 = vcmp.gt.f32.partialorder %v645_v57, 0.0 }
  0xbf   : > { %v710_v52 = vsel %vm678_vm6, %v652_v44, %v694_v48  ;;  %v714_v53 = vsel %vm682_vm7, %v662_v45, %v698_v49 }
  0xc0   : > { %v4626_v54 = vpack.c.bf16 %v710_v52, %v709_v50  ;;  %v4636_v55 = vpack.c.bf16 %v714_v53, %v713_v51  ;;  %v703_v14 = vsel %vm671_vm8, %v635_v56, %v687_v62  ;;  %v707_v15 = vsel %vm675_vm9, %v645_v57, %v691_v63 }
  0xc2   : > { %4689 = vst [vmem:[#allocation2 + $0x80] sm:$0xff] %v4626_v54   ;;  %v654_v58 = vpop.f32.mrf.mxu2  ;;  %v664_v59 = vpop.f32.mrf.mxu3 }
  0xc3   : > { %4691 = vst [vmem:[#allocation2 + $0xb0] sm:$0xff] %v4636_v55   ;;  %v636_v60 = vpop.f32.mrf.mxu0  ;;  %v646_v61 = vpop.f32.mrf.mxu1  ;;  %v655_v12 = vadd.f32 %v5058_v19, %v654_v58  ;;  %v665_v13 = vadd.f32 %v5058_v19, %v664_v59 }
  0xc4   : > { %v637_v1 = vadd.f32 %v5058_v19, %v636_v60  ;;  %v647_v9 = vadd.f32 %v5058_v19, %v646_v61 }
  0xc5   : > { %v695_v23 = vmul.f32 0.1, %v655_v12  ;;  %v699_v24 = vmul.f32 0.1, %v665_v13  ;;  %vm679_vm12 = vcmp.gt.f32.partialorder %v655_v12, 0.0  ;;  %vm683_vm13 = vcmp.gt.f32.partialorder %v665_v13, 0.0 }
  0xc6   : > { %vm672_vm10 = vcmp.gt.f32.partialorder %v637_v1, 0.0  ;;  %v688_v10 = vmul.f32 0.1, %v637_v1  ;;  %vm676_vm11 = vcmp.gt.f32.partialorder %v647_v9, 0.0  ;;  %v692_v11 = vmul.f32 0.1, %v647_v9 }
  0xc7   : > { %v711_v29 = vsel %vm679_vm12, %v655_v12, %v695_v23  ;;  %v715_v30 = vsel %vm683_vm13, %v665_v13, %v699_v24 }
  0xc8   : > { %v704_v16 = vsel %vm672_vm10, %v637_v1, %v688_v10  ;;  %v708_v17 = vsel %vm676_vm11, %v647_v9, %v692_v11 }
  0xc9   : > { %v4611_v18 = vpack.c.bf16 %v704_v16, %v703_v14  ;;  %v4621_v20 = vpack.c.bf16 %v708_v17, %v707_v15 }
  0xca   : > { %v656_v21 = vpop.f32.mrf.mxu2  ;;  %v666_v22 = vpop.f32.mrf.mxu3 }
  0xcb   : > { %4686 = vst [vmem:[#allocation2 + $0x38] sm:$0xff] %v4611_v18   ;;  %v657_v25 = vadd.f32 %v5058_v19, %v656_v21  ;;  %v667_v26 = vadd.f32 %v5058_v19, %v666_v22 }
  0xcc   : > { %4688 = vst [vmem:[#allocation2 + $0x68] sm:$0xff] %v4621_v20  }
  0xcd   : > { %vm680_vm14 = vcmp.gt.f32.partialorder %v657_v25, 0.0  ;;  %v696_v27 = vmul.f32 0.1, %v657_v25  ;;  %vm684_vm15 = vcmp.gt.f32.partialorder %v667_v26, 0.0  ;;  %v700_v28 = vmul.f32 0.1, %v667_v26 }
  0xcf   : > { %v712_v31 = vsel %vm680_vm14, %v657_v25, %v696_v27  ;;  %v716_v32 = vsel %vm684_vm15, %v667_v26, %v700_v28  ;;  %753 = sbr.rel (%p3937_p10) target bundleno = 385 (0x181), region = 52 }
  0xd0   : > { %v4631_v33 = vpack.c.bf16 %v712_v31, %v711_v29  ;;  %v4641_v34 = vpack.c.bf16 %v716_v32, %v715_v30 }
  0xd2   : > { %4690 = vst [vmem:[#allocation2 + $0x98] sm:$0xff] %v4631_v33  }
  0xd3   : > { %4692 = vst [vmem:[#allocation2 + $0xc8] sm:$0xff] %v4641_v34  }
  0xd4   : > { %762 = vmatpush.bf16.msra.mxu0 %v4913_v0  ;;  %v4505_v35 = vld [vmem:[%s4985_s18] sm:$0xff] }
  0xd8   : > { %763 = vmatpush.bf16.msra.mxu0 %v4925_v2 }
  0xdc   : > { %764 = vmatpush.bf16.msra.mxu0 %v4940_v3 }
  0xe0   : > { %765 = vmatpush.bf16.msra.mxu0 %v4959_v4 }
  0xe4   : > { %766 = vmatpush.bf16.msra.mxu0 %v4975_v5 }
  0xe8   : > { %767 = vmatpush.bf16.msra.mxu0 %v5004_v6 }
  0xec   : > { %768 = vmatpush.bf16.msra.mxu0 %v5015_v7 }
  0xf0   : > { %769 = vmatpush.bf16.msra.mxu0 %v5027_v8 }
  0xf3   : > { %770 = vmatmul.bf16.vlgmr.msra.gmra.mxu0 %v4505_v35 }
 0x170   : > { %v771_v36 = vpop.f32.mrf.mxu0 }
 0x171   : > { %v772_v37 = vadd.f32 %v5058_v19, %v771_v36 }
 0x173   : > { %v778_v39 = vmul.f32 0.1, %v772_v37  ;;  %vm776_vm0 = vcmp.gt.f32.partialorder %v772_v37, 0.0 }
 0x175   : > { %v780_v42 = vsel %vm776_vm0, %v772_v37, %v778_v39 }
 0x178   : > { %v773_v38 = vpop.f32.mrf.mxu0 }
 0x179   : > { %v774_v40 = vadd.f32 %v5058_v19, %v773_v38 }
 0x17b   : > { %vm777_vm1 = vcmp.gt.f32.partialorder %v774_v40, 0.0  ;;  %v779_v41 = vmul.f32 0.1, %v774_v40 }
 0x17d   : > { %v781_v43 = vsel %vm777_vm1, %v774_v40, %v779_v41 }
 0x17e   : > { %v4646_v44 = vpack.c.bf16 %v781_v43, %v780_v42 }
 0x180   : > { %4693 = vst [vmem:[#allocation2 + $0x8] sm:$0xff] %v4646_v44  }
 0x181 PF: > { %p3942_p11 = scmp.ne.s32.totalorder %s4817_s24, 0 }
 0x183   : > { %789 = sbr.rel (%p3942_p11) target bundleno = 395 (0x18b), region = 56 }
 0x188   : > { %v4836_v45 = vmov 0  }
 0x189   : > { %790 = vst [vmem:[#allocation2 + $0x8] sm:$0xf] %v4836_v45 }
 0x18a   : > { %791 = vst [vmem:[#allocation2 + $0xc] sm:$0xf] %v4836_v45 }
 0x18b PF: > { %p3943_p12 = scmp.ge.s32.totalorder %s4817_s24, 1 }
 0x18d   : > { %795 = sbr.rel (%p3943_p12) target bundleno = 575 (0x23f), region = 60 }
 0x192   : > { %804 = vmatpush.bf16.msra.mxu0 %v4913_v0  ;;  %v4506_v46 = vld [vmem:[%s431_s19] sm:$0xff] }
 0x196   : > { %805 = vmatpush.bf16.msra.mxu0 %v4925_v2 }
 0x19a   : > { %806 = vmatpush.bf16.msra.mxu0 %v4940_v3 }
 0x19e   : > { %807 = vmatpush.bf16.msra.mxu0 %v4959_v4 }
 0x1a2   : > { %808 = vmatpush.bf16.msra.mxu0 %v4975_v5 }
 0x1a6   : > { %809 = vmatpush.bf16.msra.mxu0 %v5004_v6 }
 0x1aa   : > { %810 = vmatpush.bf16.msra.mxu0 %v5015_v7 }
 0x1ae   : > { %811 = vmatpush.bf16.msra.mxu0 %v5027_v8 }
 0x1b1   : > { %812 = vmatmul.bf16.vlgmr.msra.gmra.mxu0 %v4506_v46 }
 0x22e   : > { %v813_v0 = vpop.f32.mrf.mxu0 }
 0x22f   : > { %v814_v2 = vadd.f32 %v5058_v19, %v813_v0 }
 0x231   : > { %v820_v47 = vmul.f32 0.1, %v814_v2  ;;  %vm818_vm2 = vcmp.gt.f32.partialorder %v814_v2, 0.0 }
 0x233   : > { %v822_v6 = vsel %vm818_vm2, %v814_v2, %v820_v47 }
 0x236   : > { %v815_v3 = vpop.f32.mrf.mxu0 }
 0x237   : > { %v816_v4 = vadd.f32 %v5058_v19, %v815_v3 }
 0x239   : > { %vm819_vm3 = vcmp.gt.f32.partialorder %v816_v4, 0.0  ;;  %v821_v5 = vmul.f32 0.1, %v816_v4 }
 0x23b   : > { %v823_v7 = vsel %vm819_vm3, %v816_v4, %v821_v5 }
 0x23c   : > { %v4651_v48 = vpack.c.bf16 %v823_v7, %v822_v6 }
 0x23e   : > { %4694 = vst [vmem:[#allocation2 + $0xe0] sm:$0xff] %v4651_v48  }
 0x23f PF: > { %p3948_p13 = scmp.ne.s32.totalorder %s4817_s24, 1 }
 0x241   : > { %832 = sbr.rel (%p3948_p13) target bundleno = 585 (0x249), region = 64 }
 0x246   : > { %v4837_v8 = vmov 0  }
 0x247   : > { %834 = vst [vmem:[#allocation2 + $0xe0] sm:$0xf] %v4837_v8 }
 0x248   : > { %835 = vst [vmem:[#allocation2 + $0xe4] sm:$0xf] %v4837_v8 }
 0x249 PF: > { %v4530_v49 = vld [vmem:[%s5858_s5 + $0x78] sm:$0xff]  ;;  %v4529_v19 = vld [vmem:[%s5858_s5 + $0x70] sm:$0xff]  ;;  %v4528_v50 = vld [vmem:[%s5858_s5 + $0x68] sm:$0xff]  ;;  %vm861_vm4 = vsmask.f32 256 }
 0x24a   : > { %4726 = vmatpush.bf16.msra.mxu1 %v4530_v49  ;;  %4727 = vmatpush.bf16.msra.mxu2 %v4530_v49  ;;  %v4527_v51 = vld [vmem:[%s5858_s5 + $0x60] sm:$0xff]  ;;  %v4526_v52 = vld [vmem:[%s5858_s5 + $0x58] sm:$0xff]  ;;  %v4525_v53 = vld [vmem:[%s5858_s5 + $0x50] sm:$0xff]  ;;  %vm862_vm5 = vsmask.f32 4368 }
 0x24b   : > { %4728 = vmatpush.bf16.msra.mxu3 %v4530_v49  ;;  %1169 = vmatpush.bf16.msra.mxu0 %v4530_v49  ;;  %v4524_v54 = vld [vmem:[%s5858_s5 + $0x48] sm:$0xff]  ;;  %v4523_v55 = vld [vmem:[%s5858_s5 + $0x40] sm:$0xff]  ;;  %v4538_v56 = vld [vmem:[%s5858_s5 + $0xb8] sm:$0xff]  ;;  %vm1371_vm6 = vsmask.f32 3328 }
 0x24c   : > { %v4522_v57 = vld [vmem:[%s5858_s5 + $0x38] sm:$0xff]  ;;  %v4511_v59 = vld [vmem:[#allocation2 + $0x68] sm:$0xff]  ;;  %v4537_v1 = vld [vmem:[%s5858_s5 + $0xb0] sm:$0xff]  ;;  %vm1372_vm7 = vsmask.f32 7440 }
 0x24d   : > { %v4509_v58 = vld [vmem:[#allocation2 + $0x38] sm:$0xff]  ;;  %v4507_v61 = vld [vmem:[#allocation2 + $0x8] sm:$0xff]  ;;  %v4521_v9 = vld [vmem:[%s5858_s5 + $0x30] sm:$0xff] }
 0x24e   : > { %4729 = vmatpush.bf16.msra.mxu1 %v4529_v19  ;;  %4730 = vmatpush.bf16.msra.mxu2 %v4529_v19  ;;  %v4513_v60 = vld [vmem:[#allocation2 + $0x98] sm:$0xff]  ;;  %v1347_v10 = vld [vmem:[#allocation2 + $0x8] sm:$0xf]  ;;  %v1348_v11 = vld [vmem:[#allocation2 + $0xc] sm:$0xf] }
 0x24f   : > { %4731 = vmatpush.bf16.msra.mxu3 %v4529_v19  ;;  %1170 = vmatpush.bf16.msra.mxu0 %v4529_v19  ;;  %v4554_v62 = vld [vmem:[%s5858_s5 + $0xf8] sm:$0xff]  ;;  %v4553_v12 = vld [vmem:[%s5858_s5 + $0xf0] sm:$0xff]  ;;  %v4536_v14 = vld [vmem:[%s5858_s5 + $0xa8] sm:$0xff]  ;;  %v1375_v16 = vshrl.u32 %v1347_v10, 16  ;;  %v1378_v17 = vshll.u32 %v1347_v10, 16  ;;  %v1384_v21 = vshll.u32 %v1348_v11, 16 }
 0x250   : > { %v4562_v63 = vld [vmem:[%s5858_s5 + $0x138] sm:$0xff]  ;;  %v4561_v13 = vld [vmem:[%s5858_s5 + $0x130] sm:$0xff]  ;;  %v4520_v15 = vld [vmem:[%s5858_s5 + $0x28] sm:$0xff]  ;;  %v1388_v22 = vshrl.u32 %v1348_v11, 16 }
 0x251   : > { %v838_v18 = vld [vmem:[#allocation2 + $0x8] sm:$0xf]  ;;  %v5160_v20 = vld [vmem:[#allocation2 + $0xc] sm:$0xf]  ;;  %v5168_v25 = vld [vmem:[#allocation2 + $0x20] sm:$0xf] }
 0x252   : > { %4732 = vmatpush.bf16.msra.mxu1 %v4528_v50  ;;  %4733 = vmatpush.bf16.msra.mxu2 %v4528_v50  ;;  %v4552_v23 = vld [vmem:[%s5858_s5 + $0xe8] sm:$0xff]  ;;  %v837_v26 = vld [vmem:[#allocation2 + $0x4] sm:$0x8]  ;;  %v870_v27 = vshrl.u32 %v838_v18, 16  ;;  %v879_v28 = vshrl.u32 %v5160_v20, 16  ;;  %v1377_v32 = vrot.slane %v1375_v16, 4  ;;  %vm5213_vm8 = vmor %vm861_vm4, %vm862_vm5 }
 0x253   : > { %4734 = vmatpush.bf16.msra.mxu3 %v4528_v50  ;;  %1171 = vmatpush.bf16.msra.mxu0 %v4528_v50  ;;  %v4560_v24 = vld [vmem:[%s5858_s5 + $0x128] sm:$0xff]  ;;  %v5171_v29 = vld [vmem:[#allocation2 + $0x24] sm:$0xf]  ;;  %v1380_v33 = vrot.slane %v1378_v17, 5  ;;  %v5179_v34 = vrot.slane %v1384_v21, 5  ;;  %v1390_v35 = vrot.slane %v1388_v22, 4  ;;  %vm5219_vm9 = vmor %vm1371_vm6, %vm1372_vm7 }
 0x254   : > { %v4535_v30 = vld [vmem:[%s5858_s5 + $0xa0] sm:$0xff]  ;;  %v1349_v36 = vld [vmem:[#allocation2 + $0x10] sm:$0x1]  ;;  %v1758_v37 = vshrl.u32 %v5168_v25, 16  ;;  %v865_v40 = vshrl.u32 %v837_v26, 16  ;;  %v1767_v42 = vshrl.u32 %v5171_v29, 16 }
 0x255   : > { %v4519_v31 = vld [vmem:[%s5858_s5 + $0x20] sm:$0xff]  ;;  %v1728_v41 = vld [vmem:[#allocation2 + $0x1c] sm:$0x8]  ;;  %v4510_v43 = vld [vmem:[#allocation2 + $0x50] sm:$0xff]  ;;  %v872_v45 = vrot.slane %v870_v27, 7  ;;  %v873_v46 = vshll.u32 %v838_v18, 16  ;;  %v1381_v5 = vor.u32 %v1380_v33, %v1377_v32  ;;  %v1391_v6 = vor.u32 %v1390_v35, %v5179_v34 }
 0x256   : > { %4735 = vmatpush.bf16.msra.mxu1 %v4527_v51  ;;  %4736 = vmatpush.bf16.msra.mxu2 %v4527_v51  ;;  %v4551_v38 = vld [vmem:[%s5858_s5 + $0xe0] sm:$0xff]  ;;  %v881_v0 = vrot.slane %v879_v28, 7  ;;  %v882_v2 = vshll.u32 %v5160_v20, 16  ;;  %v4514_v3 = vld [vmem:[#allocation2 + $0xb0] sm:$0xff]  ;;  %v4534_v47 = vld [vmem:[%s5858_s5 + $0x98] sm:$0xff]  ;;  %v1394_v7 = vshll.u32 %v1349_v36, 16 }
 0x257   : > { %4737 = vmatpush.bf16.msra.mxu3 %v4527_v51  ;;  %1172 = vmatpush.bf16.msra.mxu0 %v4527_v51  ;;  %v4559_v39 = vld [vmem:[%s5858_s5 + $0x120] sm:$0xff]  ;;  %v4518_v4 = vld [vmem:[%s5858_s5 + $0x18] sm:$0xff]  ;;  %v1753_v8 = vshrl.u32 %v1728_v41, 16  ;;  %v1760_v49 = vrot.slane %v1758_v37, 7  ;;  %v1761_v19 = vshll.u32 %v5168_v25, 16  ;;  %v1769_v50 = vrot.slane %v1767_v42, 7 }
 0x258   : > { %v4512_v44 = vld [vmem:[#allocation2 + $0x80] sm:$0xff]  ;;  %v1770_v51 = vshll.u32 %v5171_v29, 16  ;;  %v4557_v16 = vld [vmem:[%s5858_s5 + $0x110] sm:$0xff]  ;;  %v4532_v20 = vld [vmem:[%s5858_s5 + $0x88] sm:$0xff] }
 0x259   : > { %v4508_v48 = vld [vmem:[#allocation2 + $0x20] sm:$0xff]  ;;  %v1763_v10 = vor.u32 %v1761_v19, %v1760_v49  ;;  %v1765_v11 = vrot.slane %v1760_v49, 4  ;;  %v4516_v21 = vld [vmem:[%s5858_s5 + $0x8] sm:$0xff]  ;;  %v840_v27 = vld [vmem:[#allocation2 + $0x1c] sm:$0x8] }
 0x25a   : > { %4738 = vmatpush.bf16.msra.mxu1 %v4526_v52  ;;  %4739 = vmatpush.bf16.msra.mxu2 %v4526_v52  ;;  %v1351_v18 = vld [vmem:[#allocation2 + $0x24] sm:$0xf]  ;;  %v4556_v35 = vld [vmem:[%s5858_s5 + $0x108] sm:$0xff] }
 0x25b   : > { %4740 = vmatpush.bf16.msra.mxu3 %v4526_v52  ;;  %1173 = vmatpush.bf16.msra.mxu0 %v4526_v52  ;;  %v4550_v52 = vld [vmem:[%s5858_s5 + $0xd8] sm:$0xff]  ;;  %v5246_v25 = vld [vmem:[#allocation2 + $0x24] sm:$0xf]  ;;  %v1408_v32 = vshll.u32 %v1351_v18, 16  ;;  %v1412_v33 = vshrl.u32 %v1351_v18, 16 }
 0x25c   : > { %v4531_v41 = vld [vmem:[%s5858_s5 + $0x80] sm:$0xff] }
 0x25d   : > { %v4515_v42 = vld [vmem:[%s5858_s5] sm:$0xff]  ;;  %v1414_v49 = vrot.slane %v1412_v33, 4 }
 0x25e   : > { %4741 = vmatpush.bf16.msra.mxu1 %v4525_v53  ;;  %4742 = vmatpush.bf16.msra.mxu2 %v4525_v53 }
 0x25f   : > { %4743 = vmatpush.bf16.msra.mxu3 %v4525_v53  ;;  %1174 = vmatpush.bf16.msra.mxu0 %v4525_v53  ;;  %v4558_v53 = vld [vmem:[%s5858_s5 + $0x118] sm:$0xff] }
 0x262   : > { %4744 = vmatpush.bf16.msra.mxu1 %v4524_v54  ;;  %4745 = vmatpush.bf16.msra.mxu2 %v4524_v54 }
 0x263   : > { %4746 = vmatpush.bf16.msra.mxu3 %v4524_v54  ;;  %1175 = vmatpush.bf16.msra.mxu0 %v4524_v54  ;;  %v3949_v54 = vrot.slane %v865_v40, 11  ;;  %v5260_v40 = vld [vmem:[#allocation2 + $0x38] sm:$0xf] }
 0x264   : > { %v1780_v19 = vshrl.u32 %v5260_v40, 16 }
 0x266   : > { %4747 = vmatpush.bf16.msra.mxu1 %v4523_v55  ;;  %4748 = vmatpush.bf16.msra.mxu2 %v4523_v55 }
 0x267   : > { %4749 = vmatpush.bf16.msra.mxu3 %v4523_v55  ;;  %1176 = vmatpush.bf16.msra.mxu0 %v4523_v55  ;;  %v875_v55 = vor.u32 %v873_v46, %v872_v45 }
 0x269   : > { %1187 = vmatmul.bf16.vlgmr.msra.gmra.mxu1 %v4509_v58  ;;  %1197 = vmatmul.bf16.vlgmr.msra.gmra.mxu2 %v4511_v59  ;;  %v4517_v58 = vld [vmem:[%s5858_s5 + $0x10] sm:$0xff]  ;;  %v876_v17 = vsel %vm5213_vm8, %v3949_v54, %v875_v55 }
 0x26a   : > { %1663 = vmatpush.bf16.msrb.mxu2 %v4538_v56  ;;  %1298 = vmatpush.bf16.msrb.mxu1 %v4522_v57  ;;  %v877_v56 = vrot.slane %v872_v45, 4  ;;  %v4533_v57 = vld [vmem:[%s5858_s5 + $0x90] sm:$0xff]  ;;  %v1218_v36 = vunpack.c.l.b16 %v876_v17  ;;  %v887_v45 = vshrl.u32 %v840_v27, 16  ;;  %v1354_v27 = vld [vmem:[#allocation2 + $0x3c] sm:$0xf] }
 0x26b   : > { %1207 = vmatmul.bf16.vlgmr.msra.gmra.mxu3 %v4513_v60  ;;  %1177 = vmatmul.bf16.vlgmr.msra.gmra.mxu0 %v4507_v61  ;;  %v884_v60 = vor.u32 %v882_v2, %v881_v0  ;;  %v1382_v61 = vrot.slane %v1381_v5, 4  ;;  %v5269_v0 = vld [vmem:[#allocation2 + $0x3c] sm:$0xf] }
 0x26c   : > { %2025 = vmatpush.bf16.msrb.mxu3 %v4554_v62  ;;  %2203 = vmatpush.bf16.msrb.mxu0 %v4562_v63  ;;  %v1392_v62 = vrot.slane %v1391_v6, 4  ;;  %v1396_v63 = vrot.slane %v1394_v7, 5  ;;  %v4547_v7 = vld [vmem:[%s5858_s5 + $0xc0] sm:$0xff]  ;;  %v1789_v54 = vshrl.u32 %v5269_v0, 16  ;;  %v1792_v18 = vshll.u32 %v5269_v0, 16 }
 0x26d   : > { %v885_v22 = vsel %vm5213_vm8, %v877_v56, %v884_v60  ;;  %v3950_v60 = vrot.slane %v887_v45, 11 }
 0x26e   : > { %1664 = vmatpush.bf16.msrb.mxu2 %v4537_v1  ;;  %1299 = vmatpush.bf16.msrb.mxu1 %v4521_v9  ;;  %v4117_v9 = vrot.slane %v1753_v8, 11  ;;  %v1219_v37 = vunpack.c.l.b16 %v885_v22  ;;  %v5280_v8 = vrot.slane %v1408_v32, 5  ;;  %v1791_v17 = vrot.slane %v1789_v54, 7  ;;  %v4593_v22 = vld [vmem:[%s5858_s5 + $0x1f0] sm:$0xff]  ;;  %v5311_v32 = vld [vmem:[#allocation2 + $0x38] sm:$0xf] }
 0x270   : > { %2026 = vmatpush.bf16.msrb.mxu3 %v4553_v12  ;;  %2204 = vmatpush.bf16.msrb.mxu0 %v4561_v13  ;;  %v1772_v12 = vor.u32 %v1770_v51, %v1769_v50  ;;  %v5223_v13 = vld [vmem:[#allocation2 + $0x20] sm:$0xf]  ;;  %v1764_v26 = vsel %vm5213_vm8, %v4117_v9, %v1763_v10  ;;  %v1234_v55 = vpack.c.b16 %v1219_v37, %v1218_v36  ;;  %v845_v36 = vld [vmem:[#allocation2 + $0x3c] sm:$0xf] }
 0x271   : > { %v892_v28 = vshrl.u32 %v5223_v13, 16  ;;  %v895_v46 = vshll.u32 %v5223_v13, 16  ;;  %v4555_v50 = vld [vmem:[%s5858_s5 + $0x100] sm:$0xff]  ;;  %v1782_v13 = vrot.slane %v1780_v19, 7 }
 0x272   : > { %1665 = vmatpush.bf16.msrb.mxu2 %v4536_v14  ;;  %1300 = vmatpush.bf16.msrb.mxu1 %v4520_v15  ;;  %v1350_v14 = vld [vmem:[#allocation2 + $0x20] sm:$0xf]  ;;  %v4549_v15 = vld [vmem:[%s5858_s5 + $0xd0] sm:$0xff] }
 0x273   : > { %v1399_v29 = vshrl.u32 %v1350_v14, 16  ;;  %v4539_v10 = vld [vmem:[#allocation2 + $0x20] sm:$0xff] }
 0x274   : > { %2027 = vmatpush.bf16.msrb.mxu3 %v4552_v23  ;;  %2205 = vmatpush.bf16.msrb.mxu0 %v4560_v24  ;;  %v1387_v23 = vsel %vm5219_vm9, %v1382_v61, %v5179_v34  ;;  %v1397_v24 = vsel %vm5219_vm9, %v1392_v62, %v1396_v63  ;;  %v4548_v34 = vld [vmem:[%s5858_s5 + $0xc8] sm:$0xff] }
 0x275   : > { %v1401_v5 = vrot.slane %v1399_v29, 4 }
 0x276   : > { %1666 = vmatpush.bf16.msrb.mxu2 %v4535_v30  ;;  %1301 = vmatpush.bf16.msrb.mxu1 %v4519_v31  ;;  %v1402_v30 = vshll.u32 %v1350_v14, 16  ;;  %v1773_v31 = vsel %vm5213_vm8, %v1765_v11, %v1772_v12  ;;  %v1415_v11 = vor.u32 %v1414_v49, %v5280_v8  ;;  %v1783_v14 = vshll.u32 %v5260_v40, 16  ;;  %v1355_v49 = vld [vmem:[#allocation2 + $0x40] sm:$0x1] }
 0x277   : > { %v1946_v2 = vunpack.c.l.b16 %v1773_v31 }
 0x278   : > { %2028 = vmatpush.bf16.msrb.mxu3 %v4551_v38  ;;  %2206 = vmatpush.bf16.msrb.mxu0 %v4559_v39  ;;  %v1583_v38 = vunpack.c.l.b16 %v1387_v23  ;;  %v901_v39 = vshrl.u32 %v5246_v25, 16  ;;  %v1404_v6 = vrot.slane %v1402_v30, 5  ;;  %v4601_v23 = vld [vmem:[%s5858_s5 + $0x230] sm:$0xff]  ;;  %v1785_v31 = vor.u32 %v1783_v14, %v1782_v13 }
 0x279   : > { %1192 = vmatmul.bf16.gmra.mxu1 %v4510_v43  ;;  %1202 = vmatmul.bf16.gmra.mxu2 %v4512_v44  ;;  %v1584_v43 = vunpack.c.l.b16 %v1397_v24  ;;  %v1945_v44 = vunpack.c.l.b16 %v1764_v26  ;;  %v1353_v24 = vld [vmem:[#allocation2 + $0x38] sm:$0xf] }
 0x27a   : > { %1667 = vmatpush.bf16.msrb.mxu2 %v4534_v47  ;;  %1302 = vmatpush.bf16.msrb.mxu1 %v4518_v4  ;;  %v4570_v47 = vld [vmem:[%s5858_s5 + $0x178] sm:$0xff]  ;;  %v894_v4 = vrot.slane %v892_v28, 7  ;;  %v903_v51 = vrot.slane %v901_v39, 7  ;;  %v1405_v63 = vor.u32 %v1404_v6, %v1401_v5  ;;  %v1416_v28 = vrot.slane %v1415_v11, 4  ;;  %v4568_v39 = vld [vmem:[%s5858_s5 + $0x168] sm:$0xff] }
 0x27b   : > { %1212 = vmatmul.bf16.gmra.mxu3 %v4514_v3  ;;  %1182 = vmatmul.bf16.gmra.mxu0 %v4508_v48  ;;  %v4586_v3 = vld [vmem:[%s5858_s5 + $0x1b8] sm:$0xff]  ;;  %v1352_v48 = vld [vmem:[#allocation2 + $0x28] sm:$0x1]  ;;  %v1599_v56 = vpack.c.b16 %v1584_v43, %v1583_v38  ;;  %v1961_v61 = vpack.c.b16 %v1946_v2, %v1945_v44  ;;  %v1423_v37 = vshrl.u32 %v1353_v24, 16  ;;  %v1426_v40 = vshll.u32 %v1353_v24, 16 }
 0x27c   : > { %2029 = vmatpush.bf16.msrb.mxu3 %v4550_v52  ;;  %2207 = vmatpush.bf16.msrb.mxu0 %v4558_v53  ;;  %v904_v52 = vshll.u32 %v5246_v25, 16  ;;  %v1731_v53 = vld [vmem:[#allocation2 + $0x34] sm:$0x8]  ;;  %v897_v62 = vor.u32 %v895_v46, %v894_v4  ;;  %v1418_v9 = vshll.u32 %v1352_v48, 16  ;;  %v1406_v26 = vrot.slane %v1405_v63, 4  ;;  %v4584_v38 = vld [vmem:[%s5858_s5 + $0x1a8] sm:$0xff] }
 0x27d   : > { %v1775_v12 = vshrl.u32 %v1731_v53, 16  ;;  %v4592_v43 = vld [vmem:[%s5858_s5 + $0x1e8] sm:$0xff]  ;;  %v1735_v46 = vld [vmem:[#allocation2 + $0x50] sm:$0xf]  ;;  %v1736_v5 = vld [vmem:[#allocation2 + $0x54] sm:$0xf] }
 0x27e   : > { %1668 = vmatpush.bf16.msrb.mxu2 %v4533_v57  ;;  %1303 = vmatpush.bf16.msrb.mxu1 %v4517_v58  ;;  %v4594_v57 = vld [vmem:[%s5858_s5 + $0x1f8] sm:$0xff]  ;;  %v898_v25 = vsel %vm5213_vm8, %v3950_v60, %v897_v62  ;;  %v1420_v29 = vrot.slane %v1418_v9, 5  ;;  %v4600_v44 = vld [vmem:[%s5858_s5 + $0x228] sm:$0xff]  ;;  %v1411_v2 = vsel %vm5219_vm9, %v1406_v26, %v5280_v8  ;;  %v923_v48 = vshrl.u32 %v845_v36, 16 }
 0x27f   : > { %v4602_v58 = vld [vmem:[%s5858_s5 + $0x238] sm:$0xff]  ;;  %v4118_v30 = vrot.slane %v1775_v12, 11  ;;  %v1220_v45 = vunpack.c.l.b16 %v898_v25  ;;  %v1425_v19 = vrot.slane %v1423_v37, 4  ;;  %v1802_v53 = vshrl.u32 %v1735_v46, 16  ;;  %v4591_v37 = vld [vmem:[%s5858_s5 + $0x1e0] sm:$0xff] }
 0x280   : > { %2030 = vmatpush.bf16.msrb.mxu3 %v4549_v15  ;;  %2208 = vmatpush.bf16.msrb.mxu0 %v4557_v16  ;;  %v899_v15 = vrot.slane %v894_v4, 4  ;;  %v906_v16 = vor.u32 %v904_v52, %v903_v51  ;;  %v843_v4 = vld [vmem:[#allocation2 + $0x34] sm:$0x8]  ;;  %v1734_v52 = vld [vmem:[#allocation2 + $0x4c] sm:$0x8]  ;;  %v1585_v54 = vunpack.c.l.b16 %v1411_v2  ;;  %v926_v62 = vshll.u32 %v845_v36, 16 }
 0x281   : > { %v909_v60 = vshrl.u32 %v843_v4, 16  ;;  %v925_v9 = vrot.slane %v923_v48, 7  ;;  %v1797_v11 = vshrl.u32 %v1734_v52, 16  ;;  %v1804_v14 = vrot.slane %v1802_v53, 7  ;;  %v4583_v36 = vld [vmem:[%s5858_s5 + $0x1a0] sm:$0xff] }
 0x282   : > { %1669 = vmatpush.bf16.msrb.mxu2 %v4532_v20  ;;  %1304 = vmatpush.bf16.msrb.mxu1 %v4516_v21  ;;  %v4585_v20 = vld [vmem:[%s5858_s5 + $0x1b0] sm:$0xff]  ;;  %v907_v33 = vsel %vm5213_vm8, %v899_v15, %v906_v16  ;;  %v1805_v15 = vshll.u32 %v1735_v46, 16  ;;  %v846_v46 = vld [vmem:[#allocation2 + $0x4c] sm:$0x8] }
 0x283   : > { %v4569_v21 = vld [vmem:[%s5858_s5 + $0x170] sm:$0xff]  ;;  %v1221_v0 = vunpack.c.l.b16 %v907_v33  ;;  %v928_v26 = vor.u32 %v926_v62, %v925_v9  ;;  %v1739_v52 = vld [vmem:[#allocation2 + $0x6c] sm:$0xf]  ;;  %v1737_v9 = vld [vmem:[#allocation2 + $0x64] sm:$0x8] }
 0x284   : > { %2031 = vmatpush.bf16.msrb.mxu3 %v4548_v34  ;;  %2209 = vmatpush.bf16.msrb.mxu0 %v4556_v35  ;;  %v1787_v34 = vrot.slane %v1782_v13, 4  ;;  %v1794_v35 = vor.u32 %v1792_v18, %v1791_v17 }
 0x285   : > { %v1235_v16 = vpack.c.b16 %v1221_v0, %v1220_v45 }
 0x286   : > { %1670 = vmatpush.bf16.msrb.mxu2 %v4531_v41  ;;  %1305 = vmatpush.bf16.msrb.mxu1 %v4515_v42  ;;  %v1432_v41 = vshll.u32 %v1354_v27, 16  ;;  %v1436_v42 = vshrl.u32 %v1354_v27, 16  ;;  %v1795_v6 = vsel %vm5213_vm8, %v1787_v34, %v1794_v35  ;;  %v847_v34 = vld [vmem:[#allocation2 + $0x50] sm:$0xf] }
 0x287   : > { %v1356_v35 = vld [vmem:[#allocation2 + $0x50] sm:$0xf]  ;;  %v936_v0 = vshrl.u32 %v847_v34, 16 }
 0x288   : > { %2032 = vmatpush.bf16.msrb.mxu3 %v4547_v7  ;;  %2210 = vmatpush.bf16.msrb.mxu0 %v4555_v50  ;;  %v914_v7 = vshrl.u32 %v5311_v32, 16  ;;  %v1428_v50 = vrot.slane %v1426_v40, 5  ;;  %v5337_v8 = vrot.slane %v1432_v41, 5  ;;  %v1438_v51 = vrot.slane %v1436_v42, 4  ;;  %v1357_v40 = vld [vmem:[#allocation2 + $0x54] sm:$0xf] }
 0x289   : > { %1306 = vmatmul.bf16.vlgmr.msrb.gmra.mxu1 %v1234_v55  ;;  %1671 = vmatmul.bf16.vlgmr.msrb.gmra.mxu2 %v1599_v56  ;;  %v4567_v41 = vld [vmem:[%s5858_s5 + $0x160] sm:$0xff]  ;;  %v1450_v4 = vshll.u32 %v1356_v35, 16  ;;  %v1460_v48 = vshrl.u32 %v1357_v40, 16 }
 0x28a   : > { %2944 = vmatpush.bf16.msra.mxu2 %v4586_v3  ;;  %2581 = vmatpush.bf16.msra.mxu1 %v4570_v47  ;;  %v1421_v3 = vsel %vm5219_vm9, %v1416_v28, %v1420_v29  ;;  %v1786_v47 = vsel %vm5213_vm8, %v4118_v30, %v1785_v31  ;;  %v916_v63 = vrot.slane %v914_v7, 7  ;;  %v1429_v12 = vor.u32 %v1428_v50, %v1425_v19  ;;  %v4599_v42 = vld [vmem:[%s5858_s5 + $0x220] sm:$0xff] }
 0x28b   : > { %2033 = vmatmul.bf16.vlgmr.msrb.gmra.mxu3 %v1961_v61  ;;  %2211 = vmatmul.bf16.vlgmr.msrb.gmra.mxu0 %v4539_v10  ;;  %v1586_v55 = vunpack.c.l.b16 %v1421_v3  ;;  %v1947_v56 = vunpack.c.l.b16 %v1786_v47  ;;  %v917_v61 = vshll.u32 %v5311_v32, 16  ;;  %v1442_v10 = vshll.u32 %v1355_v49, 16  ;;  %v848_v3 = vld [vmem:[#allocation2 + $0x54] sm:$0xf]  ;;  %v1738_v49 = vld [vmem:[#allocation2 + $0x68] sm:$0xf] }
 0x28c   : > { %3122 = vmatpush.bf16.msra.mxu3 %v4594_v57  ;;  %3500 = vmatpush.bf16.msra.mxu0 %v4602_v58  ;;  %v1811_v57 = vshrl.u32 %v1736_v5, 16  ;;  %v1948_v58 = vunpack.c.l.b16 %v1795_v6  ;;  %v1439_v13 = vor.u32 %v1438_v51, %v5337_v8  ;;  %v921_v25 = vrot.slane %v916_v63, 4 }
 0x28d   : > { %v1600_v17 = vpack.c.b16 %v1586_v55, %v1585_v54  ;;  %v919_v24 = vor.u32 %v917_v61, %v916_v63  ;;  %v1444_v27 = vrot.slane %v1442_v10, 5  ;;  %v1430_v28 = vrot.slane %v1429_v12, 4 }
 0x28e   : > { %2945 = vmatpush.bf16.msra.mxu2 %v4585_v20  ;;  %2582 = vmatpush.bf16.msra.mxu1 %v4569_v21  ;;  %v1813_v18 = vrot.slane %v1811_v57, 7  ;;  %v1814_v20 = vshll.u32 %v1736_v5, 16  ;;  %v1962_v21 = vpack.c.b16 %v1948_v58, %v1947_v56  ;;  %v1440_v29 = vrot.slane %v1439_v13, 4  ;;  %v1358_v57 = vld [vmem:[#allocation2 + $0x58] sm:$0x1] }
 0x28f   : > { %v4119_v30 = vrot.slane %v1797_v11, 11  ;;  %v1807_v31 = vor.u32 %v1805_v15, %v1804_v14  ;;  %v1809_v32 = vrot.slane %v1804_v14, 4  ;;  %v1447_v47 = vshrl.u32 %v1356_v35, 16  ;;  %v1360_v35 = vld [vmem:[#allocation2 + $0x6c] sm:$0xf] }
 0x290   : > { %3123 = vmatpush.bf16.msra.mxu3 %v4593_v22  ;;  %3501 = vmatpush.bf16.msra.mxu0 %v4601_v23  ;;  %v4540_v22 = vld [vmem:[#allocation2 + $0x38] sm:$0xff]  ;;  %v3951_v23 = vrot.slane %v909_v60, 11  ;;  %v1816_v33 = vor.u32 %v1814_v20, %v1813_v18  ;;  %v1456_v7 = vshll.u32 %v1357_v40, 16  ;;  %v931_v51 = vshrl.u32 %v846_v46, 16  ;;  %v850_v46 = vld [vmem:[#allocation2 + $0x68] sm:$0xf] }
 0x291   : > { %v1808_v45 = vsel %vm5213_vm8, %v4119_v30, %v1807_v31  ;;  %v938_v54 = vrot.slane %v936_v0, 7  ;;  %v939_v55 = vshll.u32 %v847_v34, 16  ;;  %v945_v56 = vshrl.u32 %v848_v3, 16  ;;  %v1359_v30 = vld [vmem:[#allocation2 + $0x68] sm:$0xf]  ;;  %v4582_v40 = vld [vmem:[%s5858_s5 + $0x198] sm:$0xff] }
 0x292   : > { %2946 = vmatpush.bf16.msra.mxu2 %v4584_v38  ;;  %2583 = vmatpush.bf16.msra.mxu1 %v4568_v39  ;;  %v920_v38 = vsel %vm5213_vm8, %v3951_v23, %v919_v24  ;;  %v929_v39 = vsel %vm5213_vm8, %v921_v25, %v928_v26  ;;  %v1817_v2 = vsel %vm5213_vm8, %v1809_v32, %v1816_v33  ;;  %v1449_v58 = vrot.slane %v1447_v47, 4  ;;  %v4541_v23 = vld [vmem:[#allocation2 + $0x50] sm:$0xff]  ;;  %v851_v0 = vld [vmem:[#allocation2 + $0x6c] sm:$0xf] }
 0x293   : > { %v1222_v5 = vunpack.c.l.b16 %v920_v38  ;;  %v1223_v6 = vunpack.c.l.b16 %v929_v39  ;;  %v1950_v53 = vunpack.c.l.b16 %v1817_v2  ;;  %v1452_v60 = vrot.slane %v1450_v4, 5 }
 0x294   : > { %3124 = vmatpush.bf16.msra.mxu3 %v4592_v43  ;;  %3502 = vmatpush.bf16.msra.mxu0 %v4600_v44  ;;  %v1435_v43 = vsel %vm5219_vm9, %v1430_v28, %v5337_v8  ;;  %v1445_v44 = vsel %vm5219_vm9, %v1440_v29, %v1444_v27  ;;  %v1949_v8 = vunpack.c.l.b16 %v1808_v45  ;;  %v1824_v61 = vshrl.u32 %v1738_v49, 16  ;;  %v4598_v45 = vld [vmem:[%s5858_s5 + $0x218] sm:$0xff] }
 0x295   : > { %v1587_v19 = vunpack.c.l.b16 %v1435_v43  ;;  %v1588_v50 = vunpack.c.l.b16 %v1445_v44  ;;  %v5366_v62 = vrot.slane %v1456_v7, 5  ;;  %v1462_v63 = vrot.slane %v1460_v48, 4  ;;  %v4566_v44 = vld [vmem:[%s5858_s5 + $0x158] sm:$0xff] }
 0x296   : > { %2947 = vmatpush.bf16.msra.mxu2 %v4583_v36  ;;  %2584 = vmatpush.bf16.msra.mxu1 %v4567_v41  ;;  %v1833_v10 = vshrl.u32 %v1739_v52, 16  ;;  %v1236_v11 = vpack.c.b16 %v1223_v6, %v1222_v5  ;;  %v3952_v13 = vrot.slane %v931_v51, 11  ;;  %v1963_v14 = vpack.c.b16 %v1950_v53, %v1949_v8  ;;  %v4590_v41 = vld [vmem:[%s5858_s5 + $0x1d8] sm:$0xff]  ;;  %v1741_v5 = vld [vmem:[#allocation2 + $0x80] sm:$0xf] }
 0x297   : > { %v1601_v12 = vpack.c.b16 %v1588_v50, %v1587_v19  ;;  %v941_v15 = vor.u32 %v939_v55, %v938_v54  ;;  %v1453_v18 = vor.u32 %v1452_v60, %v1449_v58  ;;  %v1466_v20 = vshll.u32 %v1358_v57, 16  ;;  %v1742_v19 = vld [vmem:[#allocation2 + $0x84] sm:$0xf]  ;;  %v1361_v55 = vld [vmem:[#allocation2 + $0x70] sm:$0x1] }
 0x298   : > { %3125 = vmatpush.bf16.msra.mxu3 %v4591_v37  ;;  %3503 = vmatpush.bf16.msra.mxu0 %v4599_v42  ;;  %v1463_v24 = vor.u32 %v1462_v63, %v5366_v62  ;;  %v1827_v25 = vshll.u32 %v1738_v49, 16  ;;  %v1835_v26 = vrot.slane %v1833_v10, 7  ;;  %v1836_v27 = vshll.u32 %v1739_v52, 16  ;;  %v849_v50 = vld [vmem:[#allocation2 + $0x64] sm:$0x8] }
 0x299   : > { %1311 = vmatmul.bf16.gmra.mxu1 %v1235_v16  ;;  %1676 = vmatmul.bf16.gmra.mxu2 %v1600_v17  ;;  %v947_v16 = vrot.slane %v945_v56, 7  ;;  %v948_v17 = vshll.u32 %v848_v3, 16  ;;  %v943_v28 = vrot.slane %v938_v54, 4  ;;  %v942_v31 = vsel %vm5213_vm8, %v3952_v13, %v941_v15  ;;  %v1740_v63 = vld [vmem:[#allocation2 + $0x7c] sm:$0x8] }
 0x29a   : > { %v1454_v32 = vrot.slane %v1453_v18, 4  ;;  %v1468_v33 = vrot.slane %v1466_v20, 5  ;;  %v1464_v36 = vrot.slane %v1463_v24, 4  ;;  %v1838_v39 = vor.u32 %v1836_v27, %v1835_v26  ;;  %2948 = vmatpush.bf16.msra.mxu2 %v4582_v40  ;;  %2585 = vmatpush.bf16.msra.mxu1 %v4566_v44  ;;  %v853_v40 = vld [vmem:[#allocation2 + $0x80] sm:$0xf] }
 0x29b   : > { %2038 = vmatmul.bf16.gmra.mxu3 %v1962_v21  ;;  %2216 = vmatmul.bf16.gmra.mxu0 %v4540_v22  ;;  %v1819_v21 = vshrl.u32 %v1737_v9, 16  ;;  %v1826_v22 = vrot.slane %v1824_v61, 7  ;;  %v950_v29 = vor.u32 %v948_v17, %v947_v16  ;;  %v1471_v42 = vshrl.u32 %v1359_v30, 16 }
 0x29c   : > { %v1474_v43 = vshll.u32 %v1359_v30, 16  ;;  %v1480_v2 = vshll.u32 %v1360_v35, 16  ;;  %v1484_v3 = vshrl.u32 %v1360_v35, 16  ;;  %3126 = vmatpush.bf16.msra.mxu3 %v4590_v41  ;;  %v1224_v4 = vunpack.c.l.b16 %v942_v31  ;;  %3504 = vmatpush.bf16.msra.mxu0 %v4598_v45  ;;  %v1362_v41 = vld [vmem:[#allocation2 + $0x80] sm:$0xf] }
 0x29d   : > { %v4120_v34 = vrot.slane %v1819_v21, 11  ;;  %v1829_v37 = vor.u32 %v1827_v25, %v1826_v22  ;;  %v1831_v38 = vrot.slane %v1826_v22, 4  ;;  %v951_v47 = vsel %vm5213_vm8, %v943_v28, %v950_v29  ;;  %v4542_v28 = vld [vmem:[#allocation2 + $0x68] sm:$0xff] }
 0x29e   : > { %v1459_v6 = vsel %vm5219_vm9, %v1454_v32, %v5366_v62  ;;  %v1469_v7 = vsel %vm5219_vm9, %v1464_v36, %v1468_v33  ;;  %v958_v8 = vshrl.u32 %v850_v46, 16  ;;  %v967_v51 = vshrl.u32 %v851_v0, 16 }
 0x29f   : > { %v1830_v48 = vsel %vm5213_vm8, %v4120_v34, %v1829_v37  ;;  %v1839_v49 = vsel %vm5213_vm8, %v1831_v38, %v1838_v39  ;;  %v1473_v52 = vrot.slane %v1471_v42, 4  ;;  %v1476_v53 = vrot.slane %v1474_v43, 5  ;;  %v4581_v42 = vld [vmem:[%s5858_s5 + $0x190] sm:$0xff] }
 0x2a0   : > { %v1225_v54 = vunpack.c.l.b16 %v951_v47  ;;  %v5394_v56 = vrot.slane %v1480_v2, 5  ;;  %v1486_v57 = vrot.slane %v1484_v3, 4  ;;  %v1846_v58 = vshrl.u32 %v1741_v5, 16  ;;  %v4589_v43 = vld [vmem:[%s5858_s5 + $0x1d0] sm:$0xff]  ;;  %2949 = vmatpush.bf16.msra.mxu2 %v4581_v42 }
 0x2a1   : > { %v1589_v60 = vunpack.c.l.b16 %v1459_v6  ;;  %v1590_v61 = vunpack.c.l.b16 %v1469_v7  ;;  %v1951_v62 = vunpack.c.l.b16 %v1830_v48  ;;  %v1855_v9 = vshrl.u32 %v1742_v19, 16  ;;  %v4597_v2 = vld [vmem:[%s5858_s5 + $0x210] sm:$0xff]  ;;  %3127 = vmatpush.bf16.msra.mxu3 %v4589_v43  ;;  %v852_v6 = vld [vmem:[#allocation2 + $0x7c] sm:$0x8] }
 0x2a2   : > { %v1952_v10 = vunpack.c.l.b16 %v1839_v49  ;;  %v970_v13 = vshll.u32 %v851_v0, 16  ;;  %v969_v15 = vrot.slane %v967_v51, 7  ;;  %v1477_v16 = vor.u32 %v1476_v53, %v1473_v52  ;;  %v4565_v0 = vld [vmem:[%s5858_s5 + $0x150] sm:$0xff]  ;;  %3505 = vmatpush.bf16.msra.mxu0 %v4597_v2  ;;  %v856_v2 = vld [vmem:[#allocation2 + $0x98] sm:$0xf] }
 0x2a3   : > { %v1490_v17 = vshll.u32 %v1361_v55, 16  ;;  %v1487_v18 = vor.u32 %v1486_v57, %v5394_v56  ;;  %v1841_v20 = vshrl.u32 %v1740_v63, 16  ;;  %v1848_v21 = vrot.slane %v1846_v58, 7  ;;  %2586 = vmatpush.bf16.msra.mxu1 %v4565_v0  ;;  %v1744_v55 = vld [vmem:[#allocation2 + $0x98] sm:$0xf] }
 0x2a4   : > { %v1849_v22 = vshll.u32 %v1741_v5, 16  ;;  %v1602_v24 = vpack.c.b16 %v1590_v61, %v1589_v60  ;;  %v1857_v25 = vrot.slane %v1855_v9, 7  ;;  %v1858_v26 = vshll.u32 %v1742_v19, 16  ;;  %v854_v19 = vld [vmem:[#allocation2 + $0x84] sm:$0xf] }
 0x2a5   : > { %v1964_v27 = vpack.c.b16 %v1952_v10, %v1951_v62  ;;  %v972_v32 = vor.u32 %v970_v13, %v969_v15  ;;  %v1478_v33 = vrot.slane %v1477_v16, 4  ;;  %v1488_v34 = vrot.slane %v1487_v18, 4  ;;  %v1745_v61 = vld [vmem:[#allocation2 + $0x9c] sm:$0xf]  ;;  %v1743_v16 = vld [vmem:[#allocation2 + $0x94] sm:$0x8] }
 0x2a6   : > { %v1492_v35 = vrot.slane %v1490_v17, 5  ;;  %v4121_v36 = vrot.slane %v1841_v20, 11  ;;  %v1851_v37 = vor.u32 %v1849_v22, %v1848_v21  ;;  %v1853_v38 = vrot.slane %v1848_v21, 4 }
 0x2a7   : > { %v1860_v39 = vor.u32 %v1858_v26, %v1857_v25  ;;  %v1483_v3 = vsel %vm5219_vm9, %v1478_v33, %v5394_v56  ;;  %v980_v7 = vshrl.u32 %v853_v40, 16  ;;  %v1495_v48 = vshrl.u32 %v1362_v41, 16 }
 0x2a8   : > { %v1493_v47 = vsel %vm5219_vm9, %v1488_v34, %v1492_v35  ;;  %v1498_v49 = vshll.u32 %v1362_v41, 16  ;;  %v1591_v53 = vunpack.c.l.b16 %v1483_v3  ;;  %v975_v58 = vshrl.u32 %v852_v6, 16  ;;  %v1365_v34 = vld [vmem:[#allocation2 + $0x98] sm:$0xf] }
 0x2a9   : > { %1316 = vmatmul.bf16.gmra.mxu1 %v1236_v11  ;;  %1681 = vmatmul.bf16.gmra.mxu2 %v1601_v12  ;;  %v953_v11 = vshrl.u32 %v849_v50, 16  ;;  %v961_v12 = vshll.u32 %v850_v46, 16  ;;  %v1363_v46 = vld [vmem:[#allocation2 + $0x84] sm:$0xf]  ;;  %v1861_v5 = vsel %vm5213_vm8, %v1853_v38, %v1860_v39  ;;  %v1592_v56 = vunpack.c.l.b16 %v1493_v47  ;;  %v1366_v39 = vld [vmem:[#allocation2 + $0x9c] sm:$0xf] }
 0x2aa   : > { %v1504_v50 = vshll.u32 %v1363_v46, 16  ;;  %v1954_v57 = vunpack.c.l.b16 %v1861_v5  ;;  %v983_v60 = vshll.u32 %v853_v40, 16  ;;  %v982_v62 = vrot.slane %v980_v7, 7 }
 0x2ab   : > { %2043 = vmatmul.bf16.gmra.mxu3 %v1963_v14  ;;  %2221 = vmatmul.bf16.gmra.mxu0 %v4541_v23  ;;  %v960_v14 = vrot.slane %v958_v8, 7  ;;  %v1237_v23 = vpack.c.b16 %v1225_v54, %v1224_v4  ;;  %v3953_v29 = vrot.slane %v953_v11, 11  ;;  %v1852_v4 = vsel %vm5213_vm8, %v4121_v36, %v1851_v37  ;;  %v1364_v11 = vld [vmem:[#allocation2 + $0x88] sm:$0x1] }
 0x2ac   : > { %v1508_v8 = vshrl.u32 %v1363_v46, 16  ;;  %v1953_v54 = vunpack.c.l.b16 %v1852_v4  ;;  %v989_v63 = vshrl.u32 %v854_v19, 16  ;;  %v1497_v9 = vrot.slane %v1495_v48, 4  ;;  %v857_v4 = vld [vmem:[#allocation2 + $0x9c] sm:$0xf] }
 0x2ad   : > { %v963_v30 = vor.u32 %v961_v12, %v960_v14  ;;  %v965_v31 = vrot.slane %v960_v14, 4  ;;  %v1500_v10 = vrot.slane %v1498_v49, 5  ;;  %v5422_v12 = vrot.slane %v1504_v50, 5  ;;  %v1747_v49 = vld [vmem:[#allocation2 + $0xb0] sm:$0xf] }
 0x2ae   : > { %v1510_v13 = vrot.slane %v1508_v8, 4  ;;  %v1868_v14 = vshrl.u32 %v1744_v55, 16  ;;  %v1877_v17 = vshrl.u32 %v1745_v61, 16  ;;  %v1603_v18 = vpack.c.b16 %v1592_v56, %v1591_v53  ;;  %v1748_v53 = vld [vmem:[#allocation2 + $0xb4] sm:$0xf] }
 0x2af   : > { %v964_v44 = vsel %vm5213_vm8, %v3953_v29, %v963_v30  ;;  %v973_v45 = vsel %vm5213_vm8, %v965_v31, %v972_v32  ;;  %v1965_v20 = vpack.c.b16 %v1954_v57, %v1953_v54  ;;  %v3954_v21 = vrot.slane %v975_v58, 11 }
 0x2b0   : > { %v1226_v51 = vunpack.c.l.b16 %v964_v44  ;;  %v1227_v52 = vunpack.c.l.b16 %v973_v45  ;;  %v992_v22 = vshll.u32 %v854_v19, 16  ;;  %v1501_v25 = vor.u32 %v1500_v10, %v1497_v9  ;;  %v4580_v44 = vld [vmem:[%s5858_s5 + $0x188] sm:$0xff] }
 0x2b1   : > { %v1514_v26 = vshll.u32 %v1364_v11, 16  ;;  %v1863_v29 = vshrl.u32 %v1743_v16, 16  ;;  %v1870_v30 = vrot.slane %v1868_v14, 7  ;;  %v1871_v31 = vshll.u32 %v1744_v55, 16  ;;  %v4588_v45 = vld [vmem:[%s5858_s5 + $0x1c8] sm:$0xff]  ;;  %2950 = vmatpush.bf16.msra.mxu2 %v4580_v44 }
 0x2b2   : > { %v1238_v15 = vpack.c.b16 %v1227_v52, %v1226_v51  ;;  %v1879_v32 = vrot.slane %v1877_v17, 7  ;;  %v1880_v33 = vshll.u32 %v1745_v61, 16  ;;  %v987_v36 = vrot.slane %v982_v62, 4  ;;  %3128 = vmatpush.bf16.msra.mxu3 %v4588_v45  ;;  %v4564_v19 = vld [vmem:[%s5858_s5 + $0x148] sm:$0xff]  ;;  %v855_v55 = vld [vmem:[#allocation2 + $0x94] sm:$0x8] }
 0x2b3   : > { %v1502_v38 = vrot.slane %v1501_v25, 4  ;;  %v1516_v41 = vrot.slane %v1514_v26, 5  ;;  %v4122_v42 = vrot.slane %v1863_v29, 11  ;;  %v1873_v43 = vor.u32 %v1871_v31, %v1870_v30  ;;  %2587 = vmatpush.bf16.msra.mxu1 %v4564_v19  ;;  %v1746_v14 = vld [vmem:[#allocation2 + $0xac] sm:$0x8] }
 0x2b4   : > { %v1875_v46 = vrot.slane %v1870_v30, 4  ;;  %v1882_v0 = vor.u32 %v1880_v33, %v1879_v32  ;;  %v1519_v3 = vshrl.u32 %v1365_v34, 16  ;;  %v1522_v47 = vshll.u32 %v1365_v34, 16  ;;  %v4544_v34 = vld [vmem:[#allocation2 + $0x98] sm:$0xff] }
 0x2b5   : > { %v1528_v5 = vshll.u32 %v1366_v39, 16  ;;  %v1532_v6 = vshrl.u32 %v1366_v39, 16  ;;  %v1507_v50 = vsel %vm5219_vm9, %v1502_v38, %v5422_v12  ;;  %v1874_v51 = vsel %vm5213_vm8, %v4122_v42, %v1873_v43 }
 0x2b6   : > { %v1002_v52 = vshrl.u32 %v856_v2, 16  ;;  %v1883_v54 = vsel %vm5213_vm8, %v1875_v46, %v1882_v0  ;;  %v1011_v56 = vshrl.u32 %v857_v4, 16  ;;  %v1521_v57 = vrot.slane %v1519_v3, 4 }
 0x2b7   : > { %v1524_v58 = vrot.slane %v1522_v47, 5  ;;  %v1534_v9 = vrot.slane %v1532_v6, 4  ;;  %v1890_v10 = vshrl.u32 %v1747_v49, 16  ;;  %v1593_v11 = vunpack.c.l.b16 %v1507_v50 }
 0x2b8   : > { %v1956_v16 = vunpack.c.l.b16 %v1883_v54  ;;  %v997_v17 = vshrl.u32 %v855_v55, 16  ;;  %v1885_v26 = vshrl.u32 %v1746_v14, 16  ;;  %v1902_v32 = vshll.u32 %v1748_v53, 16  ;;  %v858_v54 = vld [vmem:[#allocation2 + $0xac] sm:$0x8]  ;;  %v4595_v14 = vld [vmem:[%s5858_s5 + $0x200] sm:$0xff] }
 0x2b9   : > { %1321 = vmatmul.bf16.gmra.mxu1 %v1237_v23  ;;  %1686 = vmatmul.bf16.gmra.mxu2 %v1602_v24  ;;  %v985_v23 = vor.u32 %v983_v60, %v982_v62  ;;  %v991_v24 = vrot.slane %v989_v63, 7  ;;  %v4596_v60 = vld [vmem:[%s5858_s5 + $0x208] sm:$0xff]  ;;  %v1367_v62 = vld [vmem:[#allocation2 + $0xa0] sm:$0x1]  ;;  %v5450_v63 = vrot.slane %v1528_v5, 5 }
 0x2ba   : > { %3506 = vmatpush.bf16.msra.mxu0 %v4596_v60  ;;  %v4123_v44 = vrot.slane %v1885_v26, 11  ;;  %v1749_v26 = vld [vmem:[#allocation2 + $0xc4] sm:$0x8] }
 0x2bb   : > { %2048 = vmatmul.bf16.gmra.mxu3 %v1964_v27  ;;  %2226 = vmatmul.bf16.gmra.mxu0 %v4542_v28  ;;  %v4543_v27 = vld [vmem:[#allocation2 + $0x80] sm:$0xff]  ;;  %v1511_v28 = vor.u32 %v1510_v13, %v5422_v12  ;;  %v986_v35 = vsel %vm5213_vm8, %v3954_v21, %v985_v23  ;;  %v994_v37 = vor.u32 %v992_v22, %v991_v24  ;;  %v1955_v13 = vunpack.c.l.b16 %v1874_v51 }
 0x2bc   : > { %v1228_v48 = vunpack.c.l.b16 %v986_v35  ;;  %v1013_v21 = vrot.slane %v1011_v56, 7  ;;  %v1014_v22 = vshll.u32 %v857_v4, 16  ;;  %v1525_v23 = vor.u32 %v1524_v58, %v1521_v57  ;;  %v860_v4 = vld [vmem:[#allocation2 + $0xb4] sm:$0xf]  ;;  %v4563_v58 = vld [vmem:[%s5858_s5 + $0x140] sm:$0xff] }
 0x2bd   : > { %v1512_v40 = vrot.slane %v1511_v28, 4  ;;  %v995_v7 = vsel %vm5213_vm8, %v987_v36, %v994_v37  ;;  %v1538_v24 = vshll.u32 %v1367_v62, 16  ;;  %v1535_v25 = vor.u32 %v1534_v9, %v5450_v63  ;;  %v1368_v36 = vld [vmem:[#allocation2 + $0xb0] sm:$0xf]  ;;  %2588 = vmatpush.bf16.msra.mxu1 %v4563_v58 }
 0x2be   : > { %v1229_v61 = vunpack.c.l.b16 %v995_v7  ;;  %v1893_v28 = vshll.u32 %v1747_v49, 16  ;;  %v1966_v33 = vpack.c.b16 %v1956_v16, %v1955_v13  ;;  %v3955_v35 = vrot.slane %v997_v17, 11  ;;  %v4579_v7 = vld [vmem:[%s5858_s5 + $0x180] sm:$0xff]  ;;  %v1750_v13 = vld [vmem:[#allocation2 + $0xc8] sm:$0xf]  ;;  %3507 = vmatpush.bf16.msra.mxu0 %v4595_v14 }
 0x2bf   : > { %v1517_v8 = vsel %vm5219_vm9, %v1512_v40, %v1516_v41  ;;  %v1016_v39 = vor.u32 %v1014_v22, %v1013_v21  ;;  %v1526_v40 = vrot.slane %v1525_v23, 4  ;;  %v1369_v41 = vld [vmem:[#allocation2 + $0xb4] sm:$0xf]  ;;  %v1536_v42 = vrot.slane %v1535_v25, 4  ;;  %2951 = vmatpush.bf16.msra.mxu2 %v4579_v7 }
 0x2c0   : > { %v1594_v12 = vunpack.c.l.b16 %v1517_v8  ;;  %v1239_v29 = vpack.c.b16 %v1229_v61, %v1228_v48  ;;  %v1540_v43 = vrot.slane %v1538_v24, 5  ;;  %v1543_v3 = vshrl.u32 %v1368_v36, 16  ;;  %v4587_v48 = vld [vmem:[%s5858_s5 + $0x1c0] sm:$0xff] }
 0x2c1   : > { %v1546_v47 = vshll.u32 %v1368_v36, 16  ;;  %v1552_v5 = vshll.u32 %v1369_v41, 16  ;;  %v1556_v6 = vshrl.u32 %v1369_v41, 16  ;;  %v1531_v50 = vsel %vm5219_vm9, %v1526_v40, %v5450_v63  ;;  %3129 = vmatpush.bf16.msra.mxu3 %v4587_v48  ;;  %v4545_v41 = vld [vmem:[#allocation2 + $0xb0] sm:$0xff] }
 0x2c2   : > { %v1604_v30 = vpack.c.b16 %v1594_v12, %v1593_v11  ;;  %v1541_v8 = vsel %vm5219_vm9, %v1536_v42, %v1540_v43  ;;  %v1033_v55 = vshrl.u32 %v860_v4, 16  ;;  %v1545_v56 = vrot.slane %v1543_v3, 4  ;;  %v1370_v12 = vld [vmem:[#allocation2 + $0xb8] sm:$0x1] }
 0x2c3   : > { %v1548_v57 = vrot.slane %v1546_v47, 5  ;;  %v5475_v61 = vrot.slane %v1552_v5, 5  ;;  %v1558_v62 = vrot.slane %v1556_v6, 4  ;;  %v1595_v9 = vunpack.c.l.b16 %v1531_v50 }
 0x2c4   : > { %v1019_v16 = vshrl.u32 %v858_v54, 16  ;;  %v1035_v21 = vrot.slane %v1033_v55, 7  ;;  %v1036_v22 = vshll.u32 %v860_v4, 16  ;;  %v1562_v25 = vshll.u32 %v1370_v12, 16 }
 0x2c5   : > { %v1549_v23 = vor.u32 %v1548_v57, %v1545_v56  ;;  %v1559_v24 = vor.u32 %v1558_v62, %v5475_v61 }
 0x2c6   : > { %v1038_v36 = vor.u32 %v1036_v22, %v1035_v21  ;;  %v1564_v43 = vrot.slane %v1562_v25, 5 }
 0x2c7   : > { %v1560_v42 = vrot.slane %v1559_v24, 4  ;;  %v2647_v24 = vld [vmem:[#allocation2 + $0x34] sm:$0x8] }
 0x2c9   : > { %1326 = vmatmul.bf16.gmra.mxu1 %v1238_v15  ;;  %1691 = vmatmul.bf16.gmra.mxu2 %v1603_v18  ;;  %v1899_v15 = vshrl.u32 %v1748_v53, 16  ;;  %v1004_v18 = vrot.slane %v1002_v52, 7 }
 0x2cb   : > { %2053 = vmatmul.bf16.gmra.mxu3 %v1965_v20  ;;  %2231 = vmatmul.bf16.gmra.mxu0 %v4543_v27  ;;  %v1005_v20 = vshll.u32 %v856_v2, 16  ;;  %v1892_v27 = vrot.slane %v1890_v10, 7  ;;  %v1901_v31 = vrot.slane %v1899_v15, 7  ;;  %v1009_v38 = vrot.slane %v1004_v18, 4  ;;  %v859_v2 = vld [vmem:[#allocation2 + $0xb0] sm:$0xf] }
 0x2cc   : > { %v1024_v52 = vshrl.u32 %v859_v2, 16  ;;  %v1596_v10 = vunpack.c.l.b16 %v1541_v8  ;;  %v3187_v8 = vld [vmem:[#allocation2 + $0x38] sm:$0xf] }
 0x2cd   : > { %v1007_v37 = vor.u32 %v1005_v20, %v1004_v18  ;;  %v1895_v45 = vor.u32 %v1893_v28, %v1892_v27  ;;  %v1897_v46 = vrot.slane %v1892_v27, 4  ;;  %v1904_v0 = vor.u32 %v1902_v32, %v1901_v31  ;;  %v1751_v20 = vld [vmem:[#allocation2 + $0xcc] sm:$0xf] }
 0x2ce   : > { %v1017_v19 = vsel %vm5213_vm8, %v1009_v38, %v1016_v39  ;;  %v1026_v17 = vrot.slane %v1024_v52, 7  ;;  %v1027_v18 = vshll.u32 %v859_v2, 16  ;;  %v1912_v27 = vshrl.u32 %v1750_v13, 16  ;;  %v2269_v39 = vld [vmem:[#allocation2 + $0x24] sm:$0xf] }
 0x2cf   : > { %v1008_v49 = vsel %vm5213_vm8, %v3955_v35, %v1007_v37  ;;  %v1896_v51 = vsel %vm5213_vm8, %v4123_v44, %v1895_v45  ;;  %v1905_v53 = vsel %vm5213_vm8, %v1897_v46, %v1904_v0  ;;  %v1231_v63 = vunpack.c.l.b16 %v1017_v19 }
 0x2d0   : > { %v1230_v60 = vunpack.c.l.b16 %v1008_v49  ;;  %v1957_v11 = vunpack.c.l.b16 %v1896_v51  ;;  %v1958_v15 = vunpack.c.l.b16 %v1905_v53  ;;  %v3956_v32 = vrot.slane %v1019_v16, 11  ;;  %v3188_v51 = vld [vmem:[#allocation2 + $0x3c] sm:$0xf] }
 0x2d1   : > { %v1031_v35 = vrot.slane %v1026_v17, 4  ;;  %v1550_v37 = vrot.slane %v1549_v23, 4  ;;  %v1907_v38 = vshrl.u32 %v1749_v26, 16  ;;  %v1914_v44 = vrot.slane %v1912_v27, 7 }
 0x2d2   : > { %v1240_v28 = vpack.c.b16 %v1231_v63, %v1230_v60  ;;  %v1967_v31 = vpack.c.b16 %v1958_v15, %v1957_v11  ;;  %v1915_v45 = vshll.u32 %v1750_v13, 16  ;;  %v1924_v2 = vshll.u32 %v1751_v20, 16  ;;  %v2270_v60 = vld [vmem:[#allocation2 + $0x28] sm:$0x1] }
 0x2d3   : > { %v2302_v4 = vshll.u32 %v2269_v39, 16  ;;  %v2306_v5 = vshrl.u32 %v2269_v39, 16  ;;  %v1039_v7 = vsel %vm5213_vm8, %v1031_v35, %v1038_v36  ;;  %v1555_v48 = vsel %vm5219_vm9, %v1550_v37, %v5475_v61  ;;  %v2648_v61 = vld [vmem:[#allocation2 + $0x38] sm:$0xf] }
 0x2d4   : > { %v1565_v49 = vsel %vm5219_vm9, %v1560_v42, %v1564_v43  ;;  %v4124_v19 = vrot.slane %v1907_v38, 11  ;;  %v1917_v50 = vor.u32 %v1915_v45, %v1914_v44  ;;  %v1919_v52 = vrot.slane %v1914_v44, 4  ;;  %v2271_v38 = vld [vmem:[#allocation2 + $0x38] sm:$0xf] }
 0x2d5   : > { %v1233_v58 = vunpack.c.l.b16 %v1039_v7  ;;  %v5496_v62 = vrot.slane %v2302_v4, 5  ;;  %v2308_v63 = vrot.slane %v2306_v5, 4  ;;  %v3212_v11 = vshrl.u32 %v3187_v8, 16 }
 0x2d6   : > { %v3215_v12 = vshll.u32 %v3187_v8, 16  ;;  %v3221_v13 = vshll.u32 %v3188_v51, 16  ;;  %v3225_v14 = vshrl.u32 %v3188_v51, 16  ;;  %v1597_v16 = vunpack.c.l.b16 %v1555_v48 }
 0x2d7   : > { %v2312_v23 = vshll.u32 %v2270_v60, 16  ;;  %v2677_v25 = vshrl.u32 %v2648_v61, 16  ;;  %v2309_v27 = vor.u32 %v2308_v63, %v5496_v62  ;;  %v2672_v37 = vshrl.u32 %v2647_v24, 16 }
 0x2d8   : > { %v2680_v43 = vshll.u32 %v2648_v61, 16  ;;  %v2317_v7 = vshrl.u32 %v2271_v38, 16  ;;  %v2320_v48 = vshll.u32 %v2271_v38, 16 }
 0x2d9   : > { %1331 = vmatmul.bf16.gmra.mxu1 %v1239_v29  ;;  %1696 = vmatmul.bf16.gmra.mxu2 %v1604_v30  ;;  %v1921_v29 = vshrl.u32 %v1751_v20, 16  ;;  %v1605_v30 = vpack.c.b16 %v1596_v10, %v1595_v9  ;;  %v2649_v10 = vld [vmem:[#allocation2 + $0x3c] sm:$0xf]  ;;  %v2679_v42 = vrot.slane %v2677_v25, 7  ;;  %v2310_v45 = vrot.slane %v2309_v27, 4 }
 0x2da   : > { %v4301_v8 = vrot.slane %v2672_v37, 11  ;;  %v2273_v25 = vld [vmem:[#allocation2 + $0x40] sm:$0x1]  ;;  %v2650_v27 = vld [vmem:[#allocation2 + $0x4c] sm:$0x8] }
 0x2db   : > { %2058 = vmatmul.bf16.gmra.mxu3 %v1966_v33  ;;  %2236 = vmatmul.bf16.gmra.mxu0 %v4544_v34  ;;  %v1029_v33 = vor.u32 %v1027_v18, %v1026_v17  ;;  %v2268_v34 = vld [vmem:[#allocation2 + $0x20] sm:$0xf]  ;;  %v1923_v0 = vrot.slane %v1921_v29, 7  ;;  %v1598_v17 = vunpack.c.l.b16 %v1565_v49  ;;  %v1918_v18 = vsel %vm5213_vm8, %v4124_v19, %v1917_v50  ;;  %v4546_v50 = vld [vmem:[#allocation2 + $0xc8] sm:$0xff] }
 0x2dc   : > { %v2293_v3 = vshrl.u32 %v2268_v34, 16  ;;  %v2296_v47 = vshll.u32 %v2268_v34, 16  ;;  %v3189_v29 = vld [vmem:[#allocation2 + $0x40] sm:$0x1]  ;;  %v1959_v35 = vunpack.c.l.b16 %v1918_v18  ;;  %v3190_v18 = vld [vmem:[#allocation2 + $0x50] sm:$0xf] }
 0x2dd   : > { %v1030_v6 = vsel %vm5213_vm8, %v3956_v32, %v1029_v33  ;;  %v1926_v53 = vor.u32 %v1924_v2, %v1923_v0  ;;  %v5509_v32 = vrot.slane %v3221_v13, 5  ;;  %v3227_v33 = vrot.slane %v3225_v14, 4  ;;  %v2651_v13 = vld [vmem:[#allocation2 + $0x50] sm:$0xf]  ;;  %v2652_v14 = vld [vmem:[#allocation2 + $0x54] sm:$0xf] }
 0x2de   : > { %v2295_v54 = vrot.slane %v2293_v3, 4  ;;  %v2298_v55 = vrot.slane %v2296_v47, 5  ;;  %v1232_v57 = vunpack.c.l.b16 %v1030_v6  ;;  %v1606_v34 = vpack.c.b16 %v1598_v17, %v1597_v16  ;;  %v2272_v47 = vld [vmem:[#allocation2 + $0x3c] sm:$0xf] }
 0x2df   : > { %v1927_v21 = vsel %vm5213_vm8, %v1919_v52, %v1926_v53  ;;  %v2689_v2 = vshll.u32 %v2649_v10, 16  ;;  %v3231_v3 = vshll.u32 %v3189_v29, 16  ;;  %v3228_v6 = vor.u32 %v3227_v33, %v5509_v32 }
 0x2e0   : > { %v2299_v22 = vor.u32 %v2298_v55, %v2295_v54  ;;  %v1241_v26 = vpack.c.b16 %v1233_v58, %v1232_v57  ;;  %v1960_v36 = vunpack.c.l.b16 %v1927_v21  ;;  %v2682_v53 = vor.u32 %v2680_v43, %v2679_v42  ;;  %v3191_v21 = vld [vmem:[#allocation2 + $0x54] sm:$0xf] }
 0x2e1   : > { %v2684_v54 = vrot.slane %v2679_v42, 4  ;;  %v2326_v55 = vshll.u32 %v2272_v47, 16  ;;  %v3233_v60 = vrot.slane %v3231_v3, 5  ;;  %v2330_v63 = vshrl.u32 %v2272_v47, 16 }
 0x2e2   : > { %v2300_v39 = vrot.slane %v2299_v22, 4  ;;  %v1968_v19 = vpack.c.b16 %v1960_v36, %v1959_v35  ;;  %v2683_v16 = vsel %vm5213_vm8, %v4301_v8, %v2682_v53  ;;  %v3236_v36 = vshrl.u32 %v3190_v18, 16 }
 0x2e3   : > { %v5529_v17 = vrot.slane %v2326_v55, 5  ;;  %v3239_v37 = vshll.u32 %v3190_v18, 16  ;;  %v3245_v38 = vshll.u32 %v3191_v21, 16  ;;  %v2864_v42 = vunpack.c.l.b16 %v2683_v16 }
 0x2e4   : > { %v2305_v52 = vsel %vm5219_vm9, %v2300_v39, %v5496_v62  ;;  %v3249_v39 = vshrl.u32 %v3191_v21, 16  ;;  %v2702_v47 = vshll.u32 %v2651_v13, 16 }
 0x2e5   : > { %v5525_v62 = vunpack.c.l.b16 %v2305_v52  ;;  %v3241_v8 = vrot.slane %v3239_v37, 5  ;;  %v5549_v52 = vrot.slane %v3245_v38, 5  ;;  %v2654_v38 = vld [vmem:[#allocation2 + $0x68] sm:$0xf] }
 0x2e6   : > { %v5481_v40 = vpop.f32.mrf.mxu1  ;;  %v3251_v53 = vrot.slane %v3249_v39, 4 }
 0x2e8   : > { %v5483_v46 = vpop.f32.mrf.mxu0 }
 0x2e9   : > { %1336 = vmatmul.bf16.gmra.mxu1 %v1240_v28  ;;  %1701 = vmatmul.bf16.gmra.mxu2 %v1605_v30  ;;  %v2686_v28 = vshrl.u32 %v2649_v10, 16  ;;  %v3214_v30 = vrot.slane %v3212_v11, 4  ;;  %v3229_v10 = vrot.slane %v3228_v6, 4  ;;  %v2319_v11 = vrot.slane %v2317_v7, 4 }
 0x2eb   : > { %2063 = vmatmul.bf16.gmra.mxu3 %v1967_v31  ;;  %2241 = vmatmul.bf16.gmra.mxu0 %v4545_v41  ;;  %v3217_v31 = vrot.slane %v3215_v12, 5  ;;  %v2314_v41 = vrot.slane %v2312_v23, 5  ;;  %v2688_v0 = vrot.slane %v2686_v28, 7  ;;  %v2322_v12 = vrot.slane %v2320_v48, 5 }
 0x2ec   : > { %v5494_v56 = vpop.f32.mrf.mxu2  ;;  %v2699_v28 = vshrl.u32 %v2651_v13, 16  ;;  %v2711_v48 = vshll.u32 %v2652_v14, 16 }
 0x2ed   : > { %v3218_v5 = vor.u32 %v3217_v31, %v3214_v30  ;;  %v2315_v57 = vsel %vm5219_vm9, %v2310_v45, %v2314_v41  ;;  %v2691_v58 = vor.u32 %v2689_v2, %v2688_v0  ;;  %v3234_v31 = vsel %vm5219_vm9, %v3229_v10, %v3233_v60  ;;  %v3192_v60 = vld [vmem:[#allocation2 + $0x58] sm:$0x1] }
 0x2ee   : > { %v5498_v9 = vpop.f32.mrf.mxu3  ;;  %v5500_v15 = vpop.f32.mrf.mxu1  ;;  %v5533_v23 = vunpack.c.l.b16 %v2315_v57  ;;  %v2323_v33 = vor.u32 %v2322_v12, %v2319_v11  ;;  %v2336_v45 = vshll.u32 %v2273_v25, 16  ;;  %v2694_v0 = vshrl.u32 %v2650_v27, 16 }
 0x2ef   : > { %v3219_v61 = vrot.slane %v3218_v5, 4  ;;  %v2692_v24 = vsel %vm5213_vm8, %v2684_v54, %v2691_v58  ;;  %v2701_v3 = vrot.slane %v2699_v28, 7  ;;  %v3421_v5 = vunpack.c.l.b16 %v3234_v31 }
 0x2f0   : > { %v5504_v20 = vpop.f32.mrf.mxu0  ;;  %v2865_v43 = vunpack.c.l.b16 %v2692_v24  ;;  %v2324_v6 = vrot.slane %v2323_v33, 4  ;;  %v2517_v54 = vpack.c.b16 %v5533_v23, %v5525_v62  ;;  %v2338_v57 = vrot.slane %v2336_v45, 5  ;;  %v4571_v24 = vld [vmem:[#allocation2 + $0x38] sm:$0xff] }
 0x2f1   : > { %v3224_v30 = vsel %vm5219_vm9, %v3219_v61, %v5509_v32  ;;  %v4302_v58 = vrot.slane %v2694_v0, 11  ;;  %v2704_v11 = vor.u32 %v2702_v47, %v2701_v3  ;;  %v2706_v21 = vrot.slane %v2701_v3, 4  ;;  %v3194_v3 = vld [vmem:[#allocation2 + $0x6c] sm:$0xf] }
 0x2f2   : > { %v3420_v2 = vunpack.c.l.b16 %v3224_v30  ;;  %v2880_v55 = vpack.c.b16 %v2865_v43, %v2864_v42  ;;  %v2329_v18 = vsel %vm5219_vm9, %v2324_v6, %v5529_v17  ;;  %v3255_v27 = vshll.u32 %v3192_v60, 16  ;;  %v3193_v43 = vld [vmem:[#allocation2 + $0x68] sm:$0xf]  ;;  %v2276_v6 = vld [vmem:[#allocation2 + $0x58] sm:$0x1] }
 0x2f3   : > { %v5568_v39 = vunpack.c.l.b16 %v2329_v18  ;;  %v3263_v60 = vshll.u32 %v3193_v43, 16 }
 0x2f4   : > { %v5511_v44 = vpop.f32.mrf.mxu2  ;;  %v3436_v16 = vpack.c.b16 %v3421_v5, %v3420_v2  ;;  %v3257_v2 = vrot.slane %v3255_v27, 5  ;;  %v2724_v27 = vshll.u32 %v2654_v38, 16 }
 0x2f6   : > { %v5513_v4 = vpop.f32.mrf.mxu3  ;;  %v5516_v49 = vpop.f32.mrf.mxu1 }
 0x2f8   : > { %v5518_v51 = vpop.f32.mrf.mxu0 }
 0x2f9   : > { %1341 = vmatmul.bf16.gmra.mxu1 %v1241_v26  ;;  %1706 = vmatmul.bf16.gmra.mxu2 %v1606_v34  ;;  %v2332_v26 = vrot.slane %v2330_v63, 4  ;;  %v2708_v34 = vshrl.u32 %v2652_v14, 16  ;;  %v2275_v63 = vld [vmem:[#allocation2 + $0x54] sm:$0xf] }
 0x2fa   : > { %v2350_v28 = vshll.u32 %v2275_v63, 16  ;;  %v2354_v33 = vshrl.u32 %v2275_v63, 16  ;;  %v3269_v63 = vshll.u32 %v3194_v3, 16 }
 0x2fb   : > { %2068 = vmatmul.bf16.gmra.mxu3 %v1968_v19  ;;  %2246 = vmatmul.bf16.gmra.mxu0 %v4546_v50  ;;  %v2333_v32 = vor.u32 %v2332_v26, %v5529_v17  ;;  %v2710_v7 = vrot.slane %v2708_v34, 7  ;;  %v2274_v19 = vld [vmem:[#allocation2 + $0x50] sm:$0xf]  ;;  %v3238_v50 = vrot.slane %v3236_v36, 4  ;;  %v3252_v26 = vor.u32 %v3251_v53, %v5549_v52 }
 0x2fc   : > { %v5531_v22 = vpop.f32.mrf.mxu2  ;;  %v2341_v12 = vshrl.u32 %v2274_v19, 16  ;;  %v2344_v13 = vshll.u32 %v2274_v19, 16  ;;  %v2705_v17 = vsel %vm5213_vm8, %v4302_v58, %v2704_v11  ;;  %v2721_v19 = vshrl.u32 %v2654_v38, 16 }
 0x2fd   : > { %v2334_v10 = vrot.slane %v2333_v32, 4  ;;  %v2713_v62 = vor.u32 %v2711_v48, %v2710_v7  ;;  %v3242_v25 = vor.u32 %v3241_v8, %v3238_v50  ;;  %v3253_v0 = vrot.slane %v3252_v26, 4  ;;  %v2653_v48 = vld [vmem:[#allocation2 + $0x64] sm:$0x8] }
 0x2fe   : > { %v5537_v29 = vpop.f32.mrf.mxu3  ;;  %v5544_v35 = vpop.f32.mrf.mxu1  ;;  %v2343_v36 = vrot.slane %v2341_v12, 4  ;;  %v2346_v37 = vrot.slane %v2344_v13, 5  ;;  %v5572_v32 = vrot.slane %v2350_v28, 5  ;;  %v2866_v5 = vunpack.c.l.b16 %v2705_v17 }
 0x2ff   : > { %v2339_v34 = vsel %vm5219_vm9, %v2334_v10, %v2338_v57  ;;  %v2714_v42 = vsel %vm5213_vm8, %v2706_v21, %v2713_v62  ;;  %v3243_v45 = vrot.slane %v3242_v25, 4  ;;  %v2356_v7 = vrot.slane %v2354_v33, 4 }
 0x300   : > { %v5546_v41 = vpop.f32.mrf.mxu0  ;;  %v5574_v47 = vunpack.c.l.b16 %v2339_v34  ;;  %v2867_v8 = vunpack.c.l.b16 %v2714_v42  ;;  %v2347_v53 = vor.u32 %v2346_v37, %v2343_v36  ;;  %v3273_v10 = vshrl.u32 %v3194_v3, 16  ;;  %v2277_v3 = vld [vmem:[#allocation2 + $0x68] sm:$0xf] }
 0x301   : > { %v3248_v12 = vsel %vm5219_vm9, %v3243_v45, %v5549_v52  ;;  %v3258_v13 = vsel %vm5219_vm9, %v3253_v0, %v3257_v2  ;;  %v2716_v18 = vshrl.u32 %v2653_v48, 16  ;;  %v2723_v25 = vrot.slane %v2721_v19, 7 }
 0x302   : > { %v2348_v26 = vrot.slane %v2347_v53, 4  ;;  %v3265_v34 = vrot.slane %v3263_v60, 5  ;;  %v5585_v52 = vrot.slane %v3269_v63, 5  ;;  %v3275_v17 = vrot.slane %v3273_v10, 4 }
 0x303   : > { %v2518_v36 = vpack.c.b16 %v5574_v47, %v5568_v39  ;;  %v3422_v37 = vunpack.c.l.b16 %v3248_v12  ;;  %v3423_v42 = vunpack.c.l.b16 %v3258_v13  ;;  %v4303_v2 = vrot.slane %v2716_v18, 11  ;;  %v3196_v18 = vld [vmem:[#allocation2 + $0x80] sm:$0xf] }
 0x304   : > { %v5553_v61 = vpop.f32.mrf.mxu2  ;;  %v2353_v38 = vsel %vm5219_vm9, %v2348_v26, %v5572_v32  ;;  %v3276_v39 = vor.u32 %v3275_v17, %v5585_v52  ;;  %v2657_v26 = vld [vmem:[#allocation2 + $0x80] sm:$0xf] }
 0x306   : > { %v5555_v14 = vpop.f32.mrf.mxu3  ;;  %v1307_v23 = vpop.f32.mrf.mxu1 }
 0x307   : > { %v1308_v30 = vadd.f32 %v1307_v23, %v5483_v46  ;;  %v2655_v46 = vld [vmem:[#allocation2 + $0x6c] sm:$0xf] }
 0x308   : > { %v5562_v31 = vpop.f32.mrf.mxu0 }
 0x309   : > { %2589 = vmatmul.bf16.vlgmr.msra.gmra.mxu1 %v2517_v54  ;;  %2952 = vmatmul.bf16.vlgmr.msra.gmra.mxu2 %v2880_v55  ;;  %v2730_v54 = vshrl.u32 %v2655_v46, 16  ;;  %v3260_v55 = vshrl.u32 %v3193_v43, 16  ;;  %v2881_v43 = vpack.c.b16 %v2867_v8, %v2866_v5  ;;  %v4572_v8 = vld [vmem:[#allocation2 + $0x50] sm:$0xff] }
 0x30b   : > { %3130 = vmatmul.bf16.vlgmr.msra.gmra.mxu3 %v4571_v24  ;;  %3508 = vmatmul.bf16.vlgmr.msra.gmra.mxu0 %v3436_v16  ;;  %v2360_v16 = vshll.u32 %v2276_v6, 16  ;;  %v2357_v24 = vor.u32 %v2356_v7, %v5572_v32  ;;  %v2732_v28 = vrot.slane %v2730_v54, 7  ;;  %v3262_v33 = vrot.slane %v3260_v55, 4  ;;  %v2278_v54 = vld [vmem:[#allocation2 + $0x6c] sm:$0xf] }
 0x30c   : > { %v1672_v50 = vpop.f32.mrf.mxu2  ;;  %v2728_v7 = vrot.slane %v2723_v25, 4  ;;  %v3437_v55 = vpack.c.b16 %v3423_v42, %v3422_v37  ;;  %v2374_v13 = vshll.u32 %v2278_v54, 16  ;;  %v2279_v37 = vld [vmem:[#allocation2 + $0x70] sm:$0x1]  ;;  %v3284_v42 = vshrl.u32 %v3196_v18, 16 }
 0x30d   : > { %v1712_v57 = vadd.f32 %v1672_v50, %v1308_v30  ;;  %v2733_v30 = vshll.u32 %v2655_v46, 16  ;;  %v2358_v45 = vrot.slane %v2357_v24, 4  ;;  %v2362_v0 = vrot.slane %v2360_v16, 5 }
 0x30e   : > { %v2034_v58 = vpop.f32.mrf.mxu3  ;;  %v1309_v11 = vpop.f32.mrf.mxu1  ;;  %v2726_v46 = vor.u32 %v2724_v27, %v2723_v25  ;;  %v3266_v53 = vor.u32 %v3265_v34, %v3262_v33  ;;  %v2378_v16 = vshrl.u32 %v2278_v54, 16  ;;  %v2658_v33 = vld [vmem:[#allocation2 + $0x84] sm:$0xf] }
 0x30f   : > { %v2074_v21 = vadd.f32 %v2034_v58, %v1712_v57  ;;  %v1310_v62 = vadd.f32 %v1309_v11, %v5504_v20  ;;  %v3195_v20 = vld [vmem:[#allocation2 + $0x70] sm:$0x1]  ;;  %v2735_v48 = vor.u32 %v2733_v30, %v2732_v28  ;;  %v2365_v57 = vshrl.u32 %v2277_v3, 16  ;;  %v3197_v34 = vld [vmem:[#allocation2 + $0x84] sm:$0xf] }
 0x310   : > { %v5582_v23 = vpop.f32.mrf.mxu0  ;;  %v3279_v47 = vshll.u32 %v3195_v20, 16  ;;  %v2368_v58 = vshll.u32 %v2277_v3, 16  ;;  %v2363_v32 = vsel %vm5219_vm9, %v2358_v45, %v2362_v0  ;;  %v5598_v11 = vunpack.c.l.b16 %v2353_v38 }
 0x311   : > { %v2727_v12 = vsel %vm5213_vm8, %v4303_v2, %v2726_v46  ;;  %v3267_v24 = vrot.slane %v3266_v53, 4  ;;  %v5604_v27 = vunpack.c.l.b16 %v2363_v32  ;;  %v2367_v28 = vrot.slane %v2365_v57, 4 }
 0x312   : > { %v3281_v25 = vrot.slane %v3279_v47, 5  ;;  %v2370_v30 = vrot.slane %v2368_v58, 5  ;;  %v5607_v17 = vadd.f32 %v5562_v31, %v2074_v21  ;;  %v3287_v20 = vshll.u32 %v3196_v18, 16 }
 0x313   : > { %v5612_v2 = vrot.slane %v2374_v13, 5  ;;  %v2380_v3 = vrot.slane %v2378_v16, 4  ;;  %v3297_v31 = vshrl.u32 %v3197_v34, 16  ;;  %v2519_v16 = vpack.c.b16 %v5604_v27, %v5598_v11  ;;  %v2281_v11 = vld [vmem:[#allocation2 + $0x84] sm:$0xf] }
 0x314   : > { %v1674_v6 = vpop.f32.mrf.mxu2  ;;  %v2371_v53 = vor.u32 %v2370_v30, %v2367_v28  ;;  %v2280_v30 = vld [vmem:[#allocation2 + $0x80] sm:$0xf] }
 0x315   : > { %v1713_v19 = vadd.f32 %v1674_v6, %v1310_v62  ;;  %v2736_v62 = vsel %vm5213_vm8, %v2728_v7, %v2735_v48  ;;  %v2743_v6 = vshrl.u32 %v2657_v26, 16  ;;  %v2656_v7 = vld [vmem:[#allocation2 + $0x7c] sm:$0x8]  ;;  %v2752_v48 = vshrl.u32 %v2658_v33, 16 }
 0x316   : > { %v2036_v50 = vpop.f32.mrf.mxu3  ;;  %v1312_v5 = vpop.f32.mrf.mxu1  ;;  %v2869_v0 = vunpack.c.l.b16 %v2736_v62  ;;  %v2381_v57 = vor.u32 %v2380_v3, %v5612_v2  ;;  %v2738_v58 = vshrl.u32 %v2656_v7, 16 }
 0x317   : > { %v2075_v60 = vadd.f32 %v2036_v50, %v1713_v19  ;;  %v1313_v63 = vadd.f32 %v1312_v5, %v5518_v51  ;;  %v3277_v51 = vrot.slane %v3276_v39, 4  ;;  %v3293_v19 = vshll.u32 %v3197_v34, 16 }
 0x318   : > { %v5594_v10 = vpop.f32.mrf.mxu0  ;;  %v3272_v50 = vsel %vm5219_vm9, %v3267_v24, %v5585_v52  ;;  %v2384_v39 = vshll.u32 %v2279_v37, 16  ;;  %v2754_v32 = vrot.slane %v2752_v48, 7  ;;  %v3299_v52 = vrot.slane %v3297_v31, 4  ;;  %v3198_v24 = vld [vmem:[#allocation2 + $0x88] sm:$0x1] }
 0x319   : > { %2594 = vmatmul.bf16.gmra.mxu1 %v2518_v36  ;;  %2957 = vmatmul.bf16.gmra.mxu2 %v2881_v43  ;;  %v2868_v36 = vunpack.c.l.b16 %v2727_v12  ;;  %v5610_v43 = vadd.f32 %v5582_v23, %v2075_v60  ;;  %v3282_v23 = vsel %vm5219_vm9, %v3277_v51, %v3281_v25  ;;  %v2745_v60 = vrot.slane %v2743_v6, 7 }
 0x31a   : > { %v2755_v12 = vshll.u32 %v2658_v33, 16  ;;  %v5621_v13 = vrot.slane %v3293_v19, 5  ;;  %v3424_v18 = vunpack.c.l.b16 %v3272_v50  ;;  %v3425_v62 = vunpack.c.l.b16 %v3282_v23 }
 0x31b   : > { %3135 = vmatmul.bf16.gmra.mxu3 %v4572_v8  ;;  %3513 = vmatmul.bf16.gmra.mxu0 %v3437_v55  ;;  %v3286_v8 = vrot.slane %v3284_v42, 4  ;;  %v3289_v55 = vrot.slane %v3287_v20, 5  ;;  %v2372_v51 = vrot.slane %v2371_v53, 4  ;;  %v2386_v25 = vrot.slane %v2384_v39, 5 }
 0x31c   : > { %v1677_v45 = vpop.f32.mrf.mxu2  ;;  %v2382_v37 = vrot.slane %v2381_v57, 4  ;;  %v4304_v42 = vrot.slane %v2738_v58, 11  ;;  %v2750_v20 = vrot.slane %v2745_v60, 4  ;;  %v2757_v3 = vor.u32 %v2755_v12, %v2754_v32 }
 0x31d   : > { %v1714_v38 = vadd.f32 %v1677_v45, %v1313_v63  ;;  %v2746_v63 = vshll.u32 %v2657_v26, 16  ;;  %v3290_v28 = vor.u32 %v3289_v55, %v3286_v8  ;;  %v3300_v6 = vor.u32 %v3299_v52, %v5621_v13 }
 0x31e   : > { %v2039_v46 = vpop.f32.mrf.mxu3  ;;  %v1314_v21 = vpop.f32.mrf.mxu1  ;;  %v3438_v7 = vpack.c.b16 %v3425_v62, %v3424_v18  ;;  %v2377_v50 = vsel %vm5219_vm9, %v2372_v51, %v5612_v2  ;;  %v2387_v23 = vsel %vm5219_vm9, %v2382_v37, %v2386_v25  ;;  %v2398_v53 = vshll.u32 %v2281_v11, 16  ;;  %v2660_v2 = vld [vmem:[#allocation2 + $0x98] sm:$0xf]  ;;  %v2659_v37 = vld [vmem:[#allocation2 + $0x94] sm:$0x8] }
 0x31f   : > { %v2076_v47 = vadd.f32 %v2039_v46, %v1714_v38  ;;  %v1315_v54 = vadd.f32 %v1314_v21, %v5546_v41  ;;  %v2882_v41 = vpack.c.b16 %v2869_v0, %v2868_v36  ;;  %v2748_v26 = vor.u32 %v2746_v63, %v2745_v60  ;;  %v4573_v46 = vld [vmem:[#allocation2 + $0x68] sm:$0xff]  ;;  %v2661_v60 = vld [vmem:[#allocation2 + $0x9c] sm:$0xf] }
 0x320   : > { %v2219_v5 = vpop.f32.mrf.mxu0  ;;  %v3303_v38 = vshll.u32 %v3198_v24, 16  ;;  %v2389_v36 = vshrl.u32 %v2280_v30, 16  ;;  %v2392_v0 = vshll.u32 %v2280_v30, 16  ;;  %v3291_v21 = vrot.slane %v3290_v28, 4  ;;  %v3200_v28 = vld [vmem:[#allocation2 + $0x9c] sm:$0xf] }
 0x321   : > { %v2402_v39 = vshrl.u32 %v2281_v11, 16  ;;  %v3301_v8 = vrot.slane %v3300_v6, 4  ;;  %v5639_v63 = vadd.f32 %v5594_v10, %v2076_v47  ;;  %v5641_v32 = vunpack.c.l.b16 %v2377_v50 }
 0x322   : > { %v3305_v55 = vrot.slane %v3303_v38, 5  ;;  %v2391_v57 = vrot.slane %v2389_v36, 4  ;;  %v2394_v58 = vrot.slane %v2392_v0, 5  ;;  %v5643_v12 = vunpack.c.l.b16 %v2387_v23 }
 0x323   : > { %v3296_v52 = vsel %vm5219_vm9, %v3291_v21, %v5621_v13  ;;  %v5650_v51 = vrot.slane %v2398_v53, 5  ;;  %v2404_v25 = vrot.slane %v2402_v39, 4  ;;  %v3317_v11 = vshll.u32 %v3200_v28, 16 }
 0x324   : > { %v1679_v34 = vpop.f32.mrf.mxu2  ;;  %v3306_v30 = vsel %vm5219_vm9, %v3301_v8, %v3305_v55  ;;  %v2760_v0 = vshrl.u32 %v2659_v37, 16  ;;  %v2777_v50 = vshll.u32 %v2661_v60, 16 }
 0x325   : > { %v1715_v33 = vadd.f32 %v1679_v34, %v1315_v54  ;;  %v2749_v54 = vsel %vm5213_vm8, %v4304_v42, %v2748_v26  ;;  %v2282_v34 = vld [vmem:[#allocation2 + $0x88] sm:$0x1]  ;;  %v2765_v42 = vshrl.u32 %v2660_v2, 16  ;;  %v2774_v26 = vshrl.u32 %v2661_v60, 16 }
 0x326   : > { %v2041_v45 = vpop.f32.mrf.mxu3  ;;  %v1317_v27 = vpop.f32.mrf.mxu1  ;;  %v2870_v24 = vunpack.c.l.b16 %v2749_v54  ;;  %v2408_v36 = vshll.u32 %v2282_v34, 16  ;;  %v2520_v54 = vpack.c.b16 %v5643_v12, %v5641_v32  ;;  %v5660_v8 = vrot.slane %v3317_v11, 5  ;;  %v4574_v34 = vld [vmem:[#allocation2 + $0x80] sm:$0xff] }
 0x327   : > { %v2077_v48 = vadd.f32 %v2041_v45, %v1715_v33  ;;  %v1318_v19 = vadd.f32 %v1317_v27, %v5481_v40  ;;  %v2758_v40 = vsel %vm5213_vm8, %v2750_v20, %v2757_v3  ;;  %v3426_v20 = vunpack.c.l.b16 %v3296_v52 }
 0x328   : > { %v5627_v31 = vpop.f32.mrf.mxu0  ;;  %v3321_v27 = vshrl.u32 %v3200_v28, 16  ;;  %v2776_v21 = vrot.slane %v2774_v26, 7 }
 0x329   : > { %2599 = vmatmul.bf16.gmra.mxu1 %v2519_v16  ;;  %2962 = vmatmul.bf16.gmra.mxu2 %v2882_v41  ;;  %v3199_v16 = vld [vmem:[#allocation2 + $0x98] sm:$0xf]  ;;  %v5648_v18 = vadd.f32 %v2219_v5, %v2077_v48  ;;  %v2871_v41 = vunpack.c.l.b16 %v2758_v40  ;;  %v2395_v5 = vor.u32 %v2394_v58, %v2391_v57  ;;  %v2767_v48 = vrot.slane %v2765_v42, 7  ;;  %v3201_v40 = vld [vmem:[#allocation2 + $0xa0] sm:$0x1] }
 0x32a   : > { %v3308_v33 = vshrl.u32 %v3199_v16, 16  ;;  %v3311_v45 = vshll.u32 %v3199_v16, 16  ;;  %v3323_v55 = vrot.slane %v3321_v27, 4  ;;  %v2283_v57 = vld [vmem:[#allocation2 + $0x98] sm:$0xf] }
 0x32b   : > { %3140 = vmatmul.bf16.gmra.mxu3 %v4573_v46  ;;  %3518 = vmatmul.bf16.gmra.mxu0 %v3438_v7  ;;  %v3427_v46 = vunpack.c.l.b16 %v3306_v30  ;;  %v2405_v7 = vor.u32 %v2404_v25, %v5650_v51  ;;  %v2396_v23 = vrot.slane %v2395_v5, 4  ;;  %v4305_v25 = vrot.slane %v2760_v0, 11 }
 0x32c   : > { %v1682_v62 = vpop.f32.mrf.mxu2  ;;  %v3310_v53 = vrot.slane %v3308_v33, 4  ;;  %v3313_v39 = vrot.slane %v3311_v45, 5  ;;  %v2416_v5 = vshll.u32 %v2283_v57, 16 }
 0x32d   : > { %v1716_v10 = vadd.f32 %v1682_v62, %v1318_v19  ;;  %v2768_v19 = vshll.u32 %v2660_v2, 16  ;;  %v3439_v52 = vpack.c.b16 %v3427_v46, %v3426_v20  ;;  %v2406_v16 = vrot.slane %v2405_v7, 4  ;;  %v2284_v20 = vld [vmem:[#allocation2 + $0x9c] sm:$0xf]  ;;  %v3203_v7 = vld [vmem:[#allocation2 + $0xb4] sm:$0xf] }
 0x32e   : > { %v2044_v47 = vpop.f32.mrf.mxu3  ;;  %v1319_v13 = vpop.f32.mrf.mxu1  ;;  %v2410_v62 = vrot.slane %v2408_v36, 5  ;;  %v2401_v32 = vsel %vm5219_vm9, %v2396_v23, %v5650_v51  ;;  %v3314_v12 = vor.u32 %v3313_v39, %v3310_v53  ;;  %v2422_v27 = vshll.u32 %v2284_v20, 16  ;;  %v2663_v39 = vld [vmem:[#allocation2 + $0xb0] sm:$0xf] }
 0x32f   : > { %v2078_v3 = vadd.f32 %v2044_v47, %v1716_v10  ;;  %v1320_v6 = vadd.f32 %v1319_v13, %v5500_v15  ;;  %v2883_v15 = vpack.c.b16 %v2871_v41, %v2870_v24  ;;  %v2770_v60 = vor.u32 %v2768_v19, %v2767_v48 }
 0x330   : > { %v5655_v38 = vpop.f32.mrf.mxu0  ;;  %v2772_v10 = vrot.slane %v2767_v48, 4  ;;  %v2779_v47 = vor.u32 %v2777_v50, %v2776_v21  ;;  %v3327_v24 = vshll.u32 %v3201_v40, 16  ;;  %v2413_v41 = vshrl.u32 %v2283_v57, 16  ;;  %v2664_v57 = vld [vmem:[#allocation2 + $0xb4] sm:$0xf] }
 0x331   : > { %v3324_v13 = vor.u32 %v3323_v55, %v5660_v8  ;;  %v2411_v33 = vsel %vm5219_vm9, %v2406_v16, %v2410_v62  ;;  %v5671_v45 = vunpack.c.l.b16 %v2401_v32  ;;  %v2771_v51 = vsel %vm5213_vm8, %v4305_v25, %v2770_v60 }
 0x332   : > { %v3315_v11 = vrot.slane %v3314_v12, 4  ;;  %v2426_v46 = vshrl.u32 %v2284_v20, 16  ;;  %v5678_v36 = vadd.f32 %v5627_v31, %v2078_v3  ;;  %v3329_v48 = vrot.slane %v3327_v24, 5 }
 0x333   : > { %v3325_v0 = vrot.slane %v3324_v13, 4  ;;  %v2415_v19 = vrot.slane %v2413_v41, 4  ;;  %v2418_v21 = vrot.slane %v2416_v5, 5  ;;  %v5680_v23 = vunpack.c.l.b16 %v2411_v33 }
 0x334   : > { %v1684_v58 = vpop.f32.mrf.mxu2  ;;  %v2872_v53 = vunpack.c.l.b16 %v2771_v51  ;;  %v3345_v31 = vshrl.u32 %v3203_v7, 16  ;;  %v3320_v62 = vsel %vm5219_vm9, %v3315_v11, %v5660_v8  ;;  %v5688_v25 = vrot.slane %v2422_v27, 5 }
 0x335   : > { %v1717_v2 = vadd.f32 %v1684_v58, %v1320_v6  ;;  %v2780_v6 = vsel %vm5213_vm8, %v2772_v10, %v2779_v47  ;;  %v3330_v10 = vsel %vm5219_vm9, %v3325_v0, %v3329_v48  ;;  %v2285_v47 = vld [vmem:[#allocation2 + $0xa0] sm:$0x1]  ;;  %v2787_v32 = vshrl.u32 %v2663_v39, 16 }
 0x336   : > { %v2046_v28 = vpop.f32.mrf.mxu3  ;;  %v1322_v30 = vpop.f32.mrf.mxu1  ;;  %v2873_v16 = vunpack.c.l.b16 %v2780_v6  ;;  %v2796_v12 = vshrl.u32 %v2664_v57, 16  ;;  %v3347_v8 = vrot.slane %v3345_v31, 4  ;;  %v3429_v13 = vunpack.c.l.b16 %v3330_v10 }
 0x337   : > { %v2079_v37 = vadd.f32 %v2046_v28, %v1717_v2  ;;  %v1323_v42 = vadd.f32 %v1322_v30, %v5516_v49  ;;  %v3202_v49 = vld [vmem:[#allocation2 + $0xb0] sm:$0xf]  ;;  %v2428_v2 = vrot.slane %v2426_v46, 4  ;;  %v2419_v30 = vor.u32 %v2418_v21, %v2415_v19 }
 0x338   : > { %v5666_v26 = vpop.f32.mrf.mxu0  ;;  %v3335_v58 = vshll.u32 %v3202_v49, 16  ;;  %v2432_v5 = vshll.u32 %v2285_v47, 16  ;;  %v2521_v33 = vpack.c.b16 %v5680_v23, %v5671_v45  ;;  %v2884_v51 = vpack.c.b16 %v2873_v16, %v2872_v53 }
 0x339   : > { %2604 = vmatmul.bf16.gmra.mxu1 %v2520_v54  ;;  %2967 = vmatmul.bf16.gmra.mxu2 %v2883_v15  ;;  %v3332_v54 = vshrl.u32 %v3202_v49, 16  ;;  %v5683_v15 = vadd.f32 %v5655_v38, %v2079_v37  ;;  %v2429_v20 = vor.u32 %v2428_v2, %v5688_v25  ;;  %v2420_v6 = vrot.slane %v2419_v30, 4  ;;  %v2287_v2 = vld [vmem:[#allocation2 + $0xb4] sm:$0xf] }
 0x33a   : > { %v3337_v41 = vrot.slane %v3335_v58, 5  ;;  %v2789_v27 = vrot.slane %v2787_v32, 7  ;;  %v2790_v46 = vshll.u32 %v2663_v39, 16  ;;  %v2799_v0 = vshll.u32 %v2664_v57, 16  ;;  %v4575_v58 = vld [vmem:[#allocation2 + $0x98] sm:$0xff] }
 0x33b   : > { %3145 = vmatmul.bf16.gmra.mxu3 %v4574_v34  ;;  %3523 = vmatmul.bf16.gmra.mxu0 %v3439_v52  ;;  %v3341_v52 = vshll.u32 %v3203_v7, 16  ;;  %v2662_v34 = vld [vmem:[#allocation2 + $0xac] sm:$0x8]  ;;  %v3334_v24 = vrot.slane %v3332_v54, 4  ;;  %v2798_v7 = vrot.slane %v2796_v12, 7  ;;  %v2430_v31 = vrot.slane %v2429_v20, 4 }
 0x33c   : > { %v1687_v50 = vpop.f32.mrf.mxu2  ;;  %v2782_v49 = vshrl.u32 %v2662_v34, 16  ;;  %v2434_v45 = vrot.slane %v2432_v5, 5  ;;  %v2425_v39 = vsel %vm5219_vm9, %v2420_v6, %v5688_v25  ;;  %v2794_v16 = vrot.slane %v2789_v27, 4 }
 0x33d   : > { %v1718_v40 = vadd.f32 %v1687_v50, %v1323_v42  ;;  %v5693_v37 = vrot.slane %v3341_v52, 5  ;;  %v3428_v42 = vunpack.c.l.b16 %v3320_v62  ;;  %v3338_v21 = vor.u32 %v3337_v41, %v3334_v24 }
 0x33e   : > { %v2049_v55 = vpop.f32.mrf.mxu3  ;;  %v1324_v3 = vpop.f32.mrf.mxu1  ;;  %v4306_v57 = vrot.slane %v2782_v49, 11  ;;  %v2801_v62 = vor.u32 %v2799_v0, %v2798_v7  ;;  %v2435_v32 = vsel %vm5219_vm9, %v2430_v31, %v2434_v45  ;;  %v2446_v24 = vshll.u32 %v2287_v2, 16  ;;  %v2666_v49 = vld [vmem:[#allocation2 + $0xc8] sm:$0xf] }
 0x33f   : > { %v2080_v28 = vadd.f32 %v2049_v55, %v1718_v40  ;;  %v1325_v60 = vadd.f32 %v1324_v3, %v5544_v35  ;;  %v3204_v35 = vld [vmem:[#allocation2 + $0xb8] sm:$0x1]  ;;  %v3348_v50 = vor.u32 %v3347_v8, %v5693_v37  ;;  %v2286_v40 = vld [vmem:[#allocation2 + $0xb0] sm:$0xf]  ;;  %v3440_v52 = vpack.c.b16 %v3429_v13, %v3428_v42  ;;  %v3205_v8 = vld [vmem:[#allocation2 + $0xc8] sm:$0xf] }
 0x340   : > { %v2229_v38 = vpop.f32.mrf.mxu0  ;;  %v3351_v54 = vshll.u32 %v3204_v35, 16  ;;  %v2792_v3 = vor.u32 %v2790_v46, %v2789_v27  ;;  %v3339_v10 = vrot.slane %v3338_v21, 4  ;;  %v2440_v34 = vshll.u32 %v2286_v40, 16  ;;  %v3206_v42 = vld [vmem:[#allocation2 + $0xcc] sm:$0xf] }
 0x341   : > { %v3349_v47 = vrot.slane %v3348_v50, 4  ;;  %v5707_v12 = vadd.f32 %v5666_v26, %v2080_v28  ;;  %v2450_v41 = vshrl.u32 %v2287_v2, 16  ;;  %v2511_v5 = vunpack.c.l.b16 %v2425_v39  ;;  %v2667_v27 = vld [vmem:[#allocation2 + $0xcc] sm:$0xf]  ;;  %v2665_v39 = vld [vmem:[#allocation2 + $0xc4] sm:$0x8] }
 0x342   : > { %v3353_v30 = vrot.slane %v3351_v54, 5  ;;  %v2793_v35 = vsel %vm5213_vm8, %v4306_v57, %v2792_v3  ;;  %v3356_v46 = vshrl.u32 %v3205_v8, 16  ;;  %v3359_v7 = vshll.u32 %v3205_v8, 16 }
 0x343   : > { %v3365_v0 = vshll.u32 %v3206_v42, 16  ;;  %v2512_v50 = vunpack.c.l.b16 %v2435_v32  ;;  %v2448_v54 = vrot.slane %v2446_v24, 5  ;;  %v2818_v57 = vshrl.u32 %v2667_v27, 16 }
 0x344   : > { %v1689_v11 = vpop.f32.mrf.mxu2  ;;  %v3354_v28 = vsel %vm5219_vm9, %v3349_v47, %v3353_v30  ;;  %v3358_v3 = vrot.slane %v3356_v46, 4  ;;  %v2804_v24 = vshrl.u32 %v2665_v39, 16  ;;  %v2812_v8 = vshll.u32 %v2666_v49, 16  ;;  %v3208_v39 = vld [vmem:[#allocation2 + $0xe0] sm:$0xf] }
 0x345   : > { %v1719_v48 = vadd.f32 %v1689_v11, %v1325_v60  ;;  %v2437_v60 = vshrl.u32 %v2286_v40, 16  ;;  %v2452_v40 = vrot.slane %v2450_v41, 4  ;;  %v3431_v45 = vunpack.c.l.b16 %v3354_v28 }
 0x346   : > { %v2051_v19 = vpop.f32.mrf.mxu3  ;;  %v1327_v55 = vpop.f32.mrf.mxu1 }
 0x347   : > { %v2081_v23 = vadd.f32 %v2051_v19, %v1719_v48  ;;  %v1328_v25 = vadd.f32 %v1327_v55, %v5494_v56  ;;  %v3344_v56 = vsel %vm5219_vm9, %v3339_v10, %v5693_v37  ;;  %v3369_v48 = vshrl.u32 %v3206_v42, 16 }
 0x348   : > { %v5699_v53 = vpop.f32.mrf.mxu0  ;;  %v2874_v55 = vunpack.c.l.b16 %v2793_v35  ;;  %v2809_v37 = vshrl.u32 %v2666_v49, 16  ;;  %v3430_v31 = vunpack.c.l.b16 %v3344_v56  ;;  %v2522_v10 = vpack.c.b16 %v2512_v50, %v2511_v5 }
 0x349   : > { %2609 = vmatmul.bf16.gmra.mxu1 %v2521_v33  ;;  %2972 = vmatmul.bf16.gmra.mxu2 %v2884_v51  ;;  %v5710_v13 = vadd.f32 %v2229_v38, %v2081_v23  ;;  %v2802_v33 = vsel %vm5213_vm8, %v2794_v16, %v2801_v62  ;;  %v2439_v51 = vrot.slane %v2437_v60, 4  ;;  %v2442_v38 = vrot.slane %v2440_v34, 5  ;;  %v3207_v34 = vld [vmem:[#allocation2 + $0xd0] sm:$0x1] }
 0x34a   : > { %v3361_v16 = vrot.slane %v3359_v7, 5  ;;  %v5721_v62 = vrot.slane %v3365_v0, 5  ;;  %v3371_v2 = vrot.slane %v3369_v48, 4  ;;  %v2453_v47 = vor.u32 %v2452_v40, %v2448_v54  ;;  %v2289_v40 = vld [vmem:[#allocation2 + $0xc8] sm:$0xf] }
 0x34b   : > { %3150 = vmatmul.bf16.gmra.mxu3 %v4575_v58  ;;  %3528 = vmatmul.bf16.gmra.mxu0 %v3440_v52  ;;  %v2875_v58 = vunpack.c.l.b16 %v2802_v33  ;;  %v2288_v52 = vld [vmem:[#allocation2 + $0xb8] sm:$0x1]  ;;  %v2443_v23 = vor.u32 %v2442_v38, %v2439_v51  ;;  %v2811_v41 = vrot.slane %v2809_v37, 7  ;;  %v2820_v33 = vrot.slane %v2818_v57, 7  ;;  %v2290_v37 = vld [vmem:[#allocation2 + $0xcc] sm:$0xf] }
 0x34c   : > { %v1692_v20 = vpop.f32.mrf.mxu2  ;;  %v2456_v30 = vshll.u32 %v2288_v52, 16  ;;  %v2821_v51 = vshll.u32 %v2667_v27, 16  ;;  %v3441_v56 = vpack.c.b16 %v3431_v45, %v3430_v31  ;;  %v3362_v28 = vor.u32 %v3361_v16, %v3358_v3 }
 0x34d   : > { %v1720_v6 = vadd.f32 %v1692_v20, %v1328_v25  ;;  %v2885_v25 = vpack.c.b16 %v2875_v58, %v2874_v55  ;;  %v2444_v35 = vrot.slane %v2443_v23, 4  ;;  %v3375_v5 = vshll.u32 %v3207_v34, 16 }
 0x34e   : > { %v2054_v26 = vpop.f32.mrf.mxu3  ;;  %v1329_v11 = vpop.f32.mrf.mxu1  ;;  %v2454_v46 = vrot.slane %v2453_v47, 4  ;;  %v2458_v7 = vrot.slane %v2456_v30, 5  ;;  %v4307_v0 = vrot.slane %v2804_v24, 11  ;;  %v2814_v48 = vor.u32 %v2812_v8, %v2811_v41  ;;  %v2669_v24 = vld [vmem:[#allocation2 + $0xe0] sm:$0xf] }
 0x34f   : > { %v2082_v19 = vadd.f32 %v2054_v26, %v1720_v6  ;;  %v1330_v60 = vadd.f32 %v1329_v11, %v5511_v44  ;;  %v4576_v26 = vld [vmem:[#allocation2 + $0xb0] sm:$0xff]  ;;  %v3372_v44 = vor.u32 %v3371_v2, %v5721_v62  ;;  %v2449_v49 = vsel %vm5219_vm9, %v2444_v35, %v2448_v54 }
 0x350   : > { %v2234_v21 = vpop.f32.mrf.mxu0  ;;  %v2816_v50 = vrot.slane %v2811_v41, 4  ;;  %v2823_v27 = vor.u32 %v2821_v51, %v2820_v33  ;;  %v3363_v55 = vrot.slane %v3362_v28, 4  ;;  %v3377_v52 = vrot.slane %v3375_v5, 5 }
 0x351   : > { %v3373_v58 = vrot.slane %v3372_v44, 4  ;;  %v5728_v31 = vadd.f32 %v5699_v53, %v2082_v19  ;;  %v2459_v23 = vsel %vm5219_vm9, %v2454_v46, %v2458_v7  ;;  %v2513_v3 = vunpack.c.l.b16 %v2449_v49  ;;  %v2291_v44 = vld [vmem:[#allocation2 + $0xd0] sm:$0x1] }
 0x352   : > { %v2815_v16 = vsel %vm5213_vm8, %v4307_v0, %v2814_v48  ;;  %v2461_v2 = vshrl.u32 %v2289_v40, 16  ;;  %v2824_v53 = vsel %vm5213_vm8, %v2816_v50, %v2823_v27  ;;  %v2474_v19 = vshrl.u32 %v2290_v37, 16  ;;  %v2668_v48 = vld [vmem:[#allocation2 + $0xdc] sm:$0x8] }
 0x353   : > { %v3380_v41 = vshrl.u32 %v3208_v39, 16  ;;  %v3383_v35 = vshll.u32 %v3208_v39, 16  ;;  %v2480_v39 = vshll.u32 %v2291_v44, 16 }
 0x354   : > { %v1694_v32 = vpop.f32.mrf.mxu2 }
 0x355   : > { %v1721_v42 = vadd.f32 %v1694_v32, %v1330_v60  ;;  %v2464_v60 = vshll.u32 %v2289_v40, 16  ;;  %v2514_v32 = vunpack.c.l.b16 %v2459_v23  ;;  %v3382_v50 = vrot.slane %v3380_v41, 4 }
 0x356   : > { %v2056_v20 = vpop.f32.mrf.mxu3  ;;  %v1332_v6 = vpop.f32.mrf.mxu1  ;;  %v3385_v40 = vrot.slane %v3383_v35, 5  ;;  %v2482_v35 = vrot.slane %v2480_v39, 5 }
 0x357   : > { %v2083_v38 = vadd.f32 %v2056_v20, %v1721_v42  ;;  %v1333_v45 = vadd.f32 %v1332_v6, %v5531_v22  ;;  %v2470_v22 = vshll.u32 %v2290_v37, 16  ;;  %v2670_v20 = vld [vmem:[#allocation2 + $0xe4] sm:$0xf]  ;;  %v2876_v6 = vunpack.c.l.b16 %v2815_v16 }
 0x358   : > { %v2237_v11 = vpop.f32.mrf.mxu0  ;;  %v2466_v28 = vrot.slane %v2464_v60, 5  ;;  %v2840_v49 = vshrl.u32 %v2670_v20, 16  ;;  %v2523_v37 = vpack.c.b16 %v2514_v32, %v2513_v3  ;;  %v2826_v60 = vshrl.u32 %v2668_v48, 16 }
 0x359   : > { %2614 = vmatmul.bf16.gmra.mxu1 %v2522_v10  ;;  %2977 = vmatmul.bf16.gmra.mxu2 %v2885_v25  ;;  %v5733_v57 = vadd.f32 %v2234_v21, %v2083_v38  ;;  %v3209_v10 = vld [vmem:[#allocation2 + $0xe4] sm:$0xf]  ;;  %v3368_v21 = vsel %vm5219_vm9, %v3363_v55, %v5721_v62  ;;  %v3378_v25 = vsel %vm5219_vm9, %v3373_v58, %v3377_v52  ;;  %v5744_v5 = vrot.slane %v2470_v22, 5 }
 0x35a   : > { %v3389_v33 = vshll.u32 %v3209_v10, 16  ;;  %v3393_v51 = vshrl.u32 %v3209_v10, 16  ;;  %v2476_v38 = vrot.slane %v2474_v19, 4  ;;  %v2831_v62 = vshrl.u32 %v2669_v24, 16 }
 0x35b   : > { %3155 = vmatmul.bf16.gmra.mxu3 %v4576_v26  ;;  %3533 = vmatmul.bf16.gmra.mxu0 %v3441_v56  ;;  %v2877_v26 = vunpack.c.l.b16 %v2824_v53  ;;  %v2463_v56 = vrot.slane %v2461_v2, 4  ;;  %v3432_v7 = vunpack.c.l.b16 %v3368_v21  ;;  %v3433_v0 = vunpack.c.l.b16 %v3378_v25 }
 0x35c   : > { %v1697_v54 = vpop.f32.mrf.mxu2  ;;  %v3391_v55 = vrot.slane %v3389_v33, 5  ;;  %v3395_v58 = vrot.slane %v3393_v51, 4  ;;  %v2833_v10 = vrot.slane %v2831_v62, 7  ;;  %v2834_v22 = vshll.u32 %v2669_v24, 16 }
 0x35d   : > { %v1722_v47 = vadd.f32 %v1697_v54, %v1333_v45  ;;  %v2886_v45 = vpack.c.b16 %v2877_v26, %v2876_v6  ;;  %v2467_v23 = vor.u32 %v2466_v28, %v2463_v56  ;;  %v3210_v54 = vld [vmem:[#allocation2 + $0xe8] sm:$0x1]  ;;  %v3442_v53 = vpack.c.b16 %v3433_v0, %v3432_v7 }
 0x35e   : > { %v2059_v30 = vpop.f32.mrf.mxu3  ;;  %v1334_v34 = vpop.f32.mrf.mxu1  ;;  %v2843_v19 = vshll.u32 %v2670_v20, 16  ;;  %v3386_v25 = vor.u32 %v3385_v40, %v3382_v50  ;;  %v3396_v3 = vor.u32 %v3395_v58, %v3391_v55  ;;  %v3399_v32 = vshll.u32 %v3210_v54, 16 }
 0x35f   : > { %v2084_v8 = vadd.f32 %v2059_v30, %v1722_v47  ;;  %v1335_v27 = vadd.f32 %v1334_v34, %v5553_v61  ;;  %v4577_v30 = vld [vmem:[#allocation2 + $0xc8] sm:$0xff]  ;;  %v2842_v61 = vrot.slane %v2840_v49, 7  ;;  %v2468_v41 = vrot.slane %v2467_v23, 4 }
 0x360   : > { %v2239_v42 = vpop.f32.mrf.mxu0  ;;  %v4308_v51 = vrot.slane %v2826_v60, 11  ;;  %v2836_v6 = vor.u32 %v2834_v22, %v2833_v10  ;;  %v2838_v26 = vrot.slane %v2833_v10, 4  ;;  %v3387_v56 = vrot.slane %v3386_v25, 4 }
 0x361   : > { %v5746_v46 = vadd.f32 %v2237_v11, %v2084_v8  ;;  %v2477_v11 = vor.u32 %v2476_v38, %v5744_v5  ;;  %v2845_v24 = vor.u32 %v2843_v19, %v2842_v61  ;;  %v3397_v28 = vrot.slane %v3396_v3, 4 }
 0x362   : > { %v3401_v44 = vrot.slane %v3399_v32, 5  ;;  %v2473_v0 = vsel %vm5219_vm9, %v2468_v41, %v5744_v5  ;;  %v2837_v49 = vsel %vm5213_vm8, %v4308_v51, %v2836_v6  ;;  %v3392_v40 = vsel %vm5219_vm9, %v3387_v56, %v3391_v55  ;;  %v4578_v55 = vld [vmem:[#allocation2 + $0xe0] sm:$0xff] }
 0x363   : > { %v2478_v8 = vrot.slane %v2477_v11, 4  ;;  %v3434_v39 = vunpack.c.l.b16 %v3392_v40 }
 0x364   : > { %v1699_v52 = vpop.f32.mrf.mxu2  ;;  %v3402_v58 = vsel %vm5219_vm9, %v3397_v28, %v3401_v44 }
 0x365   : > { %v1723_v16 = vadd.f32 %v1699_v52, %v1335_v27  ;;  %v2483_v48 = vsel %vm5219_vm9, %v2478_v8, %v2482_v35  ;;  %v2515_v52 = vunpack.c.l.b16 %v2473_v0  ;;  %v3435_v54 = vunpack.c.l.b16 %v3402_v58 }
 0x366   : > { %v2061_v2 = vpop.f32.mrf.mxu3  ;;  %v1337_v47 = vpop.f32.mrf.mxu1  ;;  %v2516_v5 = vunpack.c.l.b16 %v2483_v48 }
 0x367   : > { %v2085_v34 = vadd.f32 %v2061_v2, %v1723_v16  ;;  %v1338_v20 = vadd.f32 %v1337_v47, %v5498_v9  ;;  %v2846_v9 = vsel %vm5213_vm8, %v2838_v26, %v2845_v24 }
 0x368   : > { %v2242_v21 = vpop.f32.mrf.mxu0  ;;  %v2524_v60 = vpack.c.b16 %v2516_v5, %v2515_v52 }
 0x369   : > { %2619 = vmatmul.bf16.gmra.mxu1 %v2523_v37  ;;  %2982 = vmatmul.bf16.gmra.mxu2 %v2886_v45  ;;  %v5750_v33 = vadd.f32 %v2239_v42, %v2085_v34  ;;  %v2878_v37 = vunpack.c.l.b16 %v2837_v49  ;;  %v2879_v45 = vunpack.c.l.b16 %v2846_v9 }
 0x36b   : > { %3160 = vmatmul.bf16.gmra.mxu3 %v4577_v30  ;;  %3538 = vmatmul.bf16.gmra.mxu0 %v3442_v53  ;;  %v2887_v10 = vpack.c.b16 %v2879_v45, %v2878_v37  ;;  %v3443_v30 = vpack.c.b16 %v3435_v54, %v3434_v39 }
 0x36c   : > { %v1702_v38 = vpop.f32.mrf.mxu2 }
 0x36d   : > { %v1724_v62 = vadd.f32 %v1702_v38, %v1338_v20 }
 0x36e   : > { %v2064_v7 = vpop.f32.mrf.mxu3  ;;  %v1339_v42 = vpop.f32.mrf.mxu1 }
 0x36f   : > { %v2086_v50 = vadd.f32 %v2064_v7, %v1724_v62  ;;  %v1340_v16 = vadd.f32 %v1339_v42, %v5513_v4  ;;  %v4654_v42 = vld [vmem:[%s5032_s23] sm:$0xff]  }
 0x370   : > { %v2244_v27 = vpop.f32.mrf.mxu0  ;;  %v4655_v9 = vunpack.c.l.bf16 %v4654_v42 }
 0x371   : > { %v5766_v23 = vadd.f32 %v2242_v21, %v2086_v50 }
 0x374   : > { %v1704_v59 = vpop.f32.mrf.mxu2 }
 0x375   : > { %v1725_v2 = vadd.f32 %v1704_v59, %v1340_v16 }
 0x376   : > { %v2066_v11 = vpop.f32.mrf.mxu3  ;;  %v1342_v47 = vpop.f32.mrf.mxu1 }
 0x377   : > { %v2087_v1 = vadd.f32 %v2066_v11, %v1725_v2  ;;  %v1343_v61 = vadd.f32 %v1342_v47, %v5537_v29 }
 0x378   : > { %v2247_v53 = vpop.f32.mrf.mxu0 }
 0x379   : > { %2624 = vmatmul.bf16.gmra.mxu1 %v2524_v60  ;;  %2987 = vmatmul.bf16.gmra.mxu2 %v2887_v10  ;;  %v5769_v22 = vadd.f32 %v2244_v27, %v2087_v1 }
 0x37b   : > { %3165 = vmatmul.bf16.gmra.mxu3 %v4578_v55  ;;  %3543 = vmatmul.bf16.gmra.mxu0 %v3443_v30 }
 0x37c   : > { %v1707_v19 = vpop.f32.mrf.mxu2 }
 0x37d   : > { %v1726_v4 = vadd.f32 %v1707_v19, %v1343_v61  ;;  %v4695_v61 = vld [vmem:[%s5032_s23 + $0x8] sm:$0xff]  }
 0x37e   : > { %v2069_v34 = vpop.f32.mrf.mxu3  ;;  %v1344_v21 = vpop.f32.mrf.mxu1 }
 0x37f   : > { %v2088_v25 = vadd.f32 %v2069_v34, %v1726_v4  ;;  %v1345_v41 = vadd.f32 %v1344_v21, %v5555_v14  ;;  %v5781_v14 = vld [vmem:[%s5859_s6] ss:$0 sm:$0xff] }
 0x380   : > { %v2249_v3 = vpop.f32.mrf.mxu0 }
 0x381   : > { %v5772_v32 = vadd.f32 %v2247_v53, %v2088_v25 }
 0x384   : > { %v1709_v8 = vpop.f32.mrf.mxu2 }
 0x385   : > { %v1727_v35 = vadd.f32 %v1709_v8, %v1345_v41 }
 0x386   : > { %v2071_v51 = vpop.f32.mrf.mxu3  ;;  %v2590_v6 = vpop.f32.mrf.mxu1 }
 0x387   : > { %v2089_v26 = vadd.f32 %v2071_v51, %v1727_v35  ;;  %v2630_v29 = vadd.f32 %v2590_v6, %v5607_v17 }
 0x388   : > { %v3509_v24 = vpop.f32.mrf.mxu0 }
 0x389   : > { %v5775_v20 = vadd.f32 %v2249_v3, %v2089_v26 }
 0x38c   : > { %v2953_v56 = vpop.f32.mrf.mxu2 }
 0x38d   : > { %v2993_v28 = vadd.f32 %v2953_v56, %v2630_v29 }
 0x38e   : > { %v3131_v44 = vpop.f32.mrf.mxu3  ;;  %v2592_v38 = vpop.f32.mrf.mxu1 }
 0x38f   : > { %v3171_v62 = vadd.f32 %v3131_v44, %v2993_v28  ;;  %v2631_v49 = vadd.f32 %v2592_v38, %v5610_v43  ;;  %v4656_v43 = vunpack.c.h.bf16 %v4654_v42 }
 0x390   : > { %v3511_v7 = vpop.f32.mrf.mxu0 }
 0x391   : > { %v3549_v0 = vadd.f32 %v3509_v24, %v3171_v62 }
 0x393   : > { %v3568_v48 = vadd.f32 %v5781_v14, %v3549_v0 }
 0x394   : > { %v2955_v17 = vpop.f32.mrf.mxu2 }
 0x395   : > { %vm3584_vm10 = vcmp.gt.f32.partialorder %v3568_v48, 0.0  ;;  %v3600_v50 = vmul.f32 0.1, %v3568_v48  ;;  %v2994_v27 = vadd.f32 %v2955_v17, %v2631_v49 }
 0x396   : > { %v3133_v40 = vpop.f32.mrf.mxu3  ;;  %v2595_v58 = vpop.f32.mrf.mxu1 }
 0x397   : > { %v3616_v52 = vsel %vm3584_vm10, %v3568_v48, %v3600_v50  ;;  %v3172_v5 = vadd.f32 %v3133_v40, %v2994_v27  ;;  %v2632_v16 = vadd.f32 %v2595_v58, %v5639_v63  ;;  %v4659_v63 = vunpack.c.l.bf16 %v4695_v61 }
 0x398   : > { %v3514_v37 = vpop.f32.mrf.mxu0  ;;  %v3664_v45 = vadd.f32 %v4655_v9, %v3616_v52  ;;  %v4696_v9 = vld [vmem:[%s5032_s23 + $0x10] sm:$0xff]  }
 0x399   : > { %v3550_v39 = vadd.f32 %v3511_v7, %v3172_v5 }
 0x39a   : > { %3680 = vst [vmem:[%s4996_s10] sm:$0xff] %v3664_v45 }
 0x39b   : > { %v3569_v54 = vadd.f32 %v5781_v14, %v3550_v39 }
 0x39c   : > { %v2958_v59 = vpop.f32.mrf.mxu2 }
 0x39d   : > { %vm3585_vm11 = vcmp.gt.f32.partialorder %v3569_v54, 0.0  ;;  %v3601_v2 = vmul.f32 0.1, %v3569_v54  ;;  %v2995_v11 = vadd.f32 %v2958_v59, %v2632_v16 }
 0x39e   : > { %v3136_v60 = vpop.f32.mrf.mxu3  ;;  %v2597_v10 = vpop.f32.mrf.mxu1 }
 0x39f   : > { %v3617_v47 = vsel %vm3585_vm11, %v3569_v54, %v3601_v2  ;;  %v3173_v55 = vadd.f32 %v3136_v60, %v2995_v11  ;;  %v2633_v4 = vadd.f32 %v2597_v10, %v5648_v18  ;;  %v4660_v18 = vunpack.c.h.bf16 %v4695_v61 }
 0x3a0   : > { %v3516_v30 = vpop.f32.mrf.mxu0  ;;  %v3665_v1 = vadd.f32 %v4656_v43, %v3617_v47 }
 0x3a1   : > { %v3551_v53 = vadd.f32 %v3514_v37, %v3173_v55 }
 0x3a2   : > { %3681 = vst [vmem:[%s4996_s10 + $0x8] sm:$0xff] %v3665_v1 }
 0x3a3   : > { %v3570_v19 = vadd.f32 %v5781_v14, %v3551_v53 }
 0x3a4   : > { %v2960_v34 = vpop.f32.mrf.mxu2 }
 0x3a5   : > { %vm3586_vm12 = vcmp.gt.f32.partialorder %v3570_v19, 0.0  ;;  %v3602_v21 = vmul.f32 0.1, %v3570_v19  ;;  %v2996_v25 = vadd.f32 %v2960_v34, %v2633_v4 }
 0x3a6   : > { %v3138_v3 = vpop.f32.mrf.mxu3  ;;  %v2600_v41 = vpop.f32.mrf.mxu1 }
 0x3a7   : > { %v3618_v8 = vsel %vm3586_vm12, %v3570_v19, %v3602_v21  ;;  %v3174_v35 = vadd.f32 %v3138_v3, %v2996_v25  ;;  %v2634_v29 = vadd.f32 %v2600_v41, %v5678_v36  ;;  %v4663_v36 = vunpack.c.l.bf16 %v4696_v9  ;;  %v4697_v19 = vld [vmem:[%s5032_s23 + $0x18] sm:$0xff]  }
 0x3a8   : > { %v3519_v51 = vpop.f32.mrf.mxu0  ;;  %v3666_v6 = vadd.f32 %v4659_v63, %v3618_v8 }
 0x3a9   : > { %v3552_v26 = vadd.f32 %v3516_v30, %v3174_v35 }
 0x3aa   : > { %3682 = vst [vmem:[%s4996_s10 + $0x10] sm:$0xff] %v3666_v6 }
 0x3ab   : > { %v3571_v24 = vadd.f32 %v5781_v14, %v3552_v26 }
 0x3ac   : > { %v2963_v56 = vpop.f32.mrf.mxu2 }
 0x3ad   : > { %vm3587_vm13 = vcmp.gt.f32.partialorder %v3571_v24, 0.0  ;;  %v3603_v28 = vmul.f32 0.1, %v3571_v24  ;;  %v2997_v44 = vadd.f32 %v2963_v56, %v2634_v29 }
 0x3ae   : > { %v3141_v38 = vpop.f32.mrf.mxu3  ;;  %v2602_v62 = vpop.f32.mrf.mxu1 }
 0x3af   : > { %v3619_v7 = vsel %vm3587_vm13, %v3571_v24, %v3603_v28  ;;  %v3175_v0 = vadd.f32 %v3141_v38, %v2997_v44  ;;  %v2635_v50 = vadd.f32 %v2602_v62, %v5683_v15  ;;  %v4664_v15 = vunpack.c.h.bf16 %v4696_v9 }
 0x3b0   : > { %v3521_v42 = vpop.f32.mrf.mxu0  ;;  %v3667_v48 = vadd.f32 %v4660_v18, %v3619_v7 }
 0x3b1   : > { %v3553_v49 = vadd.f32 %v3519_v51, %v3175_v0 }
 0x3b2   : > { %3683 = vst [vmem:[%s4996_s10 + $0x18] sm:$0xff] %v3667_v48 }
 0x3b3   : > { %v3572_v17 = vadd.f32 %v5781_v14, %v3553_v49  ;;  %v4698_v49 = vld [vmem:[%s5032_s23 + $0x20] sm:$0xff]  }
 0x3b4   : > { %v2965_v27 = vpop.f32.mrf.mxu2 }
 0x3b5   : > { %vm3588_vm14 = vcmp.gt.f32.partialorder %v3572_v17, 0.0  ;;  %v3604_v40 = vmul.f32 0.1, %v3572_v17  ;;  %v2998_v58 = vadd.f32 %v2965_v27, %v2635_v50 }
 0x3b6   : > { %v3143_v52 = vpop.f32.mrf.mxu3  ;;  %v2605_v5 = vpop.f32.mrf.mxu1 }
 0x3b7   : > { %v3620_v37 = vsel %vm3588_vm14, %v3572_v17, %v3604_v40  ;;  %v3176_v45 = vadd.f32 %v3143_v52, %v2998_v58  ;;  %v2636_v59 = vadd.f32 %v2605_v5, %v5707_v12  ;;  %v4667_v12 = vunpack.c.l.bf16 %v4697_v19 }
 0x3b8   : > { %v3524_v39 = vpop.f32.mrf.mxu0  ;;  %v3668_v54 = vadd.f32 %v4663_v36, %v3620_v37 }
 0x3b9   : > { %v3554_v16 = vadd.f32 %v3521_v42, %v3176_v45 }
 0x3ba   : > { %3684 = vst [vmem:[%s4996_s10 + $0x20] sm:$0xff] %v3668_v54 }
 0x3bb   : > { %v3573_v43 = vadd.f32 %v5781_v14, %v3554_v16 }
 0x3bc   : > { %v2968_v2 = vpop.f32.mrf.mxu2 }
 0x3bd   : > { %vm3589_vm15 = vcmp.gt.f32.partialorder %v3573_v43, 0.0  ;;  %v3605_v11 = vmul.f32 0.1, %v3573_v43  ;;  %v2999_v60 = vadd.f32 %v2968_v2, %v2636_v59 }
 0x3be   : > { %v3146_v10 = vpop.f32.mrf.mxu3  ;;  %v2607_v47 = vpop.f32.mrf.mxu1 }
 0x3bf   : > { %v3621_v55 = vsel %vm3589_vm15, %v3573_v43, %v3605_v11  ;;  %v3177_v30 = vadd.f32 %v3146_v10, %v2999_v60  ;;  %v2637_v63 = vadd.f32 %v2607_v47, %v5710_v13  ;;  %v4668_v13 = vunpack.c.h.bf16 %v4697_v19 }
 0x3c0   : > { %v3526_v1 = vpop.f32.mrf.mxu0  ;;  %v3669_v53 = vadd.f32 %v4664_v15, %v3621_v55 }
 0x3c1   : > { %v3555_v61 = vadd.f32 %v3524_v39, %v3177_v30 }
 0x3c2   : > { %3685 = vst [vmem:[%s4996_s10 + $0x28] sm:$0xff] %v3669_v53 }
 0x3c3   : > { %v3574_v4 = vadd.f32 %v5781_v14, %v3555_v61 }
 0x3c4   : > { %v2970_v34 = vpop.f32.mrf.mxu2 }
 0x3c5   : > { %vm3590_vm0 = vcmp.gt.f32.partialorder %v3574_v4, 0.0  ;;  %v3606_v21 = vmul.f32 0.1, %v3574_v4  ;;  %v3000_v25 = vadd.f32 %v2970_v34, %v2637_v63 }
 0x3c6   : > { %v3148_v3 = vpop.f32.mrf.mxu3  ;;  %v2610_v41 = vpop.f32.mrf.mxu1 }
 0x3c7   : > { %v3622_v8 = vsel %vm3590_vm0, %v3574_v4, %v3606_v21  ;;  %v3178_v35 = vadd.f32 %v3148_v3, %v3000_v25  ;;  %v2638_v29 = vadd.f32 %v2610_v41, %v5728_v31  ;;  %v4671_v31 = vunpack.c.l.bf16 %v4698_v49 }
 0x3c8   : > { %v3529_v51 = vpop.f32.mrf.mxu0  ;;  %v3670_v6 = vadd.f32 %v4667_v12, %v3622_v8 }
 0x3c9   : > { %v3556_v26 = vadd.f32 %v3526_v1, %v3178_v35  ;;  %v4699_v1 = vld [vmem:[%s5032_s23 + $0x28] sm:$0xff]  }
 0x3ca   : > { %3686 = vst [vmem:[%s4996_s10 + $0x30] sm:$0xff] %v3670_v6 }
 0x3cb   : > { %v3575_v24 = vadd.f32 %v5781_v14, %v3556_v26 }
 0x3cc   : > { %v2973_v18 = vpop.f32.mrf.mxu2 }
 0x3cd   : > { %vm3591_vm1 = vcmp.gt.f32.partialorder %v3575_v24, 0.0  ;;  %v3607_v56 = vmul.f32 0.1, %v3575_v24  ;;  %v3001_v28 = vadd.f32 %v2973_v18, %v2638_v29 }
 0x3ce   : > { %v3151_v44 = vpop.f32.mrf.mxu3  ;;  %v2612_v38 = vpop.f32.mrf.mxu1 }
 0x3cf   : > { %v3623_v62 = vsel %vm3591_vm1, %v3575_v24, %v3607_v56  ;;  %v3179_v7 = vadd.f32 %v3151_v44, %v3001_v28  ;;  %v2639_v17 = vadd.f32 %v2612_v38, %v5733_v57  ;;  %v4672_v57 = vunpack.c.h.bf16 %v4698_v49  ;;  %v4700_v38 = vld [vmem:[%s5032_s23 + $0x30] sm:$0xff]  }
 0x3d0   : > { %v3531_v0 = vpop.f32.mrf.mxu0  ;;  %v3671_v42 = vadd.f32 %v4668_v13, %v3623_v62 }
 0x3d1   : > { %v3557_v48 = vadd.f32 %v3529_v51, %v3179_v7 }
 0x3d2   : > { %3687 = vst [vmem:[%s4996_s10 + $0x38] sm:$0xff] %v3671_v42 }
 0x3d3   : > { %v3576_v9 = vadd.f32 %v5781_v14, %v3557_v48 }
 0x3d4   : > { %v2975_v50 = vpop.f32.mrf.mxu2 }
 0x3d5   : > { %vm3592_vm2 = vcmp.gt.f32.partialorder %v3576_v9, 0.0  ;;  %v3608_v36 = vmul.f32 0.1, %v3576_v9  ;;  %v3002_v27 = vadd.f32 %v2975_v50, %v2639_v17 }
 0x3d6   : > { %v3153_v40 = vpop.f32.mrf.mxu3  ;;  %v2615_v58 = vpop.f32.mrf.mxu1 }
 0x3d7   : > { %v3624_v52 = vsel %vm3592_vm2, %v3576_v9, %v3608_v36  ;;  %v3180_v5 = vadd.f32 %v3153_v40, %v3002_v27  ;;  %v2640_v16 = vadd.f32 %v2615_v58, %v5746_v46  ;;  %v4675_v46 = vunpack.c.l.bf16 %v4699_v1 }
 0x3d8   : > { %v3534_v37 = vpop.f32.mrf.mxu0  ;;  %v3672_v45 = vadd.f32 %v4671_v31, %v3624_v52 }
 0x3d9   : > { %v3558_v39 = vadd.f32 %v3531_v0, %v3180_v5  ;;  %v4679_v0 = vunpack.c.l.bf16 %v4700_v38 }
 0x3da   : > { %3688 = vst [vmem:[%s4996_s10 + $0x40] sm:$0xff] %v3672_v45 }
 0x3db   : > { %v3577_v54 = vadd.f32 %v5781_v14, %v3558_v39 }
 0x3dc   : > { %v2978_v43 = vpop.f32.mrf.mxu2 }
 0x3dd   : > { %vm3593_vm3 = vcmp.gt.f32.partialorder %v3577_v54, 0.0  ;;  %v3609_v59 = vmul.f32 0.1, %v3577_v54  ;;  %v3003_v15 = vadd.f32 %v2978_v43, %v2640_v16 }
 0x3de   : > { %v3156_v2 = vpop.f32.mrf.mxu3  ;;  %v2617_v11 = vpop.f32.mrf.mxu1 }
 0x3df   : > { %v3625_v60 = vsel %vm3593_vm3, %v3577_v54, %v3609_v59  ;;  %v3181_v10 = vadd.f32 %v3156_v2, %v3003_v15  ;;  %v2641_v61 = vadd.f32 %v2617_v11, %v5750_v33  ;;  %v4676_v33 = vunpack.c.h.bf16 %v4699_v1  ;;  %v4701_v15 = vld [vmem:[%s5032_s23 + $0x38] sm:$0xff]  }
 0x3e0   : > { %v3673_v47 = vadd.f32 %v4672_v57, %v3625_v60  ;;  %v3536_v55 = vpop.f32.mrf.mxu0 }
 0x3e1   : > { %v3559_v30 = vadd.f32 %v3534_v37, %v3181_v10 }
 0x3e2   : > { %3689 = vst [vmem:[%s4996_s10 + $0x48] sm:$0xff] %v3673_v47 }
 0x3e3   : > { %v3578_v53 = vadd.f32 %v5781_v14, %v3559_v30 }
 0x3e4   : > { %v2980_v19 = vpop.f32.mrf.mxu2 }
 0x3e5   : > { %vm3594_vm4 = vcmp.gt.f32.partialorder %v3578_v53, 0.0  ;;  %v3610_v4 = vmul.f32 0.1, %v3578_v53  ;;  %v3004_v63 = vadd.f32 %v2980_v19, %v2641_v61 }
 0x3e6   : > { %v3158_v12 = vpop.f32.mrf.mxu3  ;;  %v2620_v34 = vpop.f32.mrf.mxu1 }
 0x3e7   : > { %v3626_v21 = vsel %vm3594_vm4, %v3578_v53, %v3610_v4  ;;  %v3182_v25 = vadd.f32 %v3158_v12, %v3004_v63  ;;  %v2642_v51 = vadd.f32 %v2620_v34, %v5766_v23  ;;  %v4684_v4 = vunpack.c.h.bf16 %v4701_v15 }
 0x3e8   : > { %v3674_v3 = vadd.f32 %v4675_v46, %v3626_v21  ;;  %v3539_v8 = vpop.f32.mrf.mxu0 }
 0x3e9   : > { %v3560_v41 = vadd.f32 %v3536_v55, %v3182_v25 }
 0x3ea   : > { %3690 = vst [vmem:[%s4996_s10 + $0x50] sm:$0xff] %v3674_v3 }
 0x3eb   : > { %v3579_v35 = vadd.f32 %v5781_v14, %v3560_v41 }
 0x3ec   : > { %v2983_v6 = vpop.f32.mrf.mxu2 }
 0x3ed   : > { %vm3595_vm5 = vcmp.gt.f32.partialorder %v3579_v35, 0.0  ;;  %v3611_v26 = vmul.f32 0.1, %v3579_v35  ;;  %v3005_v24 = vadd.f32 %v2983_v6, %v2642_v51 }
 0x3ee   : > { %v3161_v29 = vpop.f32.mrf.mxu3  ;;  %v2622_v13 = vpop.f32.mrf.mxu1 }
 0x3ef   : > { %v3627_v18 = vsel %vm3595_vm5, %v3579_v35, %v3611_v26  ;;  %v3183_v56 = vadd.f32 %v3161_v29, %v3005_v24  ;;  %v2643_v7 = vadd.f32 %v2622_v13, %v5769_v22  ;;  %v4680_v22 = vunpack.c.h.bf16 %v4700_v38 }
 0x3f0   : > { %v3675_v28 = vadd.f32 %v4676_v33, %v3627_v18  ;;  %v3541_v23 = vpop.f32.mrf.mxu0 }
 0x3f1   : > { %v3561_v44 = vadd.f32 %v3539_v8, %v3183_v56 }
 0x3f2   : > { %3691 = vst [vmem:[%s4996_s10 + $0x58] sm:$0xff] %v3675_v28 }
 0x3f3   : > { %v3580_v62 = vadd.f32 %v5781_v14, %v3561_v44 }
 0x3f4   : > { %v2985_v42 = vpop.f32.mrf.mxu2 }
 0x3f5   : > { %vm3596_vm6 = vcmp.gt.f32.partialorder %v3580_v62, 0.0  ;;  %v3612_v48 = vmul.f32 0.1, %v3580_v62  ;;  %v3006_v49 = vadd.f32 %v2985_v42, %v2643_v7 }
 0x3f6   : > { %v3163_v9 = vpop.f32.mrf.mxu3  ;;  %v2625_v17 = vpop.f32.mrf.mxu1 }
 0x3f7   : > { %v3628_v31 = vsel %vm3596_vm6, %v3580_v62, %v3612_v48  ;;  %v3184_v50 = vadd.f32 %v3163_v9, %v3006_v49  ;;  %v2644_v58 = vadd.f32 %v2625_v17, %v5772_v32  ;;  %v4683_v32 = vunpack.c.l.bf16 %v4701_v15 }
 0x3f8   : > { %v3676_v36 = vadd.f32 %v4679_v0, %v3628_v31  ;;  %v3544_v39 = vpop.f32.mrf.mxu0 }
 0x3f9   : > { %v3562_v27 = vadd.f32 %v3541_v23, %v3184_v50 }
 0x3fa   : > { %3692 = vst [vmem:[%s4996_s10 + $0x60] sm:$0xff] %v3676_v36 }
 0x3fb   : > { %v3581_v40 = vadd.f32 %v5781_v14, %v3562_v27 }
 0x3fc   : > { %v2988_v52 = vpop.f32.mrf.mxu2 }
 0x3fd   : > { %vm3597_vm7 = vcmp.gt.f32.partialorder %v3581_v40, 0.0  ;;  %v3613_v5 = vmul.f32 0.1, %v3581_v40  ;;  %v3007_v37 = vadd.f32 %v2988_v52, %v2644_v58 }
 0x3fe   : > { %v3166_v45 = vpop.f32.mrf.mxu3  ;;  %v2627_v43 = vpop.f32.mrf.mxu1 }
 0x3ff   : > { %v3629_v54 = vsel %vm3597_vm7, %v3581_v40, %v3613_v5  ;;  %v3185_v16 = vadd.f32 %v3166_v45, %v3007_v37  ;;  %v2645_v11 = vadd.f32 %v2627_v43, %v5775_v20 }
 0x400   : > { %v3677_v57 = vadd.f32 %v4680_v22, %v3629_v54  ;;  %v3546_v61 = vpop.f32.mrf.mxu0 }
 0x401   : > { %v3563_v59 = vadd.f32 %v3544_v39, %v3185_v16 }
 0x402   : > { %3693 = vst [vmem:[%s4996_s10 + $0x68] sm:$0xff] %v3677_v57 }
 0x403   : > { %v3582_v2 = vadd.f32 %v5781_v14, %v3563_v59 }
 0x404   : > { %v2990_v60 = vpop.f32.mrf.mxu2 }
 0x405   : > { %vm3598_vm8 = vcmp.gt.f32.partialorder %v3582_v2, 0.0  ;;  %v3614_v10 = vmul.f32 0.1, %v3582_v2  ;;  %v3008_v47 = vadd.f32 %v2990_v60, %v2645_v11 }
 0x406   : > { %v3168_v55 = vpop.f32.mrf.mxu3 }
 0x407   : > { %v3630_v30 = vsel %vm3598_vm8, %v3582_v2, %v3614_v10  ;;  %v3186_v1 = vadd.f32 %v3168_v55, %v3008_v47 }
 0x408   : > { %v3678_v53 = vadd.f32 %v4683_v32, %v3630_v30 }
 0x409   : > { %v3564_v46 = vadd.f32 %v3546_v61, %v3186_v1 }
 0x40a   : > { %3694 = vst [vmem:[%s4996_s10 + $0x70] sm:$0xff] %v3678_v53 }
 0x40b   : > { %v3583_v19 = vadd.f32 %v5781_v14, %v3564_v46 }
 0x40d   : > { %vm3599_vm9 = vcmp.gt.f32.partialorder %v3583_v19, 0.0  ;;  %v3615_v63 = vmul.f32 0.1, %v3583_v19 }
 0x40f   : > { %v3631_v12 = vsel %vm3599_vm9, %v3583_v19, %v3615_v63 }
 0x410   : > { %v3679_v20 = vadd.f32 %v4684_v4, %v3631_v12 }
 0x412   : > { %3695 = vst [vmem:[%s4996_s10 + $0x78] sm:$0xff] %v3679_v20 }
 0x413 PF: > { %s17_s28 = sadd.s32 1, %s4833_s28   ;;  %s5866_s24 = smov %s4825_s26 }
 0x414   : > { %p14_p0 = scmp.ge.s32.totalorder %s17_s28, 6   ;;  %s5867_s25 = smov %s4829_s27 }
 0x415   : > { %s5868_s26 = smov %s5871_s29  ;;  %s5869_s27 = smov %s5875_s30 }
 0x416   :  { %16 = sbr.rel (!%p14_p0) target bundleno = 3 (0x3), region = 112 }

</bundles_post_ra>
